<compile_context>
chip_gen: v6e
topology: v6e:2x2x1
jax: 0.10.0
libtpu: 0.0.40
codegen_flags: <defaults>
</compile_context>

<pallas_src>
from functools import partial

import jax
import jax.numpy as jnp
from jax.experimental import pallas as pl
from jax.experimental.pallas import tpu as pltpu

D = 32          # transformer dim
DH = D // 8     # attn_fc hidden dim (= 4)
DH_PAD = 8      # zero-padded attn hidden dim (exact; f32 sublane friendly)
FFH = 32        # feed-forward hidden dim (Transformer(32, 32, ...))
EPS = 1e-6      # LayerNorm eps
RC = 256        # rows per in-kernel chunk (bounds live intermediates)

# Packed f32 weight slab `w_f` (136, 32), row layout:
#   [  0: 32] wo | [ 32: 64] wf1 | [ 64: 96] wf2
#   [ 96:104] wa2 zero-padded to (8,32) | [104:136] W_qa in cols 0:8 (rest zero)
# Packed vector slab `vecs` (16, 32), rows:
#   0 an_g | 1 an_b | 2 fn_g | 3 fn_b | 4 ba2 | 5 bo | 6 bf1 | 7 bf2 | 8 ba1(cols 0:8)


def _layernorm(x, gamma, beta):
    mu = jnp.mean(x, axis=-1, keepdims=True)
    var = jnp.mean((x - mu) ** 2, axis=-1, keepdims=True)
    return (x - mu) * jax.lax.rsqrt(var + EPS) * gamma + beta


def view_layer_kernel(q_ref, k_ref, m_ref, wk_ref, wf_ref, vec_ref, o_ref, *, rc):
    tm, d = q_ref.shape
    n_views = k_ref.shape[0]
    n_chunks = tm // rc

    vec = vec_ref[...]                       # (16, 32) f32
    an_g, an_b = vec[0:1], vec[1:2]
    fn_g, fn_b = vec[2:3], vec[3:4]
    ba2, bo = vec[4:5], vec[5:6]
    bf1, bf2 = vec[6:7], vec[7:8]
    ba1 = vec[8:9, 0:DH_PAD]                 # (1, 8)

    wf = wf_ref[...]                         # (136, 32) f32
    wo = wf[0:32]
    wf1 = wf[32:64]
    wf2 = wf[64:96]
    wa2 = wf[96:96 + DH_PAD]                 # (8, 32)
    wqa = wf[96 + DH_PAD:136, 0:DH_PAD]      # (32, 8)
    w_k = wk_ref[...]                        # (32, 40) = [wv | wk@wa1], k_dtype

    def chunk(c, carry):
        r0 = pl.multiple_of(c * rc, rc)
        q = q_ref[pl.ds(r0, rc), :]                                     # (rc, 32)
        mk_all = m_ref[pl.ds(r0, rc), :]                                # (rc, V)

        # ---------------- attention block (pre-LN, subtractive) ----------------
        x = _layernorm(q, an_g, an_b)
        # folded q-side of attn_fc, ba1 pre-applied:  hk - hqb = (kp-qp)@wa1 + ba1
        hqb = jnp.dot(x, wqa, preferred_element_type=jnp.float32) - ba1  # (rc, 8)

        # pass 1: per-view logits & value projections (plain 2-D ops only).
        a_list, vp_list = [], []
        for vv in range(n_views):
            kv = k_ref[vv, pl.ds(r0, rc), :]                             # (rc, 32)
            # single fused MXU pass: [v_fc | k_fc @ wa1]
            kvh = jnp.dot(kv, w_k, preferred_element_type=jnp.float32)   # (rc, 40)
            vp_list.append(kvh[:, 0:d])
            h = jnp.maximum(kvh[:, d:d + DH_PAD] - hqb, 0.0)             # (rc, 8)
            a = jnp.dot(h, wa2, preferred_element_type=jnp.float32) + ba2
            mk = mk_all[:, vv:vv + 1]                                    # (rc, 1)
            a = jnp.where(mk == 0.0, jnp.float32(-1e9), a)               # exact ref mask
            a_list.append(a)

        amax = a_list[0]
        for a in a_list[1:]:
            amax = jnp.maximum(amax, a)

        # pass 2: masked softmax over views, normalization deferred (exact).
        s = jnp.zeros((rc, d), jnp.float32)
        num = jnp.zeros((rc, d), jnp.float32)
        for vv in range(n_views):
            e = jnp.exp(a_list[vv] - amax)
            s = s + e
            num = num + vp_list[vv] * e

        r = pl.reciprocal(s, approx=True)     # EUP slot
        r = r * (2.0 - s * r)                 # one Newton step -> ~f32-exact
        xa = jnp.dot(num * r, wo, preferred_element_type=jnp.float32) + bo
        x1 = xa + q                                                      # residual

        # ---------------- feed-forward block (pre-LN) ----------------
        y = _layernorm(x1, fn_g, fn_b)
        y = jnp.maximum(jnp.dot(y, wf1, preferred_element_type=jnp.float32) + bf1, 0.0)
        y = jnp.dot(y, wf2, preferred_element_type=jnp.float32) + bf2
        o_ref[pl.ds(r0, rc), :] = x1 + y                                 # residual
        return carry

    jax.lax.fori_loop(0, n_chunks, chunk, 0, unroll=True)


def _pack_params(params, k_dtype):
    """Fold wa1 through wq/wk and pack the 17 tiny params into 3 slabs."""
    (an_g, an_b, wq, wk, wv, wa1, ba1, wa2, ba2, wo, bo,
     fn_g, fn_b, wf1, bf1, wf2, bf2) = [jnp.asarray(p, jnp.float32) for p in params]

    dpad = DH_PAD - DH
    w_qa = jnp.pad(wq @ wa1, ((0, 0), (0, dpad)))               # (32, 8)
    w_ka = jnp.pad(wk @ wa1, ((0, 0), (0, dpad)))               # (32, 8)
    wa2p = jnp.pad(wa2, ((0, dpad), (0, 0)))                    # (8, 32)
    ba1p = jnp.pad(ba1.reshape(1, DH), ((0, 0), (0, dpad)))     # (1, 8)

    w_k = jnp.concatenate([wv, w_ka], axis=1).astype(k_dtype)   # (32, 40)
    w_f = jnp.concatenate(
        [wo, wf1, wf2, wa2p, jnp.pad(w_qa, ((0, 0), (0, D - DH_PAD)))],
        axis=0)                                                 # (136, 32)

    def row(vv):
        vv = vv.reshape(1, -1)
        return jnp.pad(vv, ((0, 0), (0, D - vv.shape[1])))

    vecs = jnp.concatenate(
        [row(an_g), row(an_b), row(fn_g), row(fn_b),
         row(ba2), row(bo), row(bf1), row(bf2), row(ba1p)]
        + [jnp.zeros((1, D), jnp.float32)] * 7, axis=0)         # (16, 32)
    return w_k, w_f, vecs


def _round_up(x, m):
    return (x + m - 1) // m * m


def _vmem_capacity_bytes():
    try:
        return int(pltpu.get_tpu_info().vmem_capacity_bytes)
    except Exception:
        return 64 * 1024 * 1024   # conservative fallback (v7x per-core VMEM)


def _select_tiles(M, tm_req=None):
    """Pick (tm, rc, Mp): row tile, in-kernel chunk, padded row count."""
    vmem = _vmem_capacity_bytes()
    big_vmem = vmem >= 96 * 1024 * 1024        # v5e/v6e (128 MiB) vs v7x (64 MiB)
    m8 = _round_up(max(M, 1), 8)
    if m8 <= RC:
        return m8, m8, m8
    tm_cap = tm_req if tm_req is not None else (1024 if big_vmem else 512)
    tm_cap = max(RC, (int(tm_cap) // RC) * RC)
    tm = min(tm_cap, _round_up(m8, RC))
    if not big_vmem:
        # small-VMEM parts (v7x) have 2 TensorCores: prefer >= 2 parallel steps.
        while _round_up(m8, tm) // tm < 2 and tm > RC:
            tm //= 2
    return tm, min(RC, tm), _round_up(m8, tm)


def _vmem_limit_bytes(tm, n_views, k_itemsize):
    lane = 128   # assume lane padding of narrow blocks
    blocks = 2 * (tm * lane * 4                      # q
                  + n_views * tm * lane * k_itemsize  # k
                  + tm * lane * 4                     # mask
                  + tm * lane * 4)                    # out
    return int(min(max(blocks + 24 * 2**20, 32 * 2**20), 48 * 2**20))


def view_layer(feats_q, feats_k, mask, params, *, tm=None, k_dtype=jnp.bfloat16):
    """feats_q: (B, N, 1, D), feats_k: (B, N, V, D), mask: (B, N, V) -> (B, N, D)."""
    B, N, _, d = feats_q.shape
    V = feats_k.shape[2]
    M = B * N
    tm, rc, Mp = _select_tiles(M, tm)
    pad = Mp - M

    q = feats_q.reshape(M, d).astype(jnp.float32)                  # squeeze + flatten
    # view-major k so the kernel gets contiguous per-view row blocks
    k = jnp.transpose(feats_k.reshape(M, V, d), (1, 0, 2)).astype(k_dtype)  # (V, M, D)
    m = mask.reshape(M, V).astype(jnp.float32)                     # compact (M, V) mask
    if pad:
        q = jnp.pad(q, ((0, pad), (0, 0)))
        k = jnp.pad(k, ((0, 0), (0, pad), (0, 0)))
        m = jnp.pad(m, ((0, pad), (0, 0)))          # padded rows fully masked (discarded)

    w_k, w_f, vecs = _pack_params(params, k_dtype)

    out = pl.pallas_call(
        partial(view_layer_kernel, rc=rc),
        out_shape=jax.ShapeDtypeStruct((Mp, d), jnp.float32),
        grid_spec=pltpu.PrefetchScalarGridSpec(
            num_scalar_prefetch=0,
            grid=(Mp // tm,),
            in_specs=[
                pl.BlockSpec((tm, d), lambda i: (i, 0)),          # q rows
                pl.BlockSpec((V, tm, d), lambda i: (0, i, 0)),    # k rows (view-major)
                pl.BlockSpec((tm, V), lambda i: (i, 0)),          # mask (compact)
                pl.BlockSpec(w_k.shape, lambda i: (0, 0)),        # constant weight slabs
                pl.BlockSpec(w_f.shape, lambda i: (0, 0)),
                pl.BlockSpec(vecs.shape, lambda i: (0, 0)),
            ],
            out_specs=pl.BlockSpec((tm, d), lambda i: (i, 0)),
        ),
        compiler_params=pltpu.CompilerParams(
            dimension_semantics=("parallel",),
            vmem_limit_bytes=_vmem_limit_bytes(tm, V, jnp.dtype(k_dtype).itemsize),
        ),
    )(q, k, m, w_k, w_f, vecs)
    return out[:M].reshape(B, N, d)


def make_params(key):
    """Deterministic synthetic parameters (eval mode, no dropout)."""
    ks = jax.random.split(key, 10)

    def lin_w(k, fan_in, shape):
        return (jax.random.normal(k, shape, jnp.float32) / jnp.sqrt(fan_in)).astype(jnp.float32)

    an_g = jnp.ones((1, D), jnp.float32)
    an_b = jnp.zeros((1, D), jnp.float32)
    wq = lin_w(ks[0], D, (D, D))
    wk = lin_w(ks[1], D, (D, D))
    wv = lin_w(ks[2], D, (D, D))
    wa1 = lin_w(ks[3], D, (D, DH))
    ba1 = 0.01 * jnp.ones((1, DH), jnp.float32)
    wa2 = lin_w(ks[4], DH, (DH, D))
    ba2 = 0.01 * jnp.ones((1, D), jnp.float32)
    wo = lin_w(ks[5], D, (D, D))
    bo = 0.01 * jnp.ones((1, D), jnp.float32)
    fn_g = jnp.ones((1, D), jnp.float32)
    fn_b = jnp.zeros((1, D), jnp.float32)
    wf1 = lin_w(ks[6], D, (D, FFH))
    bf1 = 0.01 * jnp.ones((1, FFH), jnp.float32)
    wf2 = lin_w(ks[7], FFH, (FFH, D))
    bf2 = 0.01 * jnp.ones((1, D), jnp.float32)
    return (an_g, an_b, wq, wk, wv, wa1, ba1, wa2, ba2, wo, bo,
            fn_g, fn_b, wf1, bf1, wf2, bf2)


def view_layer_ref(feats_q, feats_k, mask, params):
    """Pure-JAX reference mirroring the PyTorch forward (eval mode, unfused)."""
    (an_g, an_b, wq, wk, wv, wa1, ba1, wa2, ba2, wo, bo,
     fn_g, fn_b, wf1, bf1, wf2, bf2) = params
    q = feats_q[:, :, 0, :].astype(jnp.float32)              # (B, N, D)
    k = feats_k.astype(jnp.float32)                          # (B, N, V, D)
    m = mask[..., None].astype(jnp.float32)                  # (B, N, V, 1)

    x = _layernorm(q, an_g, an_b)
    qp = x @ wq
    kp = k @ wk
    vp = k @ wv
    attn = kp - qp[:, :, None, :]
    attn = jnp.maximum(attn @ wa1 + ba1, 0.0) @ wa2 + ba2
    attn = jnp.where(m == 0, -1e9, attn)
    attn = jax.nn.softmax(attn, axis=-2)
    xa = jnp.sum(vp * attn, axis=2) @ wo + bo
    x = xa + q
    y = _layernorm(x, fn_g, fn_b)
    y = jnp.maximum(y @ wf1 + bf1, 0.0) @ wf2 + bf2
    return x + y


if __name__ == "__main__":
    B, N, V = 2, 64, 8   # 2 batches, 64 query points, 8 source views, D=32
    key = jax.random.PRNGKey(0)
    kq, kk, km, kp = jax.random.split(key, 4)

    feats_q = jax.random.normal(kq, (B, N, 1, D), jnp.float32)
    feats_k = jax.random.normal(kk, (B, N, V, D), jnp.float32)
    mask = (jax.random.uniform(km, (B, N, V)) > 0.2).astype(jnp.float32)
    params = make_params(kp)

    ref = view_layer_ref(feats_q, feats_k, mask, params)

    # exact-math path (f32 k stream): tight check of the kernel algebra
    out32 = jax.block_until_ready(
        view_layer(feats_q, feats_k, mask, params, k_dtype=jnp.float32))
    assert out32.shape == (B, N, D)
    assert jnp.allclose(out32, ref, atol=5e-4, rtol=5e-4), float(jnp.abs(out32 - ref).max())

    # default path (bf16 k stream + bf16 fused k weights, f32 accumulation)
    out = jax.block_until_ready(view_layer(feats_q, feats_k, mask, params))
    assert out.shape == (B, N, D)
    assert jnp.allclose(out, ref, atol=6e-2, rtol=6e-2), float(jnp.abs(out - ref).max())

    # non-multiple row count: exercises padding + multi-step grid + chunk loop
    B2, N2 = 2, 200
    fq2 = jax.random.normal(kq, (B2, N2, 1, D), jnp.float32)
    fk2 = jax.random.normal(kk, (B2, N2, V, D), jnp.float32)
    mk2 = (jax.random.uniform(km, (B2, N2, V)) > 0.2).astype(jnp.float32)
    out2 = jax.block_until_ready(view_layer(fq2, fk2, mk2, params))
    ref2 = view_layer_ref(fq2, fk2, mk2, params)
    assert out2.shape == (B2, N2, D)
    assert jnp.allclose(out2, ref2, atol=6e-2, rtol=6e-2), float(jnp.abs(out2 - ref2).max())

    print("KERNEL_OK")
</pallas_src>

<mosaic_0001>
module attributes {stable_mosaic.version = 11 : i64} {
  func.func @view_layer_kernel(%arg0: i32, %arg1: memref<128x32xf32, #tpu.memory_space<vmem>>, %arg2: memref<8x128x32xf32, #tpu.memory_space<vmem>>, %arg3: memref<128x8xf32, #tpu.memory_space<vmem>>, %arg4: memref<32x40xf32, #tpu.memory_space<vmem>>, %arg5: memref<136x32xf32, #tpu.memory_space<vmem>>, %arg6: memref<16x32xf32, #tpu.memory_space<vmem>>, %arg7: memref<128x32xf32, #tpu.memory_space<vmem>>) attributes {dimension_semantics = [#tpu.dimension_semantics<parallel>], iteration_bounds = array<i64: 1>, scalar_prefetch = 0 : i64, scratch_operands = 0 : i64, tpu.core_type = #tpu.core_type<tc>, window_params = [{transform_indices = @transform_0, window_bounds = array<i64: 128, 32>}, {transform_indices = @transform_1, window_bounds = array<i64: 8, 128, 32>}, {transform_indices = @transform_2, window_bounds = array<i64: 128, 8>}, {pipeline_mode = #tpu.pipeline_mode<synchronous>, transform_indices = @transform_3, window_bounds = array<i64: 32, 40>}, {pipeline_mode = #tpu.pipeline_mode<synchronous>, transform_indices = @transform_4, window_bounds = array<i64: 136, 32>}, {pipeline_mode = #tpu.pipeline_mode<synchronous>, transform_indices = @transform_5, window_bounds = array<i64: 16, 32>}, {transform_indices = @transform_6, window_bounds = array<i64: 128, 32>}]} {
    %c0 = arith.constant 0 : index
    %c0_0 = arith.constant 0 : index
    %0 = vector.load %arg6[%c0, %c0_0] : memref<16x32xf32, #tpu.memory_space<vmem>>, vector<16x32xf32>
    %1 = vector.extract_strided_slice %0 {offsets = [0, 0], sizes = [1, 32], strides = [1, 1]} : vector<16x32xf32> to vector<1x32xf32>
    %2 = vector.extract_strided_slice %0 {offsets = [1, 0], sizes = [1, 32], strides = [1, 1]} : vector<16x32xf32> to vector<1x32xf32>
    %3 = vector.extract_strided_slice %0 {offsets = [2, 0], sizes = [1, 32], strides = [1, 1]} : vector<16x32xf32> to vector<1x32xf32>
    %4 = vector.extract_strided_slice %0 {offsets = [3, 0], sizes = [1, 32], strides = [1, 1]} : vector<16x32xf32> to vector<1x32xf32>
    %5 = vector.extract_strided_slice %0 {offsets = [4, 0], sizes = [1, 32], strides = [1, 1]} : vector<16x32xf32> to vector<1x32xf32>
    %6 = vector.extract_strided_slice %0 {offsets = [5, 0], sizes = [1, 32], strides = [1, 1]} : vector<16x32xf32> to vector<1x32xf32>
    %7 = vector.extract_strided_slice %0 {offsets = [6, 0], sizes = [1, 32], strides = [1, 1]} : vector<16x32xf32> to vector<1x32xf32>
    %8 = vector.extract_strided_slice %0 {offsets = [7, 0], sizes = [1, 32], strides = [1, 1]} : vector<16x32xf32> to vector<1x32xf32>
    %9 = vector.extract_strided_slice %0 {offsets = [8, 0], sizes = [1, 8], strides = [1, 1]} : vector<16x32xf32> to vector<1x8xf32>
    %c0_1 = arith.constant 0 : index
    %c0_2 = arith.constant 0 : index
    %10 = vector.load %arg5[%c0_1, %c0_2] : memref<136x32xf32, #tpu.memory_space<vmem>>, vector<136x32xf32>
    %11 = vector.extract_strided_slice %10 {offsets = [0, 0], sizes = [32, 32], strides = [1, 1]} : vector<136x32xf32> to vector<32x32xf32>
    %12 = vector.extract_strided_slice %10 {offsets = [32, 0], sizes = [32, 32], strides = [1, 1]} : vector<136x32xf32> to vector<32x32xf32>
    %13 = vector.extract_strided_slice %10 {offsets = [64, 0], sizes = [32, 32], strides = [1, 1]} : vector<136x32xf32> to vector<32x32xf32>
    %14 = vector.extract_strided_slice %10 {offsets = [96, 0], sizes = [8, 32], strides = [1, 1]} : vector<136x32xf32> to vector<8x32xf32>
    %15 = vector.extract_strided_slice %10 {offsets = [104, 0], sizes = [32, 8], strides = [1, 1]} : vector<136x32xf32> to vector<32x8xf32>
    %c0_3 = arith.constant 0 : index
    %c0_4 = arith.constant 0 : index
    %16 = vector.load %arg4[%c0_3, %c0_4] : memref<32x40xf32, #tpu.memory_space<vmem>>, vector<32x40xf32>
    %c0_i32 = arith.constant 0 : i32
    %c128_i32 = arith.constant 128 : i32
    %17 = arith.muli %c0_i32, %c128_i32 : i32
    %18 = tpu.assume_multiple %17, 128 : i32
    %19 = arith.index_cast %18 : i32 to index
    %c0_5 = arith.constant 0 : index
    %20 = vector.load %arg1[%19, %c0_5] : memref<128x32xf32, #tpu.memory_space<vmem>>, vector<128x32xf32>
    %21 = arith.index_cast %18 : i32 to index
    %c0_6 = arith.constant 0 : index
    %22 = vector.load %arg3[%21, %c0_6] : memref<128x8xf32, #tpu.memory_space<vmem>>, vector<128x8xf32>
    %cst = arith.constant dense<0.000000e+00> : vector<128xf32>
    %23 = vector.multi_reduction <add>, %20, %cst [1] : vector<128x32xf32> to vector<128xf32>
    %24 = vector.shape_cast %23 : vector<128xf32> to vector<128x1xf32>
    %cst_7 = arith.constant 3.200000e+01 : f32
    %25 = vector.broadcast %cst_7 : f32 to vector<128x1xf32>
    %26 = arith.divf %24, %25 : vector<128x1xf32>
    %27 = vector.broadcast %26 : vector<128x1xf32> to vector<128x32xf32>
    %28 = arith.subf %20, %27 : vector<128x32xf32>
    %29 = arith.mulf %28, %28 : vector<128x32xf32>
    %cst_8 = arith.constant dense<0.000000e+00> : vector<128xf32>
    %30 = vector.multi_reduction <add>, %29, %cst_8 [1] : vector<128x32xf32> to vector<128xf32>
    %31 = vector.shape_cast %30 : vector<128xf32> to vector<128x1xf32>
    %cst_9 = arith.constant 3.200000e+01 : f32
    %32 = vector.broadcast %cst_9 : f32 to vector<128x1xf32>
    %33 = arith.divf %31, %32 : vector<128x1xf32>
    %34 = vector.broadcast %26 : vector<128x1xf32> to vector<128x32xf32>
    %35 = arith.subf %20, %34 : vector<128x32xf32>
    %cst_10 = arith.constant 9.99999997E-7 : f32
    %36 = vector.broadcast %cst_10 : f32 to vector<128x1xf32>
    %37 = arith.addf %33, %36 : vector<128x1xf32>
    %38 = math.rsqrt %37 : vector<128x1xf32>
    %39 = vector.broadcast %38 : vector<128x1xf32> to vector<128x32xf32>
    %40 = arith.mulf %35, %39 : vector<128x32xf32>
    %41 = vector.broadcast %1 : vector<1x32xf32> to vector<128x32xf32>
    %42 = arith.mulf %40, %41 : vector<128x32xf32>
    %43 = vector.broadcast %2 : vector<1x32xf32> to vector<128x32xf32>
    %44 = arith.addf %42, %43 : vector<128x32xf32>
    %cst_11 = arith.constant dense<0.000000e+00> : vector<128x8xf32>
    %45 = tpu.matmul %44, %15, %cst_11 {dimension_numbers = #tpu.dot_dimension_numbers<[1], [0], [0], [1], [0, 0, 1, 1], [], []>} : vector<128x32xf32>, vector<32x8xf32>, vector<128x8xf32> -> vector<128x8xf32>
    %46 = vector.broadcast %9 : vector<1x8xf32> to vector<128x8xf32>
    %47 = arith.subf %45, %46 : vector<128x8xf32>
    %c0_12 = arith.constant 0 : index
    %48 = arith.index_cast %18 : i32 to index
    %c0_13 = arith.constant 0 : index
    %49 = vector.load %arg2[%c0_12, %48, %c0_13] : memref<8x128x32xf32, #tpu.memory_space<vmem>>, vector<1x128x32xf32>
    %50 = vector.shape_cast %49 : vector<1x128x32xf32> to vector<128x32xf32>
    %cst_14 = arith.constant dense<0.000000e+00> : vector<128x40xf32>
    %51 = tpu.matmul %50, %16, %cst_14 {dimension_numbers = #tpu.dot_dimension_numbers<[1], [0], [0], [1], [0, 0, 1, 1], [], []>} : vector<128x32xf32>, vector<32x40xf32>, vector<128x40xf32> -> vector<128x40xf32>
    %52 = vector.extract_strided_slice %51 {offsets = [0, 0], sizes = [128, 32], strides = [1, 1]} : vector<128x40xf32> to vector<128x32xf32>
    %53 = vector.extract_strided_slice %51 {offsets = [0, 32], sizes = [128, 8], strides = [1, 1]} : vector<128x40xf32> to vector<128x8xf32>
    %54 = arith.subf %53, %47 : vector<128x8xf32>
    %cst_15 = arith.constant 0.000000e+00 : f32
    %55 = vector.broadcast %cst_15 : f32 to vector<128x8xf32>
    %56 = arith.maximumf %54, %55 : vector<128x8xf32>
    %cst_16 = arith.constant dense<0.000000e+00> : vector<128x32xf32>
    %57 = tpu.matmul %56, %14, %cst_16 {dimension_numbers = #tpu.dot_dimension_numbers<[1], [0], [0], [1], [0, 0, 1, 1], [], []>} : vector<128x8xf32>, vector<8x32xf32>, vector<128x32xf32> -> vector<128x32xf32>
    %58 = vector.broadcast %5 : vector<1x32xf32> to vector<128x32xf32>
    %59 = arith.addf %57, %58 : vector<128x32xf32>
    %60 = vector.extract_strided_slice %22 {offsets = [0, 0], sizes = [128, 1], strides = [1, 1]} : vector<128x8xf32> to vector<128x1xf32>
    %cst_17 = arith.constant 0.000000e+00 : f32
    %61 = vector.broadcast %cst_17 : f32 to vector<128x1xf32>
    %62 = arith.cmpf oeq, %60, %61 : vector<128x1xf32>
    %cst_18 = arith.constant -1.000000e+09 : f32
    %63 = vector.shape_cast %62 : vector<128x1xi1> to vector<128x1xi1>
    %64 = vector.broadcast %63 : vector<128x1xi1> to vector<128x32xi1>
    %65 = vector.broadcast %cst_18 : f32 to vector<128x32xf32>
    %66 = arith.select %64, %65, %59 : vector<128x32xi1>, vector<128x32xf32>
    %c1 = arith.constant 1 : index
    %67 = arith.index_cast %18 : i32 to index
    %c0_19 = arith.constant 0 : index
    %68 = vector.load %arg2[%c1, %67, %c0_19] : memref<8x128x32xf32, #tpu.memory_space<vmem>>, vector<1x128x32xf32>
    %69 = vector.shape_cast %68 : vector<1x128x32xf32> to vector<128x32xf32>
    %cst_20 = arith.constant dense<0.000000e+00> : vector<128x40xf32>
    %70 = tpu.matmul %69, %16, %cst_20 {dimension_numbers = #tpu.dot_dimension_numbers<[1], [0], [0], [1], [0, 0, 1, 1], [], []>} : vector<128x32xf32>, vector<32x40xf32>, vector<128x40xf32> -> vector<128x40xf32>
    %71 = vector.extract_strided_slice %70 {offsets = [0, 0], sizes = [128, 32], strides = [1, 1]} : vector<128x40xf32> to vector<128x32xf32>
    %72 = vector.extract_strided_slice %70 {offsets = [0, 32], sizes = [128, 8], strides = [1, 1]} : vector<128x40xf32> to vector<128x8xf32>
    %73 = arith.subf %72, %47 : vector<128x8xf32>
    %cst_21 = arith.constant 0.000000e+00 : f32
    %74 = vector.broadcast %cst_21 : f32 to vector<128x8xf32>
    %75 = arith.maximumf %73, %74 : vector<128x8xf32>
    %cst_22 = arith.constant dense<0.000000e+00> : vector<128x32xf32>
    %76 = tpu.matmul %75, %14, %cst_22 {dimension_numbers = #tpu.dot_dimension_numbers<[1], [0], [0], [1], [0, 0, 1, 1], [], []>} : vector<128x8xf32>, vector<8x32xf32>, vector<128x32xf32> -> vector<128x32xf32>
    %77 = vector.broadcast %5 : vector<1x32xf32> to vector<128x32xf32>
    %78 = arith.addf %76, %77 : vector<128x32xf32>
    %79 = vector.extract_strided_slice %22 {offsets = [0, 1], sizes = [128, 1], strides = [1, 1]} : vector<128x8xf32> to vector<128x1xf32>
    %cst_23 = arith.constant 0.000000e+00 : f32
    %80 = vector.broadcast %cst_23 : f32 to vector<128x1xf32>
    %81 = arith.cmpf oeq, %79, %80 : vector<128x1xf32>
    %cst_24 = arith.constant -1.000000e+09 : f32
    %82 = vector.shape_cast %81 : vector<128x1xi1> to vector<128x1xi1>
    %83 = vector.broadcast %82 : vector<128x1xi1> to vector<128x32xi1>
    %84 = vector.broadcast %cst_24 : f32 to vector<128x32xf32>
    %85 = arith.select %83, %84, %78 : vector<128x32xi1>, vector<128x32xf32>
    %c2 = arith.constant 2 : index
    %86 = arith.index_cast %18 : i32 to index
    %c0_25 = arith.constant 0 : index
    %87 = vector.load %arg2[%c2, %86, %c0_25] : memref<8x128x32xf32, #tpu.memory_space<vmem>>, vector<1x128x32xf32>
    %88 = vector.shape_cast %87 : vector<1x128x32xf32> to vector<128x32xf32>
    %cst_26 = arith.constant dense<0.000000e+00> : vector<128x40xf32>
    %89 = tpu.matmul %88, %16, %cst_26 {dimension_numbers = #tpu.dot_dimension_numbers<[1], [0], [0], [1], [0, 0, 1, 1], [], []>} : vector<128x32xf32>, vector<32x40xf32>, vector<128x40xf32> -> vector<128x40xf32>
    %90 = vector.extract_strided_slice %89 {offsets = [0, 0], sizes = [128, 32], strides = [1, 1]} : vector<128x40xf32> to vector<128x32xf32>
    %91 = vector.extract_strided_slice %89 {offsets = [0, 32], sizes = [128, 8], strides = [1, 1]} : vector<128x40xf32> to vector<128x8xf32>
    %92 = arith.subf %91, %47 : vector<128x8xf32>
    %cst_27 = arith.constant 0.000000e+00 : f32
    %93 = vector.broadcast %cst_27 : f32 to vector<128x8xf32>
    %94 = arith.maximumf %92, %93 : vector<128x8xf32>
    %cst_28 = arith.constant dense<0.000000e+00> : vector<128x32xf32>
    %95 = tpu.matmul %94, %14, %cst_28 {dimension_numbers = #tpu.dot_dimension_numbers<[1], [0], [0], [1], [0, 0, 1, 1], [], []>} : vector<128x8xf32>, vector<8x32xf32>, vector<128x32xf32> -> vector<128x32xf32>
    %96 = vector.broadcast %5 : vector<1x32xf32> to vector<128x32xf32>
    %97 = arith.addf %95, %96 : vector<128x32xf32>
    %98 = vector.extract_strided_slice %22 {offsets = [0, 2], sizes = [128, 1], strides = [1, 1]} : vector<128x8xf32> to vector<128x1xf32>
    %cst_29 = arith.constant 0.000000e+00 : f32
    %99 = vector.broadcast %cst_29 : f32 to vector<128x1xf32>
    %100 = arith.cmpf oeq, %98, %99 : vector<128x1xf32>
    %cst_30 = arith.constant -1.000000e+09 : f32
    %101 = vector.shape_cast %100 : vector<128x1xi1> to vector<128x1xi1>
    %102 = vector.broadcast %101 : vector<128x1xi1> to vector<128x32xi1>
    %103 = vector.broadcast %cst_30 : f32 to vector<128x32xf32>
    %104 = arith.select %102, %103, %97 : vector<128x32xi1>, vector<128x32xf32>
    %c3 = arith.constant 3 : index
    %105 = arith.index_cast %18 : i32 to index
    %c0_31 = arith.constant 0 : index
    %106 = vector.load %arg2[%c3, %105, %c0_31] : memref<8x128x32xf32, #tpu.memory_space<vmem>>, vector<1x128x32xf32>
    %107 = vector.shape_cast %106 : vector<1x128x32xf32> to vector<128x32xf32>
    %cst_32 = arith.constant dense<0.000000e+00> : vector<128x40xf32>
    %108 = tpu.matmul %107, %16, %cst_32 {dimension_numbers = #tpu.dot_dimension_numbers<[1], [0], [0], [1], [0, 0, 1, 1], [], []>} : vector<128x32xf32>, vector<32x40xf32>, vector<128x40xf32> -> vector<128x40xf32>
    %109 = vector.extract_strided_slice %108 {offsets = [0, 0], sizes = [128, 32], strides = [1, 1]} : vector<128x40xf32> to vector<128x32xf32>
    %110 = vector.extract_strided_slice %108 {offsets = [0, 32], sizes = [128, 8], strides = [1, 1]} : vector<128x40xf32> to vector<128x8xf32>
    %111 = arith.subf %110, %47 : vector<128x8xf32>
    %cst_33 = arith.constant 0.000000e+00 : f32
    %112 = vector.broadcast %cst_33 : f32 to vector<128x8xf32>
    %113 = arith.maximumf %111, %112 : vector<128x8xf32>
    %cst_34 = arith.constant dense<0.000000e+00> : vector<128x32xf32>
    %114 = tpu.matmul %113, %14, %cst_34 {dimension_numbers = #tpu.dot_dimension_numbers<[1], [0], [0], [1], [0, 0, 1, 1], [], []>} : vector<128x8xf32>, vector<8x32xf32>, vector<128x32xf32> -> vector<128x32xf32>
    %115 = vector.broadcast %5 : vector<1x32xf32> to vector<128x32xf32>
    %116 = arith.addf %114, %115 : vector<128x32xf32>
    %117 = vector.extract_strided_slice %22 {offsets = [0, 3], sizes = [128, 1], strides = [1, 1]} : vector<128x8xf32> to vector<128x1xf32>
    %cst_35 = arith.constant 0.000000e+00 : f32
    %118 = vector.broadcast %cst_35 : f32 to vector<128x1xf32>
    %119 = arith.cmpf oeq, %117, %118 : vector<128x1xf32>
    %cst_36 = arith.constant -1.000000e+09 : f32
    %120 = vector.shape_cast %119 : vector<128x1xi1> to vector<128x1xi1>
    %121 = vector.broadcast %120 : vector<128x1xi1> to vector<128x32xi1>
    %122 = vector.broadcast %cst_36 : f32 to vector<128x32xf32>
    %123 = arith.select %121, %122, %116 : vector<128x32xi1>, vector<128x32xf32>
    %c4 = arith.constant 4 : index
    %124 = arith.index_cast %18 : i32 to index
    %c0_37 = arith.constant 0 : index
    %125 = vector.load %arg2[%c4, %124, %c0_37] : memref<8x128x32xf32, #tpu.memory_space<vmem>>, vector<1x128x32xf32>
    %126 = vector.shape_cast %125 : vector<1x128x32xf32> to vector<128x32xf32>
    %cst_38 = arith.constant dense<0.000000e+00> : vector<128x40xf32>
    %127 = tpu.matmul %126, %16, %cst_38 {dimension_numbers = #tpu.dot_dimension_numbers<[1], [0], [0], [1], [0, 0, 1, 1], [], []>} : vector<128x32xf32>, vector<32x40xf32>, vector<128x40xf32> -> vector<128x40xf32>
    %128 = vector.extract_strided_slice %127 {offsets = [0, 0], sizes = [128, 32], strides = [1, 1]} : vector<128x40xf32> to vector<128x32xf32>
    %129 = vector.extract_strided_slice %127 {offsets = [0, 32], sizes = [128, 8], strides = [1, 1]} : vector<128x40xf32> to vector<128x8xf32>
    %130 = arith.subf %129, %47 : vector<128x8xf32>
    %cst_39 = arith.constant 0.000000e+00 : f32
    %131 = vector.broadcast %cst_39 : f32 to vector<128x8xf32>
    %132 = arith.maximumf %130, %131 : vector<128x8xf32>
    %cst_40 = arith.constant dense<0.000000e+00> : vector<128x32xf32>
    %133 = tpu.matmul %132, %14, %cst_40 {dimension_numbers = #tpu.dot_dimension_numbers<[1], [0], [0], [1], [0, 0, 1, 1], [], []>} : vector<128x8xf32>, vector<8x32xf32>, vector<128x32xf32> -> vector<128x32xf32>
    %134 = vector.broadcast %5 : vector<1x32xf32> to vector<128x32xf32>
    %135 = arith.addf %133, %134 : vector<128x32xf32>
    %136 = vector.extract_strided_slice %22 {offsets = [0, 4], sizes = [128, 1], strides = [1, 1]} : vector<128x8xf32> to vector<128x1xf32>
    %cst_41 = arith.constant 0.000000e+00 : f32
    %137 = vector.broadcast %cst_41 : f32 to vector<128x1xf32>
    %138 = arith.cmpf oeq, %136, %137 : vector<128x1xf32>
    %cst_42 = arith.constant -1.000000e+09 : f32
    %139 = vector.shape_cast %138 : vector<128x1xi1> to vector<128x1xi1>
    %140 = vector.broadcast %139 : vector<128x1xi1> to vector<128x32xi1>
    %141 = vector.broadcast %cst_42 : f32 to vector<128x32xf32>
    %142 = arith.select %140, %141, %135 : vector<128x32xi1>, vector<128x32xf32>
    %c5 = arith.constant 5 : index
    %143 = arith.index_cast %18 : i32 to index
    %c0_43 = arith.constant 0 : index
    %144 = vector.load %arg2[%c5, %143, %c0_43] : memref<8x128x32xf32, #tpu.memory_space<vmem>>, vector<1x128x32xf32>
    %145 = vector.shape_cast %144 : vector<1x128x32xf32> to vector<128x32xf32>
    %cst_44 = arith.constant dense<0.000000e+00> : vector<128x40xf32>
    %146 = tpu.matmul %145, %16, %cst_44 {dimension_numbers = #tpu.dot_dimension_numbers<[1], [0], [0], [1], [0, 0, 1, 1], [], []>} : vector<128x32xf32>, vector<32x40xf32>, vector<128x40xf32> -> vector<128x40xf32>
    %147 = vector.extract_strided_slice %146 {offsets = [0, 0], sizes = [128, 32], strides = [1, 1]} : vector<128x40xf32> to vector<128x32xf32>
    %148 = vector.extract_strided_slice %146 {offsets = [0, 32], sizes = [128, 8], strides = [1, 1]} : vector<128x40xf32> to vector<128x8xf32>
    %149 = arith.subf %148, %47 : vector<128x8xf32>
    %cst_45 = arith.constant 0.000000e+00 : f32
    %150 = vector.broadcast %cst_45 : f32 to vector<128x8xf32>
    %151 = arith.maximumf %149, %150 : vector<128x8xf32>
    %cst_46 = arith.constant dense<0.000000e+00> : vector<128x32xf32>
    %152 = tpu.matmul %151, %14, %cst_46 {dimension_numbers = #tpu.dot_dimension_numbers<[1], [0], [0], [1], [0, 0, 1, 1], [], []>} : vector<128x8xf32>, vector<8x32xf32>, vector<128x32xf32> -> vector<128x32xf32>
    %153 = vector.broadcast %5 : vector<1x32xf32> to vector<128x32xf32>
    %154 = arith.addf %152, %153 : vector<128x32xf32>
    %155 = vector.extract_strided_slice %22 {offsets = [0, 5], sizes = [128, 1], strides = [1, 1]} : vector<128x8xf32> to vector<128x1xf32>
    %cst_47 = arith.constant 0.000000e+00 : f32
    %156 = vector.broadcast %cst_47 : f32 to vector<128x1xf32>
    %157 = arith.cmpf oeq, %155, %156 : vector<128x1xf32>
    %cst_48 = arith.constant -1.000000e+09 : f32
    %158 = vector.shape_cast %157 : vector<128x1xi1> to vector<128x1xi1>
    %159 = vector.broadcast %158 : vector<128x1xi1> to vector<128x32xi1>
    %160 = vector.broadcast %cst_48 : f32 to vector<128x32xf32>
    %161 = arith.select %159, %160, %154 : vector<128x32xi1>, vector<128x32xf32>
    %c6 = arith.constant 6 : index
    %162 = arith.index_cast %18 : i32 to index
    %c0_49 = arith.constant 0 : index
    %163 = vector.load %arg2[%c6, %162, %c0_49] : memref<8x128x32xf32, #tpu.memory_space<vmem>>, vector<1x128x32xf32>
    %164 = vector.shape_cast %163 : vector<1x128x32xf32> to vector<128x32xf32>
    %cst_50 = arith.constant dense<0.000000e+00> : vector<128x40xf32>
    %165 = tpu.matmul %164, %16, %cst_50 {dimension_numbers = #tpu.dot_dimension_numbers<[1], [0], [0], [1], [0, 0, 1, 1], [], []>} : vector<128x32xf32>, vector<32x40xf32>, vector<128x40xf32> -> vector<128x40xf32>
    %166 = vector.extract_strided_slice %165 {offsets = [0, 0], sizes = [128, 32], strides = [1, 1]} : vector<128x40xf32> to vector<128x32xf32>
    %167 = vector.extract_strided_slice %165 {offsets = [0, 32], sizes = [128, 8], strides = [1, 1]} : vector<128x40xf32> to vector<128x8xf32>
    %168 = arith.subf %167, %47 : vector<128x8xf32>
    %cst_51 = arith.constant 0.000000e+00 : f32
    %169 = vector.broadcast %cst_51 : f32 to vector<128x8xf32>
    %170 = arith.maximumf %168, %169 : vector<128x8xf32>
    %cst_52 = arith.constant dense<0.000000e+00> : vector<128x32xf32>
    %171 = tpu.matmul %170, %14, %cst_52 {dimension_numbers = #tpu.dot_dimension_numbers<[1], [0], [0], [1], [0, 0, 1, 1], [], []>} : vector<128x8xf32>, vector<8x32xf32>, vector<128x32xf32> -> vector<128x32xf32>
    %172 = vector.broadcast %5 : vector<1x32xf32> to vector<128x32xf32>
    %173 = arith.addf %171, %172 : vector<128x32xf32>
    %174 = vector.extract_strided_slice %22 {offsets = [0, 6], sizes = [128, 1], strides = [1, 1]} : vector<128x8xf32> to vector<128x1xf32>
    %cst_53 = arith.constant 0.000000e+00 : f32
    %175 = vector.broadcast %cst_53 : f32 to vector<128x1xf32>
    %176 = arith.cmpf oeq, %174, %175 : vector<128x1xf32>
    %cst_54 = arith.constant -1.000000e+09 : f32
    %177 = vector.shape_cast %176 : vector<128x1xi1> to vector<128x1xi1>
    %178 = vector.broadcast %177 : vector<128x1xi1> to vector<128x32xi1>
    %179 = vector.broadcast %cst_54 : f32 to vector<128x32xf32>
    %180 = arith.select %178, %179, %173 : vector<128x32xi1>, vector<128x32xf32>
    %c7 = arith.constant 7 : index
    %181 = arith.index_cast %18 : i32 to index
    %c0_55 = arith.constant 0 : index
    %182 = vector.load %arg2[%c7, %181, %c0_55] : memref<8x128x32xf32, #tpu.memory_space<vmem>>, vector<1x128x32xf32>
    %183 = vector.shape_cast %182 : vector<1x128x32xf32> to vector<128x32xf32>
    %cst_56 = arith.constant dense<0.000000e+00> : vector<128x40xf32>
    %184 = tpu.matmul %183, %16, %cst_56 {dimension_numbers = #tpu.dot_dimension_numbers<[1], [0], [0], [1], [0, 0, 1, 1], [], []>} : vector<128x32xf32>, vector<32x40xf32>, vector<128x40xf32> -> vector<128x40xf32>
    %185 = vector.extract_strided_slice %184 {offsets = [0, 0], sizes = [128, 32], strides = [1, 1]} : vector<128x40xf32> to vector<128x32xf32>
    %186 = vector.extract_strided_slice %184 {offsets = [0, 32], sizes = [128, 8], strides = [1, 1]} : vector<128x40xf32> to vector<128x8xf32>
    %187 = arith.subf %186, %47 : vector<128x8xf32>
    %cst_57 = arith.constant 0.000000e+00 : f32
    %188 = vector.broadcast %cst_57 : f32 to vector<128x8xf32>
    %189 = arith.maximumf %187, %188 : vector<128x8xf32>
    %cst_58 = arith.constant dense<0.000000e+00> : vector<128x32xf32>
    %190 = tpu.matmul %189, %14, %cst_58 {dimension_numbers = #tpu.dot_dimension_numbers<[1], [0], [0], [1], [0, 0, 1, 1], [], []>} : vector<128x8xf32>, vector<8x32xf32>, vector<128x32xf32> -> vector<128x32xf32>
    %191 = vector.broadcast %5 : vector<1x32xf32> to vector<128x32xf32>
    %192 = arith.addf %190, %191 : vector<128x32xf32>
    %193 = vector.extract_strided_slice %22 {offsets = [0, 7], sizes = [128, 1], strides = [1, 1]} : vector<128x8xf32> to vector<128x1xf32>
    %cst_59 = arith.constant 0.000000e+00 : f32
    %194 = vector.broadcast %cst_59 : f32 to vector<128x1xf32>
    %195 = arith.cmpf oeq, %193, %194 : vector<128x1xf32>
    %cst_60 = arith.constant -1.000000e+09 : f32
    %196 = vector.shape_cast %195 : vector<128x1xi1> to vector<128x1xi1>
    %197 = vector.broadcast %196 : vector<128x1xi1> to vector<128x32xi1>
    %198 = vector.broadcast %cst_60 : f32 to vector<128x32xf32>
    %199 = arith.select %197, %198, %192 : vector<128x32xi1>, vector<128x32xf32>
    %200 = arith.maximumf %66, %85 : vector<128x32xf32>
    %201 = arith.maximumf %200, %104 : vector<128x32xf32>
    %202 = arith.maximumf %201, %123 : vector<128x32xf32>
    %203 = arith.maximumf %202, %142 : vector<128x32xf32>
    %204 = arith.maximumf %203, %161 : vector<128x32xf32>
    %205 = arith.maximumf %204, %180 : vector<128x32xf32>
    %206 = arith.maximumf %205, %199 : vector<128x32xf32>
    %cst_61 = arith.constant 0.000000e+00 : f32
    %207 = vector.broadcast %cst_61 : f32 to vector<128x32xf32>
    %cst_62 = arith.constant 0.000000e+00 : f32
    %208 = vector.broadcast %cst_62 : f32 to vector<128x32xf32>
    %209 = arith.subf %66, %206 : vector<128x32xf32>
    %210 = math.exp %209 : vector<128x32xf32>
    %211 = arith.addf %207, %210 : vector<128x32xf32>
    %212 = arith.mulf %52, %210 : vector<128x32xf32>
    %213 = arith.addf %208, %212 : vector<128x32xf32>
    %214 = arith.subf %85, %206 : vector<128x32xf32>
    %215 = math.exp %214 : vector<128x32xf32>
    %216 = arith.addf %211, %215 : vector<128x32xf32>
    %217 = arith.mulf %71, %215 : vector<128x32xf32>
    %218 = arith.addf %213, %217 : vector<128x32xf32>
    %219 = arith.subf %104, %206 : vector<128x32xf32>
    %220 = math.exp %219 : vector<128x32xf32>
    %221 = arith.addf %216, %220 : vector<128x32xf32>
    %222 = arith.mulf %90, %220 : vector<128x32xf32>
    %223 = arith.addf %218, %222 : vector<128x32xf32>
    %224 = arith.subf %123, %206 : vector<128x32xf32>
    %225 = math.exp %224 : vector<128x32xf32>
    %226 = arith.addf %221, %225 : vector<128x32xf32>
    %227 = arith.mulf %109, %225 : vector<128x32xf32>
    %228 = arith.addf %223, %227 : vector<128x32xf32>
    %229 = arith.subf %142, %206 : vector<128x32xf32>
    %230 = math.exp %229 : vector<128x32xf32>
    %231 = arith.addf %226, %230 : vector<128x32xf32>
    %232 = arith.mulf %128, %230 : vector<128x32xf32>
    %233 = arith.addf %228, %232 : vector<128x32xf32>
    %234 = arith.subf %161, %206 : vector<128x32xf32>
    %235 = math.exp %234 : vector<128x32xf32>
    %236 = arith.addf %231, %235 : vector<128x32xf32>
    %237 = arith.mulf %147, %235 : vector<128x32xf32>
    %238 = arith.addf %233, %237 : vector<128x32xf32>
    %239 = arith.subf %180, %206 : vector<128x32xf32>
    %240 = math.exp %239 : vector<128x32xf32>
    %241 = arith.addf %236, %240 : vector<128x32xf32>
    %242 = arith.mulf %166, %240 : vector<128x32xf32>
    %243 = arith.addf %238, %242 : vector<128x32xf32>
    %244 = arith.subf %199, %206 : vector<128x32xf32>
    %245 = math.exp %244 : vector<128x32xf32>
    %246 = arith.addf %241, %245 : vector<128x32xf32>
    %247 = arith.mulf %185, %245 : vector<128x32xf32>
    %248 = arith.addf %243, %247 : vector<128x32xf32>
    %249 = tpu.reciprocal %246 {approx = true} : vector<128x32xf32> -> vector<128x32xf32>
    %250 = arith.mulf %246, %249 : vector<128x32xf32>
    %cst_63 = arith.constant 2.000000e+00 : f32
    %251 = vector.broadcast %cst_63 : f32 to vector<128x32xf32>
    %252 = arith.subf %251, %250 : vector<128x32xf32>
    %253 = arith.mulf %249, %252 : vector<128x32xf32>
    %254 = arith.mulf %248, %253 : vector<128x32xf32>
    %cst_64 = arith.constant dense<0.000000e+00> : vector<128x32xf32>
    %255 = tpu.matmul %254, %11, %cst_64 {dimension_numbers = #tpu.dot_dimension_numbers<[1], [0], [0], [1], [0, 0, 1, 1], [], []>} : vector<128x32xf32>, vector<32x32xf32>, vector<128x32xf32> -> vector<128x32xf32>
    %256 = vector.broadcast %6 : vector<1x32xf32> to vector<128x32xf32>
    %257 = arith.addf %255, %256 : vector<128x32xf32>
    %258 = arith.addf %257, %20 : vector<128x32xf32>
    %cst_65 = arith.constant dense<0.000000e+00> : vector<128xf32>
    %259 = vector.multi_reduction <add>, %258, %cst_65 [1] : vector<128x32xf32> to vector<128xf32>
    %260 = vector.shape_cast %259 : vector<128xf32> to vector<128x1xf32>
    %cst_66 = arith.constant 3.200000e+01 : f32
    %261 = vector.broadcast %cst_66 : f32 to vector<128x1xf32>
    %262 = arith.divf %260, %261 : vector<128x1xf32>
    %263 = vector.broadcast %262 : vector<128x1xf32> to vector<128x32xf32>
    %264 = arith.subf %258, %263 : vector<128x32xf32>
    %265 = arith.mulf %264, %264 : vector<128x32xf32>
    %cst_67 = arith.constant dense<0.000000e+00> : vector<128xf32>
    %266 = vector.multi_reduction <add>, %265, %cst_67 [1] : vector<128x32xf32> to vector<128xf32>
    %267 = vector.shape_cast %266 : vector<128xf32> to vector<128x1xf32>
    %cst_68 = arith.constant 3.200000e+01 : f32
    %268 = vector.broadcast %cst_68 : f32 to vector<128x1xf32>
    %269 = arith.divf %267, %268 : vector<128x1xf32>
    %270 = vector.broadcast %262 : vector<128x1xf32> to vector<128x32xf32>
    %271 = arith.subf %258, %270 : vector<128x32xf32>
    %cst_69 = arith.constant 9.99999997E-7 : f32
    %272 = vector.broadcast %cst_69 : f32 to vector<128x1xf32>
    %273 = arith.addf %269, %272 : vector<128x1xf32>
    %274 = math.rsqrt %273 : vector<128x1xf32>
    %275 = vector.broadcast %274 : vector<128x1xf32> to vector<128x32xf32>
    %276 = arith.mulf %271, %275 : vector<128x32xf32>
    %277 = vector.broadcast %3 : vector<1x32xf32> to vector<128x32xf32>
    %278 = arith.mulf %276, %277 : vector<128x32xf32>
    %279 = vector.broadcast %4 : vector<1x32xf32> to vector<128x32xf32>
    %280 = arith.addf %278, %279 : vector<128x32xf32>
    %cst_70 = arith.constant dense<0.000000e+00> : vector<128x32xf32>
    %281 = tpu.matmul %280, %12, %cst_70 {dimension_numbers = #tpu.dot_dimension_numbers<[1], [0], [0], [1], [0, 0, 1, 1], [], []>} : vector<128x32xf32>, vector<32x32xf32>, vector<128x32xf32> -> vector<128x32xf32>
    %282 = vector.broadcast %7 : vector<1x32xf32> to vector<128x32xf32>
    %283 = arith.addf %281, %282 : vector<128x32xf32>
    %cst_71 = arith.constant 0.000000e+00 : f32
    %284 = vector.broadcast %cst_71 : f32 to vector<128x32xf32>
    %285 = arith.maximumf %283, %284 : vector<128x32xf32>
    %cst_72 = arith.constant dense<0.000000e+00> : vector<128x32xf32>
    %286 = tpu.matmul %285, %13, %cst_72 {dimension_numbers = #tpu.dot_dimension_numbers<[1], [0], [0], [1], [0, 0, 1, 1], [], []>} : vector<128x32xf32>, vector<32x32xf32>, vector<128x32xf32> -> vector<128x32xf32>
    %287 = vector.broadcast %8 : vector<1x32xf32> to vector<128x32xf32>
    %288 = arith.addf %286, %287 : vector<128x32xf32>
    %289 = arith.addf %258, %288 : vector<128x32xf32>
    %290 = arith.index_cast %18 : i32 to index
    %c0_73 = arith.constant 0 : index
    %291 = vector.load %arg7[%290, %c0_73] : memref<128x32xf32, #tpu.memory_space<vmem>>, vector<128x32xf32>
    tpu.vector_store %arg7[%290, %c0_73], %289 {strides = array<i32>} : memref<128x32xf32, #tpu.memory_space<vmem>>, vector<128x32xf32>,
    %c1_i32 = arith.constant 1 : i32
    return
  }
  func.func @transform_0(%arg0: i32) -> (i32, i32) {
    %c0_i32 = arith.constant 0 : i32
    %c0_i32_0 = arith.constant 0 : i32
    return %arg0, %c0_i32 : i32, i32
  }
  func.func @transform_1(%arg0: i32) -> (i32, i32, i32) {
    %c0_i32 = arith.constant 0 : i32
    %c0_i32_0 = arith.constant 0 : i32
    %c0_i32_1 = arith.constant 0 : i32
    return %c0_i32, %arg0, %c0_i32_0 : i32, i32, i32
  }
  func.func @transform_2(%arg0: i32) -> (i32, i32) {
    %c0_i32 = arith.constant 0 : i32
    %c0_i32_0 = arith.constant 0 : i32
    return %arg0, %c0_i32 : i32, i32
  }
  func.func @transform_3(%arg0: i32) -> (i32, i32) {
    %c0_i32 = arith.constant 0 : i32
    %c0_i32_0 = arith.constant 0 : i32
    %c0_i32_1 = arith.constant 0 : i32
    return %c0_i32, %c0_i32_0 : i32, i32
  }
  func.func @transform_4(%arg0: i32) -> (i32, i32) {
    %c0_i32 = arith.constant 0 : i32
    %c0_i32_0 = arith.constant 0 : i32
    %c0_i32_1 = arith.constant 0 : i32
    return %c0_i32, %c0_i32_0 : i32, i32
  }
  func.func @transform_5(%arg0: i32) -> (i32, i32) {
    %c0_i32 = arith.constant 0 : i32
    %c0_i32_0 = arith.constant 0 : i32
    %c0_i32_1 = arith.constant 0 : i32
    return %c0_i32, %c0_i32_0 : i32, i32
  }
  func.func @transform_6(%arg0: i32) -> (i32, i32) {
    %c0_i32 = arith.constant 0 : i32
    %c0_i32_0 = arith.constant 0 : i32
    return %arg0, %c0_i32 : i32, i32
  }
}

</mosaic_0001>

<bundles_post_ra>
// kernel: tpu_custom_call.1
= control target key start
LH: loop header
LB: loop body
LE: loop exit
PB: predicated region body
PF: predicated region fallthrough
CT: control target
= control target key end

     0   :  { %vm78_vm0 = vcmask 261120   ;;  %s8767_s29 = smov 32   ;;  %s8768_s8 = smov 96   ;;  %vm898_vm1 = vcmask 64512   ;;  %s13401_s0 = inlined_call_operand.vmem [shape: f32[128,32], index: 0, kind: input, shape index: {}]   ;;  %s13402_s3 = inlined_call_operand.vmem [shape: f32[32,40], index: 3, kind: input, shape index: {}]   ;;  %s13403_s1 = inlined_call_operand.vmem [shape: f32[8,128,32], index: 1, kind: input, shape index: {}]   ;;  %s13404_s4 = inlined_call_operand.vmem [shape: f32[136,32], index: 4, kind: input, shape index: {}]   ;;  %s13405_s5 = inlined_call_operand.vmem [shape: f32[16,32], index: 5, kind: input, shape index: {}]   ;;  %s13406_s2 = inlined_call_operand.vmem [shape: f32[128,8], index: 2, kind: input, shape index: {}]   ;;  %s13407_s6 = inlined_call_operand.vmem [shape: f32[128,32], index: 6, kind: output, shape index: {}]  }
   0x1   :  { %v8815_v0 = vld [vmem:[%s13401_s0] sm:$0xff]  ;;  %v8820_v1 = vld [vmem:[%s13401_s0 + $0x10] sm:$0xff]  ;;  %v8825_v2 = vld [vmem:[%s13401_s0 + $0x8] sm:$0xff] }
   0x2   :  { %v79_v3 = vsel %vm78_vm0, %v8815_v0, 0.0  ;;  %v85_v4 = vsel %vm78_vm0, %v8820_v1, 0.0  ;;  %v8834_v5 = vld [vmem:[%s13401_s0 + $0x18] sm:$0xff]  ;;  %v82_v6 = vsel %vm78_vm0, %v8825_v2, 0.0  ;;  %v8843_v8 = vld [vmem:[%s13401_s0 + $0x20] sm:$0xff]  ;;  %v8848_v9 = vld [vmem:[%s13401_s0 + $0x28] sm:$0xff] }
   0x3   :  { %80 = vadd.xlane.f32.xlu0 %v79_v3  ;;  %86 = vadd.xlane.f32.xlu1 %v85_v4  ;;  %v88_v7 = vsel %vm78_vm0, %v8834_v5, 0.0  ;;  %v91_v10 = vsel %vm78_vm0, %v8843_v8, 0.0  ;;  %v94_v11 = vsel %vm78_vm0, %v8848_v9, 0.0  ;;  %v8857_v12 = vld [vmem:[%s13401_s0 + $0x30] sm:$0xff]  ;;  %v8862_v13 = vld [vmem:[%s13401_s0 + $0x38] sm:$0xff]  ;;  %v8871_v16 = vld [vmem:[%s13401_s0 + $0x40] sm:$0xff] }
   0x4   :  { %v97_v14 = vsel %vm78_vm0, %v8857_v12, 0.0  ;;  %v100_v15 = vsel %vm78_vm0, %v8862_v13, 0.0  ;;  %v8876_v17 = vld [vmem:[%s13401_s0 + $0x48] sm:$0xff]  ;;  %v103_v18 = vsel %vm78_vm0, %v8871_v16, 0.0  ;;  %v8885_v20 = vld [vmem:[%s13401_s0 + $0x50] sm:$0xff]  ;;  %v8890_v21 = vld [vmem:[%s13401_s0 + $0x58] sm:$0xff] }
   0x5   :  { %v106_v19 = vsel %vm78_vm0, %v8876_v17, 0.0  ;;  %v109_v22 = vsel %vm78_vm0, %v8885_v20, 0.0  ;;  %v112_v23 = vsel %vm78_vm0, %v8890_v21, 0.0  ;;  %v8899_v24 = vld [vmem:[%s13401_s0 + $0x60] sm:$0xff]  ;;  %v8904_v25 = vld [vmem:[%s13401_s0 + $0x68] sm:$0xff]  ;;  %v8913_v28 = vld [vmem:[%s13401_s0 + $0x70] sm:$0xff] }
   0x6   :  { %v115_v26 = vsel %vm78_vm0, %v8899_v24, 0.0  ;;  %v118_v27 = vsel %vm78_vm0, %v8904_v25, 0.0  ;;  %v8918_v29 = vld [vmem:[%s13401_s0 + $0x78] sm:$0xff]  ;;  %v121_v30 = vsel %vm78_vm0, %v8913_v28, 0.0  ;;  %v8932_v33 = vld [vmem:[%s13402_s3 + $0x10] sm:$0xff]  ;;  %v541_v34 = vld [vmem:[%s13403_s1] sm:$0xff] }
   0x7   :  { %83 = vadd.xlane.f32.xlu0 %v82_v6  ;;  %89 = vadd.xlane.f32.xlu1 %v88_v7  ;;  %v124_v31 = vsel %vm78_vm0, %v8918_v29, 0.0  ;;  %v8927_v32 = vld [vmem:[%s13402_s3 + $0x18] sm:$0xff]  ;;  %v8942_v35 = vld [vmem:[%s13402_s3 + $0x8] sm:$0xff]  ;;  %v8950_v36 = vld [vmem:[%s13402_s3] sm:$0xff] }
   0x8   :  { %7738 = vmatprep.subr.mxu1 %v8927_v32  ;;  %7746 = vmatprep.mubr.msk.f32.mxu1 %vm78_vm0, %v541_v34  ;;  %v542_v37 = vld [vmem:[%s13403_s1 + $0x8] sm:$0xff]  ;;  %v543_v38 = vld [vmem:[%s13403_s1 + $0x10] sm:$0xff]  ;;  %v544_v39 = vld [vmem:[%s13403_s1 + $0x18] sm:$0xff] }
   0x9   :  { %7739 = vmatpush3.msra.mxu1 %v8927_v32  ;;  %v545_v40 = vld [vmem:[%s13403_s1 + $0x20] sm:$0xff]  ;;  %v546_v41 = vld [vmem:[%s13403_s1 + $0x28] sm:$0xff]  ;;  %v547_v42 = vld [vmem:[%s13403_s1 + $0x30] sm:$0xff] }
   0xa   :  { %7740 = vmatprep.subr.mxu1 %v8932_v33  ;;  %v548_v43 = vld [vmem:[%s13403_s1 + $0x38] sm:$0xff]  ;;  %v549_v44 = vld [vmem:[%s13403_s1 + $0x40] sm:$0xff]  ;;  %v550_v45 = vld [vmem:[%s13403_s1 + $0x48] sm:$0xff] }
   0xb   :  { %92 = vadd.xlane.f32.xlu0 %v91_v10  ;;  %95 = vadd.xlane.f32.xlu1 %v94_v11  ;;  %v551_v46 = vld [vmem:[%s13403_s1 + $0x50] sm:$0xff]  ;;  %v552_v47 = vld [vmem:[%s13403_s1 + $0x58] sm:$0xff]  ;;  %v553_v48 = vld [vmem:[%s13403_s1 + $0x60] sm:$0xff] }
   0xc   :  { %7741 = vmatpush3.msra.mxu1 %v8932_v33  ;;  %v554_v49 = vld [vmem:[%s13403_s1 + $0x68] sm:$0xff]  ;;  %v555_v50 = vld [vmem:[%s13403_s1 + $0x70] sm:$0xff]  ;;  %v556_v51 = vld [vmem:[%s13403_s1 + $0x78] sm:$0xff] }
   0xd   :  { %7742 = vmatprep.subr.mxu1 %v8942_v35  ;;  %v6946_v52 = vld [vmem:[%s13403_s1 + $0x80] sm:$0xff]  ;;  %v6947_v53 = vld [vmem:[%s13403_s1 + $0x88] sm:$0xff]  ;;  %v6948_v54 = vld [vmem:[%s13403_s1 + $0x90] sm:$0xff] }
   0xe   :  { %7743 = vmatpush3.msra.mxu1 %v8942_v35  ;;  %v6949_v55 = vld [vmem:[%s13403_s1 + $0x98] sm:$0xff]  ;;  %v6950_v56 = vld [vmem:[%s13403_s1 + $0xa0] sm:$0xff]  ;;  %v6951_v57 = vld [vmem:[%s13403_s1 + $0xa8] sm:$0xff] }
   0xf   :  { %98 = vadd.xlane.f32.xlu0 %v97_v14  ;;  %101 = vadd.xlane.f32.xlu1 %v100_v15  ;;  %v6952_v58 = vld [vmem:[%s13403_s1 + $0xb0] sm:$0xff]  ;;  %v6953_v59 = vld [vmem:[%s13403_s1 + $0xb8] sm:$0xff]  ;;  %v6954_v60 = vld [vmem:[%s13403_s1 + $0xc0] sm:$0xff] }
  0x10   :  { %7744 = vmatprep.subr.mxu1 %v8950_v36  ;;  %v6955_v61 = vld [vmem:[%s13403_s1 + $0xc8] sm:$0xff]  ;;  %v6956_v62 = vld [vmem:[%s13403_s1 + $0xd0] sm:$0xff]  ;;  %v6957_v63 = vld [vmem:[%s13403_s1 + $0xd8] sm:$0xff] }
  0x11   :  { %7745 = vmatpush3.msra.mxu1 %v8950_v36  ;;  %v6958_v3 = vld [vmem:[%s13403_s1 + $0xe0] sm:$0xff]  ;;  %v6959_v4 = vld [vmem:[%s13403_s1 + $0xe8] sm:$0xff]  ;;  %v6960_v6 = vld [vmem:[%s13403_s1 + $0xf0] sm:$0xff] }
  0x12   :  { %7747 = vmatmul.mubr.msk.f32.vlgmr.msra.gmra.mxu1 %vm78_vm0, %v542_v37  ;;  %7796 = vmatprep.subr.mxu1 %v8927_v32  ;;  %v6961_v7 = vld [vmem:[%s13403_s1 + $0xf8] sm:$0xff]  ;;  %v6994_v10 = vld [vmem:[%s13403_s1 + $0x100] sm:$0xff]  ;;  %v6995_v11 = vld [vmem:[%s13403_s1 + $0x108] sm:$0xff] }
  0x13   :  { %104 = vadd.xlane.f32.xlu0 %v103_v18  ;;  %107 = vadd.xlane.f32.xlu1 %v106_v19  ;;  %v6996_v14 = vld [vmem:[%s13403_s1 + $0x110] sm:$0xff]  ;;  %v6997_v15 = vld [vmem:[%s13403_s1 + $0x118] sm:$0xff]  ;;  %v6998_v18 = vld [vmem:[%s13403_s1 + $0x120] sm:$0xff] }
  0x14   :  { %7749 = vmatprep.mubr.msk.f32.mxu1 %vm78_vm0, %v543_v38  ;;  %7797 = vmatpush3.msra.mxu1 %v8927_v32  ;;  %v6999_v19 = vld [vmem:[%s13403_s1 + $0x128] sm:$0xff] }
  0x15   :  { %7798 = vmatprep.subr.mxu1 %v8932_v33 }
  0x16   :  { %7799 = vmatpush3.msra.mxu1 %v8932_v33 }
  0x17   :  { %110 = vadd.xlane.f32.xlu0 %v109_v22  ;;  %113 = vadd.xlane.f32.xlu1 %v112_v23  ;;  %v7000_v22 = vld [vmem:[%s13403_s1 + $0x130] sm:$0xff]  ;;  %v7001_v23 = vld [vmem:[%s13403_s1 + $0x138] sm:$0xff] }
  0x18   :  { %7750 = vmatmul.mubr.msk.f32.gmra.mxu1 %vm78_vm0, %v544_v39  ;;  %7800 = vmatprep.subr.mxu1 %v8942_v35 }
  0x19   :  { %7752 = vmatprep.mubr.msk.f32.mxu1 %vm78_vm0, %v545_v40  ;;  %7801 = vmatpush3.msra.mxu1 %v8942_v35 }
  0x1a   :  { %7802 = vmatprep.subr.mxu1 %v8950_v36 }
  0x1b   :  { %116 = vadd.xlane.f32.xlu0 %v115_v26  ;;  %119 = vadd.xlane.f32.xlu1 %v118_v27 }
  0x1c   :  { %7803 = vmatpush3.msra.mxu1 %v8950_v36 }
  0x1d   :  { %7753 = vmatmul.mubr.msk.f32.gmra.mxu1 %vm78_vm0, %v546_v41  ;;  %7854 = vmatprep.subr.mxu1 %v8927_v32 }
  0x1e   :  { %7755 = vmatprep.mubr.msk.f32.mxu1 %vm78_vm0, %v547_v42 }
  0x1f   :  { %122 = vadd.xlane.f32.xlu0 %v121_v30  ;;  %125 = vadd.xlane.f32.xlu1 %v124_v31 }
  0x21   :  { %7756 = vmatmul.mubr.msk.f32.gmra.mxu1 %vm78_vm0, %v548_v43 }
  0x22   :  { %7758 = vmatprep.mubr.msk.f32.mxu1 %vm78_vm0, %v549_v44 }
  0x25   :  { %7759 = vmatmul.mubr.msk.f32.gmra.mxu1 %vm78_vm0, %v550_v45 }
  0x26   :  { %7761 = vmatprep.mubr.msk.f32.mxu1 %vm78_vm0, %v551_v46 }
  0x29   :  { %7762 = vmatmul.mubr.msk.f32.gmra.mxu1 %vm78_vm0, %v552_v47 }
  0x2a   :  { %7764 = vmatprep.mubr.msk.f32.mxu1 %vm78_vm0, %v553_v48 }
  0x2d   :  { %7765 = vmatmul.mubr.msk.f32.gmra.mxu1 %vm78_vm0, %v554_v49 }
  0x2e   :  { %7767 = vmatprep.mubr.msk.f32.mxu1 %vm78_vm0, %v555_v50 }
  0x31   :  { %7768 = vmatmul.mubr.msk.f32.gmra.mxu1 %vm78_vm0, %v556_v51 }
  0x32   :  { %7804 = vmatprep.mubr.msk.f32.mxu1 %vm78_vm0, %v6946_v52 }
  0x35   :  { %7805 = vmatmul.mubr.msk.f32.vlgmr.msra.gmra.mxu1 %vm78_vm0, %v6947_v53 }
  0x36   :  { %7807 = vmatprep.mubr.msk.f32.mxu1 %vm78_vm0, %v6948_v54  ;;  %7855 = vmatpush3.msra.mxu1 %v8927_v32 }
  0x37   :  { %7856 = vmatprep.subr.mxu1 %v8932_v33 }
  0x38   :  { %7857 = vmatpush3.msra.mxu1 %v8932_v33 }
  0x39   :  { %7808 = vmatmul.mubr.msk.f32.gmra.mxu1 %vm78_vm0, %v6949_v55  ;;  %7858 = vmatprep.subr.mxu1 %v8942_v35 }
  0x3a   :  { %7810 = vmatprep.mubr.msk.f32.mxu1 %vm78_vm0, %v6950_v56  ;;  %7859 = vmatpush3.msra.mxu1 %v8942_v35 }
  0x3b   :  { %7860 = vmatprep.subr.mxu1 %v8950_v36 }
  0x3c   :  { %7861 = vmatpush3.msra.mxu1 %v8950_v36 }
  0x3d   :  { %7811 = vmatmul.mubr.msk.f32.gmra.mxu1 %vm78_vm0, %v6951_v57  ;;  %7912 = vmatprep.subr.mxu1 %v8927_v32 }
  0x3e   :  { %7813 = vmatprep.mubr.msk.f32.mxu1 %vm78_vm0, %v6952_v58 }
  0x41   :  { %7814 = vmatmul.mubr.msk.f32.gmra.mxu1 %vm78_vm0, %v6953_v59 }
  0x42   :  { %7816 = vmatprep.mubr.msk.f32.mxu1 %vm78_vm0, %v6954_v60 }
  0x45   :  { %7817 = vmatmul.mubr.msk.f32.gmra.mxu1 %vm78_vm0, %v6955_v61 }
  0x46   :  { %7819 = vmatprep.mubr.msk.f32.mxu1 %vm78_vm0, %v6956_v62 }
  0x49   :  { %7820 = vmatmul.mubr.msk.f32.gmra.mxu1 %vm78_vm0, %v6957_v63 }
  0x4a   :  { %7822 = vmatprep.mubr.msk.f32.mxu1 %vm78_vm0, %v6958_v3 }
  0x4d   :  { %7823 = vmatmul.mubr.msk.f32.gmra.mxu1 %vm78_vm0, %v6959_v4 }
  0x4e   :  { %7825 = vmatprep.mubr.msk.f32.mxu1 %vm78_vm0, %v6960_v6 }
  0x51   :  { %7826 = vmatmul.mubr.msk.f32.gmra.mxu1 %vm78_vm0, %v6961_v7  ;;  %v7003_v7 = vld [vmem:[%s13403_s1 + $0x148] sm:$0xff] }
  0x52   :  { %7862 = vmatprep.mubr.msk.f32.mxu1 %vm78_vm0, %v6994_v10 }
  0x55   :  { %7863 = vmatmul.mubr.msk.f32.vlgmr.msra.gmra.mxu1 %vm78_vm0, %v6995_v11 }
  0x56   :  { %7865 = vmatprep.mubr.msk.f32.mxu1 %vm78_vm0, %v6996_v14  ;;  %7913 = vmatpush3.msra.mxu1 %v8927_v32 }
  0x57   :  { %7914 = vmatprep.subr.mxu1 %v8932_v33 }
  0x58   :  { %7915 = vmatpush3.msra.mxu1 %v8932_v33 }
  0x59   :  { %7866 = vmatmul.mubr.msk.f32.gmra.mxu1 %vm78_vm0, %v6997_v15  ;;  %7916 = vmatprep.subr.mxu1 %v8942_v35 }
  0x5a   :  { %7868 = vmatprep.mubr.msk.f32.mxu1 %vm78_vm0, %v6998_v18  ;;  %7917 = vmatpush3.msra.mxu1 %v8942_v35 }
  0x5b   :  { %7918 = vmatprep.subr.mxu1 %v8950_v36 }
  0x5c   :  { %7919 = vmatpush3.msra.mxu1 %v8950_v36 }
  0x5d   :  { %7869 = vmatmul.mubr.msk.f32.gmra.mxu1 %vm78_vm0, %v6999_v19  ;;  %7970 = vmatprep.subr.mxu1 %v8927_v32 }
  0x5e   :  { %7871 = vmatprep.mubr.msk.f32.mxu1 %vm78_vm0, %v7000_v22 }
  0x61   :  { %7872 = vmatmul.mubr.msk.f32.gmra.mxu1 %vm78_vm0, %v7001_v23 }
  0x8c   :  { %v81_v26 = vpop.xlane.xlu0 %80  ;;  %v87_v27 = vpop.xlane.xlu1 %86 }
  0x8d   :  { %v128_v30 = vmul.f32 0.03125, %v81_v26  ;;  %v130_v31 = vmul.f32 0.03125, %v87_v27 }
  0x8f   :  { %v9138_v34 = vsub.f32 %v8815_v0, %v128_v30  ;;  %v9141_v37 = vsub.f32 %v8820_v1, %v130_v31 }
  0x90   :  { %v84_v38 = vpop.xlane.xlu0 %83  ;;  %v90_v39 = vpop.xlane.xlu1 %89 }
  0x91   :  { %v129_v40 = vmul.f32 0.03125, %v84_v38  ;;  %v131_v41 = vmul.f32 0.03125, %v90_v39  ;;  %v160_v42 = vmul.f32 %v9138_v34, %v9138_v34  ;;  %v162_v43 = vmul.f32 %v9141_v37, %v9141_v37  ;;  %v7005_v38 = vld [vmem:[%s13403_s1 + $0x158] sm:$0xff] }
  0x93   :  { %v9148_v44 = vsub.f32 %v8825_v2, %v129_v40  ;;  %v9151_v45 = vsub.f32 %v8834_v5, %v131_v41  ;;  %v176_v0 = vsel %vm78_vm0, %v160_v42, 0.0  ;;  %v182_v47 = vsel %vm78_vm0, %v162_v43, 0.0 }
  0x94   :  { %177 = vadd.xlane.f32.xlu0 %v176_v0  ;;  %v93_v1 = vpop.xlane.xlu0 %92  ;;  %v96_v46 = vpop.xlane.xlu1 %95  ;;  %v7006_v0 = vld [vmem:[%s13403_s1 + $0x160] sm:$0xff] }
  0x95   :  { %v132_v48 = vmul.f32 0.03125, %v93_v1  ;;  %v133_v49 = vmul.f32 0.03125, %v96_v46  ;;  %v161_v50 = vmul.f32 %v9148_v44, %v9148_v44  ;;  %v163_v51 = vmul.f32 %v9151_v45, %v9151_v45 }
  0x97   :  { %v9160_v2 = vsub.f32 %v8843_v8, %v132_v48  ;;  %v9163_v5 = vsub.f32 %v8848_v9, %v133_v49  ;;  %v179_v52 = vsel %vm78_vm0, %v161_v50, 0.0  ;;  %v185_v55 = vsel %vm78_vm0, %v163_v51, 0.0  ;;  %v7007_v48 = vld [vmem:[%s13403_s1 + $0x168] sm:$0xff] }
  0x98   :  { %183 = vadd.xlane.f32.xlu0 %v182_v47  ;;  %180 = vadd.xlane.f32.xlu1 %v179_v52  ;;  %v99_v53 = vpop.xlane.xlu0 %98  ;;  %v102_v54 = vpop.xlane.xlu1 %101 }
  0x99   :  { %v134_v56 = vmul.f32 0.03125, %v99_v53  ;;  %v135_v57 = vmul.f32 0.03125, %v102_v54  ;;  %v164_v58 = vmul.f32 %v9160_v2, %v9160_v2  ;;  %v165_v8 = vmul.f32 %v9163_v5, %v9163_v5  ;;  %v7008_v54 = vld [vmem:[%s13403_s1 + $0x170] sm:$0xff] }
  0x9b   :  { %v9172_v59 = vsub.f32 %v8857_v12, %v134_v56  ;;  %v9175_v9 = vsub.f32 %v8862_v13, %v135_v57  ;;  %v188_v60 = vsel %vm78_vm0, %v164_v58, 0.0  ;;  %v191_v63 = vsel %vm78_vm0, %v165_v8, 0.0  ;;  %v7002_v13 = vld [vmem:[%s13403_s1 + $0x140] sm:$0xff]  ;;  %v7009_v58 = vld [vmem:[%s13403_s1 + $0x178] sm:$0xff] }
  0x9c   :  { %186 = vadd.xlane.f32.xlu1 %v185_v55  ;;  %189 = vadd.xlane.f32.xlu0 %v188_v60  ;;  %v105_v61 = vpop.xlane.xlu0 %104  ;;  %v108_v62 = vpop.xlane.xlu1 %107 }
  0x9d   :  { %v136_v3 = vmul.f32 0.03125, %v105_v61  ;;  %v137_v4 = vmul.f32 0.03125, %v108_v62  ;;  %v166_v6 = vmul.f32 %v9172_v59, %v9172_v59  ;;  %v167_v12 = vmul.f32 %v9175_v9, %v9175_v9  ;;  %7874 = vmatprep.mubr.msk.f32.mxu1 %vm78_vm0, %v7002_v13  ;;  %v7043_v62 = vld [vmem:[%s13403_s1 + $0x188] sm:$0xff]  ;;  %v39_v13 = vld [vmem:[%s13404_s4 + $0x70] sm:$0xff] }
  0x9e   :  { %7875 = vmatmul.mubr.msk.f32.gmra.mxu1 %vm78_vm0, %v7003_v7  ;;  %v7046_v7 = vld [vmem:[%s13403_s1 + $0x1a0] sm:$0xff] }
  0x9f   :  { %v9191_v10 = vsub.f32 %v8871_v16, %v136_v3  ;;  %v9194_v11 = vsub.f32 %v8876_v17, %v137_v4  ;;  %v194_v14 = vsel %vm78_vm0, %v166_v6, 0.0  ;;  %v197_v19 = vsel %vm78_vm0, %v167_v12, 0.0  ;;  %v7004_v17 = vld [vmem:[%s13403_s1 + $0x150] sm:$0xff]  ;;  %v41_v3 = vld [vmem:[%s13404_s4 + $0x80] sm:$0xff]  ;;  %v7045_v6 = vld [vmem:[%s13403_s1 + $0x198] sm:$0xff] }
  0xa0   :  { %192 = vadd.xlane.f32.xlu1 %v191_v63  ;;  %195 = vadd.xlane.f32.xlu0 %v194_v14  ;;  %v111_v15 = vpop.xlane.xlu0 %110  ;;  %v114_v18 = vpop.xlane.xlu1 %113  ;;  %v7044_v4 = vld [vmem:[%s13403_s1 + $0x190] sm:$0xff]  ;;  %v40_v12 = vld [vmem:[%s13404_s4 + $0x78] sm:$0xff]  ;;  %v7047_v14 = vld [vmem:[%s13403_s1 + $0x1a8] sm:$0xff] }
  0xa1   :  { %v138_v22 = vmul.f32 0.03125, %v111_v15  ;;  %v139_v23 = vmul.f32 0.03125, %v114_v18  ;;  %v168_v26 = vmul.f32 %v9191_v10, %v9191_v10  ;;  %v169_v16 = vmul.f32 %v9194_v11, %v9194_v11  ;;  %7877 = vmatprep.mubr.msk.f32.mxu1 %vm78_vm0, %v7004_v17  ;;  %7706 = vmatprep.subr.mxu0 %v41_v3  ;;  %v38_v15 = vld [vmem:[%s13404_s4 + $0x68] sm:$0xff]  ;;  %v7048_v18 = vld [vmem:[%s13403_s1 + $0x1b0] sm:$0xff]  ;;  %v7054_v17 = vld [vmem:[%s13403_s1 + $0x1e0] sm:$0xff] }
  0xa2   :  { %7878 = vmatmul.mubr.msk.f32.gmra.mxu1 %vm78_vm0, %v7005_v38  ;;  %7707 = vmatpush3.msra.mxu0 %v41_v3  ;;  %v7056_v38 = vld [vmem:[%s13403_s1 + $0x1f0] sm:$0xff] }
  0xa3   :  { %v9207_v27 = vsub.f32 %v8885_v20, %v138_v22  ;;  %v9210_v30 = vsub.f32 %v8890_v21, %v139_v23  ;;  %v200_v31 = vsel %vm78_vm0, %v168_v26, 0.0  ;;  %v203_v41 = vsel %vm78_vm0, %v169_v16, 0.0  ;;  %7880 = vmatprep.mubr.msk.f32.mxu1 %vm78_vm0, %v7006_v0  ;;  %7708 = vmatprep.subr.mxu0 %v40_v12  ;;  %v7050_v22 = vld [vmem:[%s13403_s1 + $0x1c0] sm:$0xff]  ;;  %v7051_v23 = vld [vmem:[%s13403_s1 + $0x1c8] sm:$0xff]  ;;  %v7052_v26 = vld [vmem:[%s13403_s1 + $0x1d0] sm:$0xff] }
  0xa4   :  { %198 = vadd.xlane.f32.xlu1 %v197_v19  ;;  %201 = vadd.xlane.f32.xlu0 %v200_v31  ;;  %v117_v39 = vpop.xlane.xlu0 %116  ;;  %v120_v40 = vpop.xlane.xlu1 %119  ;;  %v7049_v19 = vld [vmem:[%s13403_s1 + $0x1b8] sm:$0xff]  ;;  %v7055_v31 = vld [vmem:[%s13403_s1 + $0x1e8] sm:$0xff]  ;;  %v7096_v0 = vld [vmem:[%s13403_s1 + $0x230] sm:$0xff] }
  0xa5   :  { %v140_v42 = vmul.f32 0.03125, %v117_v39  ;;  %v141_v20 = vmul.f32 0.03125, %v120_v40  ;;  %v170_v21 = vmul.f32 %v9207_v27, %v9207_v27  ;;  %v171_v43 = vmul.f32 %v9210_v30, %v9210_v30  ;;  %7709 = vmatpush3.msra.mxu0 %v40_v12  ;;  %v7053_v16 = vld [vmem:[%s13403_s1 + $0x1d8] sm:$0xff]  ;;  %v7090_v40 = vld [vmem:[%s13403_s1 + $0x200] sm:$0xff]  ;;  %v7148_v3 = vld [vmem:[%s13403_s1 + $0x2d0] sm:$0xff] }
  0xa6   :  { %7881 = vmatmul.mubr.msk.f32.gmra.mxu1 %vm78_vm0, %v7007_v48  ;;  %7710 = vmatprep.subr.mxu0 %v39_v13  ;;  %v7057_v39 = vld [vmem:[%s13403_s1 + $0x1f8] sm:$0xff]  ;;  %v7098_v48 = vld [vmem:[%s13403_s1 + $0x240] sm:$0xff]  ;;  %v7151_v12 = vld [vmem:[%s13403_s1 + $0x2e8] sm:$0xff] }
  0xa7   :  { %v9227_v1 = vsub.f32 %v8899_v24, %v140_v42  ;;  %v9230_v46 = vsub.f32 %v8904_v25, %v141_v20  ;;  %v206_v47 = vsel %vm78_vm0, %v170_v21, 0.0  ;;  %v209_v51 = vsel %vm78_vm0, %v171_v43, 0.0  ;;  %7883 = vmatprep.mubr.msk.f32.mxu1 %vm78_vm0, %v7008_v54  ;;  %7711 = vmatpush3.msra.mxu0 %v39_v13  ;;  %v7092_v42 = vld [vmem:[%s13403_s1 + $0x210] sm:$0xff]  ;;  %v7093_v20 = vld [vmem:[%s13403_s1 + $0x218] sm:$0xff]  ;;  %v7094_v21 = vld [vmem:[%s13403_s1 + $0x220] sm:$0xff] }
  0xa8   :  { %204 = vadd.xlane.f32.xlu1 %v203_v41  ;;  %207 = vadd.xlane.f32.xlu0 %v206_v47  ;;  %v123_v49 = vpop.xlane.xlu0 %122  ;;  %v126_v50 = vpop.xlane.xlu1 %125  ;;  %v7091_v41 = vld [vmem:[%s13403_s1 + $0x208] sm:$0xff]  ;;  %v7097_v47 = vld [vmem:[%s13403_s1 + $0x238] sm:$0xff]  ;;  %v7138_v54 = vld [vmem:[%s13403_s1 + $0x280] sm:$0xff] }
  0xa9   :  { %v142_v52 = vmul.f32 0.03125, %v123_v49  ;;  %v143_v24 = vmul.f32 0.03125, %v126_v50  ;;  %v172_v25 = vmul.f32 %v9227_v1, %v9227_v1  ;;  %v173_v53 = vmul.f32 %v9230_v46, %v9230_v46  ;;  %7712 = vmatprep.subr.mxu0 %v38_v15  ;;  %v7095_v43 = vld [vmem:[%s13403_s1 + $0x228] sm:$0xff]  ;;  %v7100_v50 = vld [vmem:[%s13403_s1 + $0x250] sm:$0xff] }
  0xaa   :  { %7884 = vmatmul.mubr.msk.f32.gmra.mxu1 %vm78_vm0, %v7009_v58  ;;  %7713 = vmatpush3.msra.mxu0 %v38_v15  ;;  %v7099_v49 = vld [vmem:[%s13403_s1 + $0x248] sm:$0xff]  ;;  %v7140_v58 = vld [vmem:[%s13403_s1 + $0x290] sm:$0xff] }
  0xab   :  { %v9247_v55 = vsub.f32 %v8913_v28, %v142_v52  ;;  %v9250_v56 = vsub.f32 %v8918_v29, %v143_v24  ;;  %v212_v57 = vsel %vm78_vm0, %v172_v25, 0.0  ;;  %v215_v8 = vsel %vm78_vm0, %v173_v53, 0.0  ;;  %v7042_v29 = vld [vmem:[%s13403_s1 + $0x180] sm:$0xff]  ;;  %v7103_v24 = vld [vmem:[%s13403_s1 + $0x268] sm:$0xff]  ;;  %v7104_v25 = vld [vmem:[%s13403_s1 + $0x270] sm:$0xff] }
  0xac   :  { %210 = vadd.xlane.f32.xlu1 %v209_v51  ;;  %213 = vadd.xlane.f32.xlu0 %v212_v57  ;;  %v7101_v51 = vld [vmem:[%s13403_s1 + $0x258] sm:$0xff]  ;;  %v7102_v52 = vld [vmem:[%s13403_s1 + $0x260] sm:$0xff]  ;;  %v7139_v57 = vld [vmem:[%s13403_s1 + $0x288] sm:$0xff] }
  0xad   :  { %v174_v60 = vmul.f32 %v9247_v55, %v9247_v55  ;;  %v175_v28 = vmul.f32 %v9250_v56, %v9250_v56  ;;  %7920 = vmatprep.mubr.msk.f32.mxu1 %vm78_vm0, %v7042_v29  ;;  %v7105_v53 = vld [vmem:[%s13403_s1 + $0x278] sm:$0xff]  ;;  %v7144_v29 = vld [vmem:[%s13403_s1 + $0x2b0] sm:$0xff]  ;;  %v7187_v15 = vld [vmem:[%s13403_s1 + $0x308] sm:$0xff] }
  0xae   :  { %7921 = vmatmul.mubr.msk.f32.vlgmr.msra.gmra.mxu1 %vm78_vm0, %v7043_v62  ;;  %v7146_v62 = vld [vmem:[%s13403_s1 + $0x2c0] sm:$0xff]  ;;  %v7152_v13 = vld [vmem:[%s13403_s1 + $0x2f0] sm:$0xff] }
  0xaf   :  { %v218_v61 = vsel %vm78_vm0, %v174_v60, 0.0  ;;  %v221_v63 = vsel %vm78_vm0, %v175_v28, 0.0  ;;  %7971 = vmatpush3.msra.mxu1 %v8927_v32  ;;  %7923 = vmatprep.mubr.msk.f32.mxu1 %vm78_vm0, %v7044_v4  ;;  %v7142_v60 = vld [vmem:[%s13403_s1 + $0x2a0] sm:$0xff]  ;;  %v7143_v28 = vld [vmem:[%s13403_s1 + $0x2a8] sm:$0xff]  ;;  %v7149_v4 = vld [vmem:[%s13403_s1 + $0x2d8] sm:$0xff] }
  0xb0   :  { %216 = vadd.xlane.f32.xlu1 %v215_v8  ;;  %219 = vadd.xlane.f32.xlu0 %v218_v61  ;;  %v7141_v8 = vld [vmem:[%s13403_s1 + $0x298] sm:$0xff] }
  0xb1   :  { %7972 = vmatprep.subr.mxu1 %v8932_v33  ;;  %v7145_v61 = vld [vmem:[%s13403_s1 + $0x2b8] sm:$0xff] }
  0xb2   :  { %7924 = vmatmul.mubr.msk.f32.gmra.mxu1 %vm78_vm0, %v7045_v6  ;;  %v7150_v6 = vld [vmem:[%s13403_s1 + $0x2e0] sm:$0xff] }
  0xb3   :  { %7926 = vmatprep.mubr.msk.f32.mxu1 %vm78_vm0, %v7046_v7  ;;  %7973 = vmatpush3.msra.mxu1 %v8932_v33  ;;  %v7153_v7 = vld [vmem:[%s13403_s1 + $0x2f8] sm:$0xff] }
  0xb4   :  { %222 = vadd.xlane.f32.xlu1 %v221_v63  ;;  %7974 = vmatprep.subr.mxu1 %v8942_v35  ;;  %v7147_v63 = vld [vmem:[%s13403_s1 + $0x2c8] sm:$0xff] }
  0xb5   :  { %7975 = vmatpush3.msra.mxu1 %v8942_v35 }
  0xb6   :  { %7927 = vmatmul.mubr.msk.f32.gmra.mxu1 %vm78_vm0, %v7047_v14  ;;  %7976 = vmatprep.subr.mxu1 %v8950_v36  ;;  %v7186_v14 = vld [vmem:[%s13403_s1 + $0x300] sm:$0xff] }
  0xb7   :  { %7929 = vmatprep.mubr.msk.f32.mxu1 %vm78_vm0, %v7048_v18  ;;  %7977 = vmatpush3.msra.mxu1 %v8950_v36  ;;  %v7188_v18 = vld [vmem:[%s13403_s1 + $0x310] sm:$0xff] }
  0xb8   :  { %8028 = vmatprep.subr.mxu1 %v8927_v32 }
  0xba   :  { %7930 = vmatmul.mubr.msk.f32.gmra.mxu1 %vm78_vm0, %v7049_v19 }
  0xbb   :  { %7932 = vmatprep.mubr.msk.f32.mxu1 %vm78_vm0, %v7050_v22  ;;  %v7189_v22 = vld [vmem:[%s13403_s1 + $0x318] sm:$0xff] }
  0xbe   :  { %7933 = vmatmul.mubr.msk.f32.gmra.mxu1 %vm78_vm0, %v7051_v23  ;;  %v7190_v23 = vld [vmem:[%s13403_s1 + $0x320] sm:$0xff] }
  0xbf   :  { %7935 = vmatprep.mubr.msk.f32.mxu1 %vm78_vm0, %v7052_v26 }
  0xc2   :  { %7936 = vmatmul.mubr.msk.f32.gmra.mxu1 %vm78_vm0, %v7053_v16  ;;  %v7192_v16 = vld [vmem:[%s13403_s1 + $0x330] sm:$0xff] }
  0xc3   :  { %7938 = vmatprep.mubr.msk.f32.mxu1 %vm78_vm0, %v7054_v17 }
  0xc6   :  { %7939 = vmatmul.mubr.msk.f32.gmra.mxu1 %vm78_vm0, %v7055_v31 }
  0xc7   :  { %7941 = vmatprep.mubr.msk.f32.mxu1 %vm78_vm0, %v7056_v38 }
  0xca   :  { %7942 = vmatmul.mubr.msk.f32.gmra.mxu1 %vm78_vm0, %v7057_v39 }
  0xcb   :  { %7978 = vmatprep.mubr.msk.f32.mxu1 %vm78_vm0, %v7090_v40  ;;  %v7196_v40 = vld [vmem:[%s13403_s1 + $0x350] sm:$0xff] }
  0xce   :  { %7979 = vmatmul.mubr.msk.f32.vlgmr.msra.gmra.mxu1 %vm78_vm0, %v7091_v41 }
  0xcf   :  { %8029 = vmatpush3.msra.mxu1 %v8927_v32  ;;  %7981 = vmatprep.mubr.msk.f32.mxu1 %vm78_vm0, %v7092_v42 }
  0xd0   :  { %8030 = vmatprep.subr.mxu1 %v8932_v33 }
  0xd1   :  { %8031 = vmatpush3.msra.mxu1 %v8932_v33 }
  0xd2   :  { %7982 = vmatmul.mubr.msk.f32.gmra.mxu1 %vm78_vm0, %v7093_v20  ;;  %8032 = vmatprep.subr.mxu1 %v8942_v35  ;;  %v9503_v19 = vpop.f32.mrf.mxu1 }
  0xd3   :  { %8033 = vmatpush3.msra.mxu1 %v8942_v35  ;;  %7984 = vmatprep.mubr.msk.f32.mxu1 %vm78_vm0, %v7094_v21  ;;  %13669 = vst [vmem:[#allocation2_spill] sm:$0xff] %v9503_v19 }
  0xd4   :  { %8034 = vmatprep.subr.mxu1 %v8950_v36  ;;  %v9515_v26 = vpop.f32.mrf.mxu1 }
  0xd5   :  { %8035 = vmatpush3.msra.mxu1 %v8950_v36  ;;  %13670 = vst [vmem:[#allocation3_spill] sm:$0xff] %v9515_v26 }
  0xd6   :  { %7985 = vmatmul.mubr.msk.f32.gmra.mxu1 %vm78_vm0, %v7095_v43  ;;  %8086 = vmatprep.subr.mxu1 %v8927_v32 }
  0xd7   :  { %7987 = vmatprep.mubr.msk.f32.mxu1 %vm78_vm0, %v7096_v0 }
  0xd8   :  { %v9529_v17 = vpop.f32.mrf.mxu1 }
  0xd9   :  { %13671 = vst [vmem:[#allocation4_spill] sm:$0xff] %v9529_v17 }
  0xda   :  { %7988 = vmatmul.mubr.msk.f32.gmra.mxu1 %vm78_vm0, %v7097_v47  ;;  %v9540_v31 = vpop.f32.mrf.mxu1  ;;  %v288_v47 = vlaneseq }
  0xdb   :  { %7990 = vmatprep.mubr.msk.f32.mxu1 %vm78_vm0, %v7098_v48  ;;  %13672 = vst [vmem:[#allocation5_spill] sm:$0xff] %v9540_v31  ;;  %v7197_v48 = vld [vmem:[%s13403_s1 + $0x358] sm:$0xff] }
  0xdd   :  { %v9550_v42 = vpop.f32.mrf.mxu1 }
  0xde   :  { %7991 = vmatmul.mubr.msk.f32.gmra.mxu1 %vm78_vm0, %v7099_v49  ;;  %13673 = vst [vmem:[#allocation6_spill] sm:$0xff] %v9550_v42  ;;  %v7198_v49 = vld [vmem:[%s13403_s1 + $0x360] sm:$0xff] }
  0xdf   :  { %7993 = vmatprep.mubr.msk.f32.mxu1 %vm78_vm0, %v7100_v50 }
  0xe2   :  { %7994 = vmatmul.mubr.msk.f32.gmra.mxu1 %vm78_vm0, %v7101_v51 }
  0xe3   :  { %7996 = vmatprep.mubr.msk.f32.mxu1 %vm78_vm0, %v7102_v52  ;;  %v9560_v52 = vpop.f32.mrf.mxu1 }
  0xe4   :  { %13674 = vst [vmem:[#allocation7_spill] sm:$0xff] %v9560_v52 }
  0xe6   :  { %7997 = vmatmul.mubr.msk.f32.gmra.mxu1 %vm78_vm0, %v7103_v24 }
  0xe7   :  { %7999 = vmatprep.mubr.msk.f32.mxu1 %vm78_vm0, %v7104_v25 }
  0xea   :  { %8000 = vmatmul.mubr.msk.f32.gmra.mxu1 %vm78_vm0, %v7105_v53 }
  0xeb   :  { %8036 = vmatprep.mubr.msk.f32.mxu1 %vm78_vm0, %v7138_v54 }
  0xee   :  { %8037 = vmatmul.mubr.msk.f32.vlgmr.msra.gmra.mxu1 %vm78_vm0, %v7139_v57  ;;  %v9563_v57 = vshrl.u32 %v288_v47, 7 }
  0xef   :  { %8039 = vmatprep.mubr.msk.f32.mxu1 %vm78_vm0, %v7140_v58  ;;  %8087 = vmatpush3.msra.mxu1 %v8927_v32  ;;  %v7199_v58 = vld [vmem:[%s13403_s1 + $0x368] sm:$0xff] }
  0xf0   :  { %8088 = vmatprep.subr.mxu1 %v8932_v33  ;;  %13675 = vst [vmem:[#allocation8_spill] sm:$0xff] %v9563_v57 }
  0xf1   :  { %8089 = vmatpush3.msra.mxu1 %v8932_v33 }
  0xf2   :  { %8040 = vmatmul.mubr.msk.f32.gmra.mxu1 %vm78_vm0, %v7141_v8  ;;  %8090 = vmatprep.subr.mxu1 %v8942_v35  ;;  %v7200_v8 = vld [vmem:[%s13403_s1 + $0x370] sm:$0xff] }
  0xf3   :  { %8042 = vmatprep.mubr.msk.f32.mxu1 %vm78_vm0, %v7142_v60  ;;  %8091 = vmatpush3.msra.mxu1 %v8942_v35 }
  0xf4   :  { %8092 = vmatprep.subr.mxu1 %v8950_v36 }
  0xf5   :  { %8093 = vmatpush3.msra.mxu1 %v8950_v36 }
  0xf6   :  { %8043 = vmatmul.mubr.msk.f32.gmra.mxu1 %vm78_vm0, %v7143_v28  ;;  %8144 = vmatprep.subr.mxu1 %v8927_v32 }
  0xf7   :  { %8045 = vmatprep.mubr.msk.f32.mxu1 %vm78_vm0, %v7144_v29  ;;  %v9572_v29 = vpop.f32.mrf.mxu1 }
  0xf8   :  { %13676 = vst [vmem:[#allocation9_spill] sm:$0xff] %v9572_v29 }
  0xfa   :  { %8046 = vmatmul.mubr.msk.f32.gmra.mxu1 %vm78_vm0, %v7145_v61 }
  0xfb   :  { %8048 = vmatprep.mubr.msk.f32.mxu1 %vm78_vm0, %v7146_v62 }
  0xfe   :  { %8049 = vmatmul.mubr.msk.f32.gmra.mxu1 %vm78_vm0, %v7147_v63 }
  0xff   :  { %8051 = vmatprep.mubr.msk.f32.mxu1 %vm78_vm0, %v7148_v3 }
 0x102   :  { %8052 = vmatmul.mubr.msk.f32.gmra.mxu1 %vm78_vm0, %v7149_v4  ;;  %v290_v4 = vsub.s32 0, %v9563_v57 }
 0x103   :  { %8054 = vmatprep.mubr.msk.f32.mxu1 %vm78_vm0, %v7150_v6  ;;  %v7201_v6 = vld [vmem:[%s13403_s1 + $0x378] sm:$0xff] }
 0x106   :  { %8055 = vmatmul.mubr.msk.f32.gmra.mxu1 %vm78_vm0, %v7151_v12  ;;  %v23_v12 = vld [vmem:[%s13405_s5] sm:$0xff] }
 0x107   :  { %8057 = vmatprep.mubr.msk.f32.mxu1 %vm78_vm0, %v7152_v13  ;;  %v7234_v13 = vld [vmem:[%s13403_s1 + $0x380] sm:$0xff] }
 0x10a   :  { %8058 = vmatmul.mubr.msk.f32.gmra.mxu1 %vm78_vm0, %v7153_v7 }
 0x10b   :  { %8094 = vmatprep.mubr.msk.f32.mxu1 %vm78_vm0, %v7186_v14 }
 0x10e   :  { %8095 = vmatmul.mubr.msk.f32.vlgmr.msra.gmra.mxu1 %vm78_vm0, %v7187_v15  ;;  %v310_v15 = vsub.s32 1, %v9563_v57 }
 0x10f   :  { %8097 = vmatprep.mubr.msk.f32.mxu1 %vm78_vm0, %v7188_v18  ;;  %8145 = vmatpush3.msra.mxu1 %v8927_v32  ;;  %v7191_v32 = vld [vmem:[%s13403_s1 + $0x328] sm:$0xff]  ;;  %v9587_v18 = vpop.f32.mrf.mxu1 }
 0x110   :  { %8146 = vmatprep.subr.mxu1 %v8932_v33  ;;  %13677 = vst [vmem:[#allocation10_spill] sm:$0xff] %v9587_v18 }
 0x111   :  { %8147 = vmatpush3.msra.mxu1 %v8932_v33  ;;  %v7193_v33 = vld [vmem:[%s13403_s1 + $0x338] sm:$0xff] }
 0x112   :  { %8098 = vmatmul.mubr.msk.f32.gmra.mxu1 %vm78_vm0, %v7189_v22  ;;  %8148 = vmatprep.subr.mxu1 %v8942_v35 }
 0x113   :  { %8100 = vmatprep.mubr.msk.f32.mxu1 %vm78_vm0, %v7190_v23  ;;  %8149 = vmatpush3.msra.mxu1 %v8942_v35  ;;  %v7194_v35 = vld [vmem:[%s13403_s1 + $0x340] sm:$0xff] }
 0x114   :  { %8150 = vmatprep.subr.mxu1 %v8950_v36 }
 0x115   :  { %8151 = vmatpush3.msra.mxu1 %v8950_v36  ;;  %v7195_v36 = vld [vmem:[%s13403_s1 + $0x348] sm:$0xff] }
 0x116   :  { %8101 = vmatmul.mubr.msk.f32.gmra.mxu1 %vm78_vm0, %v7191_v32 }
 0x117   :  { %8103 = vmatprep.mubr.msk.f32.mxu1 %vm78_vm0, %v7192_v16 }
 0x11a   :  { %8104 = vmatmul.mubr.msk.f32.gmra.mxu1 %vm78_vm0, %v7193_v33  ;;  %v9592_v33 = vrot.slane %v23_v12, %v290_v4 }
 0x11b   :  { %8106 = vmatprep.mubr.msk.f32.mxu1 %vm78_vm0, %v7194_v35  ;;  %v7235_v35 = vld [vmem:[%s13403_s1 + $0x388] sm:$0xff] }
 0x11d   :  { %v178_v38 = vpop.xlane.xlu0 %177 }
 0x11e   :  { %v224_v39 = vmul.f32 0.03125, %v178_v38  ;;  %8107 = vmatmul.mubr.msk.f32.gmra.mxu1 %vm78_vm0, %v7195_v36 }
 0x11f   :  { %8109 = vmatprep.mubr.msk.f32.mxu1 %vm78_vm0, %v7196_v40 }
 0x120   :  { %v240_v41 = vadd.f32 1e-06, %v224_v39  ;;  %v7236_v39 = vld [vmem:[%s13403_s1 + $0x390] sm:$0xff] }
 0x121   :  { %v181_v20 = vpop.xlane.xlu1 %180  ;;  %v184_v21 = vpop.xlane.xlu0 %183 }
 0x122   :  { %8396 = vrsqrt.f32 %v240_v41  ;;  %v225_v43 = vmul.f32 0.03125, %v181_v20  ;;  %v226_v0 = vmul.f32 0.03125, %v184_v21  ;;  %8110 = vmatmul.mubr.msk.f32.gmra.mxu1 %vm78_vm0, %v7197_v48  ;;  %v9602_v20 = vrot.slane %v23_v12, %v310_v15  ;;  %v9604_v21 = vpop.f32.mrf.mxu1 }
 0x123   :  { %8112 = vmatprep.mubr.msk.f32.mxu1 %vm78_vm0, %v7198_v49  ;;  %13678 = vst [vmem:[#allocation11_spill] sm:$0xff] %v9604_v21 }
 0x124   :  { %v241_v50 = vadd.f32 1e-06, %v225_v43  ;;  %v242_v51 = vadd.f32 1e-06, %v226_v0 }
 0x125   :  { %v187_v24 = vpop.xlane.xlu1 %186  ;;  %v190_v25 = vpop.xlane.xlu0 %189 }
 0x126   :  { %8398 = vrsqrt.f32 %v241_v50  ;;  %v227_v53 = vmul.f32 0.03125, %v187_v24  ;;  %v228_v54 = vmul.f32 0.03125, %v190_v25  ;;  %8113 = vmatmul.mubr.msk.f32.gmra.mxu1 %vm78_vm0, %v7199_v58  ;;  %v7237_v50 = vld [vmem:[%s13403_s1 + $0x398] sm:$0xff] }
 0x127   :  { %8400 = vrsqrt.f32 %v242_v51  ;;  %8115 = vmatprep.mubr.msk.f32.mxu1 %vm78_vm0, %v7200_v8  ;;  %v7238_v51 = vld [vmem:[%s13403_s1 + $0x3a0] sm:$0xff]  ;;  %v9617_v8 = vpop.f32.mrf.mxu1 }
 0x128   :  { %v243_v60 = vadd.f32 1e-06, %v227_v53  ;;  %v244_v28 = vadd.f32 1e-06, %v228_v54  ;;  %13679 = vst [vmem:[#allocation12_spill] sm:$0xff] %v9617_v8 }
 0x129   :  { %v193_v61 = vpop.xlane.xlu1 %192  ;;  %v196_v62 = vpop.xlane.xlu0 %195 }
 0x12a   :  { %8402 = vrsqrt.f32 %v243_v60  ;;  %v229_v63 = vmul.f32 0.03125, %v193_v61  ;;  %v230_v3 = vmul.f32 0.03125, %v196_v62  ;;  %8116 = vmatmul.mubr.msk.f32.gmra.mxu1 %vm78_vm0, %v7201_v6 }
 0x12b   :  { %8404 = vrsqrt.f32 %v244_v28  ;;  %8152 = vmatprep.mubr.msk.f32.mxu1 %vm78_vm0, %v7234_v13 }
 0x12c   :  { %v245_v7 = vadd.f32 1e-06, %v229_v63  ;;  %v246_v14 = vadd.f32 1e-06, %v230_v3 }
 0x12d   :  { %v199_v22 = vpop.xlane.xlu1 %198  ;;  %v202_v23 = vpop.xlane.xlu0 %201 }
 0x12e   :  { %8406 = vrsqrt.f32 %v245_v7  ;;  %v231_v32 = vmul.f32 0.03125, %v199_v22  ;;  %v232_v16 = vmul.f32 0.03125, %v202_v23  ;;  %8153 = vmatmul.mubr.msk.f32.vlgmr.msra.gmra.mxu1 %vm78_vm0, %v7235_v35  ;;  %v9633_v23 = vpop.f32.mrf.mxu1 }
 0x12f   :  { %v8397_v38 = vpop.eup %8396  ;;  %8408 = vrsqrt.f32 %v246_v14  ;;  %8155 = vmatprep.mubr.msk.f32.mxu1 %vm78_vm0, %v7236_v39  ;;  %13680 = vst [vmem:[#allocation13_spill] sm:$0xff] %v9633_v23 }
 0x130   :  { %v247_v36 = vadd.f32 1e-06, %v231_v32  ;;  %v248_v40 = vadd.f32 1e-06, %v232_v16  ;;  %v272_v41 = vmul.f32 %v8397_v38, %v9138_v34 }
 0x131   :  { %v205_v43 = vpop.xlane.xlu1 %204  ;;  %v208_v0 = vpop.xlane.xlu0 %207 }
 0x132   :  { %8410 = vrsqrt.f32 %v247_v36  ;;  %v233_v47 = vmul.f32 0.03125, %v205_v43  ;;  %v234_v48 = vmul.f32 0.03125, %v208_v0  ;;  %v292_v49 = vmul.f32 %v9592_v33, %v272_v41  ;;  %8156 = vmatmul.mubr.msk.f32.gmra.mxu1 %vm78_vm0, %v7237_v50  ;;  %v7242_v43 = vld [vmem:[%s13403_s1 + $0x3c0] sm:$0xff] }
 0x133   :  { %v8399_v34 = vpop.eup %8398  ;;  %8412 = vrsqrt.f32 %v248_v40  ;;  %8158 = vmatprep.mubr.msk.f32.mxu1 %vm78_vm0, %v7238_v51 }
 0x134   :  { %v8401_v24 = vpop.eup %8400  ;;  %v249_v25 = vadd.f32 1e-06, %v233_v47  ;;  %v250_v53 = vadd.f32 1e-06, %v234_v48  ;;  %v312_v54 = vadd.f32 %v9602_v20, %v292_v49  ;;  %v273_v58 = vmul.f32 %v8399_v34, %v9148_v44  ;;  %v7239_v44 = vld [vmem:[%s13403_s1 + $0x3a8] sm:$0xff] }
 0x135   :  { %v211_v60 = vpop.xlane.xlu1 %210  ;;  %v214_v28 = vpop.xlane.xlu0 %213  ;;  %v274_v61 = vmul.f32 %v8401_v24, %v9141_v37  ;;  %v7240_v37 = vld [vmem:[%s13403_s1 + $0x3b0] sm:$0xff] }
 0x136   :  { %8414 = vrsqrt.f32 %v249_v25  ;;  %v235_v62 = vmul.f32 0.03125, %v211_v60  ;;  %v236_v63 = vmul.f32 0.03125, %v214_v28  ;;  %7714 = vmatprep.mubr.msk.f32.mxu0 %vm78_vm0, %v312_v54  ;;  %v293_v3 = vmul.f32 %v9592_v33, %v273_v58  ;;  %8159 = vmatmul.mubr.msk.f32.gmra.mxu1 %vm78_vm0, %v7239_v44  ;;  %v9653_v25 = vpop.f32.mrf.mxu1  ;;  %v7244_v60 = vld [vmem:[%s13403_s1 + $0x3d0] sm:$0xff] }
 0x137   :  { %v8403_v6 = vpop.eup %8402  ;;  %8416 = vrsqrt.f32 %v250_v53  ;;  %v294_v12 = vmul.f32 %v9592_v33, %v274_v61  ;;  %8161 = vmatprep.mubr.msk.f32.mxu1 %vm78_vm0, %v7240_v37  ;;  %13681 = vst [vmem:[#allocation14_spill] sm:$0xff] %v9653_v25  ;;  %v7245_v37 = vld [vmem:[%s13403_s1 + $0x3d8] sm:$0xff] }
 0x138   :  { %v8405_v13 = vpop.eup %8404  ;;  %v251_v7 = vadd.f32 1e-06, %v235_v62  ;;  %v252_v14 = vadd.f32 1e-06, %v236_v63  ;;  %v313_v15 = vadd.f32 %v9602_v20, %v293_v3  ;;  %v275_v22 = vmul.f32 %v8403_v6, %v9151_v45  ;;  %v7241_v45 = vld [vmem:[%s13403_s1 + $0x3b8] sm:$0xff]  ;;  %v9671_v6 = vpop.f32.mrf.mxu1 }
 0x139   :  { %v217_v32 = vpop.xlane.xlu1 %216  ;;  %v220_v16 = vpop.xlane.xlu0 %219  ;;  %v314_v35 = vadd.f32 %v9602_v20, %v294_v12  ;;  %v276_v38 = vmul.f32 %v8405_v13, %v9160_v2  ;;  %13682 = vst [vmem:[#allocation15_spill] sm:$0xff] %v9671_v6  ;;  %v7246_v13 = vld [vmem:[%s13403_s1 + $0x3e0] sm:$0xff] }
 0x13a   :  { %8418 = vrsqrt.f32 %v251_v7  ;;  %v237_v39 = vmul.f32 0.03125, %v217_v32  ;;  %v238_v36 = vmul.f32 0.03125, %v220_v16  ;;  %7715 = vmatmul.mubr.msk.f32.vlgmr.msra.gmra.mxu0 %vm78_vm0, %v313_v15  ;;  %v295_v40 = vmul.f32 %v9592_v33, %v275_v22  ;;  %8162 = vmatmul.mubr.msk.f32.gmra.mxu1 %vm78_vm0, %v7241_v45  ;;  %v9689_v16 = vpop.f32.mrf.mxu1 }
 0x13b   :  { %v8407_v41 = vpop.eup %8406  ;;  %8420 = vrsqrt.f32 %v252_v14  ;;  %7717 = vmatprep.mubr.msk.f32.mxu0 %vm78_vm0, %v314_v35  ;;  %v296_v2 = vmul.f32 %v9592_v33, %v276_v38  ;;  %8164 = vmatprep.mubr.msk.f32.mxu1 %vm78_vm0, %v7242_v43  ;;  %13683 = vst [vmem:[#allocation16_spill] sm:$0xff] %v9689_v16  ;;  %v7247_v38 = vld [vmem:[%s13403_s1 + $0x3e8] sm:$0xff] }
 0x13c   :  { %v8409_v0 = vpop.eup %8408  ;;  %v253_v47 = vadd.f32 1e-06, %v237_v39  ;;  %v254_v48 = vadd.f32 1e-06, %v238_v36  ;;  %v315_v49 = vadd.f32 %v9602_v20, %v295_v40  ;;  %v277_v50 = vmul.f32 %v8407_v41, %v9163_v5  ;;  %v7243_v5 = vld [vmem:[%s13403_s1 + $0x3c8] sm:$0xff]  ;;  %v9707_v43 = vpop.f32.mrf.mxu1 }
 0x13d   :  { %v223_v34 = vpop.xlane.xlu1 %222  ;;  %v316_v51 = vadd.f32 %v9602_v20, %v296_v2  ;;  %v278_v24 = vmul.f32 %v8409_v0, %v9172_v59  ;;  %13684 = vst [vmem:[#allocation17_spill] sm:$0xff] %v9707_v43 }
 0x13e   :  { %8422 = vrsqrt.f32 %v253_v47  ;;  %v239_v53 = vmul.f32 0.03125, %v223_v34  ;;  %7718 = vmatmul.mubr.msk.f32.gmra.mxu0 %vm78_vm0, %v315_v49  ;;  %v297_v54 = vmul.f32 %v9592_v33, %v277_v50  ;;  %8165 = vmatmul.mubr.msk.f32.gmra.mxu1 %vm78_vm0, %v7243_v5  ;;  %v7249_v47 = vld [vmem:[%s13403_s1 + $0x3f8] sm:$0xff] }
 0x13f   :  { %v8411_v58 = vpop.eup %8410  ;;  %8424 = vrsqrt.f32 %v254_v48  ;;  %7720 = vmatprep.mubr.msk.f32.mxu0 %vm78_vm0, %v316_v51  ;;  %v298_v59 = vmul.f32 %v9592_v33, %v278_v24  ;;  %8167 = vmatprep.mubr.msk.f32.mxu1 %vm78_vm0, %v7244_v60  ;;  %v9722_v24 = vpop.f32.mrf.mxu1 }
 0x140   :  { %v8413_v28 = vpop.eup %8412  ;;  %v255_v61 = vadd.f32 1e-06, %v239_v53  ;;  %v317_v62 = vadd.f32 %v9602_v20, %v297_v54  ;;  %v279_v63 = vmul.f32 %v8411_v58, %v9175_v9  ;;  %13685 = vst [vmem:[#allocation18_spill] sm:$0xff] %v9722_v24 }
 0x141   :  { %v318_v3 = vadd.f32 %v9602_v20, %v298_v59  ;;  %v280_v44 = vmul.f32 %v8413_v28, %v9191_v10  ;;  %v9737_v28 = vpop.f32.mrf.mxu1 }
 0x142   :  { %8426 = vrsqrt.f32 %v255_v61  ;;  %7721 = vmatmul.mubr.msk.f32.gmra.mxu0 %vm78_vm0, %v317_v62  ;;  %v299_v12 = vmul.f32 %v9592_v33, %v279_v63  ;;  %8168 = vmatmul.mubr.msk.f32.gmra.mxu1 %vm78_vm0, %v7245_v37  ;;  %13686 = vst [vmem:[#allocation19_spill] sm:$0xff] %v9737_v28 }
 0x143   :  { %v8415_v9 = vpop.eup %8414  ;;  %7723 = vmatprep.mubr.msk.f32.mxu0 %vm78_vm0, %v318_v3  ;;  %v300_v10 = vmul.f32 %v9592_v33, %v280_v44  ;;  %8170 = vmatprep.mubr.msk.f32.mxu1 %vm78_vm0, %v7246_v13  ;;  %v9739_v61 = vpop.f32.mrf.mxu1 }
 0x144   :  { %v8417_v7 = vpop.eup %8416  ;;  %v319_v14 = vadd.f32 %v9602_v20, %v299_v12  ;;  %v281_v15 = vmul.f32 %v8415_v9, %v9194_v11  ;;  %13687 = vst [vmem:[#allocation20_spill] sm:$0xff] %v9739_v61 }
 0x145   :  { %v320_v22 = vadd.f32 %v9602_v20, %v300_v10  ;;  %v282_v32 = vmul.f32 %v8417_v7, %v9207_v27  ;;  %v7248_v27 = vld [vmem:[%s13403_s1 + $0x3f0] sm:$0xff]  ;;  %v9741_v62 = vpop.f32.mrf.mxu1 }
 0x146   :  { %7724 = vmatmul.mubr.msk.f32.gmra.mxu0 %vm78_vm0, %v319_v14  ;;  %v301_v35 = vmul.f32 %v9592_v33, %v281_v15  ;;  %8171 = vmatmul.mubr.msk.f32.gmra.mxu1 %vm78_vm0, %v7247_v38  ;;  %13688 = vst [vmem:[#allocation21_spill] sm:$0xff] %v9741_v62 }
 0x147   :  { %v8419_v39 = vpop.eup %8418  ;;  %7726 = vmatprep.mubr.msk.f32.mxu0 %vm78_vm0, %v320_v22  ;;  %v302_v11 = vmul.f32 %v9592_v33, %v282_v32  ;;  %8173 = vmatprep.mubr.msk.f32.mxu1 %vm78_vm0, %v7248_v27  ;;  %v9743_v63 = vpop.f32.mrf.mxu1  ;;  %v24_v22 = vld [vmem:[%s13405_s5 + $0x8] sm:$0xff] }
 0x148   :  { %v8421_v36 = vpop.eup %8420  ;;  %v321_v40 = vadd.f32 %v9602_v20, %v301_v35  ;;  %v283_v45 = vmul.f32 %v8419_v39, %v9210_v30  ;;  %13689 = vst [vmem:[#allocation22_spill] sm:$0xff] %v9743_v63  ;;  %v524_v35 = vrot.slane %v24_v22, %v290_v4 }
 0x149   :  { %v322_v41 = vadd.f32 %v9602_v20, %v302_v11  ;;  %v284_v2 = vmul.f32 %v8421_v36, %v9227_v1 }
 0x14a   :  { %7727 = vmatmul.mubr.msk.f32.gmra.mxu0 %vm78_vm0, %v321_v40  ;;  %v303_v0 = vmul.f32 %v9592_v33, %v283_v45  ;;  %8174 = vmatmul.mubr.msk.f32.gmra.mxu1 %vm78_vm0, %v7249_v47 }
 0x14b   :  { %v8423_v48 = vpop.eup %8422  ;;  %7729 = vmatprep.mubr.msk.f32.mxu0 %vm78_vm0, %v322_v41  ;;  %v304_v30 = vmul.f32 %v9592_v33, %v284_v2 }
 0x14c   :  { %v8425_v1 = vpop.eup %8424  ;;  %v323_v49 = vadd.f32 %v9602_v20, %v303_v0  ;;  %v285_v50 = vmul.f32 %v8423_v48, %v9230_v46 }
 0x14d   :  { %v324_v34 = vadd.f32 %v9602_v20, %v304_v30  ;;  %v286_v51 = vmul.f32 %v8425_v1, %v9247_v55 }
 0x14e   :  { %7730 = vmatmul.mubr.msk.f32.gmra.mxu0 %vm78_vm0, %v323_v49  ;;  %v305_v53 = vmul.f32 %v9592_v33, %v285_v50 }
 0x14f   :  { %v8427_v54 = vpop.eup %8426  ;;  %7732 = vmatprep.mubr.msk.f32.mxu0 %vm78_vm0, %v324_v34  ;;  %v306_v5 = vmul.f32 %v9592_v33, %v286_v51 }
 0x150   :  { %v325_v58 = vadd.f32 %v9602_v20, %v305_v53  ;;  %v287_v46 = vmul.f32 %v8427_v54, %v9250_v56  ;;  %v9745_v56 = vpop.f32.mrf.mxu1 }
 0x151   :  { %v326_v59 = vadd.f32 %v9602_v20, %v306_v5  ;;  %13690 = vst [vmem:[#allocation23_spill] sm:$0xff] %v9745_v56 }
 0x152   :  { %7733 = vmatmul.mubr.msk.f32.gmra.mxu0 %vm78_vm0, %v325_v58  ;;  %v307_v55 = vmul.f32 %v9592_v33, %v287_v46  ;;  %v9747_v3 = vpop.f32.mrf.mxu1 }
 0x153   :  { %7735 = vmatprep.mubr.msk.f32.mxu0 %vm78_vm0, %v326_v59  ;;  %13691 = vst [vmem:[#allocation24_spill] sm:$0xff] %v9747_v3 }
 0x154   :  { %v327_v60 = vadd.f32 %v9602_v20, %v307_v55  ;;  %v9749_v44 = vpop.f32.mrf.mxu1 }
 0x155   :  { %13692 = vst [vmem:[#allocation25_spill] sm:$0xff] %v9749_v44 }
 0x156   :  { %7736 = vmatmul.mubr.msk.f32.gmra.mxu0 %vm78_vm0, %v327_v60  ;;  %v9751_v33 = vpop.f32.mrf.mxu1 }
 0x157   :  { %13693 = vst [vmem:[#allocation26_spill] sm:$0xff] %v9751_v33 }
 0x158   :  { %v9753_v12 = vpop.f32.mrf.mxu1 }
 0x159   :  { %13694 = vst [vmem:[#allocation27_spill] sm:$0xff] %v9753_v12 }
 0x15a   :  { %v9755_v20 = vpop.f32.mrf.mxu1 }
 0x15b   :  { %13695 = vst [vmem:[#allocation28_spill] sm:$0xff] %v9755_v20 }
 0x15c   :  { %v9757_v37 = vpop.f32.mrf.mxu1 }
 0x15d   :  { %13696 = vst [vmem:[#allocation29_spill] sm:$0xff] %v9757_v37 }
 0x15e   :  { %v9759_v9 = vpop.f32.mrf.mxu1 }
 0x15f   :  { %13697 = vst [vmem:[#allocation30_spill] sm:$0xff] %v9759_v9 }
 0x160   :  { %v9761_v10 = vpop.f32.mrf.mxu1 }
 0x161   :  { %13698 = vst [vmem:[#allocation31_spill] sm:$0xff] %v9761_v10 }
 0x162   :  { %v9763_v13 = vpop.f32.mrf.mxu1 }
 0x163   :  { %13699 = vst [vmem:[#allocation32_spill] sm:$0xff] %v9763_v13 }
 0x164   :  { %v9765_v7 = vpop.f32.mrf.mxu1 }
 0x165   :  { %13700 = vst [vmem:[#allocation33_spill] sm:$0xff] %v9765_v7 }
 0x166   :  { %v9767_v14 = vpop.f32.mrf.mxu1 }
 0x167   :  { %13701 = vst [vmem:[#allocation34_spill] sm:$0xff] %v9767_v14 }
 0x168   :  { %v9769_v15 = vpop.f32.mrf.mxu1 }
 0x169   :  { %13702 = vst [vmem:[#allocation35_spill] sm:$0xff] %v9769_v15 }
 0x16a   :  { %v9774_v32 = vpop.f32.mrf.mxu1 }
 0x16b   :  { %13703 = vst [vmem:[#allocation36_spill] sm:$0xff] %v9774_v32 }
 0x16c   :  { %v9778_v38 = vpop.f32.mrf.mxu1 }
 0x16d   :  { %13704 = vst [vmem:[#allocation37_spill] sm:$0xff] %v9778_v38 }
 0x16e   :  { %v9780_v36 = vpop.f32.mrf.mxu1 }
 0x16f   :  { %13705 = vst [vmem:[#allocation38_spill] sm:$0xff] %v9780_v36 }
 0x170   :  { %v9784_v0 = vpop.f32.mrf.mxu1 }
 0x171   :  { %13706 = vst [vmem:[#allocation39_spill] sm:$0xff] %v9784_v0 }
 0x172   :  { %v9787_v30 = vpop.f32.mrf.mxu1 }
 0x173   :  { %13707 = vst [vmem:[#allocation40_spill] sm:$0xff] %v9787_v30 }
 0x174   :  { %v9791_v51 = vpop.f32.mrf.mxu1 }
 0x175   :  { %13708 = vst [vmem:[#allocation41_spill] sm:$0xff] %v9791_v51 }
 0x176   :  { %v9795_v46 = vpop.f32.mrf.mxu1 }
 0x177   :  { %13709 = vst [vmem:[#allocation42_spill] sm:$0xff] %v9795_v46 }
 0x1fa   :  { %v7716_v39 = vpop.f32.mrf.mxu0 }
 0x1fb   :  { %v526_v11 = vsub.f32 %v7716_v39, %v524_v35  ;;  %v9799_v39 = vpop.f32.mrf.mxu1 }
 0x1fc   :  { %v442_v27 = vpop.f32.mrf.mxu0  ;;  %13710 = vst [vmem:[#allocation43_spill] sm:$0xff] %v9799_v39 }
 0x1fd   :  { %v525_v40 = vsub.f32 %v442_v27, %v524_v35  ;;  %768 = vrot.lane.b32.xlu1 %v526_v11, %s8767_s29 }
 0x1fe   :  { %v7719_v45 = vpop.f32.mrf.mxu0 }
 0x1ff   :  { %v528_v41 = vsub.f32 %v7719_v45, %v524_v35  ;;  %766 = vrot.lane.b32.xlu0 %v525_v40, %s8767_s29 }
 0x200   :  { %v452_v2 = vpop.f32.mrf.mxu0 }
 0x201   :  { %772 = vrot.lane.b32.xlu1 %v528_v41, %s8767_s29  ;;  %v527_v47 = vsub.f32 %v452_v2, %v524_v35  ;;  %v9803_v41 = vpop.f32.mrf.mxu1 }
 0x202   :  { %v7722_v4 = vpop.f32.mrf.mxu0  ;;  %13711 = vst [vmem:[#allocation44_spill] sm:$0xff] %v9803_v41 }
 0x203   :  { %v530_v50 = vsub.f32 %v7722_v4, %v524_v35 }
 0x204   :  { %v462_v48 = vpop.f32.mrf.mxu0 }
 0x205   :  { %v529_v1 = vsub.f32 %v462_v48, %v524_v35  ;;  %770 = vrot.lane.b32.xlu1 %v527_v47, %s8767_s29 }
 0x206   :  { %v7725_v49 = vpop.f32.mrf.mxu0 }
 0x207   :  { %774 = vrot.lane.b32.xlu0 %v529_v1, %s8767_s29  ;;  %v532_v5 = vsub.f32 %v7725_v49, %v524_v35  ;;  %v9807_v1 = vpop.f32.mrf.mxu1 }
 0x208   :  { %v472_v34 = vpop.f32.mrf.mxu0  ;;  %13712 = vst [vmem:[#allocation45_spill] sm:$0xff] %v9807_v1 }
 0x209   :  { %v531_v53 = vsub.f32 %v472_v34, %v524_v35  ;;  %776 = vrot.lane.b32.xlu1 %v530_v50, %s8767_s29  ;;  %v9811_v34 = vpop.f32.mrf.mxu1 }
 0x20a   :  { %v7728_v54 = vpop.f32.mrf.mxu0  ;;  %13713 = vst [vmem:[#allocation46_spill] sm:$0xff] %v9811_v34 }
 0x20b   :  { %778 = vrot.lane.b32.xlu0 %v531_v53, %s8767_s29  ;;  %v534_v60 = vsub.f32 %v7728_v54, %v524_v35  ;;  %v9814_v53 = vpop.f32.mrf.mxu1 }
 0x20c   :  { %v482_v58 = vpop.f32.mrf.mxu0  ;;  %13714 = vst [vmem:[#allocation47_spill] sm:$0xff] %v9814_v53 }
 0x20d   :  { %v533_v59 = vsub.f32 %v482_v58, %v524_v35  ;;  %780 = vrot.lane.b32.xlu1 %v532_v5, %s8767_s29  ;;  %v9816_v54 = vpop.f32.mrf.mxu1 }
 0x20e   :  { %v7731_v55 = vpop.f32.mrf.mxu0  ;;  %13715 = vst [vmem:[#allocation48_spill] sm:$0xff] %v9816_v54 }
 0x20f   :  { %782 = vrot.lane.b32.xlu0 %v533_v59, %s8767_s29  ;;  %v536_v40 = vsub.f32 %v7731_v55, %v524_v35  ;;  %v9818_v5 = vpop.f32.mrf.mxu1 }
 0x210   :  { %v492_v22 = vpop.f32.mrf.mxu0  ;;  %13716 = vst [vmem:[#allocation49_spill] sm:$0xff] %v9818_v5 }
 0x211   :  { %v535_v11 = vsub.f32 %v492_v22, %v524_v35  ;;  %784 = vrot.lane.b32.xlu1 %v534_v60, %s8767_s29  ;;  %v9820_v58 = vpop.f32.mrf.mxu1 }
 0x212   :  { %v7734_v27 = vpop.f32.mrf.mxu0  ;;  %13717 = vst [vmem:[#allocation50_spill] sm:$0xff] %v9820_v58 }
 0x213   :  { %786 = vrot.lane.b32.xlu0 %v535_v11, %s8767_s29  ;;  %v538_v47 = vsub.f32 %v7734_v27, %v524_v35  ;;  %v9822_v59 = vpop.f32.mrf.mxu1 }
 0x214   :  { %v502_v45 = vpop.f32.mrf.mxu0  ;;  %13718 = vst [vmem:[#allocation51_spill] sm:$0xff] %v9822_v59 }
 0x215   :  { %v537_v2 = vsub.f32 %v502_v45, %v524_v35  ;;  %788 = vrot.lane.b32.xlu1 %v536_v40, %s8767_s29  ;;  %v9824_v55 = vpop.f32.mrf.mxu1 }
 0x216   :  { %v7737_v4 = vpop.f32.mrf.mxu0  ;;  %13719 = vst [vmem:[#allocation52_spill] sm:$0xff] %v9824_v55 }
 0x217   :  { %790 = vrot.lane.b32.xlu0 %v537_v2, %s8767_s29  ;;  %v540_v50 = vsub.f32 %v7737_v4, %v524_v35  ;;  %v9826_v60 = vpop.f32.mrf.mxu1 }
 0x218   :  { %v512_v48 = vpop.f32.mrf.mxu0  ;;  %13720 = vst [vmem:[#allocation53_spill] sm:$0xff] %v9826_v60 }
 0x219   :  { %v539_v49 = vsub.f32 %v512_v48, %v524_v35  ;;  %792 = vrot.lane.b32.xlu1 %v538_v47, %s8767_s29  ;;  %v9828_v35 = vpop.f32.mrf.mxu1 }
 0x21a   :  { %13721 = vst [vmem:[#allocation54_spill] sm:$0xff] %v9828_v35 }
 0x21b   :  { %794 = vrot.lane.b32.xlu0 %v539_v49, %s8767_s29  ;;  %v9830_v22 = vpop.f32.mrf.mxu1 }
 0x21c   :  { %13722 = vst [vmem:[#allocation55_spill] sm:$0xff] %v9830_v22 }
 0x21d   :  { %796 = vrot.lane.b32.xlu1 %v540_v50, %s8767_s29  ;;  %v9832_v11 = vpop.f32.mrf.mxu1  ;;  %v9853_v50 = vld [vmem:[%s13404_s4 + $0x60] sm:$0xff] }
 0x21e   :  { %13723 = vst [vmem:[#allocation56_spill] sm:$0xff] %v9832_v11  ;;  %13732 = vst [vmem:[#allocation65_spill] sm:$0xff] %v9853_v50  ;;  %7770 = vmatprep.subr.mxu0 %v9853_v50 }
 0x21f   :  { %v9834_v27 = vpop.f32.mrf.mxu1  ;;  %7771 = vmatpush3.msra.mxu0 %v9853_v50 }
 0x220   :  { %13724 = vst [vmem:[#allocation57_spill] sm:$0xff] %v9834_v27  ;;  %7828 = vmatprep.subr.mxu0 %v9853_v50 }
 0x221   :  { %v9836_v40 = vpop.f32.mrf.mxu1 }
 0x222   :  { %13725 = vst [vmem:[#allocation58_spill] sm:$0xff] %v9836_v40 }
 0x223   :  { %v9838_v45 = vpop.f32.mrf.mxu1 }
 0x224   :  { %13726 = vst [vmem:[#allocation59_spill] sm:$0xff] %v9838_v45 }
 0x225   :  { %v9840_v2 = vpop.f32.mrf.mxu1 }
 0x226   :  { %13727 = vst [vmem:[#allocation60_spill] sm:$0xff] %v9840_v2 }
 0x227   :  { %v9842_v4 = vpop.f32.mrf.mxu1 }
 0x228   :  { %13728 = vst [vmem:[#allocation61_spill] sm:$0xff] %v9842_v4 }
 0x229   :  { %v9844_v47 = vpop.f32.mrf.mxu1 }
 0x22a   :  { %13729 = vst [vmem:[#allocation62_spill] sm:$0xff] %v9844_v47 }
 0x22b   :  { %v9846_v48 = vpop.f32.mrf.mxu1 }
 0x22c   :  { %13730 = vst [vmem:[#allocation63_spill] sm:$0xff] %v9846_v48 }
 0x22d   :  { %v9848_v49 = vpop.f32.mrf.mxu1 }
 0x22e   :  { %13731 = vst [vmem:[#allocation64_spill] sm:$0xff] %v9848_v49 }
 0x22f   :  { %v9857_v57 = vpop.f32.mrf.mxu1 }
 0x230   :  { %13733 = vst [vmem:[#allocation66_spill] sm:$0xff] %v9857_v57 }
 0x231   :  { %v9860_v58 = vpop.f32.mrf.mxu1 }
 0x232   :  { %13734 = vst [vmem:[#allocation67_spill] sm:$0xff] %v9860_v58 }
 0x233   :  { %v9866_v48 = vpop.f32.mrf.mxu1 }
 0x234   :  { %13735 = vst [vmem:[#allocation68_spill] sm:$0xff] %v9866_v48 }
 0x235   :  { %v9879_v50 = vpop.f32.mrf.mxu1 }
 0x236   :  { %13736 = vst [vmem:[#allocation69_spill] sm:$0xff] %v9879_v50 }
 0x26f   :  { %v9862_v4 = vpop.permute.xlu1 %768 }
 0x270   :  { %v815_v49 = vsub.f32 %v9503_v19, %v9862_v4  ;;  %v1400_v57 = vsub.f32 %v9737_v28, %v9862_v4 }
 0x271   :  { %v9868_v47 = vpop.permute.xlu0 %766 }
 0x272   :  { %v831_v45 = vmax.f32 %v815_v49, 0.0  ;;  %v814_v2 = vsub.f32 %v9515_v26, %v9868_v47  ;;  %v1399_v19 = vsub.f32 %v9739_v61, %v9868_v47  ;;  %v1416_v49 = vmax.f32 %v1400_v57, 0.0 }
 0x273   :  { %v9874_v27 = vpop.permute.xlu1 %772 }
 0x274   :  { %868 = vrot.lane.b32.xlu1 %v831_v45, %s8768_s8  ;;  %v830_v58 = vmax.f32 %v814_v2, 0.0  ;;  %v817_v26 = vsub.f32 %v9529_v17, %v9874_v27  ;;  %v1415_v28 = vmax.f32 %v1399_v19, 0.0  ;;  %v9889_v2 = vpop.f32.mrf.mxu1 }
 0x275   :  { %13737 = vst [vmem:[#allocation70_spill] sm:$0xff] %v9889_v2 }
 0x276   :  { %866 = vrot.lane.b32.xlu0 %v830_v58, %s8768_s8  ;;  %v833_v61 = vmax.f32 %v817_v26, 0.0  ;;  %v1402_v58 = vsub.f32 %v9741_v62, %v9874_v27  ;;  %v9899_v19 = vpop.f32.mrf.mxu1 }
 0x277   :  { %v9884_v48 = vpop.permute.xlu1 %770  ;;  %13738 = vst [vmem:[#allocation71_spill] sm:$0xff] %v9899_v19 }
 0x278   :  { %1449 = vrot.lane.b32.xlu1 %v1416_v49, %s8768_s8  ;;  %v816_v45 = vsub.f32 %v9540_v31, %v9884_v48  ;;  %v1401_v49 = vsub.f32 %v9743_v63, %v9884_v48  ;;  %v1418_v31 = vmax.f32 %v1402_v58, 0.0 }
 0x279   :  { %v9901_v50 = vpop.permute.xlu0 %774 }
 0x27a   :  { %1447 = vrot.lane.b32.xlu0 %v1415_v28, %s8768_s8  ;;  %v832_v17 = vmax.f32 %v816_v45, 0.0  ;;  %v1417_v28 = vmax.f32 %v1401_v49, 0.0  ;;  %v9909_v45 = vpop.f32.mrf.mxu1 }
 0x27b   :  { %v9894_v57 = vpop.permute.xlu1 %776  ;;  %13739 = vst [vmem:[#allocation72_spill] sm:$0xff] %v9909_v45 }
 0x27c   :  { %872 = vrot.lane.b32.xlu1 %v833_v61, %s8768_s8  ;;  %v819_v26 = vsub.f32 %v9550_v42, %v9894_v57  ;;  %v818_v61 = vsub.f32 %v9560_v52, %v9901_v50  ;;  %v1404_v63 = vsub.f32 %v9745_v56, %v9894_v57  ;;  %v9919_v58 = vpop.f32.mrf.mxu1 }
 0x27d   :  { %13740 = vst [vmem:[#allocation73_spill] sm:$0xff] %v9919_v58  ;;  %v9921_v49 = vpop.permute.xlu0 %778 }
 0x27e   :  { %870 = vrot.lane.b32.xlu0 %v832_v17, %s8768_s8  ;;  %v835_v62 = vmax.f32 %v819_v26, 0.0  ;;  %v834_v17 = vmax.f32 %v818_v61, 0.0  ;;  %v1420_v42 = vmax.f32 %v1404_v63, 0.0  ;;  %v9929_v61 = vpop.f32.mrf.mxu1 }
 0x27f   :  { %v9914_v2 = vpop.permute.xlu1 %780  ;;  %13741 = vst [vmem:[#allocation74_spill] sm:$0xff] %v9929_v61 }
 0x280   :  { %1453 = vrot.lane.b32.xlu1 %v1418_v31, %s8768_s8  ;;  %v1403_v31 = vsub.f32 %v9747_v3, %v9901_v50  ;;  %v821_v26 = vsub.f32 %v9572_v29, %v9914_v2  ;;  %v1406_v3 = vsub.f32 %v9749_v44, %v9914_v2 }
 0x282   :  { %1451 = vrot.lane.b32.xlu0 %v1417_v28, %s8768_s8  ;;  %v1419_v28 = vmax.f32 %v1403_v31, 0.0  ;;  %v837_v56 = vmax.f32 %v821_v26, 0.0  ;;  %v9941_v31 = vpop.permute.xlu0 %782  ;;  %v1422_v29 = vmax.f32 %v1406_v3, 0.0 }
 0x283   :  { %v9934_v52 = vpop.permute.xlu1 %784 }
 0x284   :  { %876 = vrot.lane.b32.xlu1 %v835_v62, %s8768_s8  ;;  %v820_v62 = vsub.f32 %v9587_v18, %v9921_v49  ;;  %v823_v26 = vsub.f32 %v9604_v21, %v9934_v52 }
 0x286   :  { %874 = vrot.lane.b32.xlu0 %v834_v17, %s8768_s8  ;;  %v836_v63 = vmax.f32 %v820_v62, 0.0  ;;  %v9939_v17 = vpop.f32.mrf.mxu1  ;;  %v839_v44 = vmax.f32 %v823_v26, 0.0 }
 0x287   :  { %13742 = vst [vmem:[#allocation75_spill] sm:$0xff] %v9939_v17  ;;  %v9954_v18 = vpop.permute.xlu1 %788 }
 0x288   :  { %1457 = vrot.lane.b32.xlu1 %v1420_v42, %s8768_s8  ;;  %v1405_v42 = vsub.f32 %v9751_v33, %v9921_v49  ;;  %v9949_v62 = vpop.f32.mrf.mxu1  ;;  %v1408_v33 = vsub.f32 %v9753_v12, %v9934_v52  ;;  %v825_v26 = vsub.f32 %v9633_v23, %v9954_v18 }
 0x289   :  { %13743 = vst [vmem:[#allocation76_spill] sm:$0xff] %v9949_v62 }
 0x28a   :  { %1455 = vrot.lane.b32.xlu0 %v1419_v28, %s8768_s8  ;;  %v1421_v28 = vmax.f32 %v1405_v42, 0.0  ;;  %v9961_v42 = vpop.permute.xlu0 %786  ;;  %v1424_v21 = vmax.f32 %v1408_v33, 0.0 }
 0x28b   :  { %v9971_v12 = vpop.permute.xlu1 %792 }
 0x28c   :  { %880 = vrot.lane.b32.xlu1 %v837_v56, %s8768_s8  ;;  %v822_v56 = vsub.f32 %v9617_v8, %v9941_v31 }
 0x28e   :  { %878 = vrot.lane.b32.xlu0 %v836_v63, %s8768_s8  ;;  %v838_v3 = vmax.f32 %v822_v56, 0.0  ;;  %v9959_v63 = vpop.f32.mrf.mxu1  ;;  %v9976_v33 = vpop.permute.xlu0 %790 }
 0x28f   :  { %13744 = vst [vmem:[#allocation77_spill] sm:$0xff] %v9959_v63 }
 0x290   :  { %1461 = vrot.lane.b32.xlu1 %v1422_v29, %s8768_s8  ;;  %v1407_v29 = vsub.f32 %v9755_v20, %v9941_v31  ;;  %v9969_v56 = vpop.f32.mrf.mxu1  ;;  %v841_v20 = vmax.f32 %v825_v26, 0.0  ;;  %v9986_v26 = vpop.permute.xlu1 %796 }
 0x291   :  { %13745 = vst [vmem:[#allocation78_spill] sm:$0xff] %v9969_v56 }
 0x292   :  { %1459 = vrot.lane.b32.xlu0 %v1421_v28, %s8768_s8  ;;  %v1423_v28 = vmax.f32 %v1407_v29, 0.0  ;;  %v9981_v29 = vpop.f32.mrf.mxu1  ;;  %v9993_v8 = vpop.permute.xlu0 %794 }
 0x293   :  { %13746 = vst [vmem:[#allocation79_spill] sm:$0xff] %v9981_v29 }
 0x294   :  { %884 = vrot.lane.b32.xlu1 %v839_v44, %s8768_s8  ;;  %v824_v44 = vsub.f32 %v9653_v25, %v9961_v42 }
 0x296   :  { %882 = vrot.lane.b32.xlu0 %v838_v3, %s8768_s8  ;;  %v1410_v3 = vsub.f32 %v9757_v37, %v9954_v18  ;;  %v840_v23 = vmax.f32 %v824_v44, 0.0  ;;  %v9991_v44 = vpop.f32.mrf.mxu1 }
 0x297   :  { %13747 = vst [vmem:[#allocation80_spill] sm:$0xff] %v9991_v44 }
 0x298   :  { %1465 = vrot.lane.b32.xlu1 %v1424_v21, %s8768_s8  ;;  %v1409_v21 = vsub.f32 %v9759_v9, %v9961_v42  ;;  %v1426_v25 = vmax.f32 %v1410_v3, 0.0 }
 0x29a   :  { %1463 = vrot.lane.b32.xlu0 %v1423_v28, %s8768_s8  ;;  %v827_v28 = vsub.f32 %v9671_v6, %v9971_v12  ;;  %v1425_v37 = vmax.f32 %v1409_v21, 0.0  ;;  %v10001_v21 = vpop.f32.mrf.mxu1 }
 0x29b   :  { %13748 = vst [vmem:[#allocation81_spill] sm:$0xff] %v10001_v21 }
 0x29c   :  { %888 = vrot.lane.b32.xlu1 %v841_v20, %s8768_s8  ;;  %v826_v20 = vsub.f32 %v9689_v16, %v9976_v33  ;;  %v843_v9 = vmax.f32 %v827_v28, 0.0  ;;  %v1412_v16 = vsub.f32 %v9761_v10, %v9971_v12  ;;  %v1411_v28 = vsub.f32 %v9763_v13, %v9976_v33 }
 0x29e   :  { %886 = vrot.lane.b32.xlu0 %v840_v23, %s8768_s8  ;;  %v829_v23 = vsub.f32 %v9707_v43, %v9986_v26  ;;  %v842_v3 = vmax.f32 %v826_v20, 0.0  ;;  %v10009_v43 = vpop.f32.mrf.mxu1  ;;  %v1414_v20 = vsub.f32 %v9765_v7, %v9986_v26 }
 0x29f   :  { %13749 = vst [vmem:[#allocation82_spill] sm:$0xff] %v10009_v43 }
 0x2a0   :  { %1469 = vrot.lane.b32.xlu1 %v1426_v25, %s8768_s8  ;;  %v828_v25 = vsub.f32 %v9722_v24, %v9993_v8  ;;  %v845_v6 = vmax.f32 %v829_v23, 0.0  ;;  %v1427_v23 = vmax.f32 %v1411_v28, 0.0  ;;  %v10017_v24 = vpop.f32.mrf.mxu1 }
 0x2a1   :  { %13750 = vst [vmem:[#allocation83_spill] sm:$0xff] %v10017_v24 }
 0x2a2   :  { %1467 = vrot.lane.b32.xlu0 %v1425_v37, %s8768_s8  ;;  %v844_v37 = vmax.f32 %v828_v25, 0.0  ;;  %v1948_v25 = vsub.f32 %v9769_v15, %v9862_v4  ;;  %v10025_v7 = vpop.f32.mrf.mxu1 }
 0x2a3   :  { %13751 = vst [vmem:[#allocation84_spill] sm:$0xff] %v10025_v7 }
 0x2a4   :  { %892 = vrot.lane.b32.xlu1 %v843_v9, %s8768_s8  ;;  %v1428_v9 = vmax.f32 %v1412_v16, 0.0  ;;  %v1964_v28 = vmax.f32 %v1948_v25, 0.0  ;;  %v10033_v10 = vpop.f32.mrf.mxu1 }
 0x2a5   :  { %13752 = vst [vmem:[#allocation85_spill] sm:$0xff] %v10033_v10 }
 0x2a6   :  { %890 = vrot.lane.b32.xlu0 %v842_v3, %s8768_s8  ;;  %v1947_v3 = vsub.f32 %v9774_v32, %v9868_v47  ;;  %v10041_v13 = vpop.f32.mrf.mxu1 }
 0x2a7   :  { %13753 = vst [vmem:[#allocation86_spill] sm:$0xff] %v10041_v13 }
 0x2a8   :  { %896 = vrot.lane.b32.xlu1 %v845_v6, %s8768_s8  ;;  %v1430_v6 = vmax.f32 %v1414_v20, 0.0  ;;  %v1963_v16 = vmax.f32 %v1947_v3, 0.0 }
 0x2aa   :  { %894 = vrot.lane.b32.xlu0 %v844_v37, %s8768_s8  ;;  %v1949_v37 = vsub.f32 %v9780_v36, %v9884_v48 }
 0x2ac   :  { %1473 = vrot.lane.b32.xlu1 %v1428_v9, %s8768_s8  ;;  %v1950_v9 = vsub.f32 %v9778_v38, %v9874_v27  ;;  %v1965_v20 = vmax.f32 %v1949_v37, 0.0 }
 0x2ae   :  { %1471 = vrot.lane.b32.xlu0 %v1427_v23, %s8768_s8  ;;  %v1951_v23 = vsub.f32 %v9787_v30, %v9901_v50  ;;  %v1966_v3 = vmax.f32 %v1950_v9, 0.0  ;;  %v10049_v30 = vpop.f32.mrf.mxu1 }
 0x2af   :  { %13754 = vst [vmem:[#allocation87_spill] sm:$0xff] %v10049_v30 }
 0x2b0   :  { %1477 = vrot.lane.b32.xlu1 %v1430_v6, %s8768_s8  ;;  %v1952_v6 = vsub.f32 %v9784_v0, %v9894_v57  ;;  %v1967_v25 = vmax.f32 %v1951_v23, 0.0 }
 0x2b2   :  { %1995 = vrot.lane.b32.xlu0 %v1963_v16, %s8768_s8  ;;  %v1953_v16 = vsub.f32 %v9795_v46, %v9921_v49  ;;  %v1968_v37 = vmax.f32 %v1952_v6, 0.0 }
 0x2b4   :  { %1997 = vrot.lane.b32.xlu1 %v1964_v28, %s8768_s8  ;;  %v1954_v28 = vsub.f32 %v9791_v51, %v9914_v2  ;;  %v1969_v9 = vmax.f32 %v1953_v16, 0.0  ;;  %v10057_v51 = vpop.f32.mrf.mxu1 }
 0x2b5   :  { %13755 = vst [vmem:[#allocation88_spill] sm:$0xff] %v10057_v51 }
 0x2b6   :  { %1999 = vrot.lane.b32.xlu0 %v1965_v20, %s8768_s8  ;;  %v1955_v20 = vsub.f32 %v9803_v41, %v9941_v31  ;;  %v1970_v23 = vmax.f32 %v1954_v28, 0.0 }
 0x2b8   :  { %2001 = vrot.lane.b32.xlu1 %v1966_v3, %s8768_s8  ;;  %v1956_v3 = vsub.f32 %v9799_v39, %v9934_v52  ;;  %v1971_v6 = vmax.f32 %v1955_v20, 0.0  ;;  %v10065_v39 = vpop.f32.mrf.mxu1 }
 0x2b9   :  { %13756 = vst [vmem:[#allocation89_spill] sm:$0xff] %v10065_v39 }
 0x2ba   :  { %2003 = vrot.lane.b32.xlu0 %v1967_v25, %s8768_s8  ;;  %v1957_v25 = vsub.f32 %v9811_v34, %v9961_v42  ;;  %v1972_v16 = vmax.f32 %v1956_v3, 0.0  ;;  %v10073_v34 = vpop.f32.mrf.mxu1 }
 0x2bb   :  { %13757 = vst [vmem:[#allocation90_spill] sm:$0xff] %v10073_v34 }
 0x2bc   :  { %2005 = vrot.lane.b32.xlu1 %v1968_v37, %s8768_s8  ;;  %v1958_v37 = vsub.f32 %v9807_v1, %v9954_v18  ;;  %v1973_v28 = vmax.f32 %v1957_v25, 0.0 }
 0x2be   :  { %2007 = vrot.lane.b32.xlu0 %v1969_v9, %s8768_s8  ;;  %v1413_v9 = vsub.f32 %v9767_v14, %v9993_v8  ;;  %v1974_v20 = vmax.f32 %v1958_v37, 0.0  ;;  %v10081_v14 = vpop.f32.mrf.mxu1 }
 0x2bf   :  { %13758 = vst [vmem:[#allocation91_spill] sm:$0xff] %v10081_v14 }
 0x2c0   :  { %2009 = vrot.lane.b32.xlu1 %v1970_v23, %s8768_s8  ;;  %v1960_v23 = vsub.f32 %v9814_v53, %v9971_v12  ;;  %v1429_v3 = vmax.f32 %v1413_v9, 0.0 }
 0x2c2   :  { %2011 = vrot.lane.b32.xlu0 %v1971_v6, %s8768_s8  ;;  %v1959_v6 = vsub.f32 %v9816_v54, %v9976_v33  ;;  %v1976_v25 = vmax.f32 %v1960_v23, 0.0 }
 0x2c4   :  { %2013 = vrot.lane.b32.xlu1 %v1972_v16, %s8768_s8  ;;  %v1962_v16 = vsub.f32 %v9818_v5, %v9986_v26  ;;  %v1975_v37 = vmax.f32 %v1959_v6, 0.0  ;;  %v10089_v5 = vpop.f32.mrf.mxu1 }
 0x2c5   :  { %13759 = vst [vmem:[#allocation92_spill] sm:$0xff] %v10089_v5 }
 0x2c6   :  { %2015 = vrot.lane.b32.xlu0 %v1973_v28, %s8768_s8  ;;  %v2495_v28 = vsub.f32 %v9824_v55, %v9868_v47  ;;  %v1978_v9 = vmax.f32 %v1962_v16, 0.0  ;;  %v10097_v53 = vpop.f32.mrf.mxu1 }
 0x2c7   :  { %13760 = vst [vmem:[#allocation93_spill] sm:$0xff] %v10097_v53 }
 0x2c8   :  { %2017 = vrot.lane.b32.xlu1 %v1974_v20, %s8768_s8  ;;  %v2496_v20 = vsub.f32 %v9822_v59, %v9862_v4  ;;  %v2511_v23 = vmax.f32 %v2495_v28, 0.0  ;;  %v10105_v54 = vpop.f32.mrf.mxu1 }
 0x2c9   :  { %13761 = vst [vmem:[#allocation94_spill] sm:$0xff] %v10105_v54 }
 0x2ca   :  { %1475 = vrot.lane.b32.xlu0 %v1429_v3, %s8768_s8  ;;  %v2497_v3 = vsub.f32 %v9828_v35, %v9884_v48  ;;  %v2512_v6 = vmax.f32 %v2496_v20, 0.0  ;;  %v10113_v46 = vpop.f32.mrf.mxu1  ;;  %v13776_v35 = vld [vmem:[#allocation69_spill] sm:$0xff] }
 0x2cb   :  { %13764 = vst [vmem:[#allocation95_spill] sm:$0xff] %v10113_v46 }
 0x2cc   :  { %2021 = vrot.lane.b32.xlu1 %v1976_v25, %s8768_s8  ;;  %v2498_v25 = vsub.f32 %v9826_v60, %v9874_v27  ;;  %v2513_v16 = vmax.f32 %v2497_v3, 0.0 }
 0x2ce   :  { %2019 = vrot.lane.b32.xlu0 %v1975_v37, %s8768_s8  ;;  %v2499_v37 = vsub.f32 %v9832_v11, %v9901_v50  ;;  %v2514_v28 = vmax.f32 %v2498_v25, 0.0  ;;  %v10121_v11 = vpop.f32.mrf.mxu1 }
 0x2cf   :  { %13767 = vst [vmem:[#allocation96_spill] sm:$0xff] %v10121_v11 }
 0x2d0   :  { %2025 = vrot.lane.b32.xlu1 %v1978_v9, %s8768_s8  ;;  %v2500_v9 = vsub.f32 %v9830_v22, %v9894_v57  ;;  %v2515_v20 = vmax.f32 %v2499_v37, 0.0  ;;  %v10129_v22 = vpop.f32.mrf.mxu1 }
 0x2d1   :  { %13770 = vst [vmem:[#allocation97_spill] sm:$0xff] %v10129_v22 }
 0x2d2   :  { %2543 = vrot.lane.b32.xlu0 %v2511_v23, %s8768_s8  ;;  %v2501_v23 = vsub.f32 %v9836_v40, %v9921_v49  ;;  %v2516_v3 = vmax.f32 %v2500_v9, 0.0  ;;  %v10137_v0 = vpop.f32.mrf.mxu1 }
 0x2d3   :  { %13773 = vst [vmem:[#allocation98_spill] sm:$0xff] %v10137_v0 }
 0x2d4   :  { %2545 = vrot.lane.b32.xlu1 %v2512_v6, %s8768_s8  ;;  %v13762_v6 = vld [vmem:[#allocation57_spill] sm:$0xff]  ;;  %v2517_v25 = vmax.f32 %v2501_v23, 0.0  ;;  %v10153_v36 = vpop.f32.mrf.mxu1 }
 0x2d5   :  { %v2502_v1 = vsub.f32 %v13762_v6, %v9914_v2 }
 0x2d6   :  { %2547 = vrot.lane.b32.xlu0 %v2513_v16, %s8768_s8  ;;  %v13763_v16 = vld [vmem:[#allocation60_spill] sm:$0xff]  ;;  %v10161_v32 = vpop.f32.mrf.mxu1 }
 0x2d7   :  { %v2503_v41 = vsub.f32 %v13763_v16, %v9941_v31  ;;  %v2518_v37 = vmax.f32 %v2502_v1, 0.0  ;;  %13779 = vst [vmem:[#allocation99_spill] sm:$0xff] %v10161_v32 }
 0x2d8   :  { %2549 = vrot.lane.b32.xlu1 %v2514_v28, %s8768_s8  ;;  %v13765_v28 = vld [vmem:[#allocation59_spill] sm:$0xff]  ;;  %v10177_v38 = vpop.f32.mrf.mxu1 }
 0x2d9   :  { %v2504_v40 = vsub.f32 %v13765_v28, %v9934_v52  ;;  %v2519_v9 = vmax.f32 %v2503_v41, 0.0  ;;  %13781 = vst [vmem:[#allocation100_spill] sm:$0xff] %v10177_v38 }
 0x2da   :  { %2551 = vrot.lane.b32.xlu0 %v2515_v20, %s8768_s8  ;;  %v13766_v20 = vld [vmem:[#allocation62_spill] sm:$0xff] }
 0x2db   :  { %v2505_v6 = vsub.f32 %v13766_v20, %v9961_v42  ;;  %v2520_v23 = vmax.f32 %v2504_v40, 0.0  ;;  %v13771_v20 = vld [vmem:[#allocation63_spill] sm:$0xff] }
 0x2dc   :  { %2553 = vrot.lane.b32.xlu1 %v2516_v3, %s8768_s8  ;;  %v13768_v3 = vld [vmem:[#allocation61_spill] sm:$0xff] }
 0x2dd   :  { %v2506_v16 = vsub.f32 %v13768_v3, %v9954_v18  ;;  %v2521_v1 = vmax.f32 %v2505_v6, 0.0 }
 0x2de   :  { %2555 = vrot.lane.b32.xlu0 %v2517_v25, %s8768_s8  ;;  %v13769_v25 = vld [vmem:[#allocation50_spill] sm:$0xff] }
 0x2df   :  { %v1961_v28 = vsub.f32 %v13769_v25, %v9993_v8 }
 0x2e0   :  { %2557 = vrot.lane.b32.xlu1 %v2518_v37, %s8768_s8  ;;  %v2522_v37 = vmax.f32 %v2506_v16, 0.0 }
 0x2e1   :  { %v1977_v3 = vmax.f32 %v1961_v28, 0.0 }
 0x2e2   :  { %2559 = vrot.lane.b32.xlu0 %v2519_v9, %s8768_s8  ;;  %v2508_v9 = vsub.f32 %v13771_v20, %v9971_v12 }
 0x2e4   :  { %2561 = vrot.lane.b32.xlu1 %v2520_v23, %s8768_s8  ;;  %v13772_v23 = vld [vmem:[#allocation64_spill] sm:$0xff]  ;;  %v2524_v16 = vmax.f32 %v2508_v9, 0.0 }
 0x2e5   :  { %v2507_v6 = vsub.f32 %v13772_v23, %v9976_v33  ;;  %v13778_v9 = vld [vmem:[#allocation68_spill] sm:$0xff] }
 0x2e6   :  { %v869_v41 = vpop.permute.xlu1 %868  ;;  %2563 = vrot.lane.b32.xlu0 %v2521_v1, %s8768_s8  ;;  %v13774_v1 = vld [vmem:[#allocation66_spill] sm:$0xff] }
 0x2e7   :  { %v2510_v20 = vsub.f32 %v13774_v1, %v9986_v26  ;;  %v2523_v23 = vmax.f32 %v2507_v6, 0.0  ;;  %v3044_v1 = vsub.f32 %v13778_v9, %v9862_v4  ;;  %v3045_v6 = vsub.f32 %v9899_v19, %v9884_v48 }
 0x2e8   :  { %2565 = vrot.lane.b32.xlu1 %v2522_v37, %s8768_s8  ;;  %v867_v40 = vpop.permute.xlu0 %866  ;;  %v13775_v37 = vld [vmem:[#allocation65_spill] sm:$0xff]  ;;  %v3047_v19 = vsub.f32 %v9919_v58, %v9901_v50 }
 0x2e9   :  { %7772 = vmatprep.mubr.msk.f32.mxu0 %vm898_vm1, %v867_v40  ;;  %v3043_v40 = vsub.f32 %v13776_v35, %v9868_v47  ;;  %13777 = vst [vmem:[#allocation65_spill] sm:$0xff] %v10153_v36  ;;  %v13478_v35 = vmov 1  }
 0x2ea   :  { %v10140_v25 = vpop.permute.xlu1 %1449  ;;  %2023 = vrot.lane.b32.xlu0 %v1977_v3, %s8768_s8  ;;  %7773 = vmatmul.mubr.msk.f32.vlgmr.msra.gmra.mxu0 %vm898_vm1, %v869_v41  ;;  %v2526_v41 = vmax.f32 %v2510_v20, 0.0  ;;  %v3060_v20 = vmax.f32 %v3044_v1, 0.0  ;;  %v3048_v1 = vsub.f32 %v9909_v45, %v9894_v57 }
 0x2eb   :  { %7829 = vmatpush3.msra.mxu0 %v13775_v37  ;;  %v3059_v55 = vmax.f32 %v3043_v40, 0.0  ;;  %8310 = vset.pattern.permute.xlu0 %v13478_v35 }
 0x2ec   :  { %2569 = vrot.lane.b32.xlu1 %v2524_v16, %s8768_s8  ;;  %v10148_v28 = vpop.permute.xlu0 %1447  ;;  %7886 = vmatprep.subr.mxu0 %v13775_v37 }
 0x2ed   :  { %8308 = vset.pattern.permute.xlu1 %v13478_v35  ;;  %v3063_v35 = vmax.f32 %v3047_v19, 0.0 }
 0x2ee   :  { %v873_v3 = vpop.permute.xlu1 %872  ;;  %2567 = vrot.lane.b32.xlu0 %v2523_v23, %s8768_s8  ;;  %v13780_v23 = vld [vmem:[#allocation70_spill] sm:$0xff] }
 0x2ef   :  { %v3046_v40 = vsub.f32 %v13780_v23, %v9874_v27 }
 0x2f0   :  { %2573 = vrot.lane.b32.xlu1 %v2526_v41, %s8768_s8  ;;  %v871_v16 = vpop.permute.xlu0 %870 }
 0x2f1   :  { %7775 = vmatprep.mubr.msk.f32.mxu0 %vm898_vm1, %v871_v16  ;;  %v3061_v16 = vmax.f32 %v3045_v6, 0.0  ;;  %v10185_v6 = vpop.f32.mrf.mxu1 }
 0x2f2   :  { %v10165_v60 = vpop.permute.xlu1 %1453  ;;  %3091 = vrot.lane.b32.xlu0 %v3059_v55, %s8768_s8  ;;  %7776 = vmatmul.mubr.msk.f32.gmra.mxu0 %vm898_vm1, %v873_v3  ;;  %v3062_v55 = vmax.f32 %v3046_v40, 0.0  ;;  %13782 = vst [vmem:[#allocation101_spill] sm:$0xff] %v10185_v6  ;;  %v3064_v40 = vmax.f32 %v3048_v1, 0.0 }
 0x2f3   :  { %v10199_v45 = vpop.f32.mrf.mxu1 }
 0x2f4   :  { %3093 = vrot.lane.b32.xlu1 %v3060_v20, %s8768_s8  ;;  %v10173_v41 = vpop.permute.xlu0 %1451  ;;  %v3049_v20 = vsub.f32 %v9939_v17, %v9921_v49  ;;  %v3051_v17 = vsub.f32 %v9959_v63, %v9941_v31  ;;  %13783 = vst [vmem:[#allocation102_spill] sm:$0xff] %v10199_v45 }
 0x2f6   :  { %v877_v9 = vpop.permute.xlu1 %876  ;;  %3095 = vrot.lane.b32.xlu0 %v3061_v16, %s8768_s8  ;;  %v3050_v16 = vsub.f32 %v9929_v61, %v9914_v2  ;;  %v3067_v61 = vmax.f32 %v3051_v17, 0.0 }
 0x2f8   :  { %3097 = vrot.lane.b32.xlu1 %v3062_v55, %s8768_s8  ;;  %v875_v3 = vpop.permute.xlu0 %874  ;;  %v3065_v55 = vmax.f32 %v3049_v20, 0.0  ;;  %v10207_v20 = vpop.f32.mrf.mxu1 }
 0x2f9   :  { %7778 = vmatprep.mubr.msk.f32.mxu0 %vm898_vm1, %v875_v3  ;;  %13784 = vst [vmem:[#allocation103_spill] sm:$0xff] %v10207_v20 }
 0x2fa   :  { %v10188_v58 = vpop.permute.xlu1 %1457  ;;  %3099 = vrot.lane.b32.xlu0 %v3063_v35, %s8768_s8  ;;  %7779 = vmatmul.mubr.msk.f32.gmra.mxu0 %vm898_vm1, %v877_v9  ;;  %v3066_v35 = vmax.f32 %v3050_v16, 0.0  ;;  %v3052_v9 = vsub.f32 %v9949_v62, %v9934_v52  ;;  %v10221_v23 = vpop.f32.mrf.mxu1 }
 0x2fb   :  { %13786 = vst [vmem:[#allocation104_spill] sm:$0xff] %v10221_v23 }
 0x2fc   :  { %3101 = vrot.lane.b32.xlu1 %v3064_v40, %s8768_s8  ;;  %v10195_v19 = vpop.permute.xlu0 %1455  ;;  %v3053_v40 = vsub.f32 %v9981_v29, %v9961_v42  ;;  %v3068_v16 = vmax.f32 %v3052_v9, 0.0  ;;  %v13785_v29 = vld [vmem:[#allocation67_spill] sm:$0xff] }
 0x2fd   :  { %v2509_v62 = vsub.f32 %v13785_v29, %v9993_v8 }
 0x2fe   :  { %v881_v3 = vpop.permute.xlu1 %880  ;;  %3103 = vrot.lane.b32.xlu0 %v3065_v55, %s8768_s8  ;;  %v3054_v55 = vsub.f32 %v9969_v56, %v9954_v18 }
 0x2ff   :  { %v2525_v56 = vmax.f32 %v2509_v62, 0.0 }
 0x300   :  { %3105 = vrot.lane.b32.xlu1 %v3066_v35, %s8768_s8  ;;  %v879_v1 = vpop.permute.xlu0 %878  ;;  %v3069_v35 = vmax.f32 %v3053_v40, 0.0  ;;  %v10229_v40 = vpop.f32.mrf.mxu1 }
 0x301   :  { %7781 = vmatprep.mubr.msk.f32.mxu0 %vm898_vm1, %v879_v1  ;;  %13787 = vst [vmem:[#allocation105_spill] sm:$0xff] %v10229_v40 }
 0x302   :  { %v10210_v63 = vpop.permute.xlu1 %1461  ;;  %3107 = vrot.lane.b32.xlu0 %v3067_v61, %s8768_s8  ;;  %7782 = vmatmul.mubr.msk.f32.gmra.mxu0 %vm898_vm1, %v881_v3  ;;  %v3070_v61 = vmax.f32 %v3054_v55, 0.0  ;;  %v3056_v3 = vsub.f32 %v9991_v44, %v9971_v12  ;;  %v10243_v44 = vpop.f32.mrf.mxu1 }
 0x303   :  { %13788 = vst [vmem:[#allocation106_spill] sm:$0xff] %v10243_v44 }
 0x304   :  { %3109 = vrot.lane.b32.xlu1 %v3068_v16, %s8768_s8  ;;  %v10217_v17 = vpop.permute.xlu0 %1459  ;;  %v3055_v16 = vsub.f32 %v10001_v21, %v9976_v33  ;;  %v3072_v55 = vmax.f32 %v3056_v3, 0.0  ;;  %v3591_v21 = vsub.f32 %v10033_v10, %v9868_v47 }
 0x306   :  { %v885_v1 = vpop.permute.xlu1 %884  ;;  %3111 = vrot.lane.b32.xlu0 %v3069_v35, %s8768_s8  ;;  %v3058_v35 = vsub.f32 %v10009_v43, %v9986_v26  ;;  %v3607_v43 = vmax.f32 %v3591_v21, 0.0 }
 0x308   :  { %3113 = vrot.lane.b32.xlu1 %v3070_v61, %s8768_s8  ;;  %v883_v9 = vpop.permute.xlu0 %882  ;;  %v3071_v61 = vmax.f32 %v3055_v16, 0.0  ;;  %v10251_v16 = vpop.f32.mrf.mxu1 }
 0x309   :  { %7784 = vmatprep.mubr.msk.f32.mxu0 %vm898_vm1, %v883_v9  ;;  %13789 = vst [vmem:[#allocation107_spill] sm:$0xff] %v10251_v16 }
 0x30a   :  { %v10232_v29 = vpop.permute.xlu1 %1465  ;;  %2571 = vrot.lane.b32.xlu0 %v2525_v56, %s8768_s8  ;;  %7785 = vmatmul.mubr.msk.f32.gmra.mxu0 %vm898_vm1, %v885_v1  ;;  %v3074_v56 = vmax.f32 %v3058_v35, 0.0  ;;  %v3592_v1 = vsub.f32 %v10025_v7, %v9862_v4  ;;  %v10265_v7 = vpop.f32.mrf.mxu1 }
 0x30b   :  { %13790 = vst [vmem:[#allocation108_spill] sm:$0xff] %v10265_v7 }
 0x30c   :  { %3117 = vrot.lane.b32.xlu1 %v3072_v55, %s8768_s8  ;;  %v10239_v62 = vpop.permute.xlu0 %1463  ;;  %v3593_v55 = vsub.f32 %v10049_v30, %v9884_v48  ;;  %v3608_v35 = vmax.f32 %v3592_v1, 0.0  ;;  %v3595_v30 = vsub.f32 %v10065_v39, %v9901_v50 }
 0x30e   :  { %v889_v9 = vpop.permute.xlu1 %888  ;;  %3115 = vrot.lane.b32.xlu0 %v3071_v61, %s8768_s8  ;;  %v3594_v61 = vsub.f32 %v10041_v13, %v9874_v27  ;;  %v3611_v13 = vmax.f32 %v3595_v30, 0.0 }
 0x310   :  { %3121 = vrot.lane.b32.xlu1 %v3074_v56, %s8768_s8  ;;  %v887_v3 = vpop.permute.xlu0 %886  ;;  %v3609_v56 = vmax.f32 %v3593_v55, 0.0  ;;  %v10273_v55 = vpop.f32.mrf.mxu1 }
 0x311   :  { %7787 = vmatprep.mubr.msk.f32.mxu0 %vm898_vm1, %v887_v3  ;;  %13791 = vst [vmem:[#allocation109_spill] sm:$0xff] %v10273_v55 }
 0x312   :  { %v10254_v10 = vpop.permute.xlu1 %1469  ;;  %3639 = vrot.lane.b32.xlu0 %v3607_v43, %s8768_s8  ;;  %7788 = vmatmul.mubr.msk.f32.gmra.mxu0 %vm898_vm1, %v889_v9  ;;  %v3610_v43 = vmax.f32 %v3594_v61, 0.0  ;;  %v3596_v9 = vsub.f32 %v10057_v51, %v9894_v57  ;;  %v10283_v51 = vpop.f32.mrf.mxu1 }
 0x313   :  { %13792 = vst [vmem:[#allocation110_spill] sm:$0xff] %v10283_v51 }
 0x314   :  { %3641 = vrot.lane.b32.xlu1 %v3608_v35, %s8768_s8  ;;  %v10261_v21 = vpop.permute.xlu0 %1467  ;;  %v3597_v35 = vsub.f32 %v10081_v14, %v9921_v49  ;;  %v3612_v61 = vmax.f32 %v3596_v9, 0.0  ;;  %v3599_v14 = vsub.f32 %v10097_v53, %v9941_v31 }
 0x316   :  { %v893_v3 = vpop.permute.xlu1 %892  ;;  %3643 = vrot.lane.b32.xlu0 %v3609_v56, %s8768_s8  ;;  %v3598_v56 = vsub.f32 %v10073_v34, %v9914_v2  ;;  %v3613_v30 = vmax.f32 %v3597_v35, 0.0  ;;  %v3615_v35 = vmax.f32 %v3599_v14, 0.0 }
 0x318   :  { %3645 = vrot.lane.b32.xlu1 %v3610_v43, %s8768_s8  ;;  %v891_v1 = vpop.permute.xlu0 %890 }
 0x319   :  { %7790 = vmatprep.mubr.msk.f32.mxu0 %vm898_vm1, %v891_v1 }
 0x31a   :  { %v897_v39 = vpop.permute.xlu1 %896  ;;  %3647 = vrot.lane.b32.xlu0 %v3611_v13, %s8768_s8  ;;  %7791 = vmatmul.mubr.msk.f32.gmra.mxu0 %vm898_vm1, %v893_v3  ;;  %v3614_v13 = vmax.f32 %v3598_v56, 0.0  ;;  %v3600_v3 = vsub.f32 %v10089_v5, %v9934_v52 }
 0x31c   :  { %3649 = vrot.lane.b32.xlu1 %v3612_v61, %s8768_s8  ;;  %v895_v43 = vpop.permute.xlu0 %894  ;;  %v3601_v61 = vsub.f32 %v10113_v46, %v9961_v42 }
 0x31d   :  { %7793 = vmatprep.mubr.msk.f32.mxu0 %vm898_vm1, %v895_v43  ;;  %v10299_v43 = vpop.f32.mrf.mxu1 }
 0x31e   :  { %v10286_v1 = vpop.permute.xlu1 %1473  ;;  %3651 = vrot.lane.b32.xlu0 %v3613_v30, %s8768_s8  ;;  %7794 = vmatmul.mubr.msk.f32.gmra.mxu0 %vm898_vm1, %v897_v39  ;;  %13793 = vst [vmem:[#allocation111_spill] sm:$0xff] %v10299_v43  ;;  %v3616_v39 = vmax.f32 %v3600_v3, 0.0  ;;  %v3617_v56 = vmax.f32 %v3601_v61, 0.0 }
 0x31f   :  { %7830 = vmatprep.mubr.msk.f32.mxu0 %vm898_vm1, %v10148_v28  ;;  %v3602_v28 = vsub.f32 %v10105_v54, %v9954_v18 }
 0x320   :  { %3653 = vrot.lane.b32.xlu1 %v3614_v13, %s8768_s8  ;;  %v10295_v9 = vpop.permute.xlu0 %1471  ;;  %v3057_v13 = vsub.f32 %v10017_v24, %v9993_v8  ;;  %v3603_v24 = vsub.f32 %v10129_v22, %v9976_v33 }
 0x322   :  { %v10301_v30 = vpop.permute.xlu1 %1477  ;;  %3655 = vrot.lane.b32.xlu0 %v3615_v35, %s8768_s8  ;;  %7831 = vmatmul.mubr.msk.f32.vlgmr.msra.gmra.mxu0 %vm898_vm1, %v10140_v25  ;;  %v10317_v25 = vpop.f32.mrf.mxu1  ;;  %v3604_v35 = vsub.f32 %v10121_v11, %v9971_v12 }
 0x323   :  { %7833 = vmatprep.mubr.msk.f32.mxu0 %vm898_vm1, %v10173_v41  ;;  %7887 = vmatpush3.msra.mxu0 %v13775_v37  ;;  %13794 = vst [vmem:[#allocation112_spill] sm:$0xff] %v10317_v25  ;;  %v3618_v41 = vmax.f32 %v3602_v28, 0.0 }
 0x324   :  { %3657 = vrot.lane.b32.xlu1 %v3616_v39, %s8768_s8  ;;  %v10312_v14 = vpop.permute.xlu0 %1995  ;;  %7944 = vmatprep.subr.mxu0 %v13775_v37  ;;  %v3073_v39 = vmax.f32 %v3057_v13, 0.0  ;;  %v10333_v46 = vpop.f32.mrf.mxu1  ;;  %v3619_v13 = vmax.f32 %v3603_v24, 0.0 }
 0x325   :  { %13795 = vst [vmem:[#allocation113_spill] sm:$0xff] %v10333_v46 }
 0x326   :  { %v10319_v3 = vpop.permute.xlu1 %1997  ;;  %3659 = vrot.lane.b32.xlu0 %v3617_v56, %s8768_s8  ;;  %7834 = vmatmul.mubr.msk.f32.gmra.mxu0 %vm898_vm1, %v10165_v60  ;;  %v3620_v60 = vmax.f32 %v3604_v35, 0.0  ;;  %v10349_v22 = vpop.f32.mrf.mxu1 }
 0x327   :  { %7836 = vmatprep.mubr.msk.f32.mxu0 %vm898_vm1, %v10195_v19  ;;  %v3606_v19 = vsub.f32 %v10137_v0, %v9986_v26  ;;  %13796 = vst [vmem:[#allocation114_spill] sm:$0xff] %v10349_v22 }
 0x328   :  { %3661 = vrot.lane.b32.xlu1 %v3618_v41, %s8768_s8  ;;  %v10329_v61 = vpop.permute.xlu0 %1999  ;;  %v4139_v41 = vsub.f32 %v10177_v38, %v9868_v47  ;;  %v10365_v0 = vpop.f32.mrf.mxu1 }
 0x329   :  { %13797 = vst [vmem:[#allocation115_spill] sm:$0xff] %v10365_v0 }
 0x32a   :  { %v10335_v56 = vpop.permute.xlu1 %2001  ;;  %3119 = vrot.lane.b32.xlu0 %v3073_v39, %s8768_s8  ;;  %7837 = vmatmul.mubr.msk.f32.gmra.mxu0 %vm898_vm1, %v10188_v58  ;;  %v3622_v58 = vmax.f32 %v3606_v19, 0.0  ;;  %v4155_v35 = vmax.f32 %v4139_v41, 0.0  ;;  %v10381_v11 = vpop.f32.mrf.mxu1 }
 0x32b   :  { %7839 = vmatprep.mubr.msk.f32.mxu0 %vm898_vm1, %v10217_v17  ;;  %v4140_v17 = vsub.f32 %v10161_v32, %v9862_v4  ;;  %13798 = vst [vmem:[#allocation116_spill] sm:$0xff] %v10381_v11 }
 0x32c   :  { %3665 = vrot.lane.b32.xlu1 %v3620_v60, %s8768_s8  ;;  %v10345_v28 = vpop.permute.xlu0 %2003  ;;  %v4141_v60 = vsub.f32 %v10199_v45, %v9884_v48  ;;  %v10397_v54 = vpop.f32.mrf.mxu1 }
 0x32d   :  { %13799 = vst [vmem:[#allocation117_spill] sm:$0xff] %v10397_v54 }
 0x32e   :  { %v10351_v39 = vpop.permute.xlu1 %2005  ;;  %3663 = vrot.lane.b32.xlu0 %v3619_v13, %s8768_s8  ;;  %7840 = vmatmul.mubr.msk.f32.gmra.mxu0 %vm898_vm1, %v10210_v63  ;;  %v4156_v63 = vmax.f32 %v4140_v17, 0.0  ;;  %v4157_v41 = vmax.f32 %v4141_v60, 0.0  ;;  %v10409_v5 = vpop.f32.mrf.mxu1 }
 0x32f   :  { %7842 = vmatprep.mubr.msk.f32.mxu0 %vm898_vm1, %v10239_v62  ;;  %v4142_v62 = vsub.f32 %v10185_v6, %v9874_v27  ;;  %13800 = vst [vmem:[#allocation118_spill] sm:$0xff] %v10409_v5 }
 0x330   :  { %3669 = vrot.lane.b32.xlu1 %v3622_v58, %s8768_s8  ;;  %v10361_v24 = vpop.permute.xlu0 %2007  ;;  %v4143_v58 = vsub.f32 %v10221_v23, %v9901_v50 }
 0x332   :  { %v10367_v13 = vpop.permute.xlu1 %2009  ;;  %4187 = vrot.lane.b32.xlu0 %v4155_v35, %s8768_s8  ;;  %7843 = vmatmul.mubr.msk.f32.gmra.mxu0 %vm898_vm1, %v10232_v29  ;;  %v4158_v29 = vmax.f32 %v4142_v62, 0.0  ;;  %v4159_v60 = vmax.f32 %v4143_v58, 0.0 }
 0x333   :  { %7845 = vmatprep.mubr.msk.f32.mxu0 %vm898_vm1, %v10261_v21  ;;  %v4144_v21 = vsub.f32 %v10207_v20, %v9894_v57  ;;  %v13829_v20 = vld [vmem:[#allocation8_spill] sm:$0xff] }
 0x334   :  { %4189 = vrot.lane.b32.xlu1 %v4156_v63, %s8768_s8  ;;  %v10377_v19 = vpop.permute.xlu0 %2011  ;;  %v4145_v63 = vsub.f32 %v10243_v44, %v9921_v49  ;;  %v848_v6 = vsub.s32 4, %v13829_v20  ;;  %v8749_v20 = vld [vmem:[%s13405_s5] sm:$0xff] }
 0x336   :  { %v10383_v35 = vpop.permute.xlu1 %2013  ;;  %4191 = vrot.lane.b32.xlu0 %v4157_v41, %s8768_s8  ;;  %7846 = vmatmul.mubr.msk.f32.gmra.mxu0 %vm898_vm1, %v10254_v10  ;;  %v4160_v10 = vmax.f32 %v4144_v21, 0.0  ;;  %v4161_v58 = vmax.f32 %v4145_v63, 0.0  ;;  %v4148_v21 = vsub.f32 %v10251_v16, %v9934_v52 }
 0x337   :  { %7848 = vmatprep.mubr.msk.f32.mxu0 %vm898_vm1, %v10295_v9  ;;  %v4146_v9 = vsub.f32 %v10229_v40, %v9914_v2 }
 0x338   :  { %4193 = vrot.lane.b32.xlu1 %v4158_v29, %s8768_s8  ;;  %v10393_v17 = vpop.permute.xlu0 %2015  ;;  %v4147_v29 = vsub.f32 %v10265_v7, %v9941_v31 }
 0x33a   :  { %v10399_v41 = vpop.permute.xlu1 %2017  ;;  %4195 = vrot.lane.b32.xlu0 %v4159_v60, %s8768_s8  ;;  %7849 = vmatmul.mubr.msk.f32.gmra.mxu0 %vm898_vm1, %v10286_v1  ;;  %v4162_v1 = vmax.f32 %v4146_v9, 0.0  ;;  %v4163_v63 = vmax.f32 %v4147_v29, 0.0 }
 0x33c   :  { %4197 = vrot.lane.b32.xlu1 %v4160_v10, %s8768_s8  ;;  %v1476_v62 = vpop.permute.xlu0 %1475  ;;  %v4149_v10 = vsub.f32 %v10283_v51, %v9961_v42 }
 0x33d   :  { %7851 = vmatprep.mubr.msk.f32.mxu0 %vm898_vm1, %v1476_v62  ;;  %v10426_v62 = vpop.f32.mrf.mxu1 }
 0x33e   :  { %v10412_v53 = vpop.permute.xlu1 %2021  ;;  %4199 = vrot.lane.b32.xlu0 %v4161_v58, %s8768_s8  ;;  %7852 = vmatmul.mubr.msk.f32.gmra.mxu0 %vm898_vm1, %v10301_v30  ;;  %13801 = vst [vmem:[#allocation119_spill] sm:$0xff] %v10426_v62  ;;  %v4164_v30 = vmax.f32 %v4148_v21, 0.0  ;;  %v4165_v29 = vmax.f32 %v4149_v10, 0.0 }
 0x33f   :  { %7888 = vmatprep.mubr.msk.f32.mxu0 %vm898_vm1, %v10312_v14  ;;  %v4150_v14 = vsub.f32 %v10273_v55, %v9954_v18 }
 0x340   :  { %4201 = vrot.lane.b32.xlu1 %v4162_v1, %s8768_s8  ;;  %v10422_v60 = vpop.permute.xlu0 %2019  ;;  %v3605_v1 = vsub.f32 %v10153_v36, %v9993_v8 }
 0x342   :  { %v10428_v58 = vpop.permute.xlu1 %2025  ;;  %4203 = vrot.lane.b32.xlu0 %v4163_v63, %s8768_s8  ;;  %7889 = vmatmul.mubr.msk.f32.vlgmr.msra.gmra.mxu0 %vm898_vm1, %v10319_v3  ;;  %v10444_v3 = vpop.f32.mrf.mxu1  ;;  %v4152_v63 = vsub.f32 %v10299_v43, %v9971_v12 }
 0x343   :  { %7891 = vmatprep.mubr.msk.f32.mxu0 %vm898_vm1, %v10329_v61  ;;  %7945 = vmatpush3.msra.mxu0 %v13775_v37  ;;  %13802 = vst [vmem:[#allocation120_spill] sm:$0xff] %v10444_v3  ;;  %v4166_v61 = vmax.f32 %v4150_v14, 0.0 }
 0x344   :  { %4205 = vrot.lane.b32.xlu1 %v4164_v30, %s8768_s8  ;;  %v10439_v9 = vpop.permute.xlu0 %2543  ;;  %8002 = vmatprep.subr.mxu0 %v13775_v37  ;;  %v3621_v37 = vmax.f32 %v3605_v1, 0.0  ;;  %v4151_v30 = vsub.f32 %v10317_v25, %v9976_v33  ;;  %v10460_v36 = vpop.f32.mrf.mxu1 }
 0x345   :  { %13803 = vst [vmem:[#allocation121_spill] sm:$0xff] %v10460_v36 }
 0x346   :  { %v10446_v21 = vpop.permute.xlu1 %2545  ;;  %4207 = vrot.lane.b32.xlu0 %v4165_v29, %s8768_s8  ;;  %7892 = vmatmul.mubr.msk.f32.gmra.mxu0 %vm898_vm1, %v10335_v56  ;;  %v4168_v56 = vmax.f32 %v4152_v63, 0.0  ;;  %v4167_v1 = vmax.f32 %v4151_v30, 0.0  ;;  %v10476_v25 = vpop.f32.mrf.mxu1  ;;  %v4689_v30 = vsub.f32 %v10409_v5, %v9884_v48  ;;  %v10973_v5 = vrot.slane %v8749_v20, %v848_v6  ;;  %v76_v6 = vld [vmem:[%s13406_s2 + $0x70] sm:$0xff] }
 0x347   :  { %7894 = vmatprep.mubr.msk.f32.mxu0 %vm898_vm1, %v10345_v28  ;;  %v4154_v28 = vsub.f32 %v10333_v46, %v9986_v26  ;;  %13804 = vst [vmem:[#allocation122_spill] sm:$0xff] %v10476_v25 }
 0x348   :  { %4209 = vrot.lane.b32.xlu1 %v4166_v61, %s8768_s8  ;;  %v10456_v10 = vpop.permute.xlu0 %2547  ;;  %v4687_v61 = vsub.f32 %v10381_v11, %v9868_v47  ;;  %v4705_v48 = vmax.f32 %v4689_v30, 0.0  ;;  %13831 = vst [vmem:[#allocation142_spill] sm:$0xff] %v10973_v5 }
 0x34a   :  { %v10462_v29 = vpop.permute.xlu1 %2549  ;;  %3667 = vrot.lane.b32.xlu0 %v3621_v37, %s8768_s8  ;;  %7895 = vmatmul.mubr.msk.f32.gmra.mxu0 %vm898_vm1, %v10351_v39  ;;  %v4170_v39 = vmax.f32 %v4154_v28, 0.0  ;;  %v4703_v47 = vmax.f32 %v4687_v61, 0.0  ;;  %v4691_v28 = vsub.f32 %v10444_v3, %v9901_v50 }
 0x34b   :  { %7897 = vmatprep.mubr.msk.f32.mxu0 %vm898_vm1, %v10361_v24  ;;  %v4688_v24 = vsub.f32 %v10365_v0, %v9862_v4 }
 0x34c   :  { %4213 = vrot.lane.b32.xlu1 %v4168_v56, %s8768_s8  ;;  %v10472_v14 = vpop.permute.xlu0 %2551  ;;  %v10492_v56 = vpop.f32.mrf.mxu1  ;;  %v4707_v50 = vmax.f32 %v4691_v28, 0.0 }
 0x34d   :  { %13805 = vst [vmem:[#allocation123_spill] sm:$0xff] %v10492_v56  ;;  %v4704_v4 = vmax.f32 %v4688_v24, 0.0  ;;  %v4693_v24 = vsub.f32 %v10476_v25, %v9921_v49 }
 0x34e   :  { %v10478_v37 = vpop.permute.xlu1 %2553  ;;  %4211 = vrot.lane.b32.xlu0 %v4167_v1, %s8768_s8  ;;  %7898 = vmatmul.mubr.msk.f32.gmra.mxu0 %vm898_vm1, %v10367_v13  ;;  %v4690_v13 = vsub.f32 %v10397_v54, %v9874_v27  ;;  %v10508_v61 = vpop.f32.mrf.mxu1  ;;  %v13549_v54 = vmov 7  }
 0x34f   :  { %7900 = vmatprep.mubr.msk.f32.mxu0 %vm898_vm1, %v10377_v19  ;;  %13806 = vst [vmem:[#allocation124_spill] sm:$0xff] %v10508_v61  ;;  %v4695_v49 = vsub.f32 %v10508_v61, %v9941_v31 }
 0x350   :  { %4217 = vrot.lane.b32.xlu1 %v4170_v39, %s8768_s8  ;;  %v10488_v63 = vpop.permute.xlu0 %2555  ;;  %v4706_v27 = vmax.f32 %v4690_v13, 0.0 }
 0x351   :  { %v4711_v28 = vmax.f32 %v4695_v49, 0.0 }
 0x352   :  { %v10494_v1 = vpop.permute.xlu1 %2557  ;;  %4735 = vrot.lane.b32.xlu0 %v4703_v47, %s8768_s8  ;;  %7901 = vmatmul.mubr.msk.f32.gmra.mxu0 %vm898_vm1, %v10383_v35  ;;  %v4692_v35 = vsub.f32 %v10426_v62, %v9894_v57  ;;  %v10524_v47 = vpop.f32.mrf.mxu1 }
 0x353   :  { %7903 = vmatprep.mubr.msk.f32.mxu0 %vm898_vm1, %v10393_v17  ;;  %13807 = vst [vmem:[#allocation125_spill] sm:$0xff] %v10524_v47 }
 0x354   :  { %4737 = vrot.lane.b32.xlu1 %v4704_v4, %s8768_s8  ;;  %v10504_v19 = vpop.permute.xlu0 %2559  ;;  %v4708_v57 = vmax.f32 %v4692_v35, 0.0  ;;  %v4709_v4 = vmax.f32 %v4693_v24, 0.0  ;;  %v10536_v13 = vpop.f32.mrf.mxu1 }
 0x355   :  { %13808 = vst [vmem:[#allocation126_spill] sm:$0xff] %v10536_v13 }
 0x356   :  { %v10510_v39 = vpop.permute.xlu1 %2561  ;;  %4739 = vrot.lane.b32.xlu0 %v4705_v48, %s8768_s8  ;;  %7904 = vmatmul.mubr.msk.f32.gmra.mxu0 %vm898_vm1, %v10399_v41  ;;  %v4694_v41 = vsub.f32 %v10460_v36, %v9914_v2  ;;  %v4696_v2 = vsub.f32 %v10492_v56, %v9934_v52  ;;  %v10553_v35 = vpop.f32.mrf.mxu1 }
 0x357   :  { %7906 = vmatprep.mubr.msk.f32.mxu0 %vm898_vm1, %v10422_v60  ;;  %13809 = vst [vmem:[#allocation127_spill] sm:$0xff] %v10553_v35 }
 0x358   :  { %4741 = vrot.lane.b32.xlu1 %v4706_v27, %s8768_s8  ;;  %v10520_v17 = vpop.permute.xlu0 %2563  ;;  %v4697_v27 = vsub.f32 %v10536_v13, %v9961_v42  ;;  %v4712_v52 = vmax.f32 %v4696_v2, 0.0  ;;  %v10567_v42 = vld [vmem:[%s13404_s4 + $0x60] sm:$0xff] }
 0x35a   :  { %v10526_v30 = vpop.permute.xlu1 %2565  ;;  %4743 = vrot.lane.b32.xlu0 %v4707_v50, %s8768_s8  ;;  %7907 = vmatmul.mubr.msk.f32.gmra.mxu0 %vm898_vm1, %v10412_v53  ;;  %v4710_v53 = vmax.f32 %v4694_v41, 0.0  ;;  %v4713_v24 = vmax.f32 %v4697_v27, 0.0  ;;  %v4700_v41 = vsub.f32 %v10553_v35, %v9971_v12 }
 0x35c   :  { %4745 = vrot.lane.b32.xlu1 %v4708_v57, %s8768_s8  ;;  %v2024_v60 = vpop.permute.xlu0 %2023  ;;  %v4716_v12 = vmax.f32 %v4700_v41, 0.0 }
 0x35d   :  { %7909 = vmatprep.mubr.msk.f32.mxu0 %vm898_vm1, %v2024_v60 }
 0x35e   :  { %v10539_v48 = vpop.permute.xlu1 %2569  ;;  %4747 = vrot.lane.b32.xlu0 %v4709_v4, %s8768_s8  ;;  %7910 = vmatmul.mubr.msk.f32.gmra.mxu0 %vm898_vm1, %v10428_v58  ;;  %v4698_v58 = vsub.f32 %v10524_v47, %v9954_v18  ;;  %v10576_v18 = vpop.f32.mrf.mxu1  ;;  %v13821_v47 = vmov 4  }
 0x35f   :  { %7946 = vmatprep.mubr.msk.f32.mxu0 %vm898_vm1, %v10439_v9  ;;  %13810 = vst [vmem:[#allocation128_spill] sm:$0xff] %v10576_v18  ;;  %v4699_v49 = vsub.f32 %v10576_v18, %v9976_v33  ;;  %v62_v33 = vld [vmem:[%s13406_s2] sm:$0xff] }
 0x360   :  { %4749 = vrot.lane.b32.xlu1 %v4710_v53, %s8768_s8  ;;  %v10549_v31 = vpop.permute.xlu0 %2567  ;;  %v4714_v57 = vmax.f32 %v4698_v58, 0.0  ;;  %v10592_v53 = vpop.f32.mrf.mxu1  ;;  %vm1076_vm3 = vcmp.eq.f32.partialorder %v62_v33, 0.0  ;;  %v13508_v33 = vmov 2  }
 0x361   :  { %13811 = vst [vmem:[#allocation129_spill] sm:$0xff] %v10592_v53  ;;  %v4715_v27 = vmax.f32 %v4699_v49, 0.0 }
 0x362   :  { %v10555_v50 = vpop.permute.xlu1 %2573  ;;  %4751 = vrot.lane.b32.xlu0 %v4711_v28, %s8768_s8  ;;  %7947 = vmatmul.mubr.msk.f32.vlgmr.msra.gmra.mxu0 %vm898_vm1, %v10446_v21  ;;  %v4153_v21 = vsub.f32 %v10349_v22, %v9993_v8  ;;  %v13516_v22 = vmov 4  }
 0x363   :  { %7949 = vmatprep.mubr.msk.f32.mxu0 %vm898_vm1, %v10456_v10  ;;  %8003 = vmatpush3.msra.mxu0 %v10567_v42 }
 0x364   :  { %4753 = vrot.lane.b32.xlu1 %v4712_v52, %s8768_s8  ;;  %v10571_v9 = vpop.permute.xlu0 %3091  ;;  %8060 = vmatprep.subr.mxu0 %v10567_v42  ;;  %v4169_v4 = vmax.f32 %v4153_v21, 0.0 }
 0x366   :  { %v10578_v10 = vpop.permute.xlu1 %3093  ;;  %4755 = vrot.lane.b32.xlu0 %v4713_v24, %s8768_s8  ;;  %7950 = vmatmul.mubr.msk.f32.gmra.mxu0 %vm898_vm1, %v10462_v29  ;;  %v63_v29 = vld [vmem:[%s13406_s2 + $0x8] sm:$0xff] }
 0x367   :  { %7952 = vmatprep.mubr.msk.f32.mxu0 %vm898_vm1, %v10472_v14  ;;  %v4702_v14 = vsub.f32 %v10592_v53, %v9986_v26  ;;  %vm1077_vm2 = vcmp.eq.f32.partialorder %v63_v29, 0.0  ;;  %v74_v29 = vld [vmem:[%s13406_s2 + $0x60] sm:$0xff]  ;;  %v13523_v53 = vmov 5  }
 0x368   :  { %4757 = vrot.lane.b32.xlu1 %v4714_v57, %s8768_s8  ;;  %v10588_v60 = vpop.permute.xlu0 %3095  ;;  %vm1088_vm7 = vcmp.eq.f32.partialorder %v74_v29, 0.0 }
 0x369   :  { %v4718_v26 = vmax.f32 %v4702_v14, 0.0  ;;  %v10675_v14 = vpop.f32.mrf.mxu1 }
 0x36a   :  { %v10597_v2 = vpop.permute.xlu1 %3097  ;;  %4215 = vrot.lane.b32.xlu0 %v4169_v4, %s8768_s8  ;;  %7953 = vmatmul.mubr.msk.f32.gmra.mxu0 %vm898_vm1, %v10478_v37  ;;  %v66_v37 = vld [vmem:[%s13406_s2 + $0x20] sm:$0xff]  ;;  %v73_v4 = vld [vmem:[%s13406_s2 + $0x58] sm:$0xff]  ;;  %13813 = vst [vmem:[#allocation131_spill] sm:$0xff] %v10675_v14 }
 0x36b   :  { %7955 = vmatprep.mubr.msk.f32.mxu0 %vm898_vm1, %v10488_v63  ;;  %v13514_v63 = vmov 0   ;;  %vm1080_vm4 = vcmp.eq.f32.partialorder %v66_v37, 0.0  ;;  %vm1087_vm6 = vcmp.eq.f32.partialorder %v73_v4, 0.0  ;;  %v65_v4 = vld [vmem:[%s13406_s2 + $0x18] sm:$0xff] }
 0x36c   :  { %4761 = vrot.lane.b32.xlu1 %v4716_v12, %s8768_s8  ;;  %v10610_v28 = vpop.permute.xlu0 %3099  ;;  %v10623_v58 = vsel %vm1077_vm2, 1, %v13514_v63  ;;  %v10629_v21 = vsel %vm1076_vm3, 1, %v13514_v63  ;;  %v10689_v37 = vsel %vm1088_vm7, 1, %v13514_v63  ;;  %vm1079_vm9 = vcmp.eq.f32.partialorder %v65_v4, 0.0 }
 0x36d   :  { %13814 = vst [vmem:[#allocation132_spill] sm:$0xff] %v10689_v37 }
 0x36e   :  { %v10615_v52 = vpop.permute.xlu1 %3101  ;;  %4759 = vrot.lane.b32.xlu0 %v4715_v27, %s8768_s8  ;;  %7956 = vmatmul.mubr.msk.f32.gmra.mxu0 %vm898_vm1, %v10494_v1  ;;  %v68_v1 = vld [vmem:[%s13406_s2 + $0x30] sm:$0xff] }
 0x36f   :  { %7958 = vmatprep.mubr.msk.f32.mxu0 %vm898_vm1, %v10504_v19  ;;  %v10642_v19 = vsel %vm1080_vm4, 1, %v13514_v63  ;;  %vm1082_vm5 = vcmp.eq.f32.partialorder %v68_v1, 0.0  ;;  %v4701_v1 = vsub.f32 %v10675_v14, %v9993_v8  ;;  %vm1090_vm4 = vcmp.eq.f32.partialorder %v76_v6, 0.0 }
 0x370   :  { %4765 = vrot.lane.b32.xlu1 %v4718_v26, %s8768_s8  ;;  %v10626_v24 = vpop.permute.xlu0 %3103  ;;  %v13840_v6 = vmov 6  }
 0x372   :  { %v10634_v57 = vpop.permute.xlu1 %3105  ;;  %1660 = vperm.xlu0 %8310, %v10623_v58   ;;  %7959 = vmatmul.mubr.msk.f32.gmra.mxu0 %vm898_vm1, %v10510_v39  ;;  %v10658_v39 = vsel %vm1082_vm5, 1, %v13514_v63 }
 0x373   :  { %7961 = vmatprep.mubr.msk.f32.mxu0 %vm898_vm1, %v10520_v17 }
 0x374   :  { %1657 = vperm.xlu1 %8308, %v10629_v21   ;;  %v10645_v41 = vpop.permute.xlu0 %3107 }
 0x376   :  { %v10650_v49 = vpop.permute.xlu1 %3109  ;;  %1669 = vperm.xlu0 %8310, %v10642_v19   ;;  %7962 = vmatmul.mubr.msk.f32.gmra.mxu0 %vm898_vm1, %v10526_v30  ;;  %v10673_v30 = vsel %vm1087_vm6, 1, %v13514_v63 }
 0x377   :  { %7964 = vmatprep.mubr.msk.f32.mxu0 %vm898_vm1, %v10549_v31  ;;  %13812 = vst [vmem:[#allocation130_spill] sm:$0xff] %v10673_v30 }
 0x378   :  { %8309 = vset.pattern.permute.xlu1 %v13514_v63  ;;  %v10661_v17 = vpop.permute.xlu0 %3111 }
 0x379   :  { %1112 = vperm.xlu1 %8309, %v10623_v58  }
 0x37a   :  { %v10667_v12 = vpop.permute.xlu1 %3113  ;;  %1675 = vperm.xlu0 %8310, %v10658_v39   ;;  %7965 = vmatmul.mubr.msk.f32.gmra.mxu0 %vm898_vm1, %v10539_v48  ;;  %v64_v48 = vld [vmem:[%s13406_s2 + $0x10] sm:$0xff] }
 0x37b   :  { %vm1078_vm8 = vcmp.eq.f32.partialorder %v64_v48, 0.0 }
 0x37c   :  { %v2572_v31 = vpop.permute.xlu0 %2571  ;;  %v10707_v8 = vsel %vm1078_vm8, 1, %v13514_v63 }
 0x37d   :  { %8311 = vset.pattern.permute.xlu1 %v13508_v33  ;;  %7967 = vmatprep.mubr.msk.f32.mxu0 %vm898_vm1, %v2572_v31  ;;  %v13815_v31 = vmov 1  }
 0x37e   :  { %2205 = vperm.xlu1 %8311, %v10629_v21   ;;  %v10680_v27 = vpop.permute.xlu1 %3117  ;;  %1690 = vperm.xlu0 %8310, %v10673_v30  }
 0x37f   :  { %7968 = vmatmul.mubr.msk.f32.gmra.mxu0 %vm898_vm1, %v10555_v50 }
 0x380   :  { %8004 = vmatprep.mubr.msk.f32.mxu0 %vm898_vm1, %v10571_v9  ;;  %v3116_v26 = vpop.permute.xlu0 %3115  ;;  %v4717_v9 = vmax.f32 %v4701_v1, 0.0  ;;  %v69_v1 = vld [vmem:[%s13406_s2 + $0x38] sm:$0xff] }
 0x381   :  { %vm1083_vm10 = vcmp.eq.f32.partialorder %v69_v1, 0.0 }
 0x382   :  { %2208 = vperm.xlu1 %8311, %v10623_v58   ;;  %v10699_v29 = vpop.permute.xlu1 %3121  ;;  %1693 = vperm.xlu0 %8310, %v10689_v37  }
 0x383   :  { %8005 = vmatmul.mubr.msk.f32.vlgmr.msra.gmra.mxu0 %vm898_vm1, %v10578_v10  ;;  %v10717_v10 = vsel %vm1079_vm9, 1, %v13514_v63 }
 0x384   :  { %8007 = vmatprep.mubr.msk.f32.mxu0 %vm898_vm1, %v10588_v60  ;;  %v3640_v50 = vpop.permute.xlu0 %3639  ;;  %8061 = vmatpush3.msra.mxu0 %v10567_v42 }
 0x385   :  { %8118 = vmatprep.subr.mxu0 %v10567_v42 }
 0x386   :  { %8312 = vset.pattern.permute.xlu1 %v13815_v31  ;;  %v3642_v48 = vpop.permute.xlu1 %3641  ;;  %4763 = vrot.lane.b32.xlu0 %v4717_v9, %s8768_s8 }
 0x387   :  { %8008 = vmatmul.mubr.msk.f32.gmra.mxu0 %vm898_vm1, %v10597_v2  ;;  %1663 = vperm.xlu1 %8312, %v10707_v8   ;;  %v13510_v2 = vmov 3  }
 0x388   :  { %8010 = vmatprep.mubr.msk.f32.mxu0 %vm898_vm1, %v10610_v28  ;;  %v3644_v60 = vpop.permute.xlu0 %3643  ;;  %8358 = vset.pattern.permute.xlu0 %v13508_v33  ;;  %v10736_v33 = vsel %vm1083_vm10, 1, %v13514_v63 }
 0x38a   :  { %v3646_v4 = vpop.permute.xlu1 %3645  ;;  %2214 = vperm.xlu0 %8358, %v10717_v10  }
 0x38b   :  { %8011 = vmatmul.mubr.msk.f32.gmra.mxu0 %vm898_vm1, %v10615_v52  ;;  %8313 = vset.pattern.permute.xlu1 %v13510_v2 }
 0x38c   :  { %8013 = vmatprep.mubr.msk.f32.mxu0 %vm898_vm1, %v10626_v24  ;;  %2753 = vperm.xlu1 %8313, %v10629_v21   ;;  %v3648_v28 = vpop.permute.xlu0 %3647  ;;  %v75_v24 = vld [vmem:[%s13406_s2 + $0x68] sm:$0xff] }
 0x38d   :  { %vm1089_vm11 = vcmp.eq.f32.partialorder %v75_v24, 0.0 }
 0x38e   :  { %v3650_v9 = vpop.permute.xlu1 %3649  ;;  %2223 = vperm.xlu0 %8358, %v10658_v39   ;;  %v10756_v14 = vsel %vm1089_vm11, 1, %v13514_v63  ;;  %v13518_v63 = vmov 6  }
 0x38f   :  { %8014 = vmatmul.mubr.msk.f32.gmra.mxu0 %vm898_vm1, %v10634_v57  ;;  %13817 = vst [vmem:[#allocation133_spill] sm:$0xff] %v10756_v14 }
 0x390   :  { %8016 = vmatprep.mubr.msk.f32.mxu0 %vm898_vm1, %v10645_v41  ;;  %8314 = vset.pattern.permute.xlu1 %v13815_v31  ;;  %v3652_v52 = vpop.permute.xlu0 %3651  ;;  %v13816_v41 = vmov 2  }
 0x391   :  { %1666 = vperm.xlu1 %8314, %v10717_v10  }
 0x392   :  { %v3654_v1 = vpop.permute.xlu1 %3653  ;;  %2226 = vperm.xlu0 %8358, %v10736_v33  }
 0x393   :  { %8017 = vmatmul.mubr.msk.f32.gmra.mxu0 %vm898_vm1, %v10650_v49 }
 0x394   :  { %8019 = vmatprep.mubr.msk.f32.mxu0 %vm898_vm1, %v10661_v17  ;;  %v3656_v57 = vpop.permute.xlu0 %3655 }
 0x395   :  { %8315 = vset.pattern.permute.xlu1 %v13816_v41 }
 0x396   :  { %2211 = vperm.xlu1 %8315, %v10707_v8   ;;  %v3658_v2 = vpop.permute.xlu1 %3657  ;;  %2241 = vperm.xlu0 %8358, %v10689_v37  }
 0x397   :  { %8020 = vmatmul.mubr.msk.f32.gmra.mxu0 %vm898_vm1, %v10667_v12 }
 0x398   :  { %8022 = vmatprep.mubr.msk.f32.mxu0 %vm898_vm1, %v3116_v26  ;;  %v3660_v49 = vpop.permute.xlu0 %3659 }
 0x39a   :  { %8316 = vset.pattern.permute.xlu1 %v13516_v22  ;;  %v3662_v17 = vpop.permute.xlu1 %3661  ;;  %2244 = vperm.xlu0 %8358, %v10756_v14   ;;  %v13818_v22 = vmov 0  }
 0x39b   :  { %8023 = vmatmul.mubr.msk.f32.gmra.mxu0 %vm898_vm1, %v10680_v27  ;;  %3301 = vperm.xlu1 %8316, %v10629_v21  }
 0x39c   :  { %v3120_v24 = vpop.permute.xlu0 %3119 }
 0x39d   :  { %8025 = vmatprep.mubr.msk.f32.mxu0 %vm898_vm1, %v3120_v24 }
 0x39e   :  { %v3666_v12 = vpop.permute.xlu1 %3665  ;;  %8367 = vset.pattern.permute.xlu0 %v13518_v63  ;;  %v67_v63 = vld [vmem:[%s13406_s2 + $0x28] sm:$0xff] }
 0x39f   :  { %8026 = vmatmul.mubr.msk.f32.gmra.mxu0 %vm898_vm1, %v10699_v29  ;;  %3304 = vperm.xlu1 %8316, %v10623_v58   ;;  %vm1081_vm12 = vcmp.eq.f32.partialorder %v67_v63, 0.0 }
 0x3a0   :  { %4397 = vperm.xlu0 %8367, %v10629_v21   ;;  %8062 = vmatprep.mubr.msk.f32.mxu0 %vm898_vm1, %v3640_v50  ;;  %v3664_v26 = vpop.permute.xlu0 %3663  ;;  %v10802_v46 = vsel %vm1081_vm12, 1, %v13818_v22 }
 0x3a2   :  { %v3670_v27 = vpop.permute.xlu1 %3669 }
 0x3a3   :  { %8063 = vmatmul.mubr.msk.f32.vlgmr.msra.gmra.mxu0 %vm898_vm1, %v3642_v48  ;;  %8317 = vset.pattern.permute.xlu1 %v13818_v22  ;;  %v13819_v48 = vmov 3  }
 0x3a4   :  { %4400 = vperm.xlu0 %8367, %v10623_v58   ;;  %8065 = vmatprep.mubr.msk.f32.mxu0 %vm898_vm1, %v3644_v60  ;;  %v4188_v24 = vpop.permute.xlu0 %4187 }
 0x3a5   :  { %1121 = vperm.xlu1 %8317, %v10642_v19   ;;  %8119 = vmatpush3.msra.mxu0 %v10567_v42 }
 0x3a6   :  { %v4190_v29 = vpop.permute.xlu1 %4189  ;;  %8176 = vmatprep.subr.mxu0 %v10567_v42 }
 0x3a7   :  { %8066 = vmatmul.mubr.msk.f32.gmra.mxu0 %vm898_vm1, %v3646_v4  ;;  %v71_v4 = vld [vmem:[%s13406_s2 + $0x48] sm:$0xff] }
 0x3a8   :  { %4406 = vperm.xlu0 %8367, %v10717_v10   ;;  %8068 = vmatprep.mubr.msk.f32.mxu0 %vm898_vm1, %v3648_v28  ;;  %v4192_v50 = vpop.permute.xlu0 %4191  ;;  %vm1085_vm13 = vcmp.eq.f32.partialorder %v71_v4, 0.0 }
 0x3a9   :  { %8318 = vset.pattern.permute.xlu1 %v13819_v48 }
 0x3aa   :  { %2759 = vperm.xlu1 %8318, %v10707_v8   ;;  %v10783_v60 = vpop.permute.xlu1 %4193 }
 0x3ab   :  { %8069 = vmatmul.mubr.msk.f32.gmra.mxu0 %vm898_vm1, %v3650_v9 }
 0x3ac   :  { %4415 = vperm.xlu0 %8367, %v10658_v39   ;;  %8071 = vmatprep.mubr.msk.f32.mxu0 %vm898_vm1, %v3652_v52  ;;  %v4196_v28 = vpop.permute.xlu0 %4195  ;;  %v10805_v52 = vsel %vm1085_vm13, 1, %v13818_v22 }
 0x3ad   :  { %13820 = vst [vmem:[#allocation134_spill] sm:$0xff] %v10805_v52 }
 0x3ae   :  { %8319 = vset.pattern.permute.xlu1 %v13523_v53  ;;  %v10795_v18 = vpop.permute.xlu1 %4197 }
 0x3af   :  { %3849 = vperm.xlu1 %8319, %v10629_v21   ;;  %8072 = vmatmul.mubr.msk.f32.gmra.mxu0 %vm898_vm1, %v3654_v1  ;;  %v10814_v1 = vpop.f32.mrf.mxu0 }
 0x3b0   :  { %4418 = vperm.xlu0 %8367, %v10736_v33   ;;  %8074 = vmatprep.mubr.msk.f32.mxu0 %vm898_vm1, %v3656_v57  ;;  %v4200_v9 = vpop.permute.xlu0 %4199  ;;  %v1003_v20 = vadd.f32 %v10814_v1, %v10973_v5 }
 0x3b2   :  { %v10807_v53 = vpop.permute.xlu1 %4201 }
 0x3b3   :  { %8320 = vset.pattern.permute.xlu1 %v13815_v31  ;;  %8075 = vmatmul.mubr.msk.f32.gmra.mxu0 %vm898_vm1, %v3658_v2  ;;  %v10825_v2 = vpop.f32.mrf.mxu0 }
 0x3b4   :  { %1672 = vperm.xlu1 %8320, %v10802_v46   ;;  %4424 = vperm.xlu0 %8367, %v10805_v52   ;;  %v4204_v63 = vpop.permute.xlu0 %4203 }
 0x3b5   :  { %8077 = vmatprep.mubr.msk.f32.mxu0 %vm898_vm1, %v3660_v49  ;;  %v10831_v35 = vpop.f32.mrf.mxu0 }
 0x3b6   :  { %v10816_v57 = vpop.permute.xlu1 %4205 }
 0x3b7   :  { %8078 = vmatmul.mubr.msk.f32.gmra.mxu0 %vm898_vm1, %v3662_v17  ;;  %v10840_v43 = vpop.f32.mrf.mxu0 }
 0x3b8   :  { %8321 = vset.pattern.permute.xlu1 %v13819_v48  ;;  %8369 = vset.pattern.permute.xlu0 %v13818_v22  ;;  %v10821_v4 = vpop.permute.xlu0 %4207 }
 0x3b9   :  { %8080 = vmatprep.mubr.msk.f32.mxu0 %vm898_vm1, %v3664_v26  ;;  %2762 = vperm.xlu1 %8321, %v10717_v10  }
 0x3ba   :  { %1109 = vperm.xlu0 %8369, %v10629_v21   ;;  %v10828_v49 = vpop.permute.xlu1 %4209  ;;  %v10843_v13 = vpop.f32.mrf.mxu0 }
 0x3bb   :  { %8081 = vmatmul.mubr.msk.f32.gmra.mxu0 %vm898_vm1, %v3666_v12 }
 0x3bc   :  { %v3668_v17 = vpop.permute.xlu0 %3667  ;;  %v10858_v51 = vpop.f32.mrf.mxu0 }
 0x3bd   :  { %8322 = vset.pattern.permute.xlu1 %v13816_v41  ;;  %8083 = vmatprep.mubr.msk.f32.mxu0 %vm898_vm1, %v3668_v17 }
 0x3be   :  { %1115 = vperm.xlu0 %8369, %v10707_v8   ;;  %2217 = vperm.xlu1 %8322, %v10642_v19   ;;  %v10837_v26 = vpop.permute.xlu1 %4213 }
 0x3bf   :  { %8084 = vmatmul.mubr.msk.f32.gmra.mxu0 %vm898_vm1, %v3670_v27 }
 0x3c0   :  { %8120 = vmatprep.mubr.msk.f32.mxu0 %vm898_vm1, %v4188_v24  ;;  %v4212_v12 = vpop.permute.xlu0 %4211  ;;  %v72_v24 = vld [vmem:[%s13406_s2 + $0x50] sm:$0xff] }
 0x3c1   :  { %vm1086_vm14 = vcmp.eq.f32.partialorder %v72_v24, 0.0 }
 0x3c2   :  { %1118 = vperm.xlu0 %8369, %v10717_v10   ;;  %8323 = vset.pattern.permute.xlu1 %v13821_v47  ;;  %v10847_v17 = vpop.permute.xlu1 %4217 }
 0x3c3   :  { %3307 = vperm.xlu1 %8323, %v10707_v8   ;;  %8121 = vmatmul.mubr.msk.f32.vlgmr.msra.gmra.mxu0 %vm898_vm1, %v4190_v29  ;;  %v10864_v29 = vpop.f32.mrf.mxu0 }
 0x3c4   :  { %8123 = vmatprep.mubr.msk.f32.mxu0 %vm898_vm1, %v4192_v50  ;;  %v10852_v27 = vpop.permute.xlu0 %4735  ;;  %8177 = vmatpush3.msra.mxu0 %v10567_v42  ;;  %v77_v50 = vld [vmem:[%s13406_s2 + $0x78] sm:$0xff] }
 0x3c5   :  { %v10877_v16 = vpop.f32.mrf.mxu0  ;;  %vm1091_vm15 = vcmp.eq.f32.partialorder %v77_v50, 0.0 }
 0x3c6   :  { %1124 = vperm.xlu0 %8369, %v10802_v46   ;;  %v4738_v55 = vpop.permute.xlu1 %4737 }
 0x3c7   :  { %8324 = vset.pattern.permute.xlu1 %v13816_v41  ;;  %8124 = vmatmul.mubr.msk.f32.gmra.mxu0 %vm898_vm1, %v10783_v60  ;;  %v10875_v60 = vsel %vm1086_vm14, 1, %v13818_v22 }
 0x3c8   :  { %2220 = vperm.xlu1 %8324, %v10802_v46   ;;  %8126 = vmatprep.mubr.msk.f32.mxu0 %vm898_vm1, %v4196_v28  ;;  %v4740_v42 = vpop.permute.xlu0 %4739 }
 0x3ca   :  { %1136 = vperm.xlu0 %8369, %v10805_v52   ;;  %v4742_v56 = vpop.permute.xlu1 %4741  ;;  %v10882_v24 = vpop.f32.mrf.mxu0 }
 0x3cb   :  { %8127 = vmatmul.mubr.msk.f32.gmra.mxu0 %vm898_vm1, %v10795_v18  ;;  %v10888_v18 = vsel %vm1091_vm15, 1, %v13818_v22 }
 0x3cc   :  { %8325 = vset.pattern.permute.xlu1 %v13821_v47  ;;  %8129 = vmatprep.mubr.msk.f32.mxu0 %vm898_vm1, %v4200_v9  ;;  %v4744_v28 = vpop.permute.xlu0 %4743  ;;  %13822 = vst [vmem:[#allocation135_spill] sm:$0xff] %v10888_v18  ;;  %v10892_v9 = vpop.f32.mrf.mxu0 }
 0x3cd   :  { %3310 = vperm.xlu1 %8325, %v10717_v10   ;;  %13823 = vst [vmem:[#allocation136_spill] sm:$0xff] %v10892_v9 }
 0x3ce   :  { %1139 = vperm.xlu0 %8369, %v10875_v60   ;;  %v4746_v61 = vpop.permute.xlu1 %4745 }
 0x3cf   :  { %8130 = vmatmul.mubr.msk.f32.gmra.mxu0 %vm898_vm1, %v10807_v53 }
 0x3d0   :  { %8132 = vmatprep.mubr.msk.f32.mxu0 %vm898_vm1, %v4204_v63  ;;  %v4748_v7 = vpop.permute.xlu0 %4747  ;;  %v13825_v63 = vmov 5  }
 0x3d1   :  { %8326 = vset.pattern.permute.xlu1 %v13818_v22 }
 0x3d2   :  { %1154 = vperm.xlu0 %8369, %v10888_v18   ;;  %1127 = vperm.xlu1 %8326, %v10658_v39   ;;  %v4750_v50 = vpop.permute.xlu1 %4749  ;;  %v10898_v36 = vpop.f32.mrf.mxu0 }
 0x3d3   :  { %8133 = vmatmul.mubr.msk.f32.gmra.mxu0 %vm898_vm1, %v10816_v57  ;;  %13824 = vst [vmem:[#allocation137_spill] sm:$0xff] %v10898_v36  ;;  %v13852_v36 = vmov 7  }
 0x3d4   :  { %8135 = vmatprep.mubr.msk.f32.mxu0 %vm898_vm1, %v10821_v4  ;;  %v4752_v53 = vpop.permute.xlu0 %4751  ;;  %v10906_v40 = vpop.f32.mrf.mxu0 }
 0x3d6   :  { %8374 = vset.pattern.permute.xlu0 %v13825_v63  ;;  %8327 = vset.pattern.permute.xlu1 %v13819_v48  ;;  %v4754_v34 = vpop.permute.xlu1 %4753 }
 0x3d7   :  { %3852 = vperm.xlu0 %8374, %v10623_v58   ;;  %2765 = vperm.xlu1 %8327, %v10642_v19  }
 0x3d8   :  { %8136 = vmatmul.mubr.msk.f32.gmra.mxu0 %vm898_vm1, %v10828_v49  ;;  %v10910_v57 = vpop.permute.xlu0 %4755 }
 0x3d9   :  { %8138 = vmatprep.mubr.msk.f32.mxu0 %vm898_vm1, %v4212_v12 }
 0x3da   :  { %v10913_v4 = vpop.f32.mrf.mxu0  ;;  %v10925_v62 = vpop.permute.xlu1 %4757 }
 0x3db   :  { %13826 = vst [vmem:[#allocation138_spill] sm:$0xff] %v10913_v4  ;;  %3864 = vperm.xlu0 %8374, %v10802_v46   ;;  %8328 = vset.pattern.permute.xlu1 %v13825_v63 }
 0x3dc   :  { %8139 = vmatmul.mubr.msk.f32.gmra.mxu0 %vm898_vm1, %v10837_v26  ;;  %3855 = vperm.xlu1 %8328, %v10707_v8   ;;  %v10920_v25 = vpop.f32.mrf.mxu0  ;;  %v4216_v44 = vpop.permute.xlu0 %4215 }
 0x3dd   :  { %13827 = vst [vmem:[#allocation139_spill] sm:$0xff] %v10920_v25  ;;  %8141 = vmatprep.mubr.msk.f32.mxu0 %vm898_vm1, %v4216_v44 }
 0x3de   :  { %v10923_v49 = vpop.f32.mrf.mxu0  ;;  %v10940_v23 = vpop.permute.xlu1 %4761 }
 0x3df   :  { %3867 = vperm.xlu0 %8374, %v10658_v39  }
 0x3e0   :  { %8142 = vmatmul.mubr.msk.f32.gmra.mxu0 %vm898_vm1, %v10847_v17  ;;  %8329 = vset.pattern.permute.xlu1 %v13818_v22  ;;  %v10931_v12 = vpop.f32.mrf.mxu0 }
 0x3e1   :  { %13828 = vst [vmem:[#allocation140_spill] sm:$0xff] %v10931_v12  ;;  %8178 = vmatprep.mubr.msk.f32.mxu0 %vm898_vm1, %v10852_v27  ;;  %1130 = vperm.xlu1 %8329, %v10736_v33  }
 0x3e2   :  { %v7832_v26 = vpop.f32.mrf.mxu0  ;;  %v10956_v3 = vpop.permute.xlu1 %4765 }
 0x3e3   :  { %3882 = vperm.xlu0 %8374, %v10673_v30  }
 0x3e4   :  { %8179 = vmatmul.mubr.msk.f32.vlgmr.msra.gmra.mxu0 %vm898_vm1, %v4738_v55  ;;  %v10938_v44 = vpop.f32.mrf.mxu0  ;;  %v4760_v55 = vpop.permute.xlu0 %4759 }
 0x3e5   :  { %8181 = vmatprep.mubr.msk.f32.mxu0 %vm898_vm1, %v4740_v42  ;;  %8330 = vset.pattern.permute.xlu1 %v13815_v31 }
 0x3e6   :  { %1678 = vperm.xlu1 %8330, %v10736_v33   ;;  %v10945_v17 = vpop.f32.mrf.mxu0 }
 0x3e7   :  { %8377 = vset.pattern.permute.xlu0 %v13819_v48 }
 0x3e8   :  { %2756 = vperm.xlu0 %8377, %v10623_v58   ;;  %8182 = vmatmul.mubr.msk.f32.gmra.mxu0 %vm898_vm1, %v4742_v56  ;;  %v10950_v27 = vpop.f32.mrf.mxu0 }
 0x3e9   :  { %8184 = vmatprep.mubr.msk.f32.mxu0 %vm898_vm1, %v4744_v28 }
 0x3ea   :  { %8331 = vset.pattern.permute.xlu1 %v13825_v63  ;;  %v10954_v42 = vpop.f32.mrf.mxu0 }
 0x3eb   :  { %3858 = vperm.xlu1 %8331, %v10717_v10  }
 0x3ec   :  { %2768 = vperm.xlu0 %8377, %v10802_v46   ;;  %8185 = vmatmul.mubr.msk.f32.gmra.mxu0 %vm898_vm1, %v4746_v61  ;;  %v10962_v56 = vpop.f32.mrf.mxu0 }
 0x3ed   :  { %8187 = vmatprep.mubr.msk.f32.mxu0 %vm898_vm1, %v4748_v7  ;;  %v1661_v45 = vpop.permute.xlu0 %1660 }
 0x3ee   :  { %v10965_v28 = vpop.f32.mrf.mxu0  ;;  %vm1705_vm2 = vcmp.eq.s32.totalorder %v1661_v45, 1 }
 0x3ef   :  { %13830 = vst [vmem:[#allocation141_spill] sm:$0xff] %v10965_v28  ;;  %8332 = vset.pattern.permute.xlu1 %v13549_v54  ;;  %v10968_v38 = vpop.permute.xlu1 %1657  ;;  %v1018_v28 = vadd.f32 %v10858_v51, %v10973_v5 }
 0x3f0   :  { %2771 = vperm.xlu0 %8377, %v10658_v39   ;;  %8188 = vmatmul.mubr.msk.f32.gmra.mxu0 %vm898_vm1, %v4750_v50  ;;  %v10977_v61 = vpop.f32.mrf.mxu0  ;;  %v1583_v50 = vadd.f32 %v7832_v26, %v10973_v5 }
 0x3f1   :  { %4948 = vperm.xlu1 %8332, %v10623_v58   ;;  %8190 = vmatprep.mubr.msk.f32.mxu0 %vm898_vm1, %v4752_v53  ;;  %v10981_v7 = vpop.permute.xlu0 %1669 }
 0x3f2   :  { %v10983_v54 = vpop.f32.mrf.mxu0  ;;  %v11000_v11 = vsel %vm1705_vm2, -1e+09, %v1583_v50  ;;  %vm1708_vm8 = vcmp.eq.s32.totalorder %v10981_v7, 1 }
 0x3f3   :  { %13832 = vst [vmem:[#allocation143_spill] sm:$0xff] %v10983_v54  ;;  %13834 = vst [vmem:[#allocation145_spill] sm:$0xff] %v11000_v11 }
 0x3f4   :  { %2786 = vperm.xlu0 %8377, %v10673_v30   ;;  %8191 = vmatmul.mubr.msk.f32.gmra.mxu0 %vm898_vm1, %v4754_v34  ;;  %v1113_v58 = vpop.permute.xlu1 %1112  ;;  %v10993_v53 = vpop.f32.mrf.mxu0 }
 0x3f5   :  { %13833 = vst [vmem:[#allocation144_spill] sm:$0xff] %v10993_v53  ;;  %8333 = vset.pattern.permute.xlu1 %v13821_v47  ;;  %8193 = vmatprep.mubr.msk.f32.mxu0 %vm898_vm1, %v10910_v57  ;;  %vm1157_vm3 = vcmp.eq.s32.totalorder %v1113_v58, 1  ;;  %v10998_v45 = vpop.permute.xlu0 %1675 }
 0x3f6   :  { %3313 = vperm.xlu1 %8333, %v10642_v19   ;;  %v11003_v1 = vsel %vm1157_vm3, -1e+09, %v1003_v20  ;;  %v11005_v26 = vpop.f32.mrf.mxu0  ;;  %v11020_v20 = vsel %vm1090_vm4, 1, %v13818_v22 }
 0x3f7   :  { %13835 = vst [vmem:[#allocation146_spill] sm:$0xff] %v11003_v1  ;;  %13836 = vst [vmem:[#allocation147_spill] sm:$0xff] %v11005_v26  ;;  %v5025_v34 = vmax.f32 %v11003_v1, %v11000_v11 }
 0x3f8   :  { %2789 = vperm.xlu0 %8377, %v10689_v37   ;;  %8194 = vmatmul.mubr.msk.f32.gmra.mxu0 %vm898_vm1, %v10925_v62  ;;  %v11012_v57 = vpop.f32.mrf.mxu0  ;;  %13839 = vst [vmem:[#allocation150_spill] sm:$0xff] %v11020_v20 }
 0x3f9   :  { %13837 = vst [vmem:[#allocation148_spill] sm:$0xff] %v11012_v57  ;;  %8196 = vmatprep.mubr.msk.f32.mxu0 %vm898_vm1, %v4760_v55  ;;  %v11015_v50 = vpop.permute.xlu1 %2205  ;;  %v11017_v58 = vpop.permute.xlu0 %1690  ;;  %v70_v55 = vld [vmem:[%s13406_s2 + $0x40] sm:$0xff] }
 0x3fa   :  { %13838 = vst [vmem:[#allocation149_spill] sm:$0xff] %v11017_v58  ;;  %8334 = vset.pattern.permute.xlu1 %v13840_v6  ;;  %v11023_v0 = vpop.f32.mrf.mxu0  ;;  %vm1084_vm5 = vcmp.eq.f32.partialorder %v70_v55, 0.0  ;;  %vm2252_vm11 = vcmp.eq.s32.totalorder %v11015_v50, 1 }
 0x3fb   :  { %13841 = vst [vmem:[#allocation151_spill] sm:$0xff] %v11023_v0  ;;  %4403 = vperm.xlu1 %8334, %v10707_v8   ;;  %v11047_v57 = vsel %vm1084_vm5, 1, %v13818_v22 }
 0x3fc   :  { %2795 = vperm.xlu0 %8377, %v11020_v20   ;;  %8197 = vmatmul.mubr.msk.f32.gmra.mxu0 %vm898_vm1, %v10940_v23  ;;  %v11029_v62 = vpop.f32.mrf.mxu0 }
 0x3fd   :  { %13842 = vst [vmem:[#allocation152_spill] sm:$0xff] %v11029_v62  ;;  %v2209_v32 = vpop.permute.xlu1 %2208  ;;  %v11034_v59 = vpop.permute.xlu0 %1693 }
 0x3fe   :  { %13843 = vst [vmem:[#allocation153_spill] sm:$0xff] %v11034_v59  ;;  %v11036_v15 = vpop.f32.mrf.mxu0  ;;  %vm2253_vm6 = vcmp.eq.s32.totalorder %v2209_v32, 1 }
 0x3ff   :  { %13844 = vst [vmem:[#allocation154_spill] sm:$0xff] %v11036_v15  ;;  %8335 = vset.pattern.permute.xlu1 %v13821_v47 }
 0x400   :  { %3316 = vperm.xlu1 %8335, %v10802_v46   ;;  %2798 = vperm.xlu0 %8377, %v10888_v18   ;;  %v11041_v11 = vpop.f32.mrf.mxu0 }
 0x401   :  { %13845 = vst [vmem:[#allocation155_spill] sm:$0xff] %v11041_v11  ;;  %v4764_v23 = vpop.permute.xlu0 %4763 }
 0x402   :  { %v11043_v1 = vpop.permute.xlu1 %1663  ;;  %v7890_v0 = vpop.f32.mrf.mxu0  ;;  %8199 = vmatprep.mubr.msk.f32.mxu0 %vm898_vm1, %v4764_v23 }
 0x403   :  { %v2131_v15 = vadd.f32 %v7890_v0, %v10973_v5  ;;  %8200 = vmatmul.mubr.msk.f32.gmra.mxu0 %vm898_vm1, %v10956_v3  ;;  %vm1704_vm1 = vcmp.eq.s32.totalorder %v10968_v38, 1  ;;  %vm1706_vm9 = vcmp.eq.s32.totalorder %v11043_v1, 1 }
 0x404   :  { %8336 = vset.pattern.permute.xlu1 %v13818_v22  ;;  %8385 = vset.pattern.permute.xlu0 %v13821_v47  ;;  %v11054_v55 = vpop.f32.mrf.mxu0 }
 0x405   :  { %v11056_v11 = vsel %vm2253_vm6, -1e+09, %v2131_v15  ;;  %1133 = vperm.xlu1 %8336, %v11047_v57   ;;  %3319 = vperm.xlu0 %8385, %v10658_v39   ;;  %v11060_v23 = vpop.permute.xlu0 %2214 }
 0x406   :  { %13846 = vst [vmem:[#allocation156_spill] sm:$0xff] %v11056_v11  ;;  %v11063_v0 = vmax.f32 %v5025_v34, %v11056_v11  ;;  %v11065_v53 = vpop.f32.mrf.mxu0  ;;  %vm2255_vm3 = vcmp.eq.s32.totalorder %v11060_v23, 1 }
 0x407   :  { %v11067_v32 = vpop.permute.xlu1 %2753 }
 0x408   :  { %13847 = vst [vmem:[#allocation157_spill] sm:$0xff] %v11063_v0  ;;  %v11069_v3 = vpop.f32.mrf.mxu0  ;;  %vm2800_vm12 = vcmp.eq.s32.totalorder %v11067_v32, 1 }
 0x409   :  { %8337 = vset.pattern.permute.xlu1 %v13815_v31  ;;  %3322 = vperm.xlu0 %8385, %v10736_v33   ;;  %v11073_v15 = vpop.permute.xlu0 %2223 }
 0x40a   :  { %1681 = vperm.xlu1 %8337, %v11047_v57   ;;  %v11076_v59 = vpop.f32.mrf.mxu0 }
 0x40c   :  { %v11078_v26 = vpop.permute.xlu1 %1666  ;;  %v11080_v34 = vpop.f32.mrf.mxu0 }
 0x40d   :  { %3337 = vperm.xlu0 %8385, %v10689_v37   ;;  %v11083_v11 = vpop.permute.xlu0 %2226  ;;  %vm1707_vm2 = vcmp.eq.s32.totalorder %v11078_v26, 1 }
 0x40e   :  { %13848 = vst [vmem:[#allocation158_spill] sm:$0xff] %v11083_v11  ;;  %8338 = vset.pattern.permute.xlu1 %v13825_v63  ;;  %v11086_v12 = vpop.f32.mrf.mxu0 }
 0x40f   :  { %13849 = vst [vmem:[#allocation159_spill] sm:$0xff] %v11086_v12  ;;  %3861 = vperm.xlu1 %8338, %v10642_v19  }
 0x410   :  { %v11089_v62 = vpop.f32.mrf.mxu0 }
 0x411   :  { %3340 = vperm.xlu0 %8385, %v10756_v14   ;;  %v11092_v58 = vpop.permute.xlu1 %2211  ;;  %v11094_v25 = vpop.permute.xlu0 %2241 }
 0x412   :  { %13850 = vst [vmem:[#allocation160_spill] sm:$0xff] %v11094_v25  ;;  %v11096_v4 = vpop.f32.mrf.mxu0  ;;  %vm2254_vm13 = vcmp.eq.s32.totalorder %v11092_v58, 1 }
 0x413   :  { %13851 = vst [vmem:[#allocation161_spill] sm:$0xff] %v11096_v4  ;;  %8339 = vset.pattern.permute.xlu1 %v13852_v36 }
 0x414   :  { %4951 = vperm.xlu1 %8339, %v10707_v8   ;;  %v11100_v9 = vpop.f32.mrf.mxu0 }
 0x415   :  { %13853 = vst [vmem:[#allocation162_spill] sm:$0xff] %v11100_v9  ;;  %3346 = vperm.xlu0 %8385, %v10888_v18   ;;  %v11103_v54 = vpop.permute.xlu0 %2244 }
 0x416   :  { %13854 = vst [vmem:[#allocation163_spill] sm:$0xff] %v11103_v54  ;;  %v11105_v0 = vpop.permute.xlu1 %3301  ;;  %v11107_v11 = vpop.f32.mrf.mxu0 }
 0x417   :  { %13855 = vst [vmem:[#allocation164_spill] sm:$0xff] %v11107_v11 }
 0x418   :  { %8340 = vset.pattern.permute.xlu1 %v13815_v31  ;;  %v11110_v14 = vpop.f32.mrf.mxu0 }
 0x419   :  { %13856 = vst [vmem:[#allocation165_spill] sm:$0xff] %v11110_v14  ;;  %1684 = vperm.xlu1 %8340, %v10805_v52   ;;  %8389 = vset.pattern.permute.xlu0 %v13852_v36 }
 0x41a   :  { %4945 = vperm.xlu0 %8389, %v10629_v21   ;;  %v11115_v8 = vpop.permute.xlu1 %3304  ;;  %v11117_v9 = vpop.f32.mrf.mxu0 }
 0x41b   :  { %13857 = vst [vmem:[#allocation166_spill] sm:$0xff] %v11115_v8  ;;  %13858 = vst [vmem:[#allocation167_spill] sm:$0xff] %v11117_v9  ;;  %v11119_v4 = vpop.permute.xlu0 %4397 }
 0x41c   :  { %13859 = vst [vmem:[#allocation168_spill] sm:$0xff] %v11119_v4  ;;  %v11121_v25 = vpop.f32.mrf.mxu0 }
 0x41d   :  { %13860 = vst [vmem:[#allocation169_spill] sm:$0xff] %v11121_v25  ;;  %8341 = vset.pattern.permute.xlu1 %v13819_v48 }
 0x41e   :  { %2774 = vperm.xlu1 %8341, %v10736_v33   ;;  %4960 = vperm.xlu0 %8389, %v10802_v46   ;;  %v11126_v14 = vpop.f32.mrf.mxu0 }
 0x41f   :  { %13861 = vst [vmem:[#allocation170_spill] sm:$0xff] %v11126_v14  ;;  %v11128_v11 = vpop.permute.xlu0 %4400 }
 0x420   :  { %13862 = vst [vmem:[#allocation171_spill] sm:$0xff] %v11128_v11  ;;  %v1122_v54 = vpop.permute.xlu1 %1121  ;;  %v11130_v21 = vpop.f32.mrf.mxu0 }
 0x421   :  { %13863 = vst [vmem:[#allocation172_spill] sm:$0xff] %v11130_v21  ;;  %vm1160_vm7 = vcmp.eq.s32.totalorder %v1122_v54, 1  ;;  %v2136_v54 = vadd.f32 %v11069_v3, %v10973_v5 }
 0x422   :  { %8342 = vset.pattern.permute.xlu1 %v13852_v36  ;;  %4963 = vperm.xlu0 %8389, %v10658_v39   ;;  %v11134_v4 = vpop.f32.mrf.mxu0  ;;  %v11205_v51 = vsel %vm1160_vm7, -1e+09, %v1018_v28 }
 0x423   :  { %13864 = vst [vmem:[#allocation173_spill] sm:$0xff] %v11134_v4  ;;  %4954 = vperm.xlu1 %8342, %v10717_v10   ;;  %v11137_v25 = vpop.permute.xlu0 %4406  ;;  %13875 = vst [vmem:[#allocation184_spill] sm:$0xff] %v11205_v51 }
 0x424   :  { %13865 = vst [vmem:[#allocation174_spill] sm:$0xff] %v11137_v25  ;;  %v2673_v9 = vpop.f32.mrf.mxu0 }
 0x425   :  { %v11139_v8 = vpop.permute.xlu1 %2759  ;;  %v2674_v7 = vadd.f32 %v2673_v9, %v10973_v5  ;;  %v2146_v9 = vadd.f32 %v11080_v34, %v10973_v5 }
 0x426   :  { %4978 = vperm.xlu0 %8389, %v10673_v30   ;;  %v11142_v14 = vpop.f32.mrf.mxu0  ;;  %vm2802_vm4 = vcmp.eq.s32.totalorder %v11139_v8, 1 }
 0x427   :  { %8343 = vset.pattern.permute.xlu1 %v13816_v41  ;;  %v11145_v21 = vpop.permute.xlu0 %4415  ;;  %v11234_v32 = vsel %vm2800_vm12, -1e+09, %v2674_v7 }
 0x428   :  { %13866 = vst [vmem:[#allocation175_spill] sm:$0xff] %v11145_v21  ;;  %2229 = vperm.xlu1 %8343, %v11047_v57   ;;  %v2683_v39 = vpop.f32.mrf.mxu0  ;;  %13879 = vst [vmem:[#allocation188_spill] sm:$0xff] %v11234_v32 }
 0x429   :  { %v2684_v3 = vadd.f32 %v2683_v39, %v10973_v5  ;;  %v1013_v39 = vadd.f32 %v10831_v35, %v10973_v5 }
 0x42a   :  { %4981 = vperm.xlu0 %8389, %v10689_v37   ;;  %v11149_v11 = vpop.permute.xlu1 %3849  ;;  %v11151_v10 = vpop.f32.mrf.mxu0 }
 0x42b   :  { %13867 = vst [vmem:[#allocation176_spill] sm:$0xff] %v11149_v11  ;;  %13868 = vst [vmem:[#allocation177_spill] sm:$0xff] %v11151_v10  ;;  %v11153_v25 = vpop.permute.xlu0 %4418 }
 0x42c   :  { %13869 = vst [vmem:[#allocation178_spill] sm:$0xff] %v11153_v25  ;;  %8344 = vset.pattern.permute.xlu1 %v13840_v6  ;;  %v11156_v4 = vpop.f32.mrf.mxu0 }
 0x42d   :  { %4409 = vperm.xlu1 %8344, %v10642_v19  }
 0x42e   :  { %8392 = vset.pattern.permute.xlu0 %v13840_v6  ;;  %v11160_v21 = vpop.f32.mrf.mxu0 }
 0x42f   :  { %13870 = vst [vmem:[#allocation179_spill] sm:$0xff] %v11160_v21  ;;  %4439 = vperm.xlu0 %8392, %v11020_v20   ;;  %v11163_v12 = vpop.permute.xlu1 %1672  ;;  %v11165_v37 = vpop.permute.xlu0 %4424  ;;  %v998_v21 = vadd.f32 %v10825_v2, %v10973_v5  ;;  %v1578_v20 = vadd.f32 %v10938_v44, %v10973_v5  ;;  %v1588_v44 = vadd.f32 %v10950_v27, %v10973_v5 }
 0x430   :  { %13871 = vst [vmem:[#allocation180_spill] sm:$0xff] %v11165_v37  ;;  %v11167_v11 = vpop.f32.mrf.mxu0  ;;  %v2126_v37 = vadd.f32 %v11054_v55, %v10973_v5  ;;  %v1598_v55 = vadd.f32 %v10962_v56, %v10973_v5  ;;  %vm1709_vm6 = vcmp.eq.s32.totalorder %v11163_v12, 1 }
 0x431   :  { %13872 = vst [vmem:[#allocation181_spill] sm:$0xff] %v11167_v11  ;;  %8345 = vset.pattern.permute.xlu1 %v13816_v41  ;;  %v11213_v38 = vsel %vm1706_vm9, -1e+09, %v1588_v44 }
 0x432   :  { %2232 = vperm.xlu1 %8345, %v10805_v52   ;;  %v11171_v25 = vpop.f32.mrf.mxu0  ;;  %v11211_v56 = vsel %vm1708_vm8, -1e+09, %v1598_v55  ;;  %13877 = vst [vmem:[#allocation186_spill] sm:$0xff] %v11213_v38  ;;  %v11215_v1 = vsel %vm2252_vm11, -1e+09, %v2126_v37 }
 0x433   :  { %13873 = vst [vmem:[#allocation182_spill] sm:$0xff] %v11171_v25  ;;  %8395 = vset.pattern.permute.xlu0 %v13852_v36  ;;  %v1008_v25 = vadd.f32 %v10840_v43, %v10973_v5  ;;  %13876 = vst [vmem:[#allocation185_spill] sm:$0xff] %v11211_v56  ;;  %v5028_v37 = vmax.f32 %v11205_v51, %v11211_v56 }
 0x434   :  { %v11181_v11 = vpop.permute.xlu1 %2762  ;;  %v11183_v10 = vpop.f32.mrf.mxu0  ;;  %4990 = vperm.xlu0 %8395, %v10888_v18   ;;  %v11198_v18 = vsel %vm1704_vm1, -1e+09, %v1578_v20 }
 0x435   :  { %v1110_v2 = vpop.permute.xlu0 %1109  ;;  %13874 = vst [vmem:[#allocation183_spill] sm:$0xff] %v11198_v18  ;;  %vm2803_vm1 = vcmp.eq.s32.totalorder %v11181_v11, 1  ;;  %v2689_v11 = vadd.f32 %v11142_v14, %v10973_v5 }
 0x436   :  { %vm1156_vm10 = vcmp.eq.s32.totalorder %v1110_v2, 1  ;;  %8346 = vset.pattern.permute.xlu1 %v13840_v6  ;;  %v11201_v43 = vpop.f32.mrf.mxu0 }
 0x437   :  { %v11208_v27 = vsel %vm1156_vm10, -1e+09, %v998_v21  ;;  %4412 = vperm.xlu1 %8346, %v10802_v46   ;;  %vm3348_vm10 = vcmp.eq.s32.totalorder %v11105_v0, 1 }
 0x438   :  { %v5024_v20 = vmax.f32 %v11208_v27, %v11198_v18  ;;  %v11219_v2 = vpop.f32.mrf.mxu0 }
 0x439   :  { %v1116_v46 = vpop.permute.xlu0 %1115  ;;  %v2218_v28 = vpop.permute.xlu1 %2217 }
 0x43a   :  { %v11230_v50 = vmax.f32 %v5024_v20, %v11215_v1  ;;  %vm1158_vm14 = vcmp.eq.s32.totalorder %v1116_v46, 1  ;;  %vm2256_vm15 = vcmp.eq.s32.totalorder %v2218_v28, 1  ;;  %v11232_v21 = vpop.f32.mrf.mxu0  ;;  %v2141_v46 = vadd.f32 %v11065_v53, %v10973_v5 }
 0x43b   :  { %13878 = vst [vmem:[#allocation187_spill] sm:$0xff] %v11232_v21  ;;  %v11237_v44 = vsel %vm1158_vm14, -1e+09, %v1008_v25  ;;  %v11239_v34 = vsel %vm2256_vm15, -1e+09, %v2146_v9  ;;  %8347 = vset.pattern.permute.xlu1 %v13815_v31  ;;  %v1593_v9 = vadd.f32 %v10945_v17, %v10973_v5  ;;  %vm1710_vm14 = vcmp.eq.s32.totalorder %v10998_v45, 1 }
 0x43c   :  { %13880 = vst [vmem:[#allocation189_spill] sm:$0xff] %v11237_v44  ;;  %13881 = vst [vmem:[#allocation190_spill] sm:$0xff] %v11239_v34  ;;  %v5026_v55 = vmax.f32 %v11237_v44, %v11213_v38  ;;  %v11246_v20 = vmax.f32 %v5028_v37, %v11239_v34  ;;  %1687 = vperm.xlu1 %8347, %v10875_v60   ;;  %v11249_v7 = vpop.f32.mrf.mxu0  ;;  %v5056_v25 = vmax.f32 %v11230_v50, %v11234_v32  ;;  %v13904_v44 = vld [vmem:[#allocation158_spill] sm:$0xff] }
 0x43d   :  { %v11261_v28 = vsel %vm2254_vm13, -1e+09, %v2136_v54  ;;  %v1119_v37 = vpop.permute.xlu0 %1118  ;;  %v11270_v17 = vsel %vm1707_vm2, -1e+09, %v1593_v9  ;;  %v11272_v21 = vsel %vm2802_vm4, -1e+09, %v2684_v3  ;;  %v1023_v54 = vadd.f32 %v10843_v13, %v10973_v5 }
 0x43e   :  { %13882 = vst [vmem:[#allocation191_spill] sm:$0xff] %v11261_v28  ;;  %v11266_v50 = vmax.f32 %v5026_v55, %v11261_v28  ;;  %vm1159_vm5 = vcmp.eq.s32.totalorder %v1119_v37, 1  ;;  %v3308_v35 = vpop.permute.xlu1 %3307  ;;  %13883 = vst [vmem:[#allocation192_spill] sm:$0xff] %v11270_v17  ;;  %v1603_v3 = vadd.f32 %v10954_v42, %v10973_v5  ;;  %v11291_v55 = vsel %vm2255_vm3, -1e+09, %v2141_v46  ;;  %v26_v28 = vld [vmem:[%s13404_s4 + $0x8] sm:$0xff] }
 0x43f   :  { %13884 = vst [vmem:[#allocation193_spill] sm:$0xff] %v11272_v21  ;;  %v11274_v53 = vsel %vm1159_vm5, -1e+09, %v1013_v39  ;;  %v11276_v58 = vpop.f32.mrf.mxu0  ;;  %13886 = vst [vmem:[#allocation195_spill] sm:$0xff] %v11291_v55  ;;  %v2151_v13 = vadd.f32 %v11076_v59, %v10973_v5  ;;  %v11303_v42 = vsel %vm2803_vm1, -1e+09, %v2689_v11  ;;  %v1048_v34 = vadd.f32 %v10906_v40, %v10973_v5 }
 0x440   :  { %13885 = vst [vmem:[#allocation194_spill] sm:$0xff] %v11274_v53  ;;  %v5027_v8 = vmax.f32 %v11274_v53, %v11270_v17  ;;  %8348 = vset.pattern.permute.xlu1 %v13819_v48  ;;  %v5058_v26 = vmax.f32 %v11266_v50, %v11272_v21  ;;  %v11301_v37 = vsel %vm1709_vm6, -1e+09, %v1603_v3  ;;  %13888 = vst [vmem:[#allocation197_spill] sm:$0xff] %v11303_v42  ;;  %vm3350_vm13 = vcmp.eq.s32.totalorder %v3308_v35, 1 }
 0x441   :  { %2777 = vperm.xlu1 %8348, %v11047_v57   ;;  %v1125_v12 = vpop.permute.xlu0 %1124  ;;  %v11296_v39 = vpop.f32.mrf.mxu0  ;;  %13887 = vst [vmem:[#allocation196_spill] sm:$0xff] %v11301_v37  ;;  %vm2258_vm15 = vcmp.eq.s32.totalorder %v11073_v15, 1  ;;  %vm2259_vm6 = vcmp.eq.s32.totalorder %v13904_v44, 1 }
 0x442   :  { %v5043_v9 = vmax.f32 %v5027_v8, %v11291_v55  ;;  %vm1161_vm7 = vcmp.eq.s32.totalorder %v1125_v12, 1  ;;  %v1043_v8 = vadd.f32 %v10882_v24, %v10973_v5 }
 0x443   :  { %v11305_v23 = vsel %vm1161_vm7, -1e+09, %v1023_v54  ;;  %v2221_v46 = vpop.permute.xlu1 %2220  ;;  %v11307_v50 = vpop.f32.mrf.mxu0 }
 0x444   :  { %13889 = vst [vmem:[#allocation198_spill] sm:$0xff] %v11305_v23  ;;  %v5029_v14 = vmax.f32 %v11305_v23, %v11301_v37  ;;  %vm2257_vm8 = vcmp.eq.s32.totalorder %v2221_v46, 1  ;;  %v5059_v21 = vmax.f32 %v5043_v9, %v11303_v42  ;;  %v13903_v37 = vld [vmem:[#allocation159_spill] sm:$0xff] }
 0x445   :  { %v11314_v12 = vsel %vm2257_vm8, -1e+09, %v2151_v13  ;;  %8349 = vset.pattern.permute.xlu1 %v13852_v36  ;;  %v1137_v59 = vpop.permute.xlu0 %1136  ;;  %v3221_v3 = vpop.f32.mrf.mxu0  ;;  %v2161_v23 = vadd.f32 %v13903_v37, %v10973_v5 }
 0x446   :  { %13890 = vst [vmem:[#allocation199_spill] sm:$0xff] %v11314_v12  ;;  %v11318_v54 = vmax.f32 %v5029_v14, %v11314_v12  ;;  %vm1165_vm9 = vcmp.eq.s32.totalorder %v1137_v59, 1  ;;  %4957 = vperm.xlu1 %8349, %v10642_v19   ;;  %v3222_v11 = vadd.f32 %v3221_v3, %v10973_v5 }
 0x447   :  { %v11323_v9 = vsel %vm1165_vm9, -1e+09, %v1043_v8  ;;  %v8009_v46 = vpop.f32.mrf.mxu0 }
 0x448   :  { %13891 = vst [vmem:[#allocation200_spill] sm:$0xff] %v11323_v9  ;;  %v11325_v24 = vsel %vm3348_vm10, -1e+09, %v3222_v11  ;;  %v3237_v13 = vadd.f32 %v8009_v46, %v10973_v5  ;;  %v3311_v32 = vpop.permute.xlu1 %3310  ;;  %v1073_v46 = vadd.f32 %v10923_v49, %v10973_v5 }
 0x449   :  { %13892 = vst [vmem:[#allocation201_spill] sm:$0xff] %v11325_v24  ;;  %v11331_v14 = vmax.f32 %v5056_v25, %v11325_v24  ;;  %vm3351_vm11 = vcmp.eq.s32.totalorder %v3311_v32, 1  ;;  %v1140_v19 = vpop.permute.xlu0 %1139  ;;  %v3231_v59 = vpop.f32.mrf.mxu0  ;;  %v1028_v32 = vadd.f32 %v10877_v16, %v10973_v5 }
 0x44a   :  { %v11333_v3 = vsel %vm3351_vm11, -1e+09, %v3237_v13  ;;  %vm1166_vm12 = vcmp.eq.s32.totalorder %v1140_v19, 1  ;;  %8350 = vset.pattern.permute.xlu1 %v13818_v22  ;;  %v3232_v0 = vadd.f32 %v3231_v59, %v10973_v5 }
 0x44b   :  { %13893 = vst [vmem:[#allocation202_spill] sm:$0xff] %v11333_v3  ;;  %v11338_v8 = vmax.f32 %v5059_v21, %v11333_v3  ;;  %v11340_v11 = vsel %vm1166_vm12, -1e+09, %v1048_v34  ;;  %1142 = vperm.xlu1 %8350, %v10673_v30   ;;  %v11343_v40 = vpop.f32.mrf.mxu0  ;;  %v1608_v21 = vadd.f32 %v10977_v61, %v10973_v5  ;;  %v2156_v34 = vadd.f32 %v11089_v62, %v10973_v5 }
 0x44c   :  { %13894 = vst [vmem:[#allocation203_spill] sm:$0xff] %v11340_v11  ;;  %v11348_v25 = vsel %vm3350_vm13, -1e+09, %v3232_v0  ;;  %v27_v11 = vld [vmem:[%s13404_s4 + $0x10] sm:$0xff] }
 0x44d   :  { %13895 = vst [vmem:[#allocation204_spill] sm:$0xff] %v11348_v25  ;;  %v11357_v35 = vmax.f32 %v5058_v26, %v11348_v25  ;;  %v1155_v13 = vpop.permute.xlu0 %1154  ;;  %v1128_v19 = vpop.permute.xlu1 %1127  ;;  %v11362_v45 = vsel %vm1710_vm14, -1e+09, %v1608_v21  ;;  %v11374_v15 = vsel %vm2258_vm15, -1e+09, %v2156_v34  ;;  %v2694_v26 = vadd.f32 %v11156_v4, %v10973_v5 }
 0x44e   :  { %vm1171_vm2 = vcmp.eq.s32.totalorder %v1155_v13, 1  ;;  %vm1162_vm3 = vcmp.eq.s32.totalorder %v1128_v19, 1  ;;  %v11360_v16 = vpop.f32.mrf.mxu0  ;;  %13896 = vst [vmem:[#allocation205_spill] sm:$0xff] %v11362_v45  ;;  %13899 = vst [vmem:[#allocation208_spill] sm:$0xff] %v11374_v15 }
 0x44f   :  { %v11364_v49 = vsel %vm1171_vm2, -1e+09, %v1073_v46  ;;  %v11366_v59 = vsel %vm1162_vm3, -1e+09, %v1028_v32  ;;  %8351 = vset.pattern.permute.xlu1 %v13819_v48 }
 0x450   :  { %13897 = vst [vmem:[#allocation206_spill] sm:$0xff] %v11364_v49  ;;  %13898 = vst [vmem:[#allocation207_spill] sm:$0xff] %v11366_v59  ;;  %v5030_v61 = vmax.f32 %v11366_v59, %v11362_v45  ;;  %2780 = vperm.xlu1 %8351, %v10805_v52   ;;  %v11372_v62 = vpop.f32.mrf.mxu0  ;;  %v13902_v59 = vld [vmem:[#allocation141_spill] sm:$0xff] }
 0x451   :  { %v1613_v12 = vadd.f32 %v13902_v59, %v10973_v5  ;;  %v3227_v59 = vadd.f32 %v11307_v50, %v10973_v5  ;;  %v11454_v50 = vsel %vm2259_vm6, -1e+09, %v2161_v23 }
 0x452   :  { %v11378_v0 = vpop.f32.mrf.mxu0  ;;  %v2766_v46 = vpop.permute.xlu1 %2765  ;;  %v11381_v32 = vmax.f32 %v5030_v61, %v11374_v15  ;;  %v1033_v15 = vadd.f32 %v10864_v29, %v10973_v5  ;;  %v13906_v29 = vld [vmem:[#allocation173_spill] sm:$0xff] }
 0x453   :  { %vm2804_vm4 = vcmp.eq.s32.totalorder %v2766_v46, 1  ;;  %v11383_v21 = vpop.permute.xlu0 %3852  ;;  %v2679_v3 = vadd.f32 %v13906_v29, %v10973_v5  ;;  %13909 = vst [vmem:[#allocation173_spill] sm:$0xff] %v11454_v50 }
 0x454   :  { %v11385_v13 = vsel %vm2804_vm4, -1e+09, %v2694_v26  ;;  %8352 = vset.pattern.permute.xlu1 %v13825_v63  ;;  %v11388_v19 = vpop.f32.mrf.mxu0 }
 0x455   :  { %13900 = vst [vmem:[#allocation209_spill] sm:$0xff] %v11385_v13  ;;  %3870 = vperm.xlu1 %8352, %v10736_v33  }
 0x456   :  { %v11393_v4 = vpop.f32.mrf.mxu0 }
 0x457   :  { %v11395_v49 = vpop.permute.xlu0 %3864  ;;  %v11397_v61 = vpop.permute.xlu1 %3855 }
 0x458   :  { %v11399_v46 = vpop.f32.mrf.mxu0  ;;  %vm3901_vm11 = vcmp.eq.s32.totalorder %v11395_v49, 1  ;;  %v2729_v49 = vadd.f32 %v11201_v43, %v10973_v5  ;;  %v2734_v43 = vadd.f32 %v11249_v7, %v10973_v5 }
 0x459   :  { %13901 = vst [vmem:[#allocation210_spill] sm:$0xff] %v11399_v46  ;;  %8353 = vset.pattern.permute.xlu1 %v13816_v41  ;;  %v28_v46 = vld [vmem:[%s13404_s4 + $0x18] sm:$0xff] }
 0x45a   :  { %2235 = vperm.xlu1 %8353, %v10875_v60   ;;  %v11403_v26 = vpop.f32.mrf.mxu0  ;;  %8202 = vmatprep.subr.mxu1 %v28_v46 }
 0x45b   :  { %v11405_v25 = vpop.permute.xlu0 %3867  ;;  %8203 = vmatpush3.msra.mxu1 %v28_v46 }
 0x45c   :  { %v11407_v24 = vpop.f32.mrf.mxu0  ;;  %v1131_v34 = vpop.permute.xlu1 %1130  ;;  %8204 = vmatprep.subr.mxu1 %v27_v11  ;;  %vm3902_vm14 = vcmp.eq.s32.totalorder %v11405_v25, 1 }
 0x45d   :  { %vm1163_vm5 = vcmp.eq.s32.totalorder %v1131_v34, 1  ;;  %8205 = vmatpush3.msra.mxu1 %v27_v11  ;;  %v13910_v11 = vld [vmem:[#allocation166_spill] sm:$0xff] }
 0x45e   :  { %8354 = vset.pattern.permute.xlu1 %v13821_v47  ;;  %v11410_v56 = vpop.f32.mrf.mxu0  ;;  %v11439_v42 = vsel %vm1163_vm5, -1e+09, %v1033_v15  ;;  %8206 = vmatprep.subr.mxu1 %v26_v28  ;;  %vm3349_vm8 = vcmp.eq.s32.totalorder %v13910_v11, 1  ;;  %v13911_v15 = vld [vmem:[#allocation157_spill] sm:$0xff] }
 0x45f   :  { %3325 = vperm.xlu1 %8354, %v11047_v57   ;;  %v11413_v51 = vpop.permute.xlu0 %3882  ;;  %13907 = vst [vmem:[#allocation159_spill] sm:$0xff] %v11439_v42  ;;  %8207 = vmatpush3.msra.mxu1 %v26_v28  ;;  %v11468_v23 = vsel %vm3349_vm8, -1e+09, %v3227_v59 }
 0x460   :  { %v11421_v45 = vpop.f32.mrf.mxu0  ;;  %vm3907_vm3 = vcmp.eq.s32.totalorder %v11413_v51, 1 }
 0x461   :  { %v1679_v38 = vpop.permute.xlu1 %1678 }
 0x462   :  { %vm1711_vm1 = vcmp.eq.s32.totalorder %v1679_v38, 1  ;;  %v11433_v34 = vpop.f32.mrf.mxu0  ;;  %v25_v38 = vld [vmem:[%s13404_s4] sm:$0xff] }
 0x463   :  { %13905 = vst [vmem:[#allocation141_spill] sm:$0xff] %v11433_v34  ;;  %v11441_v37 = vsel %vm1711_vm1, -1e+09, %v1613_v12  ;;  %8355 = vset.pattern.permute.xlu1 %v13816_v41  ;;  %v2757_v46 = vpop.permute.xlu0 %2756  ;;  %8208 = vmatprep.subr.mxu1 %v25_v38 }
 0x464   :  { %13908 = vst [vmem:[#allocation158_spill] sm:$0xff] %v11441_v37  ;;  %v5031_v34 = vmax.f32 %v11439_v42, %v11441_v37  ;;  %vm2801_vm7 = vcmp.eq.s32.totalorder %v2757_v46, 1  ;;  %2238 = vperm.xlu1 %8355, %v10673_v30   ;;  %v11450_v29 = vpop.f32.mrf.mxu0  ;;  %v13912_v42 = vld [vmem:[#allocation177_spill] sm:$0xff]  ;;  %8209 = vmatpush3.msra.mxu1 %v25_v38 }
 0x465   :  { %v11456_v12 = vsel %vm2801_vm7, -1e+09, %v2679_v3  ;;  %v2699_v44 = vadd.f32 %v13912_v42, %v10973_v5  ;;  %v13914_v38 = vld [vmem:[#allocation181_spill] sm:$0xff] }
 0x466   :  { %v5057_v41 = vmax.f32 %v13911_v15, %v11456_v12  ;;  %v11461_v55 = vpop.f32.mrf.mxu0  ;;  %v3859_v46 = vpop.permute.xlu1 %3858  ;;  %v11464_v37 = vmax.f32 %v5031_v34, %v11454_v50 }
 0x467   :  { %v2769_v3 = vpop.permute.xlu0 %2768  ;;  %vm3899_vm10 = vcmp.eq.s32.totalorder %v3859_v46, 1 }
 0x468   :  { %v11471_v28 = vmax.f32 %v5057_v41, %v11468_v23  ;;  %vm2805_vm9 = vcmp.eq.s32.totalorder %v2769_v3, 1  ;;  %8356 = vset.pattern.permute.xlu1 %v13821_v47  ;;  %v8067_v11 = vpop.f32.mrf.mxu0  ;;  %v2704_v41 = vadd.f32 %v13914_v38, %v10973_v5  ;;  %v13917_v38 = vld [vmem:[#allocation132_spill] sm:$0xff] }
 0x469   :  { %v11474_v15 = vsel %vm2805_vm9, -1e+09, %v2699_v44  ;;  %v3785_v34 = vadd.f32 %v8067_v11, %v10973_v5  ;;  %3328 = vperm.xlu1 %8356, %v10805_v52  }
 0x46a   :  { %13913 = vst [vmem:[#allocation166_spill] sm:$0xff] %v11474_v15  ;;  %v5061_v42 = vmax.f32 %v11318_v54, %v11474_v15  ;;  %v11480_v59 = vpop.f32.mrf.mxu0 }
 0x46b   :  { %v11484_v50 = vsel %vm3899_vm10, -1e+09, %v3785_v34  ;;  %v2772_v3 = vpop.permute.xlu0 %2771 }
 0x46c   :  { %13915 = vst [vmem:[#allocation157_spill] sm:$0xff] %v11484_v50  ;;  %vm2806_vm12 = vcmp.eq.s32.totalorder %v2772_v3, 1  ;;  %v11489_v11 = vpop.permute.xlu1 %4948  ;;  %v8070_v46 = vpop.f32.mrf.mxu0 }
 0x46d   :  { %v11491_v17 = vsel %vm2806_vm12, -1e+09, %v2704_v41  ;;  %v3795_v54 = vadd.f32 %v8070_v46, %v10973_v5  ;;  %8357 = vset.pattern.permute.xlu1 %v13818_v22  ;;  %v3242_v46 = vadd.f32 %v11360_v16, %v10973_v5  ;;  %v13921_v16 = vmax.f32 %v11246_v20, %v11385_v13 }
 0x46e   :  { %13916 = vst [vmem:[#allocation177_spill] sm:$0xff] %v11491_v17  ;;  %v5062_v34 = vmax.f32 %v11381_v32, %v11491_v17  ;;  %1145 = vperm.xlu1 %8357, %v13917_v38   ;;  %v11498_v15 = vpop.f32.mrf.mxu0 }
 0x46f   :  { %v11502_v3 = vsel %vm3901_vm11, -1e+09, %v3795_v54  ;;  %v2787_v44 = vpop.permute.xlu0 %2786 }
 0x470   :  { %13918 = vst [vmem:[#allocation181_spill] sm:$0xff] %v11502_v3  ;;  %vm2811_vm13 = vcmp.eq.s32.totalorder %v2787_v44, 1  ;;  %v11504_v41 = vpop.f32.mrf.mxu0 }
 0x471   :  { %v11508_v53 = vsel %vm2811_vm13, -1e+09, %v2729_v49  ;;  %v3314_v18 = vpop.permute.xlu1 %3313 }
 0x472   :  { %13919 = vst [vmem:[#allocation211_spill] sm:$0xff] %v11508_v53  ;;  %vm3352_vm15 = vcmp.eq.s32.totalorder %v3314_v18, 1  ;;  %8359 = vset.pattern.permute.xlu1 %v13819_v48  ;;  %v3799_v32 = vpop.f32.mrf.mxu0 }
 0x473   :  { %v11514_v54 = vsel %vm3352_vm15, -1e+09, %v3242_v46  ;;  %v3800_v44 = vadd.f32 %v3799_v32, %v10973_v5  ;;  %2783 = vperm.xlu1 %8359, %v10875_v60   ;;  %v2790_v17 = vpop.permute.xlu0 %2789  ;;  %v2744_v32 = vadd.f32 %v11296_v39, %v10973_v5  ;;  %v3247_v39 = vadd.f32 %v11343_v40, %v10973_v5 }
 0x474   :  { %13920 = vst [vmem:[#allocation212_spill] sm:$0xff] %v11514_v54  ;;  %v11522_v49 = vmax.f32 %v13921_v16, %v11514_v54  ;;  %vm2812_vm2 = vcmp.eq.s32.totalorder %v2790_v17, 1  ;;  %v11524_v18 = vpop.f32.mrf.mxu0  ;;  %v2749_v16 = vadd.f32 %v11276_v58, %v10973_v5 }
 0x475   :  { %v11526_v25 = vsel %vm3902_vm14, -1e+09, %v3800_v44  ;;  %v11528_v53 = vsel %vm2812_vm2, -1e+09, %v2734_v43 }
 0x476   :  { %13922 = vst [vmem:[#allocation213_spill] sm:$0xff] %v11522_v49  ;;  %13923 = vst [vmem:[#allocation214_spill] sm:$0xff] %v11526_v25  ;;  %v11530_v7 = vpop.permute.xlu1 %4403  ;;  %v11532_v46 = vpop.f32.mrf.mxu0 }
 0x477   :  { %13924 = vst [vmem:[#allocation215_spill] sm:$0xff] %v11528_v53  ;;  %13925 = vst [vmem:[#allocation216_spill] sm:$0xff] %v11532_v46  ;;  %8360 = vset.pattern.permute.xlu1 %v13825_v63  ;;  %v2796_v38 = vpop.permute.xlu0 %2795 }
 0x478   :  { %vm2814_vm4 = vcmp.eq.s32.totalorder %v2796_v38, 1  ;;  %3873 = vperm.xlu1 %8360, %v11047_v57   ;;  %v8079_v20 = vpop.f32.mrf.mxu0 }
 0x479   :  { %v11539_v17 = vsel %vm2814_vm4, -1e+09, %v2744_v32  ;;  %v3825_v43 = vadd.f32 %v8079_v20, %v10973_v5 }
 0x47a   :  { %13926 = vst [vmem:[#allocation217_spill] sm:$0xff] %v11539_v17  ;;  %v11542_v44 = vpop.f32.mrf.mxu0  ;;  %v13932_v17 = vld [vmem:[#allocation133_spill] sm:$0xff] }
 0x47b   :  { %13927 = vst [vmem:[#allocation218_spill] sm:$0xff] %v11542_v44  ;;  %v11548_v53 = vsel %vm3907_vm3, -1e+09, %v3825_v43  ;;  %v3317_v54 = vpop.permute.xlu1 %3316  ;;  %v2799_v51 = vpop.permute.xlu0 %2798 }
 0x47c   :  { %13928 = vst [vmem:[#allocation219_spill] sm:$0xff] %v11548_v53  ;;  %vm3353_vm5 = vcmp.eq.s32.totalorder %v3317_v54, 1  ;;  %vm2815_vm6 = vcmp.eq.s32.totalorder %v2799_v51, 1  ;;  %8361 = vset.pattern.permute.xlu1 %v13818_v22  ;;  %v11551_v38 = vpop.f32.mrf.mxu0  ;;  %v3257_v54 = vadd.f32 %v11372_v62, %v10973_v5  ;;  %v3790_v53 = vadd.f32 %v11498_v15, %v10973_v5 }
 0x47d   :  { %13929 = vst [vmem:[#allocation220_spill] sm:$0xff] %v11551_v38  ;;  %v11553_v32 = vsel %vm3353_vm5, -1e+09, %v3247_v39  ;;  %v11555_v20 = vsel %vm2815_vm6, -1e+09, %v2749_v16  ;;  %1148 = vperm.xlu1 %8361, %v13932_v17   ;;  %v3252_v39 = vadd.f32 %v11378_v0, %v10973_v5 }
 0x47e   :  { %13930 = vst [vmem:[#allocation221_spill] sm:$0xff] %v11553_v32  ;;  %13931 = vst [vmem:[#allocation222_spill] sm:$0xff] %v11555_v20  ;;  %v11559_v58 = vmax.f32 %v5061_v42, %v11553_v32  ;;  %v11561_v40 = vpop.f32.mrf.mxu0  ;;  %v13946_v32 = vld [vmem:[#allocation180_spill] sm:$0xff] }
 0x47f   :  { %13933 = vst [vmem:[#allocation223_spill] sm:$0xff] %v11561_v40  ;;  %vm4453_vm14 = vcmp.eq.s32.totalorder %v13946_v32, 1  ;;  %v13951_v32 = vld [vmem:[#allocation136_spill] sm:$0xff] }
 0x480   :  { %v11563_v43 = vpop.permute.xlu1 %1133  ;;  %v11565_v44 = vpop.f32.mrf.mxu0 }
 0x481   :  { %13934 = vst [vmem:[#allocation224_spill] sm:$0xff] %v11565_v44  ;;  %v3320_v51 = vpop.permute.xlu0 %3319  ;;  %8362 = vset.pattern.permute.xlu1 %v13815_v31 }
 0x482   :  { %vm3354_vm1 = vcmp.eq.s32.totalorder %v3320_v51, 1  ;;  %1696 = vperm.xlu1 %8362, %v13932_v17   ;;  %v11573_v42 = vpop.f32.mrf.mxu0 }
 0x483   :  { %13935 = vst [vmem:[#allocation225_spill] sm:$0xff] %v11573_v42  ;;  %v11575_v16 = vsel %vm3354_vm1, -1e+09, %v3252_v39  ;;  %v3282_v39 = vadd.f32 %v11410_v56, %v10973_v5  ;;  %v3287_v56 = vadd.f32 %v11407_v24, %v10973_v5 }
 0x484   :  { %13936 = vst [vmem:[#allocation226_spill] sm:$0xff] %v11575_v16  ;;  %v5078_v20 = vmax.f32 %v5062_v34, %v11575_v16  ;;  %v11578_v40 = vpop.f32.mrf.mxu0 }
 0x485   :  { %v3323_v44 = vpop.permute.xlu0 %3322  ;;  %v11582_v38 = vpop.permute.xlu1 %1681 }
 0x486   :  { %v5094_v0 = vmax.f32 %v5078_v20, %v11526_v25  ;;  %vm3355_vm7 = vcmp.eq.s32.totalorder %v3323_v44, 1  ;;  %8363 = vset.pattern.permute.xlu1 %v13825_v63  ;;  %v11586_v51 = vpop.f32.mrf.mxu0 }
 0x487   :  { %v11588_v42 = vsel %vm3355_vm7, -1e+09, %v3257_v54  ;;  %3876 = vperm.xlu1 %8363, %v10805_v52   ;;  %vm1712_vm7 = vcmp.eq.s32.totalorder %v11582_v38, 1 }
 0x488   :  { %13937 = vst [vmem:[#allocation227_spill] sm:$0xff] %v11588_v42  ;;  %v11591_v34 = vpop.f32.mrf.mxu0 }
 0x489   :  { %v3338_v62 = vpop.permute.xlu0 %3337 }
 0x48a   :  { %vm3360_vm8 = vcmp.eq.s32.totalorder %v3338_v62, 1  ;;  %v3862_v20 = vpop.permute.xlu1 %3861  ;;  %v11597_v44 = vpop.f32.mrf.mxu0 }
 0x48b   :  { %v11599_v25 = vsel %vm3360_vm8, -1e+09, %v3282_v39  ;;  %vm3900_vm9 = vcmp.eq.s32.totalorder %v3862_v20, 1  ;;  %8364 = vset.pattern.permute.xlu1 %v13852_v36 }
 0x48c   :  { %13938 = vst [vmem:[#allocation228_spill] sm:$0xff] %v11599_v25  ;;  %v11602_v54 = vsel %vm3900_vm9, -1e+09, %v3790_v53  ;;  %4966 = vperm.xlu1 %8364, %v10736_v33   ;;  %v11605_v16 = vpop.f32.mrf.mxu0  ;;  %v13941_v53 = vld [vmem:[#allocation178_spill] sm:$0xff]  ;;  %v3297_v25 = vadd.f32 %v11421_v45, %v10973_v5 }
 0x48d   :  { %13939 = vst [vmem:[#allocation229_spill] sm:$0xff] %v11602_v54  ;;  %v3341_v62 = vpop.permute.xlu0 %3340  ;;  %vm4451_vm11 = vcmp.eq.s32.totalorder %v13941_v53, 1  ;;  %v13945_v54 = vld [vmem:[#allocation143_spill] sm:$0xff] }
 0x48e   :  { %vm3361_vm10 = vcmp.eq.s32.totalorder %v3341_v62, 1  ;;  %v11611_v13 = vpop.f32.mrf.mxu0  ;;  %v13942_v62 = vld [vmem:[#allocation175_spill] sm:$0xff]  ;;  %v1623_v49 = vadd.f32 %v13945_v54, %v10973_v5  ;;  %v1038_v54 = vadd.f32 %v13951_v32, %v10973_v5  ;;  %v13960_v32 = vld [vmem:[#allocation152_spill] sm:$0xff] }
 0x48f   :  { %v11613_v39 = vsel %vm3361_vm10, -1e+09, %v3287_v56  ;;  %v11615_v20 = vpop.permute.xlu1 %4951  ;;  %vm4450_vm12 = vcmp.eq.s32.totalorder %v13942_v62, 1  ;;  %vm3897_vm10 = vcmp.eq.s32.totalorder %v11383_v21, 1 }
 0x490   :  { %13940 = vst [vmem:[#allocation230_spill] sm:$0xff] %v11613_v39  ;;  %8365 = vset.pattern.permute.xlu1 %v13821_v47  ;;  %v8131_v33 = vpop.f32.mrf.mxu0 }
 0x491   :  { %v4353_v24 = vadd.f32 %v8131_v33, %v10973_v5  ;;  %v3347_v46 = vpop.permute.xlu0 %3346  ;;  %3331 = vperm.xlu1 %8365, %v10875_v60  }
 0x492   :  { %vm3363_vm13 = vcmp.eq.s32.totalorder %v3347_v46, 1  ;;  %v4347_v56 = vpop.f32.mrf.mxu0 }
 0x493   :  { %v11624_v15 = vsel %vm4451_vm11, -1e+09, %v4353_v24  ;;  %v11626_v39 = vsel %vm3363_vm13, -1e+09, %v3297_v25  ;;  %v4348_v53 = vadd.f32 %v4347_v56, %v10973_v5  ;;  %v13952_v56 = vld [vmem:[#allocation137_spill] sm:$0xff]  ;;  %vm1164_vm11 = vcmp.eq.s32.totalorder %v11563_v43, 1 }
 0x494   :  { %13943 = vst [vmem:[#allocation178_spill] sm:$0xff] %v11624_v15  ;;  %13944 = vst [vmem:[#allocation175_spill] sm:$0xff] %v11626_v39  ;;  %v1685_v45 = vpop.permute.xlu1 %1684  ;;  %v8134_v33 = vpop.f32.mrf.mxu0  ;;  %v13957_v39 = vld [vmem:[#allocation139_spill] sm:$0xff]  ;;  %v11764_v43 = vadd.f32 %v11219_v2, %v10973_v5  ;;  %vm3898_vm13 = vcmp.eq.s32.totalorder %v11397_v61, 1  ;;  %v11775_v38 = vsel %vm1164_vm11, -1e+09, %v1038_v54 }
 0x495   :  { %v11632_v52 = vsel %vm4450_vm12, -1e+09, %v4348_v53  ;;  %vm1713_vm15 = vcmp.eq.s32.totalorder %v1685_v45, 1  ;;  %v4363_v62 = vadd.f32 %v8134_v33, %v10973_v5  ;;  %8366 = vset.pattern.permute.xlu1 %v13840_v6  ;;  %v11648_v53 = vadd.f32 %v13952_v56, %v10973_v5  ;;  %v4946_v54 = vpop.permute.xlu0 %4945 }
 0x496   :  { %13947 = vst [vmem:[#allocation143_spill] sm:$0xff] %v11632_v52  ;;  %v11637_v46 = vmax.f32 %v5094_v0, %v11632_v52  ;;  %v11639_v25 = vsel %vm1713_vm15, -1e+09, %v1623_v49  ;;  %4421 = vperm.xlu1 %8366, %v11047_v57   ;;  %v11642_v24 = vpop.f32.mrf.mxu0  ;;  %v13955_v0 = vld [vmem:[#allocation138_spill] sm:$0xff]  ;;  %v11660_v15 = vadd.f32 %v13957_v39, %v10973_v5  ;;  %v1638_v52 = vadd.f32 %v13960_v32, %v10973_v5  ;;  %v13968_v32 = vld [vmem:[#allocation148_spill] sm:$0xff] }
 0x497   :  { %13949 = vst [vmem:[#allocation231_spill] sm:$0xff] %v11639_v25  ;;  %13950 = vst [vmem:[#allocation232_spill] sm:$0xff] %v11642_v24  ;;  %v11652_v33 = vsel %vm4453_vm14, -1e+09, %v4363_v62  ;;  %v11656_v49 = vadd.f32 %v13955_v0, %v10973_v5  ;;  %v13959_v24 = vld [vmem:[#allocation149_spill] sm:$0xff]  ;;  %v13964_v62 = vld [vmem:[#allocation147_spill] sm:$0xff] }
 0x498   :  { %13948 = vst [vmem:[#allocation180_spill] sm:$0xff] %v11637_v46  ;;  %13953 = vst [vmem:[#allocation136_spill] sm:$0xff] %v11648_v53  ;;  %vm1715_vm2 = vcmp.eq.s32.totalorder %v13959_v24, 1  ;;  %v11665_v56 = vpop.f32.mrf.mxu0  ;;  %v13962_v53 = vld [vmem:[#allocation140_spill] sm:$0xff]  ;;  %v13965_v0 = vld [vmem:[#allocation153_spill] sm:$0xff]  ;;  %v11680_v46 = vadd.f32 %v13968_v32, %v10973_v5  ;;  %vm4993_vm15 = vcmp.eq.s32.totalorder %v11489_v11, 1 }
 0x499   :  { %13954 = vst [vmem:[#allocation137_spill] sm:$0xff] %v11652_v33  ;;  %13956 = vst [vmem:[#allocation138_spill] sm:$0xff] %v11656_v49  ;;  %v11669_v45 = vadd.f32 %v13962_v53, %v10973_v5  ;;  %v1633_v33 = vadd.f32 %v13964_v62, %v10973_v5  ;;  %vm1716_vm3 = vcmp.eq.s32.totalorder %v13965_v0, 1  ;;  %v13966_v49 = vld [vmem:[#allocation179_spill] sm:$0xff]  ;;  %v13967_v24 = vld [vmem:[#allocation144_spill] sm:$0xff] }
 0x49a   :  { %13958 = vst [vmem:[#allocation139_spill] sm:$0xff] %v11660_v15  ;;  %13961 = vst [vmem:[#allocation149_spill] sm:$0xff] %v11665_v56  ;;  %v2709_v39 = vadd.f32 %v13966_v49, %v10973_v5  ;;  %v2775_v15 = vpop.permute.xlu1 %2774  ;;  %v1618_v6 = vadd.f32 %v13967_v24, %v10973_v5  ;;  %v13970_v56 = vld [vmem:[#allocation167_spill] sm:$0xff]  ;;  %8368 = vset.pattern.permute.xlu1 %v13821_v47  ;;  %v11685_v62 = vpop.f32.mrf.mxu0  ;;  %v13974_v49 = vld [vmem:[#allocation169_spill] sm:$0xff] }
 0x49b   :  { %13963 = vst [vmem:[#allocation152_spill] sm:$0xff] %v11669_v45  ;;  %13969 = vst [vmem:[#allocation140_spill] sm:$0xff] %v11680_v46  ;;  %v2191_v53 = vadd.f32 %v13970_v56, %v10973_v5  ;;  %vm2807_vm4 = vcmp.eq.s32.totalorder %v2775_v15, 1  ;;  %v11687_v0 = vsel %vm1715_vm2, -1e+09, %v1633_v33  ;;  %v13973_v45 = vld [vmem:[#allocation163_spill] sm:$0xff]  ;;  %v2186_v3 = vadd.f32 %v13974_v49, %v10973_v5  ;;  %3334 = vperm.xlu1 %8368, %v10673_v30  }
 0x49c   :  { %13971 = vst [vmem:[#allocation147_spill] sm:$0xff] %v11685_v62  ;;  %13972 = vst [vmem:[#allocation153_spill] sm:$0xff] %v11687_v0  ;;  %vm2265_vm5 = vcmp.eq.s32.totalorder %v13973_v45, 1  ;;  %v11692_v24 = vsel %vm2807_vm4, -1e+09, %v2709_v39  ;;  %v13976_v32 = vld [vmem:[#allocation151_spill] sm:$0xff]  ;;  %v11704_v62 = vpop.f32.mrf.mxu0 }
 0x49d   :  { %13975 = vst [vmem:[#allocation179_spill] sm:$0xff] %v11692_v24  ;;  %v11697_v46 = vadd.f32 %v13976_v32, %v10973_v5  ;;  %v11699_v15 = vsel %vm1716_vm3, -1e+09, %v1638_v52  ;;  %v13979_v56 = vld [vmem:[#allocation160_spill] sm:$0xff]  ;;  %v5063_v33 = vmax.f32 %v11464_v37, %v11692_v24  ;;  %13980 = vst [vmem:[#allocation167_spill] sm:$0xff] %v11704_v62  ;;  %v13981_v45 = vld [vmem:[#allocation161_spill] sm:$0xff] }
 0x49e   :  { %13978 = vst [vmem:[#allocation148_spill] sm:$0xff] %v11699_v15  ;;  %vm2264_vm6 = vcmp.eq.s32.totalorder %v13979_v56, 1  ;;  %v11708_v49 = vadd.f32 %v13981_v45, %v10973_v5  ;;  %v13982_v39 = vld [vmem:[#allocation162_spill] sm:$0xff]  ;;  %v13983_v30 = vld [vmem:[#allocation164_spill] sm:$0xff]  ;;  %v13984_v52 = vld [vmem:[#allocation165_spill] sm:$0xff]  ;;  %v11724_v62 = vpop.permute.xlu1 %4954  ;;  %v11726_v45 = vpop.f32.mrf.mxu0  ;;  %vm4992_vm2 = vcmp.eq.s32.totalorder %v4946_v54, 1 }
 0x49f   :  { %13977 = vst [vmem:[#allocation144_spill] sm:$0xff] %v11697_v46  ;;  %v2166_v47 = vadd.f32 %v13982_v39, %v10973_v5  ;;  %v11714_v32 = vadd.f32 %v13983_v30, %v10973_v5  ;;  %v11718_v46 = vadd.f32 %v13984_v52, %v10973_v5  ;;  %v11720_v56 = vsel %vm2265_vm5, -1e+09, %v2191_v53  ;;  %v13986_v37 = vld [vmem:[#allocation168_spill] sm:$0xff]  ;;  %13987 = vst [vmem:[#allocation169_spill] sm:$0xff] %v11726_v45  ;;  %v13990_v30 = vld [vmem:[#allocation171_spill] sm:$0xff] }
 0x4a0   :  { %13985 = vst [vmem:[#allocation163_spill] sm:$0xff] %v11720_v56  ;;  %vm4444_vm1 = vcmp.eq.s32.totalorder %v13986_v37, 1  ;;  %v11729_v39 = vmax.f32 %v5063_v33, %v11588_v42  ;;  %v11731_v24 = vsel %vm2264_vm6, -1e+09, %v2186_v3  ;;  %vm4445_vm8 = vcmp.eq.s32.totalorder %v13990_v30, 1  ;;  %8370 = vset.pattern.permute.xlu1 %v13818_v22  ;;  %v13991_v56 = vld [vmem:[#allocation174_spill] sm:$0xff]  ;;  %v11745_v45 = vpop.f32.mrf.mxu0 }
 0x4a1   :  { %13989 = vst [vmem:[#allocation160_spill] sm:$0xff] %v11731_v24  ;;  %v3775_v52 = vadd.f32 %v11450_v29, %v10973_v5  ;;  %v4323_v53 = vadd.f32 %v11578_v40, %v10973_v5  ;;  %vm4447_vm9 = vcmp.eq.s32.totalorder %v13991_v56, 1  ;;  %v3770_v33 = vadd.f32 %v11461_v55, %v10973_v5  ;;  %v13992_v3 = vld [vmem:[#allocation150_spill] sm:$0xff]  ;;  %13993 = vst [vmem:[#allocation161_spill] sm:$0xff] %v11745_v45  ;;  %v13994_v42 = vld [vmem:[#allocation176_spill] sm:$0xff] }
 0x4a2   :  { %13988 = vst [vmem:[#allocation151_spill] sm:$0xff] %v11729_v39  ;;  %1151 = vperm.xlu1 %8370, %v13992_v3   ;;  %vm3896_vm12 = vcmp.eq.s32.totalorder %v13994_v42, 1  ;;  %v13995_v29 = vld [vmem:[#allocation182_spill] sm:$0xff]  ;;  %v3780_v22 = vadd.f32 %v11480_v59, %v10973_v5  ;;  %v11756_v21 = vsel %vm1712_vm7, -1e+09, %v1618_v6  ;;  %v11760_v55 = vadd.f32 %v11183_v10, %v10973_v5  ;;  %13997 = vst [vmem:[#allocation164_spill] sm:$0xff] %v11764_v43 }
 0x4a3   :  { %v11750_v40 = vadd.f32 %v13995_v29, %v10973_v5  ;;  %13996 = vst [vmem:[#allocation162_spill] sm:$0xff] %v11756_v21  ;;  %v4318_v42 = vadd.f32 %v11586_v51, %v10973_v5  ;;  %v11769_v29 = vpop.f32.mrf.mxu0  ;;  %v11773_v59 = vadd.f32 %v11388_v19, %v10973_v5  ;;  %v3913_v6 = vsel %vm3897_vm10, -1e+09, %v3775_v52  ;;  %14000 = vst [vmem:[#allocation171_spill] sm:$0xff] %v11775_v38  ;;  %v2230_v2 = vpop.permute.xlu1 %2229 }
 0x4a4   :  { %13998 = vst [vmem:[#allocation165_spill] sm:$0xff] %v11769_v29  ;;  %v11779_v10 = vsel %vm4445_vm8, -1e+09, %v4323_v53  ;;  %v5089_v45 = vmax.f32 %v11471_v28, %v3913_v6  ;;  %v11782_v61 = vsel %vm3896_vm12, -1e+09, %v3770_v33  ;;  %v5032_v51 = vmax.f32 %v11775_v38, %v11756_v21  ;;  %v14005_v21 = vld [vmem:[#allocation145_spill] sm:$0xff] }
 0x4a5   :  { %13999 = vst [vmem:[#allocation168_spill] sm:$0xff] %v11773_v59  ;;  %vm2260_vm14 = vcmp.eq.s32.totalorder %v2230_v2, 1  ;;  %v8180_v19 = vpop.f32.mrf.mxu0  ;;  %v11787_v29 = vsel %vm3898_vm13, -1e+09, %v3780_v22  ;;  %v11797_v53 = vsel %vm4444_vm1, -1e+09, %v4318_v42  ;;  %v5088_v11 = vmax.f32 %v11331_v14, %v11782_v61 }
 0x4a6   :  { %8371 = vset.pattern.permute.xlu1 %v13815_v31  ;;  %14001 = vst [vmem:[#allocation174_spill] sm:$0xff] %v11787_v29  ;;  %v11790_v30 = vsel %vm2260_vm14, -1e+09, %v2166_v47  ;;  %v4871_v52 = vadd.f32 %v8180_v19, %v10973_v5  ;;  %v5105_v28 = vmax.f32 %v5089_v45, %v11779_v10  ;;  %v4333_v47 = vadd.f32 %v11591_v34, %v10973_v5 }
 0x4a7   :  { %14002 = vst [vmem:[#allocation176_spill] sm:$0xff] %v11790_v30  ;;  %1699 = vperm.xlu1 %8371, %v13992_v3   ;;  %v11800_v33 = vmax.f32 %v5032_v51, %v11790_v30  ;;  %v4865_v22 = vpop.f32.mrf.mxu0  ;;  %v11809_v45 = vadd.f32 %v11393_v4, %v10973_v5  ;;  %v11813_v37 = vadd.f32 %v11403_v26, %v10973_v5  ;;  %vm4446_vm3 = vcmp.eq.s32.totalorder %v11530_v7, 1  ;;  %v14004_v26 = vld [vmem:[#allocation146_spill] sm:$0xff] }
 0x4a8   :  { %v5009_v2 = vsel %vm4993_vm15, -1e+09, %v4871_v52  ;;  %v4866_v19 = vadd.f32 %v4865_v22, %v10973_v5  ;;  %v5090_v42 = vmax.f32 %v11357_v35, %v11787_v29  ;;  %v11817_v30 = vpop.permute.xlu1 %4409  ;;  %v5104_v34 = vmax.f32 %v5088_v11, %v11797_v53 }
 0x4a9   :  { %14003 = vst [vmem:[#allocation182_spill] sm:$0xff] %v11813_v37  ;;  %v5121_v51 = vmax.f32 %v5105_v28, %v5009_v2  ;;  %v8183_v14 = vpop.f32.mrf.mxu0  ;;  %v4328_v52 = vadd.f32 %v11597_v44, %v10973_v5  ;;  %v14006_v28 = vld [vmem:[#allocation156_spill] sm:$0xff]  ;;  %v11834_v11 = vsel %vm4447_vm9, -1e+09, %v4333_v47  ;;  %vm4995_vm4 = vcmp.eq.s32.totalorder %v11724_v62, 1 }
 0x4aa   :  { %v11824_v4 = vsel %vm4992_vm2, -1e+09, %v4866_v19  ;;  %14007 = vst [vmem:[#allocation146_spill] sm:$0xff] %v11834_v11  ;;  %v4881_v19 = vadd.f32 %v8183_v14, %v10973_v5  ;;  %vm4994_vm5 = vcmp.eq.s32.totalorder %v11615_v20, 1  ;;  %v14012_v20 = vld [vmem:[#allocation194_spill] sm:$0xff]  ;;  %vm4448_vm1 = vcmp.eq.s32.totalorder %v11817_v30, 1 }
 0x4ab   :  { %8372 = vset.pattern.permute.xlu1 %v13825_v63  ;;  %v5137_v22 = vsub.f32 %v14004_v26, %v5121_v51  ;;  %v5233_v35 = vsub.f32 %v14005_v21, %v5121_v51  ;;  %v5329_v38 = vsub.f32 %v14006_v28, %v5121_v51  ;;  %v5425_v37 = vsub.f32 %v11456_v12, %v5121_v51  ;;  %v4875_v43 = vpop.f32.mrf.mxu0 }
 0x4ac   :  { %3879 = vperm.xlu1 %8372, %v10875_v60   ;;  %v5521_v44 = vsub.f32 %v11468_v23, %v5121_v51  ;;  %v5617_v54 = vsub.f32 %v3913_v6, %v5121_v51  ;;  %v11839_v21 = vmax.f32 %v5104_v34, %v11824_v4  ;;  %v11843_v12 = vsel %vm4446_vm3, -1e+09, %v4328_v52  ;;  %v14019_v52 = vld [vmem:[#allocation191_spill] sm:$0xff] }
 0x4ad   :  { %v5154_v24 = vmul.f32 1.442695, %v5137_v22  ;;  %v5250_v26 = vmul.f32 1.442695, %v5233_v35  ;;  %v5346_v15 = vmul.f32 1.442695, %v5329_v38  ;;  %v5713_v47 = vsub.f32 %v11779_v10, %v5121_v51  ;;  %v11847_v23 = vpop.permute.xlu1 %2232  ;;  %v11864_v10 = vpop.permute.xlu0 %4960 }
 0x4ae   :  { %14008 = vst [vmem:[#allocation145_spill] sm:$0xff] %v11843_v12  ;;  %v5442_v56 = vmul.f32 1.442695, %v5425_v37  ;;  %v5538_v6 = vmul.f32 1.442695, %v5521_v44  ;;  %v5136_v14 = vsub.f32 %v11208_v27, %v11839_v21  ;;  %v4876_v38 = vadd.f32 %v4875_v43, %v10973_v5  ;;  %v8186_v37 = vpop.f32.mrf.mxu0 }
 0x4af   :  { %8428 = vpow2.f32 %v5154_v24  ;;  %v5634_v7 = vmul.f32 1.442695, %v5617_v54  ;;  %v5809_v34 = vsub.f32 %v5009_v2, %v5121_v51  ;;  %v11858_v24 = vadd.f32 %v11504_v41, %v10973_v5  ;;  %v14011_v41 = vld [vmem:[#allocation183_spill] sm:$0xff]  ;;  %v14013_v54 = vld [vmem:[#allocation192_spill] sm:$0xff] }
 0x4b0   :  { %8373 = vset.pattern.permute.xlu1 %v13852_v36  ;;  %8430 = vpow2.f32 %v5250_v26  ;;  %v14009_v27 = vmax.f32 %v11338_v8, %v11484_v50  ;;  %v5011_v2 = vsel %vm4995_vm4, -1e+09, %v4881_v19  ;;  %v11870_v51 = vadd.f32 %v11524_v18, %v10973_v5  ;;  %v11882_v44 = vpop.f32.mrf.mxu0  ;;  %v14014_v26 = vld [vmem:[#allocation195_spill] sm:$0xff] }
 0x4b1   :  { %4969 = vperm.xlu1 %8373, %v11047_v57   ;;  %8432 = vpow2.f32 %v5346_v15  ;;  %v5106_v57 = vmax.f32 %v5090_v42, %v11843_v12  ;;  %v5232_v8 = vsub.f32 %v14011_v41, %v11839_v21  ;;  %v11878_v35 = vsel %vm4994_vm5, -1e+09, %v4876_v38  ;;  %v4964_v41 = vpop.permute.xlu0 %4963 }
 0x4b2   :  { %v5107_v43 = vmax.f32 %v14009_v27, %v11834_v11  ;;  %14010 = vst [vmem:[#allocation156_spill] sm:$0xff] %v11870_v51  ;;  %8434 = vpow2.f32 %v5442_v56  ;;  %v4413_v15 = vpop.permute.xlu1 %4412  ;;  %v5730_v62 = vmul.f32 1.442695, %v5713_v47  ;;  %v5826_v28 = vmul.f32 1.442695, %v5809_v34  ;;  %v14015_v47 = vld [vmem:[#allocation135_spill] sm:$0xff] }
 0x4b3   :  { %8436 = vpow2.f32 %v5538_v6  ;;  %v5808_v18 = vsub.f32 %v11824_v4, %v11839_v21  ;;  %v11892_v6 = vmax.f32 %v5106_v57, %v11878_v35  ;;  %v4343_v4 = vadd.f32 %v11605_v16, %v10973_v5  ;;  %v14017_v34 = vld [vmem:[#allocation202_spill] sm:$0xff] }
 0x4b4   :  { %v11876_v22 = vmax.f32 %v5107_v43, %v5011_v2  ;;  %8438 = vpow2.f32 %v5634_v7  ;;  %v5152_v38 = vmul.f32 1.442695, %v5136_v14  ;;  %v4338_v43 = vadd.f32 %v11611_v13, %v10973_v5  ;;  %v11906_v14 = vpop.f32.mrf.mxu0 }
 0x4b5   :  { %8375 = vset.pattern.permute.xlu1 %v13815_v31  ;;  %v14016_v31 = vld [vmem:[#allocation197_spill] sm:$0xff]  ;;  %vm4997_vm6 = vcmp.eq.s32.totalorder %v11864_v10, 1  ;;  %v5248_v57 = vmul.f32 1.442695, %v5232_v8  ;;  %vm4998_vm7 = vcmp.eq.s32.totalorder %v4964_v41, 1  ;;  %8440 = vpow2.f32 %v5730_v62  ;;  %v14034_v41 = vld [vmem:[#allocation180_spill] sm:$0xff] }
 0x4b6   :  { %v5139_v42 = vsub.f32 %v14012_v20, %v11876_v22  ;;  %v5235_v19 = vsub.f32 %v14013_v54, %v11876_v22  ;;  %v5331_v56 = vsub.f32 %v14014_v26, %v11876_v22  ;;  %1702 = vperm.xlu1 %8375, %v14015_v47   ;;  %v5427_v7 = vsub.f32 %v14016_v31, %v11876_v22  ;;  %v14018_v31 = vld [vmem:[#allocation189_spill] sm:$0xff] }
 0x4b7   :  { %v5824_v20 = vmul.f32 1.442695, %v5808_v18  ;;  %v5811_v16 = vsub.f32 %v5011_v2, %v11876_v22  ;;  %v11908_v54 = vpop.permute.xlu1 %1687  ;;  %8442 = vpow2.f32 %v5826_v28  ;;  %v5138_v13 = vsub.f32 %v14018_v31, %v11892_v6 }
 0x4b8   :  { %v5158_v26 = vmul.f32 1.442695, %v5139_v42  ;;  %8444 = vpow2.f32 %v5152_v38  ;;  %v11915_v30 = vsel %vm4448_vm1, -1e+09, %v4338_v43  ;;  %v4891_v8 = vadd.f32 %v8186_v37, %v10973_v5  ;;  %v4895_v37 = vpop.f32.mrf.mxu0  ;;  %v14022_v43 = vld [vmem:[#allocation2_spill] sm:$0xff] }
 0x4b9   :  { %vm2261_vm8 = vcmp.eq.s32.totalorder %v11847_v23, 1  ;;  %8446 = vpow2.f32 %v5248_v57  ;;  %v5254_v2 = vmul.f32 1.442695, %v5235_v19  ;;  %v5350_v62 = vmul.f32 1.442695, %v5331_v56  ;;  %v14023_v19 = vld [vmem:[#allocation186_spill] sm:$0xff] }
 0x4ba   :  { %8376 = vset.pattern.permute.xlu1 %v13819_v48  ;;  %v11921_v28 = vsel %vm2261_vm8, -1e+09, %v11708_v49  ;;  %8448 = vpow2.f32 %v5824_v20  ;;  %v5446_v42 = vmul.f32 1.442695, %v5427_v7  ;;  %v5830_v31 = vmul.f32 1.442695, %v5811_v16 }
 0x4bb   :  { %2792 = vperm.xlu1 %8376, %v13932_v17   ;;  %14020 = vst [vmem:[#allocation183_spill] sm:$0xff] %v11921_v28  ;;  %v14021_v48 = vmax.f32 %v11323_v9, %v11639_v25  ;;  %8450 = vpow2.f32 %v5158_v26  ;;  %v5234_v56 = vsub.f32 %v14023_v19, %v11892_v6  ;;  %vm4449_vm9 = vcmp.eq.s32.totalorder %v4413_v15, 1  ;;  %v14024_v20 = vld [vmem:[#allocation19_spill] sm:$0xff]  ;;  %v14026_v15 = vld [vmem:[#allocation181_spill] sm:$0xff]  ;;  %v14028_v19 = vld [vmem:[#allocation134_spill] sm:$0xff] }
 0x4bc   :  { %v8429_v18 = vpop.eup %8428  ;;  %v11932_v49 = vpop.permute.xlu1 %2777  ;;  %8452 = vpow2.f32 %v5254_v2  ;;  %v11942_v26 = vsel %vm4997_vm6, -1e+09, %v4891_v8  ;;  %v14029_v9 = vld [vmem:[#allocation35_spill] sm:$0xff]  ;;  %v5156_v10 = vmul.f32 1.442695, %v5138_v13  ;;  %vm1714_vm10 = vcmp.eq.s32.totalorder %v11908_v54, 1 }
 0x4bd   :  { %v11927_v38 = vmax.f32 %v14021_v48, %v11921_v28  ;;  %v8431_v23 = vpop.eup %8430  ;;  %v5201_v27 = vmul.f32 %v8429_v18, %v14022_v43  ;;  %v11937_v48 = vsel %vm4449_vm9, -1e+09, %v4343_v4  ;;  %14025 = vst [vmem:[#allocation194_spill] sm:$0xff] %v11942_v26  ;;  %v14027_v43 = vmax.f32 %v11559_v58, %v14026_v15  ;;  %v14033_v13 = vld [vmem:[#allocation199_spill] sm:$0xff] }
 0x4be   :  { %v8433_v57 = vpop.eup %8432  ;;  %v5281_v7 = vadd.f32 %v8431_v23, %v8429_v18  ;;  %v5297_v16 = vmul.f32 %v8431_v23, %v14024_v20  ;;  %v4896_v23 = vadd.f32 %v4895_v37, %v10973_v5  ;;  %8454 = vpow2.f32 %v5350_v62  ;;  %v14030_v37 = vld [vmem:[#allocation51_spill] sm:$0xff]  ;;  %v14032_v62 = vld [vmem:[#allocation196_spill] sm:$0xff] }
 0x4bf   :  { %8378 = vset.pattern.permute.xlu1 %v13852_v36  ;;  %v8435_v28 = vpop.eup %8434  ;;  %v5109_v18 = vmax.f32 %v14027_v43, %v11937_v48  ;;  %v5393_v51 = vmul.f32 %v8433_v57, %v14029_v9  ;;  %8456 = vpow2.f32 %v5446_v42  ;;  %v14041_v17 = vld [vmem:[#allocation99_spill] sm:$0xff]  ;;  %vm2808_vm11 = vcmp.eq.s32.totalorder %v11932_v49, 1 }
 0x4c0   :  { %4972 = vperm.xlu1 %8378, %v14028_v19   ;;  %v8437_v20 = vpop.eup %8436  ;;  %v5313_v4 = vadd.f32 %v5297_v16, %v5201_v27  ;;  %v5377_v25 = vadd.f32 %v8433_v57, %v5281_v7  ;;  %v11955_v11 = vsel %vm4998_vm7, -1e+09, %v4896_v23  ;;  %v5489_v50 = vmul.f32 %v8435_v28, %v14030_v37  ;;  %v14031_v27 = vld [vmem:[#allocation198_spill] sm:$0xff]  ;;  %v14038_v37 = vld [vmem:[#allocation84_spill] sm:$0xff] }
 0x4c1   :  { %v8439_v2 = vpop.eup %8438  ;;  %v11952_v8 = vmax.f32 %v5109_v18, %v11942_v26  ;;  %8458 = vpow2.f32 %v5830_v31  ;;  %v11958_v19 = vpop.permute.xlu1 %4957  ;;  %v11968_v7 = vmax.f32 %v14034_v41, %v11955_v11  ;;  %v14036_v31 = vld [vmem:[#allocation68_spill] sm:$0xff]  ;;  %v14037_v18 = vld [vmem:[#allocation166_spill] sm:$0xff]  ;;  %v14039_v26 = vld [vmem:[#allocation221_spill] sm:$0xff]  ;;  %v12048_v49 = vadd.f32 %v11906_v14, %v10973_v5 }
 0x4c2   :  { %v5409_v58 = vadd.f32 %v5393_v51, %v5313_v4  ;;  %v5473_v43 = vadd.f32 %v8435_v28, %v5377_v25  ;;  %v14035_v51 = vmov 2   ;;  %v5585_v16 = vmul.f32 %v8437_v20, %v14036_v31  ;;  %v8441_v4 = vpop.eup %8440 }
 0x4c3   :  { %v5141_v9 = vsub.f32 %v14031_v27, %v11952_v8  ;;  %v5237_v42 = vsub.f32 %v14032_v62, %v11952_v8  ;;  %v5333_v57 = vsub.f32 %v14033_v13, %v11952_v8  ;;  %v5429_v23 = vsub.f32 %v14037_v18, %v11952_v8  ;;  %v14040_v18 = vld [vmem:[#allocation207_spill] sm:$0xff]  ;;  %14055 = vst [vmem:[#allocation135_spill] sm:$0xff] %v12048_v49 }
 0x4c4   :  { %8379 = vset.pattern.permute.xlu1 %v14035_v51  ;;  %v5505_v25 = vadd.f32 %v5489_v50, %v5409_v58  ;;  %v5569_v28 = vadd.f32 %v8437_v20, %v5473_v43  ;;  %v5681_v27 = vmul.f32 %v8439_v2, %v14038_v37  ;;  %v5525_v41 = vsub.f32 %v14039_v26, %v11952_v8  ;;  %v8443_v59 = vpop.eup %8442 }
 0x4c5   :  { %2247 = vperm.xlu1 %8379, %v13992_v3   ;;  %v5162_v62 = vmul.f32 1.442695, %v5141_v9  ;;  %v5258_v13 = vmul.f32 1.442695, %v5237_v42  ;;  %v5354_v50 = vmul.f32 1.442695, %v5333_v57  ;;  %v5621_v20 = vsub.f32 %v14026_v15, %v11952_v8  ;;  %v11980_v58 = vpop.eup %8444 }
 0x4c6   :  { %v5601_v12 = vadd.f32 %v5585_v16, %v5505_v25  ;;  %v5665_v29 = vadd.f32 %v8439_v2, %v5569_v28  ;;  %v5252_v43 = vmul.f32 1.442695, %v5234_v56  ;;  %v5450_v31 = vmul.f32 1.442695, %v5429_v23  ;;  %v1143_v9 = vpop.permute.xlu1 %1142  ;;  %v11984_v42 = vpop.eup %8446  ;;  %v14043_v15 = vld [vmem:[#allocation115_spill] sm:$0xff] }
 0x4c7   :  { %8460 = vpow2.f32 %v5162_v62  ;;  %v5142_v37 = vsub.f32 %v14040_v18, %v11968_v7  ;;  %v5777_v25 = vmul.f32 %v8441_v4, %v14041_v17  ;;  %v14042_v2 = vmov 6   ;;  %v11988_v57 = vpop.eup %8448  ;;  %v14044_v17 = vld [vmem:[#allocation208_spill] sm:$0xff] }
 0x4c8   :  { %v5697_v3 = vadd.f32 %v5681_v27, %v5601_v12  ;;  %v5761_v26 = vadd.f32 %v8441_v4, %v5665_v29  ;;  %8462 = vpow2.f32 %v5258_v13  ;;  %v5873_v28 = vmul.f32 %v8443_v59, %v14043_v15  ;;  %v11994_v23 = vpop.eup %8450  ;;  %v14045_v27 = vld [vmem:[#allocation216_spill] sm:$0xff] }
 0x4c9   :  { %8380 = vset.pattern.permute.xlu1 %v14042_v2  ;;  %8464 = vpow2.f32 %v5156_v10  ;;  %v5546_v56 = vmul.f32 1.442695, %v5525_v41  ;;  %v5717_v16 = vsub.f32 %v11937_v48, %v11952_v8  ;;  %v12002_v62 = vadd.f32 %v14045_v27, %v10973_v5  ;;  %v14047_v48 = vld [vmem:[#allocation205_spill] sm:$0xff]  ;;  %v12009_v18 = vpop.eup %8452 }
 0x4ca   :  { %4427 = vperm.xlu1 %8380, %v10875_v60   ;;  %v5793_v12 = vadd.f32 %v5777_v25, %v5697_v3  ;;  %v11996_v29 = vadd.f32 %v8443_v59, %v5761_v26  ;;  %8466 = vpow2.f32 %v5354_v50  ;;  %v14046_v10 = vsub.f32 %v11878_v35, %v11892_v6  ;;  %v14048_v59 = vld [vmem:[#allocation213_spill] sm:$0xff] }
 0x4cb   :  { %8468 = vpow2.f32 %v5450_v31  ;;  %v5238_v41 = vsub.f32 %v14047_v48, %v11968_v7  ;;  %v14049_v50 = vld [vmem:[#allocation229_spill] sm:$0xff]  ;;  %v5642_v15 = vmul.f32 1.442695, %v5621_v20  ;;  %v2781_v27 = vpop.permute.xlu1 %2780  ;;  %v12018_v4 = vpop.eup %8454  ;;  %v14051_v35 = vsub.f32 %v14017_v34, %v11876_v22  ;;  %v14056_v48 = vld [vmem:[#allocation136_spill] sm:$0xff] }
 0x4cc   :  { %v5828_v13 = vmul.f32 1.442695, %v14046_v10  ;;  %v12011_v3 = vadd.f32 %v5873_v28, %v5793_v12  ;;  %8470 = vrcp.f32 %v11996_v29  ;;  %v14050_v26 = vmax.f32 %v14048_v59, %v14049_v50  ;;  %v12027_v28 = vpop.eup %8456 }
 0x4cd   :  { %v12023_v31 = vmul.f32 1.442695, %v14051_v35  ;;  %8472 = vpow2.f32 %v5252_v43  ;;  %v5738_v10 = vmul.f32 1.442695, %v5717_v16  ;;  %v5164_v12 = vmul.f32 1.442695, %v5142_v37 }
 0x4ce   :  { %v5108_v25 = vmax.f32 %v14050_v26, %v11915_v30  ;;  %8381 = vset.pattern.permute.xlu1 %v14035_v51  ;;  %8474 = vpow2.f32 %v5546_v56  ;;  %v5814_v20 = vsub.f32 %v11955_v11, %v11968_v7  ;;  %v12033_v34 = vpop.eup %8458  ;;  %v4886_v43 = vadd.f32 %v11882_v44, %v10973_v5  ;;  %v14053_v56 = vld [vmem:[#allocation140_spill] sm:$0xff]  ;;  %v14059_v26 = vld [vmem:[#allocation130_spill] sm:$0xff]  ;;  %v14061_v35 = vld [vmem:[#allocation185_spill] sm:$0xff] }
 0x4cf   :  { %2250 = vperm.xlu1 %8381, %v14015_v47   ;;  %8476 = vpow2.f32 %v5828_v13  ;;  %v5260_v54 = vmul.f32 1.442695, %v5238_v41  ;;  %v12038_v51 = vsel %vm2808_vm11, -1e+09, %v11760_v55  ;;  %v12041_v37 = vsel %vm1714_vm10, -1e+09, %v14053_v56 }
 0x4d0   :  { %14052 = vst [vmem:[#allocation192_spill] sm:$0xff] %v12038_v51  ;;  %8478 = vpow2.f32 %v5642_v15  ;;  %14054 = vst [vmem:[#allocation195_spill] sm:$0xff] %v12041_v37  ;;  %vm4996_vm12 = vcmp.eq.s32.totalorder %v11958_v19, 1  ;;  %vm1167_vm13 = vcmp.eq.s32.totalorder %v1143_v9, 1  ;;  %v3871_v44 = vpop.permute.xlu1 %3870  ;;  %v5836_v55 = vmul.f32 1.442695, %v5814_v20 }
 0x4d1   :  { %8480 = vpow2.f32 %v5738_v10  ;;  %v5012_v16 = vsel %vm4996_vm12, -1e+09, %v4886_v43  ;;  %v12053_v41 = vsel %vm1167_vm13, -1e+09, %v14056_v48  ;;  %v14058_v19 = vld [vmem:[#allocation203_spill] sm:$0xff]  ;;  %vm2809_vm14 = vcmp.eq.s32.totalorder %v2781_v27, 1 }
 0x4d2   :  { %8482 = vpow2.f32 %v5164_v12  ;;  %v12050_v13 = vmax.f32 %v5108_v25, %v5012_v16  ;;  %14057 = vst [vmem:[#allocation197_spill] sm:$0xff] %v12053_v41  ;;  %v5034_v59 = vmax.f32 %v14058_v19, %v12041_v37  ;;  %v14060_v25 = vld [vmem:[#allocation184_spill] sm:$0xff]  ;;  %v14062_v12 = vld [vmem:[#allocation190_spill] sm:$0xff]  ;;  %v12073_v56 = vsel %vm2809_vm14, -1e+09, %v11750_v40  ;;  %v14064_v27 = vld [vmem:[#allocation3_spill] sm:$0xff] }
 0x4d3   :  { %8382 = vset.pattern.permute.xlu1 %v14042_v2  ;;  %8484 = vpow2.f32 %v5260_v54  ;;  %14063 = vst [vmem:[#allocation202_spill] sm:$0xff] %v12073_v56  ;;  %vm3903_vm15 = vcmp.eq.s32.totalorder %v3871_v44, 1  ;;  %v5200_v48 = vmul.f32 %v11980_v58, %v14064_v27  ;;  %v14068_v40 = vld [vmem:[#allocation132_spill] sm:$0xff] }
 0x4d4   :  { %4430 = vperm.xlu1 %8382, %v14059_v26   ;;  %v12061_v9 = vpop.eup %8460  ;;  %v5140_v15 = vsub.f32 %v14060_v25, %v12050_v13  ;;  %v5236_v10 = vsub.f32 %v14061_v35, %v12050_v13  ;;  %v5812_v43 = vsub.f32 %v5012_v16, %v12050_v13  ;;  %v12079_v26 = vadd.f32 %v11984_v42, %v11980_v58  ;;  %v14066_v58 = vld [vmem:[#allocation20_spill] sm:$0xff] }
 0x4d5   :  { %v12070_v54 = vpop.eup %8462  ;;  %8486 = vpow2.f32 %v5836_v55  ;;  %v2236_v14 = vpop.permute.xlu1 %2235  ;;  %v12088_v44 = vsel %vm3903_vm15, -1e+09, %v11858_v24  ;;  %v5296_v27 = vmul.f32 %v11984_v42, %v14066_v58  ;;  %v14069_v42 = vsub.f32 %v11215_v1, %v11839_v21 }
 0x4d6   :  { %v8465_v25 = vpop.eup %8464  ;;  %v5285_v35 = vadd.f32 %v12070_v54, %v12061_v9  ;;  %v5160_v20 = vmul.f32 1.442695, %v5140_v15  ;;  %v5256_v16 = vmul.f32 1.442695, %v5236_v10  ;;  %14065 = vst [vmem:[#allocation189_spill] sm:$0xff] %v12088_v44  ;;  %vm2262_vm2 = vcmp.eq.s32.totalorder %v2236_v14, 1 }
 0x4d7   :  { %v12083_v11 = vpop.eup %8466  ;;  %v5832_v15 = vmul.f32 1.442695, %v5812_v43  ;;  %v12099_v19 = vsel %vm2262_vm2, -1e+09, %v11718_v46  ;;  %v12105_v5 = vadd.f32 %v5296_v27, %v5200_v48  ;;  %v14070_v46 = vld [vmem:[#allocation188_spill] sm:$0xff]  ;;  %v5616_v1 = vsub.f32 %v11782_v61, %v11839_v21 }
 0x4d8   :  { %8383 = vset.pattern.permute.xlu1 %v13825_v63  ;;  %v12093_v37 = vpop.eup %8468  ;;  %v5381_v55 = vadd.f32 %v12083_v11, %v5285_v35  ;;  %14067 = vst [vmem:[#allocation191_spill] sm:$0xff] %v12099_v19  ;;  %8488 = vpow2.f32 %v5160_v20  ;;  %v12103_v14 = vmax.f32 %v5034_v59, %v12099_v19  ;;  %v5344_v35 = vmul.f32 1.442695, %v14069_v42  ;;  %v14071_v59 = vld [vmem:[#allocation201_spill] sm:$0xff] }
 0x4d9   :  { %3885 = vperm.xlu1 %8383, %v14068_v40   ;;  %v8471_v24 = vpop.eup %8470  ;;  %8490 = vpow2.f32 %v5256_v16  ;;  %v5424_v44 = vsub.f32 %v14070_v46, %v11839_v21  ;;  %v5520_v48 = vsub.f32 %v14071_v59, %v11839_v21  ;;  %v5712_v27 = vsub.f32 %v11797_v53, %v11839_v21 }
 0x4da   :  { %v8473_v43 = vpop.eup %8472  ;;  %v5921_v58 = vmul.f32 %v8471_v24, %v11996_v29  ;;  %v5477_v10 = vadd.f32 %v12093_v37, %v5381_v55  ;;  %v3326_v20 = vpop.permute.xlu1 %3325  ;;  %8492 = vpow2.f32 %v5344_v35  ;;  %v5632_v59 = vmul.f32 1.442695, %v5616_v1 }
 0x4db   :  { %v12114_v39 = vpop.eup %8474  ;;  %vm3356_vm3 = vcmp.eq.s32.totalorder %v3326_v20, 1  ;;  %v5440_v42 = vmul.f32 1.442695, %v5424_v44  ;;  %8494 = vpow2.f32 %v5832_v15  ;;  %v5536_v61 = vmul.f32 1.442695, %v5520_v48  ;;  %v14074_v20 = vld [vmem:[#allocation5_spill] sm:$0xff] }
 0x4dc   :  { %v12122_v29 = vpop.eup %8476  ;;  %v5937_v55 = vsub.f32 2.0, %v5921_v58  ;;  %v5573_v16 = vadd.f32 %v12114_v39, %v5477_v10  ;;  %v12129_v35 = vsel %vm3356_vm3, -1e+09, %v11809_v45  ;;  %v14073_v10 = vmax.f32 %v11800_v33, %v12038_v51 }
 0x4dd   :  { %8384 = vset.pattern.permute.xlu1 %v13852_v36  ;;  %v12126_v46 = vpop.eup %8478  ;;  %14072 = vst [vmem:[#allocation2_spill] sm:$0xff] %v12129_v35  ;;  %8496 = vpow2.f32 %v5440_v42  ;;  %v5728_v45 = vmul.f32 1.442695, %v5712_v27  ;;  %v12144_v48 = vadd.f32 %v8473_v43, %v8465_v25 }
 0x4de   :  { %4975 = vperm.xlu1 %8384, %v10875_v60   ;;  %v12132_v53 = vpop.eup %8480  ;;  %v5953_v21 = vmul.f32 %v8471_v24, %v5937_v55  ;;  %v5669_v58 = vadd.f32 %v12126_v46, %v5573_v16  ;;  %v12139_v44 = vmax.f32 %v14073_v10, %v12129_v35  ;;  %8498 = vpow2.f32 %v5536_v61  ;;  %v14076_v16 = vld [vmem:[#allocation22_spill] sm:$0xff]  ;;  %v14078_v61 = vld [vmem:[#allocation193_spill] sm:$0xff] }
 0x4df   :  { %v12141_v15 = vpop.eup %8482  ;;  %v5202_v60 = vmul.f32 %v8465_v25, %v14074_v20  ;;  %v2239_v33 = vpop.permute.xlu1 %2238  ;;  %8500 = vpow2.f32 %v5632_v59  ;;  %v5298_v42 = vmul.f32 %v8473_v43, %v14076_v16  ;;  %v14077_v25 = vsub.f32 %v14019_v52, %v11892_v6  ;;  %v14081_v43 = vld [vmem:[#allocation204_spill] sm:$0xff]  ;;  %v14082_v20 = vld [vmem:[#allocation174_spill] sm:$0xff] }
 0x4e0   :  { %v12146_v1 = vpop.eup %8484  ;;  %v12149_v24 = vmul.f32 %v5953_v21, %v12011_v3  ;;  %v12152_v55 = vadd.f32 %v12132_v53, %v5669_v58  ;;  %vm2263_vm4 = vcmp.eq.s32.totalorder %v2239_v33, 1  ;;  %8502 = vpow2.f32 %v5728_v45  ;;  %v14080_v21 = vld [vmem:[#allocation133_spill] sm:$0xff] }
 0x4e1   :  { %v5348_v27 = vmul.f32 1.442695, %v14077_v25  ;;  %v5426_v10 = vsub.f32 %v14078_v61, %v11892_v6  ;;  %v12162_v3 = vsel %vm2263_vm4, -1e+09, %v11714_v32  ;;  %v12165_v58 = vadd.f32 %v5298_v42, %v5202_v60  ;;  %v14086_v25 = vld [vmem:[#allocation145_spill] sm:$0xff]  ;;  %v14087_v42 = vld [vmem:[#allocation116_spill] sm:$0xff] }
 0x4e2   :  { %14075 = vst [vmem:[#allocation186_spill] sm:$0xff] %v12152_v55  ;;  %8386 = vset.pattern.permute.xlu1 %v13825_v63  ;;  %14079 = vst [vmem:[#allocation19_spill] sm:$0xff] %v12162_v3  ;;  %v5522_v59 = vsub.f32 %v14081_v43, %v11892_v6  ;;  %v5618_v45 = vsub.f32 %v14082_v20, %v11892_v6  ;;  %v12171_v33 = vpop.eup %8486  ;;  %v14084_v52 = vmax.f32 %v12053_v41, %v11687_v0  ;;  %v14088_v20 = vld [vmem:[#allocation4_spill] sm:$0xff]  ;;  %v14095_v0 = vld [vmem:[#allocation150_spill] sm:$0xff] }
 0x4e3   :  { %3888 = vperm.xlu1 %8386, %v14080_v21   ;;  %14083 = vst [vmem:[#allocation181_spill] sm:$0xff] %v12171_v33  ;;  %8504 = vpow2.f32 %v5348_v27  ;;  %v5444_v32 = vmul.f32 1.442695, %v5426_v10  ;;  %v5714_v60 = vsub.f32 %v14086_v25, %v11892_v6  ;;  %v12183_v61 = vmul.f32 %v11988_v57, %v14087_v42  ;;  %v14089_v27 = vld [vmem:[#allocation21_spill] sm:$0xff] }
 0x4e4   :  { %v12177_v16 = vmax.f32 %v14084_v52, %v12162_v3  ;;  %v5540_v43 = vmul.f32 1.442695, %v5522_v59  ;;  %v5636_v19 = vmul.f32 1.442695, %v5618_v45  ;;  %v5203_v35 = vmul.f32 %v11994_v23, %v14088_v20  ;;  %v3329_v51 = vpop.permute.xlu1 %3328  ;;  %v14091_v25 = vld [vmem:[#allocation37_spill] sm:$0xff] }
 0x4e5   :  { %8506 = vpow2.f32 %v5444_v32  ;;  %v5732_v33 = vmul.f32 1.442695, %v5714_v60  ;;  %v5283_v52 = vadd.f32 %v12009_v18, %v11994_v23  ;;  %v5299_v10 = vmul.f32 %v12009_v18, %v14089_v27  ;;  %v8489_v3 = vpop.eup %8488  ;;  %v14092_v45 = vld [vmem:[#allocation53_spill] sm:$0xff]  ;;  %v14093_v32 = vld [vmem:[#allocation168_spill] sm:$0xff] }
 0x4e6   :  { %14085 = vst [vmem:[#allocation134_spill] sm:$0xff] %v12177_v16  ;;  %vm3357_vm5 = vcmp.eq.s32.totalorder %v3329_v51, 1  ;;  %v14090_v6 = vmov 4   ;;  %8508 = vpow2.f32 %v5540_v43  ;;  %v5395_v59 = vmul.f32 %v12018_v4, %v14091_v25  ;;  %v8491_v20 = vpop.eup %8490  ;;  %v14110_v16 = vld [vmem:[#allocation160_spill] sm:$0xff] }
 0x4e7   :  { %8387 = vset.pattern.permute.xlu1 %v14090_v6  ;;  %v5491_v42 = vmul.f32 %v12027_v28, %v14092_v45  ;;  %v12197_v60 = vsel %vm3357_vm5, -1e+09, %v14093_v32  ;;  %8510 = vpow2.f32 %v5636_v19  ;;  %v5315_v23 = vadd.f32 %v5299_v10, %v5203_v35  ;;  %v8493_v51 = vpop.eup %8492  ;;  %v14097_v6 = vld [vmem:[#allocation157_spill] sm:$0xff]  ;;  %v14098_v45 = vld [vmem:[#allocation146_spill] sm:$0xff]  ;;  %v14099_v19 = vld [vmem:[#allocation36_spill] sm:$0xff] }
 0x4e8   :  { %14094 = vst [vmem:[#allocation35_spill] sm:$0xff] %v12197_v60  ;;  %3343 = vperm.xlu1 %8387, %v14095_v0   ;;  %v5379_v18 = vadd.f32 %v12018_v4, %v5283_v52  ;;  %v14096_v43 = vmax.f32 %v11927_v38, %v12073_v56  ;;  %8512 = vpow2.f32 %v5732_v33  ;;  %v5619_v25 = vsub.f32 %v14097_v6, %v11876_v22  ;;  %v12216_v52 = vpop.eup %8494  ;;  %v14100_v38 = vld [vmem:[#allocation118_spill] sm:$0xff]  ;;  %v14107_v56 = vld [vmem:[#allocation85_spill] sm:$0xff] }
 0x4e9   :  { %v5715_v32 = vsub.f32 %v14098_v45, %v11876_v22  ;;  %v5376_v41 = vadd.f32 %v8493_v51, %v12079_v26  ;;  %v5392_v35 = vmul.f32 %v8493_v51, %v14099_v19  ;;  %v5411_v10 = vadd.f32 %v5395_v59, %v5315_v23  ;;  %v14102_v51 = vld [vmem:[#allocation52_spill] sm:$0xff] }
 0x4ea   :  { %v12205_v27 = vmax.f32 %v14096_v43, %v12197_v60  ;;  %v12214_v4 = vadd.f32 %v12027_v28, %v5379_v18  ;;  %v12220_v43 = vmul.f32 %v12122_v29, %v14100_v38  ;;  %8514 = vpow2.f32 %v12023_v31  ;;  %v1146_v60 = vpop.permute.xlu1 %1145  ;;  %v8497_v22 = vpop.eup %8496  ;;  %v14101_v28 = vld [vmem:[#allocation7_spill] sm:$0xff] }
 0x4eb   :  { %v5638_v33 = vmul.f32 1.442695, %v5619_v25  ;;  %v5734_v6 = vmul.f32 1.442695, %v5715_v32  ;;  %v5408_v26 = vadd.f32 %v5392_v35, %v12105_v5  ;;  %v12224_v45 = vadd.f32 %v5491_v42, %v5411_v10  ;;  %v8499_v23 = vpop.eup %8498  ;;  %v14103_v38 = vld [vmem:[#allocation139_spill] sm:$0xff]  ;;  %v14105_v32 = vld [vmem:[#allocation69_spill] sm:$0xff] }
 0x4ec   :  { %vm1168_vm6 = vcmp.eq.s32.totalorder %v1146_v60, 1  ;;  %8388 = vset.pattern.permute.xlu1 %v14042_v2  ;;  %v5204_v59 = vmul.f32 %v8489_v3, %v14101_v28  ;;  %v5472_v18 = vadd.f32 %v8497_v22, %v5376_v41  ;;  %v5488_v19 = vmul.f32 %v8497_v22, %v14102_v51  ;;  %v8501_v25 = vpop.eup %8500  ;;  %v14106_v42 = vld [vmem:[#allocation148_spill] sm:$0xff] }
 0x4ed   :  { %8516 = vpow2.f32 %v5638_v33  ;;  %v12230_v31 = vsel %vm1168_vm6, -1e+09, %v14103_v38  ;;  %4433 = vperm.xlu1 %8388, %v14068_v40   ;;  %v5584_v5 = vmul.f32 %v8499_v23, %v14105_v32  ;;  %v12236_v35 = vadd.f32 %v8491_v20, %v8489_v3  ;;  %v8503_v10 = vpop.eup %8502  ;;  %v14108_v33 = vld [vmem:[#allocation24_spill] sm:$0xff]  ;;  %v14112_v3 = vld [vmem:[#allocation209_spill] sm:$0xff] }
 0x4ee   :  { %14104 = vst [vmem:[#allocation51_spill] sm:$0xff] %v12230_v31  ;;  %8518 = vpow2.f32 %v5734_v6  ;;  %v5036_v60 = vmax.f32 %v12230_v31, %v14106_v42  ;;  %v5504_v28 = vadd.f32 %v5488_v19, %v5408_v26  ;;  %v5568_v41 = vadd.f32 %v8499_v23, %v5472_v18  ;;  %v14109_v38 = vld [vmem:[#allocation100_spill] sm:$0xff]  ;;  %v2784_v49 = vpop.permute.xlu1 %2783  ;;  %v14113_v18 = vld [vmem:[#allocation38_spill] sm:$0xff] }
 0x4ef   :  { %v5680_v22 = vmul.f32 %v8501_v25, %v14107_v56  ;;  %v5300_v51 = vmul.f32 %v8491_v20, %v14108_v33  ;;  %v5776_v55 = vmul.f32 %v8503_v10, %v14109_v38  ;;  %v14111_v6 = vsub.f32 %v14062_v12, %v12050_v13 }
 0x4f0   :  { %v12242_v40 = vmax.f32 %v5036_v60, %v14110_v16  ;;  %v5428_v42 = vsub.f32 %v14112_v3, %v12050_v13  ;;  %v8505_v31 = vpop.eup %8504  ;;  %v5600_v26 = vadd.f32 %v5584_v5, %v5504_v28  ;;  %v5664_v23 = vadd.f32 %v8501_v25, %v5568_v41  ;;  %v14114_v60 = vld [vmem:[#allocation164_spill] sm:$0xff]  ;;  %v14115_v41 = vld [vmem:[#allocation54_spill] sm:$0xff] }
 0x4f1   :  { %v5352_v32 = vmul.f32 1.442695, %v14111_v6  ;;  %vm2810_vm1 = vcmp.eq.s32.totalorder %v2784_v49, 1  ;;  %4436 = vperm.xlu1 %8388, %v14080_v21   ;;  %v12250_v56 = vadd.f32 %v5300_v51, %v5204_v59  ;;  %v5378_v20 = vadd.f32 %v8505_v31, %v12144_v48  ;;  %v14116_v48 = vld [vmem:[#allocation212_spill] sm:$0xff] }
 0x4f2   :  { %v5394_v19 = vmul.f32 %v8505_v31, %v14113_v18  ;;  %v12255_v33 = vsel %vm2810_vm1, -1e+09, %v14114_v60  ;;  %v8507_v12 = vpop.eup %8506  ;;  %v5696_v38 = vadd.f32 %v5680_v22, %v5600_v26  ;;  %v5760_v6 = vadd.f32 %v8503_v10, %v5664_v23  ;;  %v14117_v22 = vld [vmem:[#allocation117_spill] sm:$0xff] }
 0x4f3   :  { %8520 = vpow2.f32 %v5352_v32  ;;  %v5066_v5 = vmax.f32 %v12103_v14, %v12255_v33  ;;  %v5448_v25 = vmul.f32 1.442695, %v5428_v42  ;;  %v8509_v49 = vpop.eup %8508  ;;  %v5474_v59 = vadd.f32 %v8507_v12, %v5378_v20  ;;  %v3874_v42 = vpop.permute.xlu1 %3873  ;;  %v14118_v20 = vld [vmem:[#allocation71_spill] sm:$0xff] }
 0x4f4   :  { %v5410_v28 = vadd.f32 %v5394_v19, %v12165_v58  ;;  %v5490_v51 = vmul.f32 %v8507_v12, %v14115_v41  ;;  %v5524_v31 = vsub.f32 %v14116_v48, %v12050_v13  ;;  %v8511_v3 = vpop.eup %8510  ;;  %v5792_v18 = vadd.f32 %v5776_v55, %v5696_v38  ;;  %v14158_v14 = vld [vmem:[#allocation159_spill] sm:$0xff] }
 0x4f5   :  { %v12264_v32 = vadd.f32 %v11988_v57, %v5760_v6  ;;  %v5875_v10 = vmul.f32 %v12033_v34, %v14117_v22  ;;  %8390 = vset.pattern.permute.xlu1 %v13825_v63  ;;  %8522 = vpow2.f32 %v5448_v25  ;;  %v8513_v26 = vpop.eup %8512  ;;  %v5570_v23 = vadd.f32 %v8509_v49, %v5474_v59  ;;  %v14119_v57 = vld [vmem:[#allocation87_spill] sm:$0xff]  ;;  %v14120_v59 = vld [vmem:[#allocation70_spill] sm:$0xff] }
 0x4f6   :  { %v5506_v58 = vadd.f32 %v5490_v51, %v5410_v28  ;;  %v5586_v19 = vmul.f32 %v8509_v49, %v14118_v20  ;;  %vm3904_vm7 = vcmp.eq.s32.totalorder %v3874_v42, 1  ;;  %3891 = vperm.xlu1 %8390, %v14095_v0   ;;  %v12272_v55 = vadd.f32 %v12183_v61, %v5792_v18  ;;  %v14121_v22 = vld [vmem:[#allocation102_spill] sm:$0xff] }
 0x4f7   :  { %8524 = vrcp.f32 %v12264_v32  ;;  %v5682_v60 = vmul.f32 %v8511_v3, %v14119_v57  ;;  %v12277_v12 = vsel %vm3904_vm7, -1e+09, %v12002_v62  ;;  %v8515_v63 = vpop.eup %8514  ;;  %v5666_v6 = vadd.f32 %v8511_v3, %v5570_v23  ;;  %v14122_v23 = vld [vmem:[#allocation86_spill] sm:$0xff] }
 0x4f8   :  { %v5602_v38 = vadd.f32 %v5586_v19, %v5506_v58  ;;  %v5096_v25 = vmax.f32 %v12139_v44, %v12277_v12  ;;  %v5544_v49 = vmul.f32 1.442695, %v5524_v31  ;;  %v5571_v28 = vadd.f32 %v8515_v63, %v12214_v4  ;;  %v1149_v3 = vpop.permute.xlu1 %1148  ;;  %v14124_v57 = vld [vmem:[#allocation138_spill] sm:$0xff] }
 0x4f9   :  { %v5587_v41 = vmul.f32 %v8515_v63, %v14120_v59  ;;  %v5620_v61 = vsub.f32 %v14049_v50, %v12050_v13  ;;  %v5716_v51 = vsub.f32 %v11915_v30, %v12050_v13  ;;  %v5762_v18 = vadd.f32 %v8513_v26, %v5666_v6  ;;  %v14123_v30 = vld [vmem:[#allocation101_spill] sm:$0xff] }
 0x4fa   :  { %v8517_v48 = vpop.eup %8516  ;;  %v5698_v62 = vadd.f32 %v5682_v60, %v5602_v38  ;;  %v5778_v42 = vmul.f32 %v8513_v26, %v14121_v22  ;;  %3894 = vperm.xlu1 %8390, %v14015_v47   ;;  %8526 = vpow2.f32 %v5544_v49  ;;  %vm1169_vm8 = vcmp.eq.s32.totalorder %v1149_v3, 1  ;;  %v14128_v22 = vld [vmem:[#allocation40_spill] sm:$0xff] }
 0x4fb   :  { %v8519_v31 = vpop.eup %8518  ;;  %v5603_v4 = vadd.f32 %v5587_v41, %v12224_v45  ;;  %v5667_v58 = vadd.f32 %v8517_v48, %v5571_v28  ;;  %v5683_v20 = vmul.f32 %v8517_v48, %v14122_v23  ;;  %v12292_v19 = vadd.f32 %v12122_v29, %v5762_v18  ;;  %v14125_v45 = vld [vmem:[#allocation6_spill] sm:$0xff]  ;;  %v14126_v28 = vld [vmem:[#allocation23_spill] sm:$0xff] }
 0x4fc   :  { %v5794_v50 = vadd.f32 %v5778_v42, %v5698_v62  ;;  %v5779_v13 = vmul.f32 %v8519_v31, %v14123_v30  ;;  %v12296_v60 = vsel %vm1169_vm8, -1e+09, %v14124_v57  ;;  %v5640_v38 = vmul.f32 1.442695, %v5620_v61  ;;  %v14127_v61 = vld [vmem:[#allocation39_spill] sm:$0xff] }
 0x4fd   :  { %v5699_v26 = vadd.f32 %v5683_v20, %v5603_v4  ;;  %v5763_v63 = vadd.f32 %v8519_v31, %v5667_v58  ;;  %v5736_v6 = vmul.f32 1.442695, %v5716_v51  ;;  %8528 = vrcp.f32 %v12292_v19  ;;  %v14130_v4 = vld [vmem:[#allocation55_spill] sm:$0xff]  ;;  %v14131_v58 = vld [vmem:[#allocation72_spill] sm:$0xff] }
 0x4fe   :  { %v12299_v49 = vadd.f32 %v12220_v43, %v5794_v50  ;;  %8391 = vset.pattern.permute.xlu1 %v13852_v36  ;;  %v5205_v29 = vmul.f32 %v12061_v9, %v14125_v45  ;;  %v5301_v59 = vmul.f32 %v12070_v54, %v14126_v28  ;;  %8530 = vpow2.f32 %v5640_v38  ;;  %v1697_v43 = vpop.permute.xlu1 %1696  ;;  %v14129_v54 = vld [vmem:[#allocation144_spill] sm:$0xff]  ;;  %v14135_v38 = vld [vmem:[#allocation194_spill] sm:$0xff] }
 0x4ff   :  { %v5795_v48 = vadd.f32 %v5779_v13, %v5699_v26  ;;  %v12308_v62 = vadd.f32 %v12033_v34, %v5763_v63  ;;  %4984 = vperm.xlu1 %8391, %v14080_v21   ;;  %v5397_v51 = vmul.f32 %v12083_v11, %v14127_v61  ;;  %8532 = vpow2.f32 %v5736_v6  ;;  %v14132_v20 = vld [vmem:[#allocation56_spill] sm:$0xff] }
 0x500   :  { %v8521_v41 = vpop.eup %8520  ;;  %vm1717_vm9 = vcmp.eq.s32.totalorder %v1697_v43, 1  ;;  %v5317_v3 = vadd.f32 %v5301_v59, %v5205_v29  ;;  %v5589_v23 = vmul.f32 %v12114_v39, %v14131_v58  ;;  %v14133_v13 = vld [vmem:[#allocation88_spill] sm:$0xff]  ;;  %v5813_v6 = vsub.f32 %v14135_v38, %v11952_v8  ;;  %v14137_v59 = vld [vmem:[#allocation26_spill] sm:$0xff]  ;;  %v14139_v43 = vld [vmem:[#allocation177_spill] sm:$0xff] }
 0x501   :  { %v5380_v18 = vadd.f32 %v8521_v41, %v12236_v35  ;;  %v5396_v42 = vmul.f32 %v8521_v41, %v14128_v22  ;;  %v12315_v9 = vadd.f32 %v5875_v10, %v5795_v48  ;;  %8534 = vrcp.f32 %v12308_v62 }
 0x502   :  { %v12319_v34 = vsel %vm1717_vm9, -1e+09, %v14129_v54  ;;  %v8523_v31 = vpop.eup %8522  ;;  %v5493_v35 = vmul.f32 %v12093_v37, %v14130_v4  ;;  %v5413_v30 = vadd.f32 %v5397_v51, %v5317_v3  ;;  %v5685_v57 = vmul.f32 %v12126_v46, %v14133_v13  ;;  %v14136_v37 = vld [vmem:[#allocation10_spill] sm:$0xff]  ;;  %v3877_v29 = vpop.permute.xlu1 %3876  ;;  %v14142_v3 = vld [vmem:[#allocation73_spill] sm:$0xff] }
 0x503   :  { %v5412_v21 = vadd.f32 %v5396_v42, %v12250_v56  ;;  %v5037_v11 = vmax.f32 %v12296_v60, %v12319_v34  ;;  %v5476_v10 = vadd.f32 %v8523_v31, %v5380_v18  ;;  %v5492_v50 = vmul.f32 %v8523_v31, %v14132_v20  ;;  %8393 = vset.pattern.permute.xlu1 %v14042_v2  ;;  %v14134_v56 = vld [vmem:[#allocation103_spill] sm:$0xff]  ;;  %v14141_v42 = vld [vmem:[#allocation214_spill] sm:$0xff] }
 0x504   :  { %v8525_v26 = vpop.eup %8524  ;;  %v5781_v63 = vmul.f32 %v12132_v53, %v14134_v56  ;;  %v5206_v45 = vmul.f32 %v12141_v15, %v14136_v37  ;;  %v12340_v39 = vadd.f32 %v12146_v1, %v12141_v15  ;;  %4442 = vperm.xlu1 %8393, %v14015_v47   ;;  %v5509_v28 = vadd.f32 %v5493_v35, %v5413_v30  ;;  %v14140_v15 = vld [vmem:[#allocation226_spill] sm:$0xff]  ;;  %v14144_v56 = vld [vmem:[#allocation120_spill] sm:$0xff] }
 0x505   :  { %v5920_v46 = vmul.f32 %v8525_v26, %v12264_v32  ;;  %v5508_v2 = vadd.f32 %v5492_v50, %v5412_v21  ;;  %v5302_v53 = vmul.f32 %v12146_v1, %v14137_v59  ;;  %v5834_v41 = vmul.f32 1.442695, %v5813_v6  ;;  %v14143_v50 = vld [vmem:[#allocation143_spill] sm:$0xff] }
 0x506   :  { %v14138_v8 = vsub.f32 %v14044_v17, %v11968_v7  ;;  %v5430_v61 = vsub.f32 %v14139_v43, %v11968_v7  ;;  %v5526_v51 = vsub.f32 %v14140_v15, %v11968_v7  ;;  %v5605_v22 = vadd.f32 %v5589_v23, %v5509_v28  ;;  %v14147_v28 = vld [vmem:[#allocation104_spill] sm:$0xff]  ;;  %v14149_v15 = vld [vmem:[#allocation178_spill] sm:$0xff] }
 0x507   :  { %v8527_v47 = vpop.eup %8526  ;;  %v5936_v18 = vsub.f32 2.0, %v5920_v46  ;;  %v12353_v32 = vadd.f32 %v5302_v53, %v5206_v45  ;;  %v5622_v54 = vsub.f32 %v14141_v42, %v11968_v7  ;;  %8536 = vpow2.f32 %v5834_v41  ;;  %v4967_v58 = vpop.permute.xlu1 %4966  ;;  %v14146_v46 = vld [vmem:[#allocation156_spill] sm:$0xff]  ;;  %v14154_v42 = vld [vmem:[#allocation134_spill] sm:$0xff] }
 0x508   :  { %v5356_v48 = vmul.f32 1.442695, %v14138_v8  ;;  %v5572_v1 = vadd.f32 %v8527_v47, %v5476_v10  ;;  %v5588_v31 = vmul.f32 %v8527_v47, %v14142_v3  ;;  %v5452_v17 = vmul.f32 1.442695, %v5430_v61  ;;  %8394 = vset.pattern.permute.xlu1 %v13852_v36  ;;  %v14151_v47 = vld [vmem:[#allocation189_spill] sm:$0xff] }
 0x509   :  { %v5952_v21 = vmul.f32 %v8525_v26, %v5936_v18  ;;  %v5701_v4 = vadd.f32 %v5685_v57, %v5605_v22  ;;  %v5548_v35 = vmul.f32 1.442695, %v5526_v51  ;;  %4987 = vperm.xlu1 %8394, %v14095_v0   ;;  %v5644_v20 = vmul.f32 1.442695, %v5622_v54  ;;  %v14150_v51 = vld [vmem:[#allocation151_spill] sm:$0xff] }
 0x50a   :  { %8538 = vpow2.f32 %v5356_v48  ;;  %v5604_v23 = vadd.f32 %v5588_v31, %v5508_v2  ;;  %v5718_v30 = vsub.f32 %v14143_v50, %v11968_v7  ;;  %v8529_v10 = vpop.eup %8528  ;;  %v5876_v38 = vmul.f32 %v12216_v52, %v14144_v56  ;;  %v14145_v7 = vld [vmem:[#allocation89_spill] sm:$0xff]  ;;  %v14148_v48 = vld [vmem:[#allocation135_spill] sm:$0xff] }
 0x50b   :  { %8540 = vpow2.f32 %v5452_v17  ;;  %v5968_v13 = vmul.f32 %v5952_v21, %v12272_v55  ;;  %v12365_v36 = vadd.f32 %v5781_v63, %v5701_v4  ;;  %v8531_v57 = vpop.eup %8530  ;;  %v5922_v26 = vmul.f32 %v8529_v10, %v12292_v19  ;;  %v14153_v22 = vld [vmem:[#allocation211_spill] sm:$0xff] }
 0x50c   :  { %8542 = vpow2.f32 %v5548_v35  ;;  %v5740_v0 = vmul.f32 1.442695, %v5718_v30  ;;  %vm3905_vm10 = vcmp.eq.s32.totalorder %v3877_v29, 1  ;;  %v8533_v6 = vpop.eup %8532  ;;  %v5668_v37 = vadd.f32 %v8531_v57, %v5572_v1  ;;  %v3332_v59 = vpop.permute.xlu1 %3331  ;;  %v14156_v35 = vld [vmem:[#allocation163_spill] sm:$0xff]  ;;  %v14159_v30 = vld [vmem:[#allocation158_spill] sm:$0xff] }
 0x50d   :  { %8544 = vpow2.f32 %v5644_v20  ;;  %8210 = vmatprep.mubr.msk.f32.mxu1 %vm78_vm0, %v5968_v13  ;;  %v5684_v45 = vmul.f32 %v8531_v57, %v14145_v7  ;;  %v12371_v55 = vsel %vm3905_vm10, -1e+09, %v14146_v46  ;;  %vm4999_vm11 = vcmp.eq.s32.totalorder %v4967_v58, 1  ;;  %v14157_v20 = vld [vmem:[#allocation137_spill] sm:$0xff]  ;;  %v14161_v56 = vld [vmem:[#allocation179_spill] sm:$0xff]  ;;  %v14163_v46 = vld [vmem:[#allocation186_spill] sm:$0xff] }
 0x50e   :  { %v8535_v2 = vpop.eup %8534  ;;  %8211 = vmatmul.mubr.msk.f32.vlgmr.msra.gmra.mxu1 %vm78_vm0, %v12149_v24  ;;  %v5938_v63 = vsub.f32 2.0, %v5922_v26  ;;  %v5780_v19 = vmul.f32 %v8533_v6, %v14147_v28  ;;  %8546 = vpow2.f32 %v5740_v0  ;;  %v5097_v29 = vmax.f32 %v12205_v27, %v12371_v55  ;;  %v14162_v0 = vld [vmem:[#allocation227_spill] sm:$0xff] }
 0x50f   :  { %v5923_v53 = vmul.f32 %v8535_v2, %v12308_v62  ;;  %v5700_v41 = vadd.f32 %v5684_v45, %v5604_v23  ;;  %v5764_v8 = vadd.f32 %v8533_v6, %v5668_v37  ;;  %v12380_v43 = vsel %vm4999_vm11, -1e+09, %v14148_v48  ;;  %v14155_v62 = vld [vmem:[#allocation182_spill] sm:$0xff] }
 0x510   :  { %v5954_v61 = vmul.f32 %v8529_v10, %v5938_v63  ;;  %v14152_v24 = vmax.f32 %v14150_v51, %v14151_v47  ;;  %vm3358_vm12 = vcmp.eq.s32.totalorder %v3332_v59, 1  ;;  %v5067_v54 = vmax.f32 %v14154_v42, %v14153_v22  ;;  %v14164_v63 = vld [vmem:[#allocation119_spill] sm:$0xff]  ;;  %v14167_v48 = vld [vmem:[#allocation42_spill] sm:$0xff] }
 0x511   :  { %v5939_v1 = vsub.f32 2.0, %v5923_v53  ;;  %v5796_v27 = vadd.f32 %v5780_v19, %v5700_v41  ;;  %v12389_v3 = vadd.f32 %v12216_v52, %v5764_v8  ;;  %v12392_v31 = vsel %vm3358_vm12, -1e+09, %v14155_v62  ;;  %v14165_v53 = vld [vmem:[#allocation142_spill] sm:$0xff] }
 0x512   :  { %v5111_v18 = vmax.f32 %v14152_v24, %v14149_v15  ;;  %v5970_v17 = vmul.f32 %v5954_v61, %v12299_v49  ;;  %v12402_v4 = vmax.f32 %v5066_v5, %v12392_v31  ;;  %v12408_v52 = vmax.f32 %v5037_v11, %v14156_v35  ;;  %v4422_v49 = vpop.permute.xlu1 %4421  ;;  %v14160_v11 = vld [vmem:[#allocation173_spill] sm:$0xff] }
 0x513   :  { %v5955_v58 = vmul.f32 %v8535_v2, %v5939_v1  ;;  %v12410_v23 = vadd.f32 %v5876_v38, %v5796_v27  ;;  %8548 = vrcp.f32 %v12389_v3  ;;  %v12414_v50 = vmax.f32 %v5097_v29, %v14157_v20 }
 0x514   :  { %v12396_v21 = vmax.f32 %v5111_v18, %v12380_v43  ;;  %8213 = vmatprep.mubr.msk.f32.mxu1 %vm78_vm0, %v5970_v17  ;;  %v8537_v57 = vpop.eup %8536  ;;  %vm4452_vm13 = vcmp.eq.s32.totalorder %v4422_v49, 1 }
 0x515   :  { %v5971_v26 = vmul.f32 %v5955_v58, %v12315_v9  ;;  %v12433_v2 = vadd.f32 %v8537_v57, %v14163_v46  ;;  %v5877_v28 = vmul.f32 %v8537_v57, %v14164_v63  ;;  %v14166_v9 = vld [vmem:[#allocation210_spill] sm:$0xff] }
 0x516   :  { %v5143_v5 = vsub.f32 %v14158_v14, %v12396_v21  ;;  %v5239_v10 = vsub.f32 %v14159_v30, %v12396_v21  ;;  %v5335_v13 = vsub.f32 %v14160_v11, %v12396_v21  ;;  %v5431_v38 = vsub.f32 %v14161_v56, %v12396_v21  ;;  %v3335_v27 = vpop.permute.xlu1 %3334  ;;  %v14169_v14 = vld [vmem:[#allocation58_spill] sm:$0xff] }
 0x517   :  { %v5527_v6 = vsub.f32 %v14162_v0, %v12396_v21  ;;  %v5623_v37 = vsub.f32 %v14151_v47, %v12396_v21  ;;  %v5719_v7 = vsub.f32 %v14149_v15, %v12396_v21  ;;  %v8539_v45 = vpop.eup %8538  ;;  %v3277_v41 = vadd.f32 %v14166_v9, %v14165_v53  ;;  %8214 = vmatmul.mubr.msk.f32.gmra.mxu1 %vm78_vm0, %v5971_v26  ;;  %v14168_v47 = vld [vmem:[#allocation232_spill] sm:$0xff] }
 0x518   :  { %v5166_v19 = vmul.f32 1.442695, %v5143_v5  ;;  %v5262_v29 = vmul.f32 1.442695, %v5239_v10  ;;  %v8541_v59 = vpop.eup %8540  ;;  %v5382_v8 = vadd.f32 %v8539_v45, %v12340_v39  ;;  %v5398_v61 = vmul.f32 %v8539_v45, %v14167_v48  ;;  %v14170_v5 = vld [vmem:[#allocation75_spill] sm:$0xff]  ;;  %v14172_v45 = vld [vmem:[#allocation106_spill] sm:$0xff] }
 0x519   :  { %v5358_v51 = vmul.f32 1.442695, %v5335_v13  ;;  %v8543_v15 = vpop.eup %8542  ;;  %v4358_v24 = vadd.f32 %v14168_v47, %v14165_v53  ;;  %v12444_v18 = vadd.f32 %v5877_v28, %v12365_v36  ;;  %8550 = vrcp.f32 %v12433_v2  ;;  %v14171_v10 = vld [vmem:[#allocation91_spill] sm:$0xff] }
 0x51a   :  { %v5454_v1 = vmul.f32 1.442695, %v5431_v38  ;;  %v8545_v62 = vpop.eup %8544  ;;  %v5414_v17 = vadd.f32 %v5398_v61, %v12353_v32  ;;  %v5478_v58 = vadd.f32 %v8541_v59, %v5382_v8  ;;  %v5494_v39 = vmul.f32 %v8541_v59, %v14169_v14  ;;  %v14178_v47 = vld [vmem:[#allocation155_spill] sm:$0xff] }
 0x51b   :  { %8552 = vpow2.f32 %v5166_v19  ;;  %v5590_v30 = vmul.f32 %v8543_v15, %v14170_v5  ;;  %v5686_v11 = vmul.f32 %v8545_v62, %v14171_v10  ;;  %v5550_v13 = vmul.f32 1.442695, %v5527_v6  ;;  %v8547_v56 = vpop.eup %8546 }
 0x51c   :  { %8554 = vpow2.f32 %v5262_v29  ;;  %v5510_v36 = vadd.f32 %v5494_v39, %v5414_v17  ;;  %v5574_v57 = vadd.f32 %v8543_v15, %v5478_v58  ;;  %v5815_v38 = vsub.f32 %v12380_v43, %v12396_v21 }
 0x51d   :  { %8556 = vpow2.f32 %v5358_v51  ;;  %v5646_v26 = vmul.f32 1.442695, %v5623_v37  ;;  %vm3359_vm14 = vcmp.eq.s32.totalorder %v3335_v27, 1  ;;  %v5782_v46 = vmul.f32 %v8547_v56, %v14172_v45  ;;  %v1152_v28 = vpop.permute.xlu1 %1151  ;;  %v14173_v37 = vld [vmem:[#allocation152_spill] sm:$0xff]  ;;  %v14176_v51 = vld [vmem:[#allocation181_spill] sm:$0xff] }
 0x51e   :  { %8558 = vpow2.f32 %v5454_v1  ;;  %v5606_v32 = vadd.f32 %v5590_v30, %v5510_v36  ;;  %v5670_v0 = vadd.f32 %v8545_v62, %v5574_v57  ;;  %v5742_v63 = vmul.f32 1.442695, %v5719_v7  ;;  %v14180_v27 = vld [vmem:[#allocation228_spill] sm:$0xff] }
 0x51f   :  { %8560 = vpow2.f32 %v5550_v13  ;;  %v12454_v19 = vsel %vm4452_vm13, -1e+09, %v4358_v24  ;;  %v12456_v6 = vsel %vm3359_vm14, -1e+09, %v3277_v41  ;;  %vm1170_vm15 = vcmp.eq.s32.totalorder %v1152_v28, 1  ;;  %v14175_v41 = vld [vmem:[#allocation215_spill] sm:$0xff] }
 0x520   :  { %v5702_v29 = vadd.f32 %v5686_v11, %v5606_v32  ;;  %v5766_v59 = vadd.f32 %v8547_v56, %v5670_v0  ;;  %v5838_v9 = vmul.f32 1.442695, %v5815_v38  ;;  %v5112_v43 = vmax.f32 %v5096_v25, %v12454_v19  ;;  %v8549_v21 = vpop.eup %8548  ;;  %v14177_v25 = vld [vmem:[#allocation122_spill] sm:$0xff]  ;;  %v14183_v38 = vld [vmem:[#allocation9_spill] sm:$0xff] }
 0x521   :  { %8562 = vpow2.f32 %v5646_v26  ;;  %v12466_v49 = vmax.f32 %v5067_v54, %v12456_v6  ;;  %v12469_v7 = vsel %vm1170_vm15, -1e+09, %v14173_v37  ;;  %v5068_v8 = vmax.f32 %v12242_v40, %v14175_v41  ;;  %v14179_v54 = vld [vmem:[#allocation219_spill] sm:$0xff]  ;;  %v14182_v13 = vld [vmem:[#allocation218_spill] sm:$0xff] }
 0x522   :  { %14174 = vst [vmem:[#allocation198_spill] sm:$0xff] %v12469_v7  ;;  %v5924_v48 = vmul.f32 %v8549_v21, %v12389_v3  ;;  %v5798_v61 = vadd.f32 %v5782_v46, %v5702_v29  ;;  %v5862_v44 = vadd.f32 %v14176_v51, %v5766_v59  ;;  %v5878_v15 = vmul.f32 %v14176_v51, %v14177_v25  ;;  %v1700_v42 = vpop.permute.xlu1 %1699  ;;  %v12486_v3 = vpop.f32.mrf.mxu0  ;;  %v14185_v59 = vld [vmem:[#allocation41_spill] sm:$0xff] }
 0x523   :  { %v1648_v24 = vadd.f32 %v14178_v47, %v14165_v53  ;;  %8564 = vpow2.f32 %v5742_v63  ;;  %v12482_v62 = vmax.f32 %v5068_v8, %v14180_v27  ;;  %vm1718_vm2 = vcmp.eq.s32.totalorder %v1700_v42, 1  ;;  %v14184_v63 = vld [vmem:[#allocation25_spill] sm:$0xff] }
 0x524   :  { %v5940_v40 = vsub.f32 2.0, %v5924_v48  ;;  %v12484_v17 = vadd.f32 %v5878_v15, %v5798_v61  ;;  %8566 = vrcp.f32 %v5862_v44  ;;  %v3820_v56 = vadd.f32 %v14182_v13, %v14165_v53  ;;  %v4905_v0 = vpop.f32.mrf.mxu0 }
 0x525   :  { %8568 = vpow2.f32 %v5838_v9  ;;  %v12488_v58 = vsel %vm1718_vm2, -1e+09, %v1648_v24  ;;  %v4906_v61 = vadd.f32 %v4905_v0, %v14165_v53  ;;  %v14186_v24 = vld [vmem:[#allocation57_spill] sm:$0xff] }
 0x526   :  { %14181 = vst [vmem:[#allocation196_spill] sm:$0xff] %v12488_v58  ;;  %v8551_v14 = vpop.eup %8550  ;;  %v5956_v39 = vmul.f32 %v8549_v21, %v5940_v40  ;;  %v5038_v5 = vmax.f32 %v12469_v7, %v12488_v58 }
 0x527   :  { %v5925_v10 = vmul.f32 %v8551_v14, %v12433_v2  ;;  %v3880_v57 = vpop.permute.xlu1 %3879 }
 0x528   :  { %v8553_v30 = vpop.eup %8552  ;;  %v5972_v36 = vmul.f32 %v5956_v39, %v12410_v23  ;;  %vm3906_vm3 = vcmp.eq.s32.totalorder %v3880_v57, 1 }
 0x529   :  { %v8555_v11 = vpop.eup %8554  ;;  %v5207_v26 = vmul.f32 %v8553_v30, %v14183_v38  ;;  %v5941_v45 = vsub.f32 2.0, %v5925_v10  ;;  %v12499_v2 = vsel %vm3906_vm3, -1e+09, %v3820_v56  ;;  %v14187_v10 = vld [vmem:[#allocation74_spill] sm:$0xff]  ;;  %v14189_v38 = vld [vmem:[#allocation187_spill] sm:$0xff] }
 0x52a   :  { %v8557_v32 = vpop.eup %8556  ;;  %v5287_v46 = vadd.f32 %v8555_v11, %v8553_v30  ;;  %v5303_v28 = vmul.f32 %v8555_v11, %v14184_v63  ;;  %8216 = vmatprep.mubr.msk.f32.mxu1 %vm78_vm0, %v5972_v36  ;;  %v5098_v23 = vmax.f32 %v12402_v4, %v12499_v2  ;;  %v14188_v56 = vld [vmem:[#allocation154_spill] sm:$0xff] }
 0x52b   :  { %v8559_v29 = vpop.eup %8558  ;;  %v5399_v9 = vmul.f32 %v8557_v32, %v14185_v59  ;;  %v5957_v21 = vmul.f32 %v8551_v14, %v5941_v45  ;;  %v1653_v36 = vadd.f32 %v14188_v56, %v14165_v53  ;;  %v14190_v45 = vld [vmem:[#allocation90_spill] sm:$0xff] }
 0x52c   :  { %v5383_v37 = vadd.f32 %v8557_v32, %v5287_v46  ;;  %v5319_v8 = vadd.f32 %v5303_v28, %v5207_v26  ;;  %v8561_v48 = vpop.eup %8560  ;;  %v4970_v15 = vpop.permute.xlu1 %4969  ;;  %v5495_v42 = vmul.f32 %v8559_v29, %v14186_v24  ;;  %v2739_v26 = vadd.f32 %v14189_v38, %v14165_v53  ;;  %v14197_v38 = vld [vmem:[#allocation206_spill] sm:$0xff] }
 0x52d   :  { %v5973_v51 = vmul.f32 %v5957_v21, %v12444_v18  ;;  %vm5000_vm4 = vcmp.eq.s32.totalorder %v4970_v15, 1  ;;  %v5591_v11 = vmul.f32 %v8561_v48, %v14187_v10  ;;  %v14196_v10 = vld [vmem:[#allocation121_spill] sm:$0xff] }
 0x52e   :  { %v5479_v25 = vadd.f32 %v8559_v29, %v5383_v37  ;;  %v5415_v47 = vadd.f32 %v5399_v9, %v5319_v8  ;;  %v8563_v40 = vpop.eup %8562  ;;  %v12508_v39 = vsel %vm5000_vm4, -1e+09, %v4906_v61  ;;  %v14191_v29 = vld [vmem:[#allocation171_spill] sm:$0xff]  ;;  %v14192_v9 = vld [vmem:[#allocation162_spill] sm:$0xff]  ;;  %v14193_v37 = vld [vmem:[#allocation176_spill] sm:$0xff] }
 0x52f   :  { %8217 = vmatmul.mubr.msk.f32.gmra.mxu1 %vm78_vm0, %v5973_v51  ;;  %v5128_v18 = vmax.f32 %v5112_v43, %v12508_v39  ;;  %v5687_v46 = vmul.f32 %v8563_v40, %v14190_v45  ;;  %v14194_v51 = vld [vmem:[#allocation105_spill] sm:$0xff] }
 0x530   :  { %v5575_v14 = vadd.f32 %v8561_v48, %v5479_v25  ;;  %v5511_v30 = vadd.f32 %v5495_v42, %v5415_v47  ;;  %v8565_v13 = vpop.eup %8564  ;;  %v14195_v42 = vld [vmem:[#allocation192_spill] sm:$0xff] }
 0x531   :  { %v8567_v57 = vpop.eup %8566  ;;  %v5144_v59 = vsub.f32 %v14191_v29, %v5128_v18  ;;  %v5240_v21 = vsub.f32 %v14192_v9, %v5128_v18  ;;  %v5336_v8 = vsub.f32 %v14193_v37, %v5128_v18  ;;  %v1703_v48 = vpop.permute.xlu1 %1702  ;;  %v5783_v25 = vmul.f32 %v8565_v13, %v14194_v51 }
 0x532   :  { %v5671_v32 = vadd.f32 %v8563_v40, %v5575_v14  ;;  %v5607_v0 = vadd.f32 %v5591_v11, %v5511_v30  ;;  %v8569_v63 = vpop.eup %8568  ;;  %v5926_v28 = vmul.f32 %v8567_v57, %v5862_v44  ;;  %vm1719_vm5 = vcmp.eq.s32.totalorder %v1703_v48, 1 }
 0x533   :  { %v5168_v47 = vmul.f32 1.442695, %v5144_v59  ;;  %v5264_v24 = vmul.f32 1.442695, %v5240_v21  ;;  %v5432_v14 = vsub.f32 %v14195_v42, %v5128_v18  ;;  %v5360_v44 = vmul.f32 1.442695, %v5336_v8 }
 0x534   :  { %v5767_v61 = vadd.f32 %v8565_v13, %v5671_v32  ;;  %v5703_v43 = vadd.f32 %v5687_v46, %v5607_v0  ;;  %v5942_v15 = vsub.f32 2.0, %v5926_v28  ;;  %v12524_v30 = vsel %vm1719_vm5, -1e+09, %v1653_v36  ;;  %v14198_v46 = vld [vmem:[#allocation2_spill] sm:$0xff] }
 0x535   :  { %v5879_v11 = vmul.f32 %v8569_v63, %v14196_v10  ;;  %8570 = vpow2.f32 %v5168_v47  ;;  %v5039_v32 = vmax.f32 %v14197_v38, %v12524_v30  ;;  %v5456_v45 = vmul.f32 1.442695, %v5432_v14  ;;  %v14199_v8 = vld [vmem:[#allocation230_spill] sm:$0xff] }
 0x536   :  { %v12522_v40 = vadd.f32 %v8569_v63, %v5767_v61  ;;  %v5958_v56 = vmul.f32 %v8567_v57, %v5942_v15  ;;  %v5799_v0 = vadd.f32 %v5783_v25, %v5703_v43  ;;  %v2793_v13 = vpop.permute.xlu1 %2792  ;;  %v5528_v28 = vsub.f32 %v14198_v46, %v5128_v18  ;;  %v14200_v43 = vld [vmem:[#allocation170_spill] sm:$0xff]  ;;  %v14203_v15 = vld [vmem:[#allocation220_spill] sm:$0xff] }
 0x537   :  { %v5624_v29 = vsub.f32 %v12277_v12, %v5128_v18  ;;  %vm2813_vm6 = vcmp.eq.s32.totalorder %v2793_v13, 1  ;;  %v5720_v21 = vsub.f32 %v12454_v19, %v5128_v18  ;;  %v4911_v12 = vadd.f32 %v12486_v3, %v14165_v53  ;;  %v14201_v19 = vld [vmem:[#allocation172_spill] sm:$0xff]  ;;  %v14208_v13 = vld [vmem:[#allocation202_spill] sm:$0xff] }
 0x538   :  { %8572 = vrcp.f32 %v12522_v40  ;;  %v5974_v59 = vmul.f32 %v5958_v56, %v12484_v17  ;;  %v12533_v36 = vadd.f32 %v5879_v11, %v5799_v0  ;;  %v12535_v57 = vsel %vm2813_vm6, -1e+09, %v2739_v26  ;;  %v14206_v11 = vld [vmem:[#allocation231_spill] sm:$0xff] }
 0x539   :  { %8574 = vpow2.f32 %v5264_v24  ;;  %v5069_v63 = vmax.f32 %v12408_v52, %v12535_v57  ;;  %v5552_v9 = vmul.f32 1.442695, %v5528_v28  ;;  %v5816_v17 = vsub.f32 %v12508_v39, %v5128_v18  ;;  %v14202_v39 = vld [vmem:[#allocation141_spill] sm:$0xff]  ;;  %v14204_v24 = vld [vmem:[#allocation223_spill] sm:$0xff] }
 0x53a   :  { %8219 = vmatprep.mubr.msk.f32.mxu1 %vm78_vm0, %v5974_v59  ;;  %8576 = vpow2.f32 %v5360_v44  ;;  %v5648_v26 = vmul.f32 1.442695, %v5624_v29  ;;  %v5744_v52 = vmul.f32 1.442695, %v5720_v21  ;;  %v12551_v51 = vadd.f32 %v14200_v43, %v14165_v53  ;;  %v14205_v44 = vld [vmem:[#allocation200_spill] sm:$0xff]  ;;  %v14207_v0 = vld [vmem:[#allocation183_spill] sm:$0xff] }
 0x53b   :  { %v4973_v37 = vpop.permute.xlu1 %4972  ;;  %v12545_v48 = vmax.f32 %v5069_v63, %v14199_v8  ;;  %8578 = vpow2.f32 %v5456_v45  ;;  %v2196_v3 = vadd.f32 %v14201_v19, %v14165_v53  ;;  %v12557_v18 = vadd.f32 %v14202_v39, %v14165_v53  ;;  %v14209_v28 = vld [vmem:[#allocation35_spill] sm:$0xff]  ;;  %v14210_v21 = vld [vmem:[#allocation224_spill] sm:$0xff]  ;;  %v14211_v19 = vld [vmem:[#allocation225_spill] sm:$0xff] }
 0x53c   :  { %vm5001_vm1 = vcmp.eq.s32.totalorder %v4973_v37, 1  ;;  %8580 = vpow2.f32 %v5552_v9  ;;  %v12565_v47 = vadd.f32 %v14203_v15, %v14165_v53  ;;  %v12569_v42 = vadd.f32 %v14204_v24, %v14165_v53  ;;  %v14212_v15 = vld [vmem:[#allocation147_spill] sm:$0xff] }
 0x53d   :  { %v12547_v61 = vsel %vm5001_vm1, -1e+09, %v4911_v12  ;;  %v5840_v14 = vmul.f32 1.442695, %v5816_v17  ;;  %8582 = vpow2.f32 %v5648_v26  ;;  %v12587_v12 = vadd.f32 %v14210_v21, %v14165_v53 }
 0x53e   :  { %v12561_v25 = vmax.f32 %v12414_v50, %v12547_v61  ;;  %8584 = vpow2.f32 %v5744_v52  ;;  %v12591_v39 = vadd.f32 %v14211_v19, %v14165_v53 }
 0x53f   :  { %8586 = vpow2.f32 %v5840_v14 }
 0x540   :  { %v5145_v10 = vsub.f32 %v14205_v44, %v12561_v25  ;;  %v5241_v56 = vsub.f32 %v14206_v11, %v12561_v25  ;;  %v5337_v50 = vsub.f32 %v14207_v0, %v12561_v25  ;;  %v5433_v45 = vsub.f32 %v14208_v13, %v12561_v25  ;;  %v2248_v46 = vpop.permute.xlu1 %2247  ;;  %v14213_v44 = vld [vmem:[#allocation12_spill] sm:$0xff]  ;;  %v12596_v0 = vpop.permute.xlu0 %4978 }
 0x541   :  { %v5529_v29 = vsub.f32 %v14209_v28, %v12561_v25  ;;  %v5625_v59 = vsub.f32 %v12371_v55, %v12561_v25  ;;  %v5721_v63 = vsub.f32 %v14157_v20, %v12561_v25  ;;  %v4368_v55 = vadd.f32 %v14212_v15, %v14165_v53 }
 0x542   :  { %v8571_v9 = vpop.eup %8570  ;;  %v5170_v17 = vmul.f32 1.442695, %v5145_v10  ;;  %v5266_v37 = vmul.f32 1.442695, %v5241_v56  ;;  %v5362_v26 = vmul.f32 1.442695, %v5337_v50 }
 0x543   :  { %v5458_v24 = vmul.f32 1.442695, %v5433_v45  ;;  %v5554_v52 = vmul.f32 1.442695, %v5529_v29  ;;  %vm2266_vm7 = vcmp.eq.s32.totalorder %v2248_v46, 1  ;;  %v5208_v11 = vmul.f32 %v8571_v9, %v14213_v44  ;;  %v14215_v45 = vld [vmem:[#allocation28_spill] sm:$0xff] }
 0x544   :  { %8588 = vpow2.f32 %v5170_v17  ;;  %v12598_v10 = vsel %vm2266_vm7, -1e+09, %v2196_v3  ;;  %v5817_v29 = vsub.f32 %v12547_v61, %v12561_v25  ;;  %v14218_v44 = vld [vmem:[#allocation149_spill] sm:$0xff]  ;;  %v5746_v4 = vmul.f32 1.442695, %v5721_v63 }
 0x545   :  { %v8573_v43 = vpop.eup %8572  ;;  %8590 = vpow2.f32 %v5266_v37  ;;  %14214 = vst [vmem:[#allocation199_spill] sm:$0xff] %v12598_v10  ;;  %v4428_v50 = vpop.permute.xlu1 %4427  ;;  %v12605_v14 = vmax.f32 %v5038_v5, %v12598_v10  ;;  %v14216_v5 = vld [vmem:[#allocation217_spill] sm:$0xff]  ;;  %vm5003_vm10 = vcmp.eq.s32.totalorder %v12596_v0, 1 }
 0x546   :  { %v8575_v20 = vpop.eup %8574  ;;  %v5927_v56 = vmul.f32 %v8573_v43, %v12522_v40  ;;  %8592 = vpow2.f32 %v5362_v26  ;;  %vm4454_vm8 = vcmp.eq.s32.totalorder %v4428_v50, 1 }
 0x547   :  { %v5288_v13 = vadd.f32 %v8575_v20, %v8571_v9  ;;  %v8577_v28 = vpop.eup %8576  ;;  %v5304_v46 = vmul.f32 %v8575_v20, %v14215_v45  ;;  %v12610_v21 = vsel %vm4454_vm8, -1e+09, %v4368_v55  ;;  %v5650_v9 = vmul.f32 1.442695, %v5625_v59  ;;  %v14217_v20 = vld [vmem:[#allocation44_spill] sm:$0xff]  ;;  %v14219_v59 = vld [vmem:[#allocation167_spill] sm:$0xff]  ;;  %v8195_v45 = vpop.f32.mrf.mxu0 }
 0x548   :  { %v5943_v3 = vsub.f32 2.0, %v5927_v56  ;;  %v8579_v17 = vpop.eup %8578  ;;  %v12616_v37 = vmax.f32 %v5098_v23, %v12610_v21  ;;  %8594 = vpow2.f32 %v5458_v24  ;;  %v5400_v61 = vmul.f32 %v8577_v28, %v14217_v20 }
 0x549   :  { %v5384_v40 = vadd.f32 %v8577_v28, %v5288_v13  ;;  %v5320_v19 = vadd.f32 %v5304_v46, %v5208_v11  ;;  %v8581_v55 = vpop.eup %8580  ;;  %v4373_v56 = vadd.f32 %v14218_v44, %v14165_v53  ;;  %v12625_v50 = vadd.f32 %v14219_v59, %v14165_v53  ;;  %v12627_v13 = vpop.permute.xlu0 %4981  ;;  %v14220_v11 = vld [vmem:[#allocation60_spill] sm:$0xff] }
 0x54a   :  { %v5959_v15 = vmul.f32 %v8573_v43, %v5943_v3  ;;  %8596 = vpow2.f32 %v5554_v52  ;;  %v2251_v23 = vpop.permute.xlu1 %2250  ;;  %v5496_v28 = vmul.f32 %v8579_v17, %v14220_v11  ;;  %v8583_v46 = vpop.eup %8582  ;;  %v14221_v3 = vld [vmem:[#allocation169_spill] sm:$0xff]  ;;  %v5842_v20 = vmul.f32 1.442695, %v5817_v29 }
 0x54b   :  { %v5480_v25 = vadd.f32 %v8579_v17, %v5384_v40  ;;  %vm2267_vm9 = vcmp.eq.s32.totalorder %v2251_v23, 1  ;;  %v5416_v43 = vadd.f32 %v5400_v61, %v5320_v19  ;;  %v12633_v40 = vadd.f32 %v14221_v3, %v14165_v53  ;;  %v14223_v17 = vld [vmem:[#allocation77_spill] sm:$0xff] }
 0x54c   :  { %v5975_v24 = vmul.f32 %v5959_v15, %v12533_v36  ;;  %v12636_v44 = vsel %vm2267_vm9, -1e+09, %v12551_v51  ;;  %8598 = vpow2.f32 %v5650_v9  ;;  %v5592_v19 = vmul.f32 %v8581_v55, %v14223_v17  ;;  %v8585_v15 = vpop.eup %8584  ;;  %v14224_v61 = vld [vmem:[#allocation161_spill] sm:$0xff]  ;;  %v14225_v9 = vld [vmem:[#allocation222_spill] sm:$0xff] }
 0x54d   :  { %14222 = vst [vmem:[#allocation180_spill] sm:$0xff] %v12636_v44  ;;  %v5576_v63 = vadd.f32 %v8581_v55, %v5480_v25  ;;  %v5055_v36 = vmax.f32 %v5039_v32, %v12636_v44  ;;  %v5512_v52 = vadd.f32 %v5496_v28, %v5416_v43  ;;  %v12646_v59 = vadd.f32 %v14224_v61, %v14165_v53  ;;  %v14226_v11 = vld [vmem:[#allocation93_spill] sm:$0xff]  ;;  %v8587_v43 = vpop.eup %8586  ;;  %v4440_v61 = vpop.permute.xlu0 %4439 }
 0x54e   :  { %8220 = vmatmul.mubr.msk.f32.gmra.mxu1 %vm78_vm0, %v5975_v24  ;;  %v4921_v51 = vadd.f32 %v8195_v45, %v14165_v53  ;;  %8600 = vpow2.f32 %v5746_v4  ;;  %v5688_v32 = vmul.f32 %v8583_v46, %v14226_v11  ;;  %v14227_v55 = vld [vmem:[#allocation165_spill] sm:$0xff]  ;;  %v14228_v45 = vld [vmem:[#allocation108_spill] sm:$0xff]  ;;  %v14229_v4 = vld [vmem:[#allocation175_spill] sm:$0xff]  ;;  %vm4458_vm12 = vcmp.eq.s32.totalorder %v4440_v61, 1 }
 0x54f   :  { %v5672_v29 = vadd.f32 %v8583_v46, %v5576_v63  ;;  %v5071_v25 = vmax.f32 %v5055_v36, %v14225_v9  ;;  %v4431_v23 = vpop.permute.xlu1 %4430  ;;  %v5608_v24 = vadd.f32 %v5592_v19, %v5512_v52  ;;  %v4388_v28 = vadd.f32 %v14227_v55, %v14165_v53 }
 0x550   :  { %8602 = vpow2.f32 %v5842_v20  ;;  %vm4455_vm11 = vcmp.eq.s32.totalorder %v4431_v23, 1  ;;  %v5784_v63 = vmul.f32 %v8585_v15, %v14228_v45  ;;  %v12660_v46 = vsel %vm5003_vm10, -1e+09, %v4921_v51 }
 0x551   :  { %v5768_v3 = vadd.f32 %v8585_v15, %v5672_v29  ;;  %v8589_v17 = vpop.eup %8588  ;;  %v4471_v26 = vsel %vm4455_vm11, -1e+09, %v4373_v56  ;;  %v5704_v1 = vadd.f32 %v5688_v32, %v5608_v24  ;;  %v12656_v10 = vmax.f32 %v5071_v25, %v14229_v4  ;;  %v14231_v29 = vld [vmem:[#allocation11_spill] sm:$0xff]  ;;  %v14232_v15 = vld [vmem:[#allocation124_spill] sm:$0xff] }
 0x552   :  { %v8591_v36 = vpop.eup %8590  ;;  %v14230_v52 = vmax.f32 %v12466_v49, %v14179_v54  ;;  %v5209_v23 = vmul.f32 %v8589_v17, %v14231_v29  ;;  %v5880_v32 = vmul.f32 %v8587_v43, %v14232_v15  ;;  %v14233_v25 = vld [vmem:[#allocation27_spill] sm:$0xff]  ;;  %vm5004_vm2 = vcmp.eq.s32.totalorder %v12627_v13, 1 }
 0x553   :  { %v12665_v19 = vadd.f32 %v8587_v43, %v5768_v3  ;;  %v8593_v56 = vpop.eup %8592  ;;  %v5289_v24 = vadd.f32 %v8591_v36, %v8589_v17  ;;  %v5800_v11 = vadd.f32 %v5784_v63, %v5704_v1  ;;  %v5305_v55 = vmul.f32 %v8591_v36, %v14233_v25  ;;  %v14234_v49 = vld [vmem:[#allocation43_spill] sm:$0xff]  ;;  %v4915_v1 = vpop.f32.mrf.mxu0  ;;  %v14235_v43 = vld [vmem:[#allocation197_spill] sm:$0xff] }
 0x554   :  { %v5115_v20 = vmax.f32 %v14230_v52, %v4471_v26  ;;  %v3886_v51 = vpop.permute.xlu1 %3885  ;;  %v5401_v45 = vmul.f32 %v8593_v56, %v14234_v49  ;;  %v14236_v36 = vld [vmem:[#allocation153_spill] sm:$0xff]  ;;  %v4916_v7 = vadd.f32 %v4915_v1, %v14165_v53 }
 0x555   :  { %8604 = vrcp.f32 %v12665_v19  ;;  %v5385_v3 = vadd.f32 %v8593_v56, %v5289_v24  ;;  %vm3908_vm13 = vcmp.eq.s32.totalorder %v3886_v51, 1  ;;  %v12675_v52 = vadd.f32 %v5880_v32, %v5800_v11  ;;  %v8595_v17 = vpop.eup %8594 }
 0x556   :  { %v12671_v0 = vmax.f32 %v5115_v20, %v12660_v46  ;;  %v5321_v29 = vadd.f32 %v5305_v55, %v5209_v23  ;;  %v14237_v20 = vld [vmem:[#allocation19_spill] sm:$0xff] }
 0x557   :  { %v8597_v49 = vpop.eup %8596  ;;  %v5481_v56 = vadd.f32 %v8595_v17, %v5385_v3 }
 0x558   :  { %v5147_v63 = vsub.f32 %v14235_v43, %v12671_v0  ;;  %v5243_v15 = vsub.f32 %v14236_v36, %v12671_v0  ;;  %v5339_v25 = vsub.f32 %v14237_v20, %v12671_v0  ;;  %v5435_v58 = vsub.f32 %v14153_v22, %v12671_v0 }
 0x559   :  { %v5531_v24 = vsub.f32 %v12456_v6, %v12671_v0  ;;  %v5627_v23 = vsub.f32 %v14179_v54, %v12671_v0  ;;  %v5723_v11 = vsub.f32 %v4471_v26, %v12671_v0  ;;  %v5417_v36 = vadd.f32 %v5401_v45, %v5321_v29  ;;  %v4976_v22 = vpop.permute.xlu1 %4975  ;;  %v8599_v44 = vpop.eup %8598 }
 0x55a   :  { %v5174_v32 = vmul.f32 1.442695, %v5147_v63  ;;  %v5270_v55 = vmul.f32 1.442695, %v5243_v15  ;;  %v5366_v43 = vmul.f32 1.442695, %v5339_v25  ;;  %v5577_v20 = vadd.f32 %v8597_v49, %v5481_v56 }
 0x55b   :  { %v5462_v4 = vmul.f32 1.442695, %v5435_v58  ;;  %v5558_v9 = vmul.f32 1.442695, %v5531_v24  ;;  %v5654_v3 = vmul.f32 1.442695, %v5627_v23  ;;  %v8601_v29 = vpop.eup %8600 }
 0x55c   :  { %8606 = vpow2.f32 %v5174_v32  ;;  %v12693_v6 = vsel %vm3908_vm13, -1e+09, %v12569_v42  ;;  %vm5002_vm14 = vcmp.eq.s32.totalorder %v4976_v22, 1  ;;  %v5673_v54 = vadd.f32 %v8599_v44, %v5577_v20  ;;  %v14238_v15 = vld [vmem:[#allocation59_spill] sm:$0xff]  ;;  %v14239_v56 = vld [vmem:[#allocation76_spill] sm:$0xff] }
 0x55d   :  { %8608 = vpow2.f32 %v5270_v55  ;;  %v5100_v26 = vmax.f32 %v12482_v62, %v12693_v6  ;;  %v12697_v45 = vsel %vm5002_vm14, -1e+09, %v4916_v7  ;;  %v12700_v58 = vsel %vm4458_vm12, -1e+09, %v4388_v28  ;;  %v8603_v42 = vpop.eup %8602  ;;  %v14240_v7 = vld [vmem:[#allocation203_spill] sm:$0xff] }
 0x55e   :  { %8610 = vpow2.f32 %v5366_v43  ;;  %v5750_v1 = vmul.f32 1.442695, %v5723_v11  ;;  %v12704_v63 = vmax.f32 %v12616_v37, %v12697_v45  ;;  %v5769_v51 = vadd.f32 %v8601_v29, %v5673_v54  ;;  %v14241_v28 = vld [vmem:[#allocation195_spill] sm:$0xff]  ;;  %v3889_v55 = vpop.permute.xlu1 %3888  ;;  %v8198_v54 = vpop.f32.mrf.mxu0 }
 0x55f   :  { %8612 = vpow2.f32 %v5462_v4  ;;  %v5497_v25 = vmul.f32 %v8595_v17, %v14238_v15  ;;  %v5593_v24 = vmul.f32 %v8597_v49, %v14239_v56  ;;  %v14242_v11 = vld [vmem:[#allocation191_spill] sm:$0xff]  ;;  %vm3909_vm15 = vcmp.eq.s32.totalorder %v3889_v55, 1  ;;  %v14243_v4 = vld [vmem:[#allocation92_spill] sm:$0xff] }
 0x560   :  { %8614 = vpow2.f32 %v5558_v9  ;;  %v5146_v23 = vsub.f32 %v14240_v7, %v12704_v63  ;;  %v5242_v61 = vsub.f32 %v14241_v28, %v12704_v63  ;;  %v5338_v32 = vsub.f32 %v14242_v11, %v12704_v63  ;;  %v14244_v9 = vld [vmem:[#allocation107_spill] sm:$0xff] }
 0x561   :  { %v12714_v37 = vadd.f32 %v8603_v42, %v5769_v51  ;;  %8616 = vpow2.f32 %v5654_v3  ;;  %v5689_v43 = vmul.f32 %v8599_v44, %v14243_v4  ;;  %v5785_v20 = vmul.f32 %v8601_v29, %v14244_v9 }
 0x562   :  { %8618 = vpow2.f32 %v5750_v1  ;;  %v5172_v17 = vmul.f32 1.442695, %v5146_v23  ;;  %v5268_v49 = vmul.f32 1.442695, %v5242_v61  ;;  %v8605_v22 = vpop.eup %8604  ;;  %v5364_v15 = vmul.f32 1.442695, %v5338_v32  ;;  %v4925_v61 = vpop.f32.mrf.mxu0 }
 0x563   :  { %8620 = vrcp.f32 %v12714_v37  ;;  %v12721_v56 = vsel %vm3909_vm15, -1e+09, %v12565_v47  ;;  %v5513_v51 = vadd.f32 %v5497_v25, %v5417_v36  ;;  %v5818_v44 = vsub.f32 %v12697_v45, %v12704_v63  ;;  %v3344_v1 = vpop.permute.xlu1 %3343  ;;  %v14245_v25 = vld [vmem:[#allocation123_spill] sm:$0xff] }
 0x564   :  { %8622 = vpow2.f32 %v5172_v17  ;;  %v5101_v3 = vmax.f32 %v12545_v48, %v12721_v56  ;;  %v5928_v29 = vmul.f32 %v8605_v22, %v12665_v19  ;;  %v5434_v23 = vsub.f32 %v12255_v33, %v12704_v63  ;;  %v14255_v48 = vld [vmem:[#allocation30_spill] sm:$0xff] }
 0x565   :  { %8624 = vpow2.f32 %v5268_v49  ;;  %v5609_v7 = vadd.f32 %v5593_v24, %v5513_v51  ;;  %v5530_v47 = vsub.f32 %v12392_v31, %v12704_v63  ;;  %vm3362_vm3 = vcmp.eq.s32.totalorder %v3344_v1, 1 }
 0x566   :  { %v5944_v36 = vsub.f32 2.0, %v5928_v29  ;;  %v5881_v28 = vmul.f32 %v8603_v42, %v14245_v25  ;;  %v5626_v45 = vsub.f32 %v12499_v2, %v12704_v63  ;;  %v12736_v11 = vsel %vm3362_vm3, -1e+09, %v12557_v18 }
 0x567   :  { %v5705_v19 = vadd.f32 %v5689_v43, %v5609_v7  ;;  %8626 = vpow2.f32 %v5364_v15  ;;  %v5460_v24 = vmul.f32 1.442695, %v5434_v23  ;;  %v14246_v33 = vmax.f32 %v12605_v14, %v14216_v5  ;;  %v14247_v15 = vld [vmem:[#allocation13_spill] sm:$0xff] }
 0x568   :  { %v5960_v31 = vmul.f32 %v8605_v22, %v5944_v36  ;;  %v5556_v55 = vmul.f32 1.442695, %v5530_v47  ;;  %v5652_v4 = vmul.f32 1.442695, %v5626_v45  ;;  %v5722_v2 = vsub.f32 %v12610_v21, %v12704_v63  ;;  %v4434_v14 = vpop.permute.xlu1 %4433 }
 0x569   :  { %v12742_v32 = vmax.f32 %v14246_v33, %v12736_v11  ;;  %v8607_v42 = vpop.eup %8606  ;;  %v5801_v17 = vadd.f32 %v5785_v20, %v5705_v19  ;;  %8628 = vpow2.f32 %v5460_v24  ;;  %v5819_v18 = vsub.f32 %v12660_v46, %v12671_v0  ;;  %v14248_v0 = vld [vmem:[#allocation29_spill] sm:$0xff] }
 0x56a   :  { %v8609_v43 = vpop.eup %8608  ;;  %v4926_v49 = vadd.f32 %v4925_v61, %v14165_v53  ;;  %v5976_v9 = vmul.f32 %v5960_v31, %v12675_v52  ;;  %8630 = vpow2.f32 %v5556_v55  ;;  %v5211_v22 = vmul.f32 %v8607_v42, %v14247_v15  ;;  %v14249_v61 = vld [vmem:[#allocation45_spill] sm:$0xff] }
 0x56b   :  { %v8611_v51 = vpop.eup %8610  ;;  %v5291_v29 = vadd.f32 %v8609_v43, %v8607_v42  ;;  %v5844_v1 = vmul.f32 1.442695, %v5818_v44  ;;  %vm4456_vm4 = vcmp.eq.s32.totalorder %v4434_v14, 1  ;;  %v12751_v20 = vadd.f32 %v5881_v28, %v5801_v17  ;;  %v14250_v55 = vld [vmem:[#allocation61_spill] sm:$0xff] }
 0x56c   :  { %v8613_v7 = vpop.eup %8612  ;;  %8222 = vmatprep.mubr.msk.f32.mxu1 %vm78_vm0, %v5976_v9  ;;  %v12755_v21 = vsel %vm4456_vm4, -1e+09, %v12633_v40  ;;  %8632 = vpow2.f32 %v5652_v4  ;;  %v5748_v46 = vmul.f32 1.442695, %v5722_v2  ;;  %v5307_v52 = vmul.f32 %v8609_v43, %v14248_v0  ;;  %v4437_v28 = vpop.permute.xlu1 %4436  ;;  %v14251_v2 = vld [vmem:[#allocation51_spill] sm:$0xff]  ;;  %v14252_v43 = vld [vmem:[#allocation148_spill] sm:$0xff] }
 0x56d   :  { %v8615_v63 = vpop.eup %8614  ;;  %v12759_v23 = vadd.f32 %v8198_v54, %v14165_v53  ;;  %v5387_v47 = vadd.f32 %v8611_v51, %v5291_v29  ;;  %v5116_v44 = vmax.f32 %v5100_v26, %v12755_v21  ;;  %v5846_v36 = vmul.f32 1.442695, %v5819_v18  ;;  %v8201_v26 = vpop.f32.mrf.mxu0 }
 0x56e   :  { %v8617_v25 = vpop.eup %8616  ;;  %v12767_v40 = vsel %vm5004_vm2, -1e+09, %v4926_v49  ;;  %8634 = vpow2.f32 %v5748_v46  ;;  %v5323_v45 = vadd.f32 %v5307_v52, %v5211_v22  ;;  %v5403_v19 = vmul.f32 %v8611_v51, %v14249_v61  ;;  %v14253_v22 = vld [vmem:[#allocation14_spill] sm:$0xff] }
 0x56f   :  { %v8619_v24 = vpop.eup %8618  ;;  %v5483_v54 = vadd.f32 %v8613_v7, %v5387_v47  ;;  %8636 = vpow2.f32 %v5844_v1  ;;  %v12771_v33 = vmax.f32 %v5116_v44, %v12767_v40  ;;  %vm4457_vm5 = vcmp.eq.s32.totalorder %v4437_v28, 1  ;;  %v14254_v52 = vld [vmem:[#allocation78_spill] sm:$0xff] }
 0x570   :  { %v8621_v62 = vpop.eup %8620  ;;  %v12774_v31 = vsel %vm4457_vm5, -1e+09, %v12625_v50  ;;  %v5419_v13 = vadd.f32 %v5403_v19, %v5323_v45  ;;  %v5499_v4 = vmul.f32 %v8613_v7, %v14250_v55  ;;  %8638 = vpow2.f32 %v5846_v36  ;;  %v14256_v19 = vld [vmem:[#allocation46_spill] sm:$0xff] }
 0x571   :  { %v8623_v42 = vpop.eup %8622  ;;  %v5579_v17 = vadd.f32 %v8615_v63, %v5483_v54  ;;  %v5148_v18 = vsub.f32 %v14251_v2, %v12771_v33  ;;  %v5244_v49 = vsub.f32 %v14252_v43, %v12771_v33  ;;  %v5724_v9 = vsub.f32 %v12755_v21, %v12771_v33  ;;  %v3892_v0 = vpop.permute.xlu1 %3891 }
 0x572   :  { %v8625_v14 = vpop.eup %8624  ;;  %v12787_v50 = vmax.f32 %v5101_v3, %v12774_v31  ;;  %v5929_v15 = vmul.f32 %v8621_v62, %v12714_v37  ;;  %v5210_v51 = vmul.f32 %v8623_v42, %v14253_v22  ;;  %v5515_v29 = vadd.f32 %v5499_v4, %v5419_v13 }
 0x573   :  { %v12792_v1 = vadd.f32 %v8201_v26, %v14165_v53  ;;  %v5675_v7 = vadd.f32 %v8617_v25, %v5579_v17  ;;  %v5176_v46 = vmul.f32 1.442695, %v5148_v18  ;;  %v5595_v47 = vmul.f32 %v8615_v63, %v14254_v52  ;;  %v14257_v18 = vld [vmem:[#allocation62_spill] sm:$0xff]  ;;  %v14260_v52 = vld [vmem:[#allocation79_spill] sm:$0xff] }
 0x574   :  { %v8627_v44 = vpop.eup %8626  ;;  %vm3910_vm6 = vcmp.eq.s32.totalorder %v3892_v0, 1  ;;  %v5945_v36 = vsub.f32 2.0, %v5929_v15  ;;  %v5290_v28 = vadd.f32 %v8625_v14, %v8623_v42  ;;  %v5306_v3 = vmul.f32 %v8625_v14, %v14255_v48  ;;  %v14258_v14 = vld [vmem:[#allocation94_spill] sm:$0xff]  ;;  %v4991_v48 = vpop.permute.xlu0 %4990 }
 0x575   :  { %v5771_v45 = vadd.f32 %v8619_v24, %v5675_v7  ;;  %v5272_v61 = vmul.f32 1.442695, %v5244_v49  ;;  %v12797_v37 = vsel %vm3910_vm6, -1e+09, %v12591_v39  ;;  %v5402_v54 = vmul.f32 %v8627_v44, %v14256_v19  ;;  %v3895_v2 = vpop.permute.xlu1 %3894 }
 0x576   :  { %v8629_v26 = vpop.eup %8628  ;;  %v5102_v13 = vmax.f32 %v12742_v32, %v12797_v37  ;;  %v5961_v55 = vmul.f32 %v8621_v62, %v5945_v36  ;;  %v5322_v4 = vadd.f32 %v5306_v3, %v5210_v51  ;;  %v5386_v63 = vadd.f32 %v8627_v44, %v5290_v28  ;;  %v14259_v32 = vld [vmem:[#allocation109_spill] sm:$0xff] }
 0x577   :  { %v8631_v17 = vpop.eup %8630  ;;  %v5498_v42 = vmul.f32 %v8629_v26, %v14257_v18  ;;  %v5611_v43 = vadd.f32 %v5595_v47, %v5515_v29  ;;  %v5691_v15 = vmul.f32 %v8617_v25, %v14258_v14  ;;  %8640 = vpow2.f32 %v5176_v46 }
 0x578   :  { %vm3911_vm1 = vcmp.eq.s32.totalorder %v3895_v2, 1  ;;  %v5977_v39 = vmul.f32 %v5961_v55, %v12751_v20  ;;  %v12806_v49 = vmax.f32 %v5102_v13, %v12700_v58  ;;  %v5418_v22 = vadd.f32 %v5402_v54, %v5322_v4  ;;  %v14261_v54 = vld [vmem:[#allocation95_spill] sm:$0xff] }
 0x579   :  { %v8633_v7 = vpop.eup %8632  ;;  %v5787_v62 = vmul.f32 %v8619_v24, %v14259_v32  ;;  %v12810_v51 = vsel %vm3911_vm1, -1e+09, %v12587_v12  ;;  %v5482_v0 = vadd.f32 %v8629_v26, %v5386_v63  ;;  %v5594_v44 = vmul.f32 %v8631_v17, %v14260_v52 }
 0x57a   :  { %v5103_v25 = vmax.f32 %v12656_v10, %v12810_v51  ;;  %8223 = vmatmul.mubr.msk.f32.gmra.mxu1 %vm78_vm0, %v5977_v39  ;;  %v5514_v29 = vadd.f32 %v5498_v42, %v5418_v22  ;;  %v5707_v20 = vadd.f32 %v5691_v15, %v5611_v43  ;;  %8642 = vpow2.f32 %v5272_v61  ;;  %v4985_v3 = vpop.permute.xlu1 %4984  ;;  %v14263_v43 = vld [vmem:[#allocation125_spill] sm:$0xff] }
 0x57b   :  { %v8635_v46 = vpop.eup %8634  ;;  %v5578_v47 = vadd.f32 %v8631_v17, %v5482_v0  ;;  %v5340_v36 = vsub.f32 %v14110_v16, %v12771_v33  ;;  %v5436_v12 = vsub.f32 %v14175_v41, %v12771_v33  ;;  %v5532_v24 = vsub.f32 %v14180_v27, %v12771_v33  ;;  %v14262_v16 = vld [vmem:[#allocation110_spill] sm:$0xff] }
 0x57c   :  { %v8637_v28 = vpop.eup %8636  ;;  %v5610_v19 = vadd.f32 %v5594_v44, %v5514_v29  ;;  %v5690_v26 = vmul.f32 %v8633_v7, %v14261_v54  ;;  %v5803_v13 = vadd.f32 %v5787_v62, %v5707_v20  ;;  %v5628_v61 = vsub.f32 %v12693_v6, %v12771_v33  ;;  %v14265_v54 = vld [vmem:[#allocation16_spill] sm:$0xff] }
 0x57d   :  { %v8639_v55 = vpop.eup %8638  ;;  %vm5005_vm7 = vcmp.eq.s32.totalorder %v4985_v3, 1  ;;  %v5674_v4 = vadd.f32 %v8633_v7, %v5578_v47  ;;  %v5786_v63 = vmul.f32 %v8635_v46, %v14262_v16  ;;  %v5368_v17 = vmul.f32 1.442695, %v5340_v36  ;;  %v14264_v7 = vld [vmem:[#allocation126_spill] sm:$0xff]  ;;  %v14266_v16 = vld [vmem:[#allocation32_spill] sm:$0xff] }
 0x57e   :  { %v5021_v2 = vsel %vm5005_vm7, -1e+09, %v12759_v23  ;;  %v5706_v18 = vadd.f32 %v5690_v26, %v5610_v19  ;;  %v12827_v42 = vadd.f32 %v8639_v55, %v5771_v45  ;;  %v5883_v14 = vmul.f32 %v8639_v55, %v14263_v43  ;;  %v4935_v23 = vpop.f32.mrf.mxu0  ;;  %v14267_v43 = vld [vmem:[#allocation180_spill] sm:$0xff] }
 0x57f   :  { %vm5007_vm8 = vcmp.eq.s32.totalorder %v4991_v48, 1  ;;  %v5752_v15 = vmul.f32 1.442695, %v5724_v9  ;;  %v5133_v39 = vmax.f32 %v12787_v50, %v5021_v2  ;;  %v5770_v22 = vadd.f32 %v8635_v46, %v5674_v4  ;;  %v4443_v9 = vpop.permute.xlu1 %4442 }
 0x580   :  { %v5802_v32 = vadd.f32 %v5786_v63, %v5706_v18  ;;  %v5882_v62 = vmul.f32 %v8637_v28, %v14264_v7  ;;  %v12835_v0 = vadd.f32 %v5883_v14, %v5803_v13  ;;  %8644 = vrcp.f32 %v12827_v42 }
 0x581   :  { %v5149_v45 = vsub.f32 %v12296_v60, %v5133_v39  ;;  %v5245_v52 = vsub.f32 %v12319_v34, %v5133_v39  ;;  %v5341_v44 = vsub.f32 %v14156_v35, %v5133_v39  ;;  %v5437_v21 = vsub.f32 %v12535_v57, %v5133_v39 }
 0x582   :  { %v5533_v50 = vsub.f32 %v14199_v8, %v5133_v39  ;;  %v5629_v29 = vsub.f32 %v12721_v56, %v5133_v39  ;;  %v5725_v20 = vsub.f32 %v12774_v31, %v5133_v39  ;;  %8646 = vpow2.f32 %v5368_v17 }
 0x583   :  { %v5178_v46 = vmul.f32 1.442695, %v5149_v45  ;;  %v5274_v47 = vmul.f32 1.442695, %v5245_v52  ;;  %v5370_v36 = vmul.f32 1.442695, %v5341_v44  ;;  %v12845_v3 = vadd.f32 %v8637_v28, %v5770_v22 }
 0x584   :  { %v8641_v60 = vpop.eup %8640  ;;  %v12849_v34 = vsel %vm5007_vm8, -1e+09, %v12792_v1  ;;  %v4936_v35 = vadd.f32 %v4935_v23, %v14165_v53  ;;  %8648 = vpow2.f32 %v5752_v15  ;;  %v12852_v57 = vadd.f32 %v5882_v62, %v5802_v32  ;;  %v4988_v28 = vpop.permute.xlu1 %4987  ;;  %v14268_v15 = vld [vmem:[#allocation222_spill] sm:$0xff]  ;;  %v14269_v22 = vld [vmem:[#allocation175_spill] sm:$0xff] }
 0x585   :  { %8650 = vpow2.f32 %v5178_v46  ;;  %v5466_v8 = vmul.f32 1.442695, %v5437_v21  ;;  %v5821_v56 = vsub.f32 %v5021_v2, %v5133_v39  ;;  %vm4459_vm9 = vcmp.eq.s32.totalorder %v4443_v9, 1  ;;  %v14270_v52 = vld [vmem:[#allocation198_spill] sm:$0xff] }
 0x586   :  { %8652 = vpow2.f32 %v5274_v47  ;;  %v5562_v31 = vmul.f32 1.442695, %v5533_v50  ;;  %v4475_v19 = vsel %vm4459_vm9, -1e+09, %v12646_v59  ;;  %v5212_v26 = vmul.f32 %v8641_v60, %v14265_v54 }
 0x587   :  { %v8643_v13 = vpop.eup %8642  ;;  %8654 = vpow2.f32 %v5370_v36  ;;  %v5658_v1 = vmul.f32 1.442695, %v5629_v29  ;;  %v5119_v53 = vmax.f32 %v5103_v25, %v4475_v19  ;;  %vm5006_vm10 = vcmp.eq.s32.totalorder %v4988_v28, 1  ;;  %v14273_v28 = vld [vmem:[#allocation48_spill] sm:$0xff] }
 0x588   :  { %v5754_v48 = vmul.f32 1.442695, %v5725_v20  ;;  %v12859_v55 = vsel %vm5006_vm10, -1e+09, %v4936_v35  ;;  %v5292_v4 = vadd.f32 %v8643_v13, %v8641_v60  ;;  %v5308_v63 = vmul.f32 %v8643_v13, %v14266_v16  ;;  %v14272_v20 = vld [vmem:[#allocation199_spill] sm:$0xff] }
 0x589   :  { %8656 = vpow2.f32 %v5466_v8  ;;  %v12863_v59 = vmax.f32 %v5119_v53, %v12849_v34  ;;  %v5850_v17 = vmul.f32 1.442695, %v5821_v56  ;;  %v12867_v2 = vmax.f32 %v12806_v49, %v12859_v55  ;;  %v14274_v13 = vld [vmem:[#allocation15_spill] sm:$0xff] }
 0x58a   :  { %8658 = vpow2.f32 %v5562_v31  ;;  %v5324_v18 = vadd.f32 %v5308_v63, %v5212_v26  ;;  %v5464_v21 = vmul.f32 1.442695, %v5436_v12  ;;  %v5820_v60 = vsub.f32 %v12767_v40, %v12771_v33 }
 0x58b   :  { %8660 = vpow2.f32 %v5658_v1  ;;  %v5151_v10 = vsub.f32 %v14197_v38, %v12863_v59  ;;  %v5247_v25 = vsub.f32 %v12524_v30, %v12863_v59  ;;  %v5343_v14 = vsub.f32 %v14267_v43, %v12863_v59 }
 0x58c   :  { %8662 = vpow2.f32 %v5754_v48  ;;  %v5439_v39 = vsub.f32 %v14268_v15, %v12863_v59  ;;  %v5535_v32 = vsub.f32 %v14269_v22, %v12863_v59  ;;  %v5631_v49 = vsub.f32 %v12810_v51, %v12863_v59  ;;  %v14271_v51 = vld [vmem:[#allocation196_spill] sm:$0xff] }
 0x58d   :  { %v8645_v7 = vpop.eup %8644  ;;  %v5182_v62 = vmul.f32 1.442695, %v5151_v10  ;;  %v5278_v23 = vmul.f32 1.442695, %v5247_v25  ;;  %v5374_v38 = vmul.f32 1.442695, %v5343_v14  ;;  %v5727_v45 = vsub.f32 %v4475_v19, %v12863_v59 }
 0x58e   :  { %8664 = vpow2.f32 %v5850_v17  ;;  %v5470_v30 = vmul.f32 1.442695, %v5439_v39  ;;  %v5150_v44 = vsub.f32 %v14270_v52, %v12867_v2  ;;  %v5566_v50 = vmul.f32 1.442695, %v5535_v32  ;;  %v14275_v10 = vld [vmem:[#allocation31_spill] sm:$0xff] }
 0x58f   :  { %v8647_v9 = vpop.eup %8646  ;;  %8666 = vpow2.f32 %v5182_v62  ;;  %v5246_v29 = vsub.f32 %v14271_v51, %v12867_v2  ;;  %v5342_v46 = vsub.f32 %v14272_v20, %v12867_v2  ;;  %v5662_v47 = vmul.f32 1.442695, %v5631_v49  ;;  %v14280_v20 = vld [vmem:[#allocation111_spill] sm:$0xff] }
 0x590   :  { %8668 = vpow2.f32 %v5278_v23  ;;  %v5931_v36 = vmul.f32 %v8645_v7, %v12827_v42  ;;  %v5758_v41 = vmul.f32 1.442695, %v5727_v45  ;;  %v5180_v12 = vmul.f32 1.442695, %v5150_v44 }
 0x591   :  { %v12894_v35 = vpop.eup %8648  ;;  %8670 = vpow2.f32 %v5374_v38  ;;  %v12896_v8 = vadd.f32 %v8647_v9, %v5292_v4  ;;  %v5276_v31 = vmul.f32 1.442695, %v5246_v29  ;;  %v5404_v54 = vmul.f32 %v8647_v9, %v14273_v28  ;;  %v14278_v38 = vld [vmem:[#allocation80_spill] sm:$0xff] }
 0x592   :  { %v8651_v56 = vpop.eup %8650  ;;  %8672 = vpow2.f32 %v5470_v30  ;;  %v5947_v19 = vsub.f32 2.0, %v5931_v36  ;;  %v5438_v40 = vsub.f32 %v14216_v5, %v12867_v2  ;;  %v5534_v1 = vsub.f32 %v12736_v11, %v12867_v2  ;;  %v14279_v9 = vld [vmem:[#allocation96_spill] sm:$0xff]  ;;  %v14281_v36 = vld [vmem:[#allocation17_spill] sm:$0xff] }
 0x593   :  { %v8653_v26 = vpop.eup %8652  ;;  %8674 = vpow2.f32 %v5566_v50  ;;  %v5213_v42 = vmul.f32 %v8651_v56, %v14274_v13  ;;  %v12904_v16 = vadd.f32 %v5404_v54, %v5324_v18  ;;  %v5560_v63 = vmul.f32 1.442695, %v5532_v24  ;;  %v14276_v24 = vld [vmem:[#allocation47_spill] sm:$0xff] }
 0x594   :  { %v8655_v53 = vpop.eup %8654  ;;  %v5293_v48 = vadd.f32 %v8653_v26, %v8651_v56  ;;  %8676 = vpow2.f32 %v5662_v47  ;;  %v5963_v4 = vmul.f32 %v8645_v7, %v5947_v19  ;;  %v5656_v17 = vmul.f32 1.442695, %v5628_v61  ;;  %v14277_v7 = vld [vmem:[#allocation63_spill] sm:$0xff] }
 0x595   :  { %8678 = vpow2.f32 %v5758_v41  ;;  %v5309_v5 = vmul.f32 %v8653_v26, %v14275_v10  ;;  %v5848_v14 = vmul.f32 1.442695, %v5820_v60  ;;  %v5822_v15 = vsub.f32 %v12859_v55, %v12867_v2 }
 0x596   :  { %v8657_v25 = vpop.eup %8656  ;;  %v5389_v43 = vadd.f32 %v8655_v53, %v5293_v48  ;;  %8680 = vpow2.f32 %v5180_v12  ;;  %v12914_v11 = vmul.f32 %v5963_v4, %v12835_v0  ;;  %v5405_v39 = vmul.f32 %v8655_v53, %v14276_v24  ;;  %v14286_v24 = vld [vmem:[#allocation82_spill] sm:$0xff] }
 0x597   :  { %v8659_v18 = vpop.eup %8658  ;;  %8682 = vpow2.f32 %v5276_v31  ;;  %v5325_v27 = vadd.f32 %v5309_v5, %v5213_v42  ;;  %v5372_v33 = vmul.f32 1.442695, %v5342_v46  ;;  %v5468_v61 = vmul.f32 1.442695, %v5438_v40  ;;  %v14282_v31 = vld [vmem:[#allocation33_spill] sm:$0xff] }
 0x598   :  { %v8661_v22 = vpop.eup %8660  ;;  %v5485_v6 = vadd.f32 %v8657_v25, %v5389_v43  ;;  %v5630_v32 = vsub.f32 %v12797_v37, %v12867_v2  ;;  %8684 = vrcp.f32 %v12845_v3  ;;  %v5501_v62 = vmul.f32 %v8657_v25, %v14277_v7  ;;  %v14285_v43 = vld [vmem:[#allocation66_spill] sm:$0xff] }
 0x599   :  { %v8663_v49 = vpop.eup %8662  ;;  %v5421_v0 = vadd.f32 %v5405_v39, %v5325_v27  ;;  %v5726_v23 = vsub.f32 %v12700_v58, %v12867_v2  ;;  %8686 = vpow2.f32 %v5464_v21  ;;  %v5597_v45 = vmul.f32 %v8659_v18, %v14278_v38 }
 0x59a   :  { %v5581_v55 = vadd.f32 %v8659_v18, %v5485_v6  ;;  %v5564_v30 = vmul.f32 1.442695, %v5534_v1  ;;  %8688 = vpow2.f32 %v5560_v63  ;;  %v5693_v50 = vmul.f32 %v8661_v22, %v14279_v9  ;;  %v14284_v63 = vld [vmem:[#allocation127_spill] sm:$0xff] }
 0x59b   :  { %v8665_v52 = vpop.eup %8664  ;;  %v5517_v44 = vadd.f32 %v5501_v62, %v5421_v0  ;;  %v5823_v37 = vsub.f32 %v12849_v34, %v12863_v59  ;;  %8690 = vpow2.f32 %v5656_v17  ;;  %v5789_v46 = vmul.f32 %v8663_v49, %v14280_v20  ;;  %v14283_v59 = vld [vmem:[#allocation49_spill] sm:$0xff] }
 0x59c   :  { %v8667_v51 = vpop.eup %8666  ;;  %v5677_v29 = vadd.f32 %v8661_v22, %v5581_v55  ;;  %v5660_v47 = vmul.f32 1.442695, %v5630_v32  ;;  %8692 = vpow2.f32 %v5848_v14  ;;  %v5756_v21 = vmul.f32 1.442695, %v5726_v23  ;;  %v14289_v55 = vld [vmem:[#allocation98_spill] sm:$0xff] }
 0x59d   :  { %v8669_v58 = vpop.eup %8668  ;;  %v5613_v2 = vadd.f32 %v5597_v45, %v5517_v44  ;;  %v5215_v60 = vmul.f32 %v8667_v51, %v14281_v36  ;;  %8694 = vpow2.f32 %v5372_v33  ;;  %v5854_v26 = vmul.f32 1.442695, %v5823_v37 }
 0x59e   :  { %v8671_v41 = vpop.eup %8670  ;;  %v5773_v12 = vadd.f32 %v8663_v49, %v5677_v29  ;;  %v5295_v56 = vadd.f32 %v8669_v58, %v8667_v51  ;;  %v5311_v19 = vmul.f32 %v8669_v58, %v14282_v31  ;;  %8696 = vpow2.f32 %v5468_v61  ;;  %v14288_v49 = vld [vmem:[#allocation34_spill] sm:$0xff]  ;;  %v14291_v29 = vld [vmem:[#allocation64_spill] sm:$0xff] }
 0x59f   :  { %v8673_v28 = vpop.eup %8672  ;;  %v5709_v34 = vadd.f32 %v5693_v50, %v5613_v2  ;;  %v5407_v54 = vmul.f32 %v8671_v41, %v14283_v59  ;;  %8698 = vpow2.f32 %v5564_v30  ;;  %v5852_v48 = vmul.f32 1.442695, %v5822_v15  ;;  %v14287_v15 = vld [vmem:[#allocation18_spill] sm:$0xff]  ;;  %v14290_v30 = vld [vmem:[#allocation113_spill] sm:$0xff] }
 0x5a0   :  { %v8675_v13 = vpop.eup %8674  ;;  %v12933_v42 = vadd.f32 %v8665_v52, %v5773_v12  ;;  %v5391_v40 = vadd.f32 %v8671_v41, %v5295_v56  ;;  %v5327_v1 = vadd.f32 %v5311_v19, %v5215_v60  ;;  %v5885_v17 = vmul.f32 %v8665_v52, %v14284_v63  ;;  %v14292_v60 = vld [vmem:[#allocation81_spill] sm:$0xff] }
 0x5a1   :  { %v8677_v53 = vpop.eup %8676  ;;  %v5805_v4 = vadd.f32 %v5789_v46, %v5709_v34  ;;  %8700 = vpow2.f32 %v5660_v47  ;;  %v5503_v14 = vmul.f32 %v8673_v28, %v14285_v43  ;;  %v5599_v39 = vmul.f32 %v8675_v13, %v14286_v24  ;;  %v14297_v43 = vld [vmem:[#allocation128_spill] sm:$0xff] }
 0x5a2   :  { %v8679_v10 = vpop.eup %8678  ;;  %8702 = vrcp.f32 %v12933_v42  ;;  %v5487_v5 = vadd.f32 %v8673_v28, %v5391_v40  ;;  %v5423_v25 = vadd.f32 %v5407_v54, %v5327_v1  ;;  %v5695_v38 = vmul.f32 %v8677_v53, %v14289_v55  ;;  %v14294_v54 = vld [vmem:[#allocation50_spill] sm:$0xff]  ;;  %v14295_v1 = vld [vmem:[#allocation112_spill] sm:$0xff] }
 0x5a3   :  { %v8681_v18 = vpop.eup %8680  ;;  %v12938_v27 = vadd.f32 %v5885_v17, %v5805_v4  ;;  %8704 = vpow2.f32 %v5756_v21  ;;  %v5791_v52 = vmul.f32 %v8679_v10, %v14290_v30 }
 0x5a4   :  { %v8683_v22 = vpop.eup %8682  ;;  %v5583_v6 = vadd.f32 %v8675_v13, %v5487_v5  ;;  %v5214_v33 = vmul.f32 %v8681_v18, %v14287_v15  ;;  %v5519_v61 = vadd.f32 %v5503_v14, %v5423_v25  ;;  %8706 = vpow2.f32 %v5854_v26 }
 0x5a5   :  { %v5294_v32 = vadd.f32 %v8683_v22, %v8681_v18  ;;  %v5310_v0 = vmul.f32 %v8683_v22, %v14288_v49  ;;  %v8685_v7 = vpop.eup %8684  ;;  %8708 = vpow2.f32 %v5852_v48  ;;  %v14298_v18 = vld [vmem:[#allocation83_spill] sm:$0xff] }
 0x5a6   :  { %v5679_v62 = vadd.f32 %v8677_v53, %v5583_v6  ;;  %v5615_v23 = vadd.f32 %v5599_v39, %v5519_v61  ;;  %v8687_v45 = vpop.eup %8686  ;;  %v5930_v44 = vmul.f32 %v8685_v7, %v12845_v3  ;;  %v14293_v3 = vld [vmem:[#allocation97_spill] sm:$0xff]  ;;  %v14296_v53 = vld [vmem:[#allocation67_spill] sm:$0xff] }
 0x5a7   :  { %v5326_v9 = vadd.f32 %v5310_v0, %v5214_v33  ;;  %v8689_v50 = vpop.eup %8688  ;;  %v5484_v51 = vadd.f32 %v8687_v45, %v12896_v8  ;;  %v5500_v20 = vmul.f32 %v8687_v45, %v14291_v29  ;;  %v14299_v61 = vld [vmem:[#allocation65_spill] sm:$0xff]  ;;  %v14302_v29 = vld [vmem:[#allocation131_spill] sm:$0xff] }
 0x5a8   :  { %v5775_v37 = vadd.f32 %v8679_v10, %v5679_v62  ;;  %v5711_v46 = vadd.f32 %v5695_v38, %v5615_v23  ;;  %v8691_v47 = vpop.eup %8690  ;;  %v5946_v58 = vsub.f32 2.0, %v5930_v44  ;;  %v5596_v41 = vmul.f32 %v8689_v50, %v14292_v60  ;;  %v14300_v38 = vld [vmem:[#allocation129_spill] sm:$0xff] }
 0x5a9   :  { %v8693_v2 = vpop.eup %8692  ;;  %v5516_v21 = vadd.f32 %v5500_v20, %v12904_v16  ;;  %v5580_v36 = vadd.f32 %v8689_v50, %v5484_v51  ;;  %v5692_v19 = vmul.f32 %v8691_v47, %v14293_v3  ;;  %v5788_v16 = vmul.f32 %v12894_v35, %v14295_v1 }
 0x5aa   :  { %v5807_v12 = vadd.f32 %v5791_v52, %v5711_v46  ;;  %v8695_v56 = vpop.eup %8694  ;;  %v5962_v31 = vmul.f32 %v8685_v7, %v5946_v58  ;;  %v5884_v14 = vmul.f32 %v8693_v2, %v14297_v43  ;;  %v14301_v52 = vld [vmem:[#allocation114_spill] sm:$0xff] }
 0x5ab   :  { %v8697_v28 = vpop.eup %8696  ;;  %v5612_v34 = vadd.f32 %v5596_v41, %v5516_v21  ;;  %v5676_v59 = vadd.f32 %v8691_v47, %v5580_v36  ;;  %v5390_v8 = vadd.f32 %v8695_v56, %v5294_v32  ;;  %v5406_v26 = vmul.f32 %v8695_v56, %v14294_v54 }
 0x5ac   :  { %v8699_v13 = vpop.eup %8698  ;;  %v5978_v40 = vmul.f32 %v5962_v31, %v12852_v57  ;;  %v5502_v48 = vmul.f32 %v8697_v28, %v14296_v53 }
 0x5ad   :  { %v5708_v63 = vadd.f32 %v5692_v19, %v5612_v34  ;;  %v5772_v17 = vadd.f32 %v12894_v35, %v5676_v59  ;;  %v5422_v10 = vadd.f32 %v5406_v26, %v5326_v9  ;;  %v5486_v5 = vadd.f32 %v8697_v28, %v5390_v8  ;;  %v12974_v8 = vld [vmem:[%s13405_s5] sm:$0xff] }
 0x5ae   :  { %v8701_v4 = vpop.eup %8700  ;;  %8225 = vmatprep.mubr.msk.f32.mxu1 %vm78_vm0, %v5978_v40  ;;  %v5598_v24 = vmul.f32 %v8699_v13, %v14298_v18 }
 0x5af   :  { %v8703_v25 = vpop.eup %8702  ;;  %8226 = vmatmul.mubr.msk.f32.gmra.mxu1 %vm78_vm0, %v12914_v11  ;;  %v5804_v57 = vadd.f32 %v5788_v16, %v5708_v63  ;;  %v5868_v22 = vadd.f32 %v8693_v2, %v5772_v17  ;;  %v5518_v15 = vadd.f32 %v5502_v48, %v5422_v10  ;;  %v5582_v35 = vadd.f32 %v8699_v13, %v5486_v5  ;;  %v8751_v16 = vld [vmem:[%s13401_s0 + $0x8] sm:$0xff] }
 0x5b0   :  { %v8705_v39 = vpop.eup %8704  ;;  %v5933_v6 = vmul.f32 %v8703_v25, %v12933_v42  ;;  %v5694_v32 = vmul.f32 %v8701_v4, %v14299_v61  ;;  %v8755_v61 = vld [vmem:[%s13401_s0 + $0x28] sm:$0xff] }
 0x5b1   :  { %v8707_v33 = vpop.eup %8706  ;;  %v5900_v49 = vadd.f32 %v5884_v14, %v5804_v57  ;;  %8710 = vrcp.f32 %v5868_v22  ;;  %v5614_v7 = vadd.f32 %v5598_v24, %v5518_v15  ;;  %v5678_v23 = vadd.f32 %v8701_v4, %v5582_v35  ;;  %v8752_v4 = vld [vmem:[%s13401_s0] sm:$0xff]  ;;  %v8753_v14 = vld [vmem:[%s13401_s0 + $0x18] sm:$0xff] }
 0x5b2   :  { %v5949_v0 = vsub.f32 2.0, %v5933_v6  ;;  %v8709_v62 = vpop.eup %8708  ;;  %v5871_v55 = vadd.f32 %v8707_v33, %v5775_v37  ;;  %v5887_v45 = vmul.f32 %v8707_v33, %v14300_v38  ;;  %v5790_v44 = vmul.f32 %v8705_v39, %v14301_v52 }
 0x5b3   :  { %v5710_v11 = vadd.f32 %v5694_v32, %v5614_v7  ;;  %v5774_v9 = vadd.f32 %v8705_v39, %v5678_v23  ;;  %v5886_v20 = vmul.f32 %v8709_v62, %v14302_v29  ;;  %v8754_v39 = vld [vmem:[%s13401_s0 + $0x10] sm:$0xff] }
 0x5b4   :  { %v5965_v30 = vmul.f32 %v8703_v25, %v5949_v0  ;;  %v5903_v42 = vadd.f32 %v5887_v45, %v5807_v12  ;;  %8712 = vrcp.f32 %v5871_v55  ;;  %v8756_v0 = vld [vmem:[%s13401_s0 + $0x20] sm:$0xff] }
 0x5b5   :  { %v5806_v51 = vadd.f32 %v5790_v44, %v5710_v11  ;;  %v5870_v46 = vadd.f32 %v8709_v62, %v5774_v9  ;;  %v8758_v44 = vld [vmem:[%s13401_s0 + $0x30] sm:$0xff] }
 0x5b6   :  { %v5981_v50 = vmul.f32 %v5965_v30, %v12938_v27  ;;  %v14303_v27 = vld [vmem:[#allocation8_spill] sm:$0xff]  ;;  %v8757_v30 = vld [vmem:[%s13401_s0 + $0x38] sm:$0xff] }
 0x5b7   :  { %v5902_v47 = vadd.f32 %v5886_v20, %v5806_v51  ;;  %8714 = vrcp.f32 %v5870_v46  ;;  %v5986_v19 = vsub.s32 5, %v14303_v27 }
 0x5b9   :  { %v12977_v54 = vrot.slane %v12974_v8, %v5986_v19  ;;  %v8762_v19 = vld [vmem:[%s13401_s0 + $0x50] sm:$0xff] }
 0x5be   :  { %v8711_v58 = vpop.eup %8710 }
 0x5bf   :  { %v5932_v2 = vmul.f32 %v8711_v58, %v5868_v22 }
 0x5c1   :  { %v8713_v37 = vpop.eup %8712  ;;  %v5948_v21 = vsub.f32 2.0, %v5932_v2  ;;  %v8760_v2 = vld [vmem:[%s13401_s0 + $0x40] sm:$0xff] }
 0x5c2   :  { %v5935_v36 = vmul.f32 %v8713_v37, %v5871_v55 }
 0x5c3   :  { %v5964_v60 = vmul.f32 %v8711_v58, %v5948_v21 }
 0x5c4   :  { %v5951_v41 = vsub.f32 2.0, %v5935_v36  ;;  %v8715_v56 = vpop.eup %8714 }
 0x5c5   :  { %v5980_v31 = vmul.f32 %v5964_v60, %v5900_v49  ;;  %v5934_v3 = vmul.f32 %v8715_v56, %v5870_v46  ;;  %v8759_v46 = vld [vmem:[%s13401_s0 + $0x48] sm:$0xff] }
 0x5c6   :  { %v5967_v12 = vmul.f32 %v8713_v37, %v5951_v41 }
 0x5c7   :  { %8228 = vmatprep.mubr.msk.f32.mxu1 %vm78_vm0, %v5980_v31  ;;  %v5950_v28 = vsub.f32 2.0, %v5934_v3  ;;  %v8761_v31 = vld [vmem:[%s13401_s0 + $0x58] sm:$0xff] }
 0x5c8   :  { %8229 = vmatmul.mubr.msk.f32.gmra.mxu1 %vm78_vm0, %v5981_v50  ;;  %v5983_v34 = vmul.f32 %v5967_v12, %v5903_v42 }
 0x5c9   :  { %v5966_v59 = vmul.f32 %v8715_v56, %v5950_v28 }
 0x5cb   :  { %v5982_v26 = vmul.f32 %v5966_v59, %v5902_v47 }
 0x5cd   :  { %8231 = vmatprep.mubr.msk.f32.mxu1 %vm78_vm0, %v5982_v26 }
 0x5ce   :  { %v8212_v13 = vpop.f32.mrf.mxu1  ;;  %8232 = vmatmul.mubr.msk.f32.gmra.mxu1 %vm78_vm0, %v5983_v34 }
 0x5cf   :  { %v6108_v40 = vadd.f32 %v8212_v13, %v12977_v54 }
 0x5d0   :  { %v6102_v1 = vpop.f32.mrf.mxu1 }
 0x5d1   :  { %v12985_v53 = vadd.f32 %v8751_v16, %v6108_v40  ;;  %v6103_v48 = vadd.f32 %v6102_v1, %v12977_v54 }
 0x5d3   :  { %v12991_v63 = vadd.f32 %v8752_v4, %v6103_v48  ;;  %v6200_v17 = vsel %vm78_vm0, %v12985_v53, 0.0  ;;  %v8763_v4 = vld [vmem:[%s13401_s0 + $0x68] sm:$0xff] }
 0x5d4   :  { %6201 = vadd.xlane.f32.xlu0 %v6200_v17 }
 0x5d5   :  { %v6197_v10 = vsel %vm78_vm0, %v12991_v63, 0.0 }
 0x5d6   :  { %6198 = vadd.xlane.f32.xlu1 %v6197_v10 }
 0x5d7   :  { %v8215_v5 = vpop.f32.mrf.mxu1 }
 0x5d8   :  { %v6118_v25 = vadd.f32 %v8215_v5, %v12977_v54 }
 0x5d9   :  { %v6112_v43 = vpop.f32.mrf.mxu1 }
 0x5da   :  { %v13001_v18 = vadd.f32 %v8753_v14, %v6118_v25  ;;  %v6113_v24 = vadd.f32 %v6112_v43, %v12977_v54  ;;  %v8764_v25 = vld [vmem:[%s13401_s0 + $0x60] sm:$0xff] }
 0x5dc   :  { %v13007_v57 = vadd.f32 %v8754_v39, %v6113_v24  ;;  %v6206_v22 = vsel %vm78_vm0, %v13001_v18, 0.0 }
 0x5dd   :  { %6207 = vadd.xlane.f32.xlu1 %v6206_v22 }
 0x5de   :  { %v6203_v6 = vsel %vm78_vm0, %v13007_v57, 0.0 }
 0x5df   :  { %6204 = vadd.xlane.f32.xlu0 %v6203_v6 }
 0x5ef   :  { %v8218_v15 = vpop.f32.mrf.mxu1 }
 0x5f0   :  { %v6128_v33 = vadd.f32 %v8218_v15, %v12977_v54 }
 0x5f1   :  { %v6122_v35 = vpop.f32.mrf.mxu1 }
 0x5f2   :  { %v13017_v32 = vadd.f32 %v8755_v61, %v6128_v33  ;;  %v6123_v49 = vadd.f32 %v6122_v35, %v12977_v54 }
 0x5f4   :  { %v13023_v7 = vadd.f32 %v8756_v0, %v6123_v49  ;;  %v6212_v62 = vsel %vm78_vm0, %v13017_v32, 0.0 }
 0x5f5   :  { %6213 = vadd.xlane.f32.xlu1 %v6212_v62 }
 0x5f6   :  { %v6209_v23 = vsel %vm78_vm0, %v13023_v7, 0.0 }
 0x5f7   :  { %6210 = vadd.xlane.f32.xlu0 %v6209_v23  ;;  %v8765_v23 = vld [vmem:[%s13401_s0 + $0x78] sm:$0xff] }
 0x60e   :  { %v8221_v55 = vpop.f32.mrf.mxu1 }
 0x60f   :  { %v6138_v38 = vadd.f32 %v8221_v55, %v12977_v54 }
 0x610   :  { %v6132_v45 = vpop.f32.mrf.mxu1 }
 0x611   :  { %v13033_v11 = vadd.f32 %v8757_v30, %v6138_v38  ;;  %v6133_v52 = vadd.f32 %v6132_v45, %v12977_v54 }
 0x613   :  { %v13039_v9 = vadd.f32 %v8758_v44, %v6133_v52  ;;  %v6218_v42 = vsel %vm78_vm0, %v13033_v11, 0.0 }
 0x614   :  { %6219 = vadd.xlane.f32.xlu1 %v6218_v42  ;;  %v8766_v42 = vld [vmem:[%s13401_s0 + $0x70] sm:$0xff] }
 0x615   :  { %v6215_v50 = vsel %vm78_vm0, %v13039_v9, 0.0 }
 0x616   :  { %6216 = vadd.xlane.f32.xlu0 %v6215_v50 }
 0x63a   :  { %v8224_v51 = vpop.f32.mrf.mxu1 }
 0x63b   :  { %v6148_v29 = vadd.f32 %v8224_v51, %v12977_v54 }
 0x63c   :  { %v6142_v20 = vpop.f32.mrf.mxu1 }
 0x63d   :  { %v13049_v47 = vadd.f32 %v8759_v46, %v6148_v29  ;;  %v6143_v58 = vadd.f32 %v6142_v20, %v12977_v54 }
 0x63f   :  { %v13055_v37 = vadd.f32 %v8760_v2, %v6143_v58  ;;  %v6224_v21 = vsel %vm78_vm0, %v13049_v47, 0.0 }
 0x640   :  { %6225 = vadd.xlane.f32.xlu1 %v6224_v21 }
 0x641   :  { %v6221_v36 = vsel %vm78_vm0, %v13055_v37, 0.0 }
 0x642   :  { %6222 = vadd.xlane.f32.xlu0 %v6221_v36 }
 0x65d   :  { %v6202_v13 = vpop.xlane.xlu0 %6201 }
 0x65e   :  { %v6246_v48 = vmul.f32 0.03125, %v6202_v13 }
 0x65f   :  { %v6199_v26 = vpop.xlane.xlu1 %6198 }
 0x660   :  { %v6245_v24 = vmul.f32 0.03125, %v6199_v26  ;;  %v13092_v39 = vsub.f32 %v12985_v53, %v6246_v48 }
 0x662   :  { %v13098_v0 = vsub.f32 %v12991_v63, %v6245_v24  ;;  %v6278_v30 = vmul.f32 %v13092_v39, %v13092_v39  ;;  %v31_v24 = vld [vmem:[%s13404_s4 + $0x30] sm:$0xff] }
 0x664   :  { %v6277_v46 = vmul.f32 %v13098_v0, %v13098_v0  ;;  %v6296_v2 = vsel %vm78_vm0, %v6278_v30, 0.0 }
 0x666   :  { %v6208_v5 = vpop.xlane.xlu1 %6207 }
 0x667   :  { %v6248_v33 = vmul.f32 0.03125, %v6208_v5 }
 0x668   :  { %v6205_v22 = vpop.xlane.xlu0 %6204 }
 0x669   :  { %v6247_v62 = vmul.f32 0.03125, %v6205_v22  ;;  %v13109_v52 = vsub.f32 %v13001_v18, %v6248_v33  ;;  %v30_v22 = vld [vmem:[%s13404_s4 + $0x28] sm:$0xff] }
 0x66b   :  { %v6280_v21 = vmul.f32 %v13109_v52, %v13109_v52 }
 0x66f   :  { %v8227_v60 = vpop.f32.mrf.mxu1 }
 0x670   :  { %v6158_v41 = vadd.f32 %v8227_v60, %v12977_v54  ;;  %v6293_v60 = vsel %vm78_vm0, %v6277_v46, 0.0 }
 0x671   :  { %v6152_v56 = vpop.f32.mrf.mxu1 }
 0x672   :  { %v13065_v3 = vadd.f32 %v8761_v31, %v6158_v41  ;;  %v6153_v12 = vadd.f32 %v6152_v56, %v12977_v54  ;;  %v6302_v56 = vsel %vm78_vm0, %v6280_v21, 0.0 }
 0x674   :  { %v13071_v28 = vadd.f32 %v8762_v19, %v6153_v12  ;;  %v6230_v34 = vsel %vm78_vm0, %v13065_v3, 0.0 }
 0x675   :  { %6231 = vadd.xlane.f32.xlu1 %v6230_v34 }
 0x676   :  { %v6227_v59 = vsel %vm78_vm0, %v13071_v28, 0.0 }
 0x677   :  { %6228 = vadd.xlane.f32.xlu0 %v6227_v59 }
 0x67e   :  { %v6214_v61 = vpop.xlane.xlu1 %6213 }
 0x67f   :  { %v6250_v44 = vmul.f32 0.03125, %v6214_v61 }
 0x680   :  { %v6211_v45 = vpop.xlane.xlu0 %6210 }
 0x681   :  { %v6249_v29 = vmul.f32 0.03125, %v6211_v45  ;;  %v13126_v58 = vsub.f32 %v13017_v32, %v6250_v44 }
 0x683   :  { %v13132_v36 = vsub.f32 %v13023_v7, %v6249_v29  ;;  %v6282_v31 = vmul.f32 %v13126_v58, %v13126_v58 }
 0x685   :  { %v6281_v59 = vmul.f32 %v13132_v36, %v13132_v36  ;;  %v6308_v13 = vsel %vm78_vm0, %v6282_v31, 0.0 }
 0x688   :  { %v8230_v40 = vpop.f32.mrf.mxu1 }
 0x689   :  { %v6168_v1 = vadd.f32 %v8230_v40, %v12977_v54 }
 0x68a   :  { %v6162_v16 = vpop.f32.mrf.mxu1 }
 0x68b   :  { %v13081_v17 = vadd.f32 %v8763_v4, %v6168_v1  ;;  %v6163_v10 = vadd.f32 %v6162_v16, %v12977_v54  ;;  %v6305_v16 = vsel %vm78_vm0, %v6281_v59, 0.0 }
 0x68d   :  { %v13087_v43 = vadd.f32 %v8764_v25, %v6163_v10  ;;  %v6236_v14 = vsel %vm78_vm0, %v13081_v17, 0.0 }
 0x68e   :  { %6237 = vadd.xlane.f32.xlu1 %v6236_v14  ;;  %v8233_v15 = vpop.f32.mrf.mxu1  ;;  %v32_v14 = vld [vmem:[%s13404_s4 + $0x38] sm:$0xff] }
 0x68f   :  { %v6233_v6 = vsel %vm78_vm0, %v13087_v43, 0.0  ;;  %v6178_v35 = vadd.f32 %v8233_v15, %v12977_v54  ;;  %8234 = vmatprep.subr.mxu0 %v32_v14 }
 0x690   :  { %6234 = vadd.xlane.f32.xlu0 %v6233_v6  ;;  %v6172_v49 = vpop.f32.mrf.mxu1  ;;  %8235 = vmatpush3.msra.mxu0 %v32_v14  ;;  %v29_v6 = vld [vmem:[%s13404_s4 + $0x20] sm:$0xff] }
 0x691   :  { %v13103_v55 = vadd.f32 %v8765_v23, %v6178_v35  ;;  %v6173_v38 = vadd.f32 %v6172_v49, %v12977_v54  ;;  %v13119_v54 = vsub.f32 %v13007_v57, %v6247_v62  ;;  %8236 = vmatprep.subr.mxu0 %v31_v24 }
 0x692   :  { %8237 = vmatpush3.msra.mxu0 %v31_v24 }
 0x693   :  { %v13114_v50 = vadd.f32 %v8766_v42, %v6173_v38  ;;  %v6242_v51 = vsel %vm78_vm0, %v13103_v55, 0.0  ;;  %v6279_v41 = vmul.f32 %v13119_v54, %v13119_v54  ;;  %8238 = vmatprep.subr.mxu0 %v30_v22 }
 0x694   :  { %6243 = vadd.xlane.f32.xlu1 %v6242_v51  ;;  %8239 = vmatpush3.msra.mxu0 %v30_v22 }
 0x695   :  { %v6239_v20 = vsel %vm78_vm0, %v13114_v50, 0.0  ;;  %v6299_v19 = vsel %vm78_vm0, %v6279_v41, 0.0  ;;  %8240 = vmatprep.subr.mxu0 %v29_v6 }
 0x696   :  { %6240 = vadd.xlane.f32.xlu0 %v6239_v20  ;;  %8241 = vmatpush3.msra.mxu0 %v29_v6 }
 0x698   :  { %6297 = vadd.xlane.f32.xlu1 %v6296_v2 }
 0x69a   :  { %6294 = vadd.xlane.f32.xlu0 %v6293_v60 }
 0x69c   :  { %6303 = vadd.xlane.f32.xlu1 %v6302_v56 }
 0x69d   :  { %v6220_v12 = vpop.xlane.xlu1 %6219 }
 0x69e   :  { %v6252_v34 = vmul.f32 0.03125, %v6220_v12  ;;  %6300 = vadd.xlane.f32.xlu0 %v6299_v19 }
 0x69f   :  { %v6217_v26 = vpop.xlane.xlu0 %6216 }
 0x6a0   :  { %v13145_v40 = vsub.f32 %v13033_v11, %v6252_v34  ;;  %v6251_v1 = vmul.f32 0.03125, %v6217_v26  ;;  %6309 = vadd.xlane.f32.xlu1 %v6308_v13 }
 0x6a2   :  { %v13149_v48 = vsub.f32 %v13039_v9, %v6251_v1  ;;  %v6284_v4 = vmul.f32 %v13145_v40, %v13145_v40  ;;  %6306 = vadd.xlane.f32.xlu0 %v6305_v16 }
 0x6a4   :  { %v6314_v10 = vsel %vm78_vm0, %v6284_v4, 0.0  ;;  %v6283_v5 = vmul.f32 %v13149_v48, %v13149_v48 }
 0x6a5   :  { %6315 = vadd.xlane.f32.xlu1 %v6314_v10 }
 0x6a6   :  { %v6311_v25 = vsel %vm78_vm0, %v6283_v5, 0.0 }
 0x6a7   :  { %6312 = vadd.xlane.f32.xlu0 %v6311_v25 }
 0x6c9   :  { %v6226_v15 = vpop.xlane.xlu1 %6225 }
 0x6ca   :  { %v6254_v33 = vmul.f32 0.03125, %v6226_v15 }
 0x6cb   :  { %v6223_v35 = vpop.xlane.xlu0 %6222 }
 0x6cc   :  { %v13170_v61 = vsub.f32 %v13049_v47, %v6254_v33  ;;  %v6253_v49 = vmul.f32 0.03125, %v6223_v35 }
 0x6ce   :  { %v13173_v62 = vsub.f32 %v13055_v37, %v6253_v49  ;;  %v6286_v23 = vmul.f32 %v13170_v61, %v13170_v61 }
 0x6d0   :  { %v6320_v38 = vsel %vm78_vm0, %v6286_v23, 0.0  ;;  %v6285_v45 = vmul.f32 %v13173_v62, %v13173_v62 }
 0x6d1   :  { %6321 = vadd.xlane.f32.xlu1 %v6320_v38 }
 0x6d2   :  { %v6317_v30 = vsel %vm78_vm0, %v6285_v45, 0.0 }
 0x6d3   :  { %6318 = vadd.xlane.f32.xlu0 %v6317_v30 }
 0x6fe   :  { %v6232_v44 = vpop.xlane.xlu1 %6231 }
 0x6ff   :  { %v6256_v42 = vmul.f32 0.03125, %v6232_v44 }
 0x700   :  { %v6229_v51 = vpop.xlane.xlu0 %6228 }
 0x701   :  { %v13182_v29 = vsub.f32 %v13065_v3, %v6256_v42  ;;  %v6255_v20 = vmul.f32 0.03125, %v6229_v51 }
 0x703   :  { %v13185_v46 = vsub.f32 %v13071_v28, %v6255_v20  ;;  %v6288_v2 = vmul.f32 %v13182_v29, %v13182_v29 }
 0x705   :  { %v6326_v21 = vsel %vm78_vm0, %v6288_v2, 0.0  ;;  %v6287_v60 = vmul.f32 %v13185_v46, %v13185_v46 }
 0x706   :  { %6327 = vadd.xlane.f32.xlu1 %v6326_v21 }
 0x707   :  { %v6323_v41 = vsel %vm78_vm0, %v6287_v60, 0.0 }
 0x708   :  { %6324 = vadd.xlane.f32.xlu0 %v6323_v41 }
 0x717   :  { %v6238_v56 = vpop.xlane.xlu1 %6237 }
 0x718   :  { %v6258_v31 = vmul.f32 0.03125, %v6238_v56 }
 0x719   :  { %v6235_v12 = vpop.xlane.xlu0 %6234 }
 0x71a   :  { %v13194_v19 = vsub.f32 %v13081_v17, %v6258_v31  ;;  %v6257_v34 = vmul.f32 0.03125, %v6235_v12 }
 0x71c   :  { %v13197_v59 = vsub.f32 %v13087_v43, %v6257_v34  ;;  %v6290_v26 = vmul.f32 %v13194_v19, %v13194_v19 }
 0x71d   :  { %v6244_v16 = vpop.xlane.xlu1 %6243 }
 0x71e   :  { %v6332_v13 = vsel %vm78_vm0, %v6290_v26, 0.0  ;;  %v6289_v1 = vmul.f32 %v13197_v59, %v13197_v59  ;;  %v6260_v4 = vmul.f32 0.03125, %v6244_v16 }
 0x71f   :  { %6333 = vadd.xlane.f32.xlu1 %v6332_v13  ;;  %v6241_v5 = vpop.xlane.xlu0 %6240 }
 0x720   :  { %v6329_v10 = vsel %vm78_vm0, %v6289_v1, 0.0  ;;  %v13206_v25 = vsub.f32 %v13103_v55, %v6260_v4  ;;  %v6259_v14 = vmul.f32 0.03125, %v6241_v5  ;;  %v6407_v1 = vsub.s32 2, %v14303_v27 }
 0x721   :  { %6330 = vadd.xlane.f32.xlu0 %v6329_v10  ;;  %v6298_v24 = vpop.xlane.xlu1 %6297 }
 0x722   :  { %v13209_v22 = vsub.f32 %v13114_v50, %v6259_v14  ;;  %v6342_v6 = vmul.f32 0.03125, %v6298_v24  ;;  %v6292_v15 = vmul.f32 %v13206_v25, %v13206_v25  ;;  %v13219_v24 = vrot.slane %v12974_v8, %v6407_v1 }
 0x723   :  { %v6295_v33 = vpop.xlane.xlu0 %6294 }
 0x724   :  { %v6358_v35 = vadd.f32 1e-06, %v6342_v6  ;;  %v6341_v49 = vmul.f32 0.03125, %v6295_v33  ;;  %v6338_v23 = vsel %vm78_vm0, %v6292_v15, 0.0  ;;  %v6291_v38 = vmul.f32 %v13209_v22, %v13209_v22 }
 0x725   :  { %6339 = vadd.xlane.f32.xlu1 %v6338_v23  ;;  %v6304_v45 = vpop.xlane.xlu1 %6303  ;;  %v6427_v6 = vsub.s32 3, %v14303_v27 }
 0x726   :  { %8716 = vrsqrt.f32 %v6358_v35  ;;  %v6357_v30 = vadd.f32 1e-06, %v6341_v49  ;;  %v6344_v44 = vmul.f32 0.03125, %v6304_v45  ;;  %v6335_v42 = vsel %vm78_vm0, %v6291_v38, 0.0 }
 0x727   :  { %6336 = vadd.xlane.f32.xlu0 %v6335_v42  ;;  %v6301_v51 = vpop.xlane.xlu0 %6300  ;;  %v13225_v23 = vrot.slane %v12974_v8, %v6427_v6 }
 0x728   :  { %8718 = vrsqrt.f32 %v6357_v30  ;;  %v6360_v20 = vadd.f32 1e-06, %v6344_v44  ;;  %v6343_v2 = vmul.f32 0.03125, %v6301_v51 }
 0x729   :  { %v6310_v21 = vpop.xlane.xlu1 %6309 }
 0x72a   :  { %8720 = vrsqrt.f32 %v6360_v20  ;;  %v6359_v60 = vadd.f32 1e-06, %v6343_v2  ;;  %v6346_v41 = vmul.f32 0.03125, %v6310_v21 }
 0x72b   :  { %v6307_v56 = vpop.xlane.xlu0 %6306 }
 0x72c   :  { %8722 = vrsqrt.f32 %v6359_v60  ;;  %v6362_v31 = vadd.f32 1e-06, %v6346_v41  ;;  %v6345_v12 = vmul.f32 0.03125, %v6307_v56 }
 0x72e   :  { %v6316_v34 = vpop.xlane.xlu1 %6315  ;;  %8724 = vrsqrt.f32 %v6362_v31  ;;  %v6361_v26 = vadd.f32 1e-06, %v6345_v12 }
 0x72f   :  { %v6348_v13 = vmul.f32 0.03125, %v6316_v34 }
 0x730   :  { %v6313_v16 = vpop.xlane.xlu0 %6312  ;;  %8726 = vrsqrt.f32 %v6361_v26 }
 0x731   :  { %v6364_v4 = vadd.f32 1e-06, %v6348_v13  ;;  %v6347_v10 = vmul.f32 0.03125, %v6313_v16 }
 0x733   :  { %8728 = vrsqrt.f32 %v6364_v4  ;;  %v6363_v5 = vadd.f32 1e-06, %v6347_v10  ;;  %v8717_v14 = vpop.eup %8716 }
 0x734   :  { %v6390_v15 = vmul.f32 %v8717_v14, %v13092_v39 }
 0x735   :  { %8730 = vrsqrt.f32 %v6363_v5  ;;  %v8719_v33 = vpop.eup %8718 }
 0x736   :  { %v6389_v35 = vmul.f32 %v8719_v33, %v13098_v0  ;;  %v6410_v38 = vmul.f32 %v13219_v24, %v6390_v15 }
 0x737   :  { %v8721_v49 = vpop.eup %8720 }
 0x738   :  { %v6392_v45 = vmul.f32 %v8721_v49, %v13109_v52  ;;  %v6409_v30 = vmul.f32 %v13219_v24, %v6389_v35  ;;  %v6430_v20 = vadd.f32 %v13225_v23, %v6410_v38 }
 0x739   :  { %v8723_v44 = vpop.eup %8722 }
 0x73a   :  { %v6429_v42 = vadd.f32 %v13225_v23, %v6409_v30  ;;  %v6391_v51 = vmul.f32 %v8723_v44, %v13119_v54  ;;  %v6412_v0 = vmul.f32 %v13219_v24, %v6392_v45 }
 0x73b   :  { %v8725_v39 = vpop.eup %8724 }
 0x73c   :  { %v6394_v2 = vmul.f32 %v8725_v39, %v13126_v58  ;;  %8242 = vmatprep.mubr.msk.f32.mxu0 %vm78_vm0, %v6429_v42  ;;  %v6411_v21 = vmul.f32 %v13219_v24, %v6391_v51  ;;  %v6432_v54 = vadd.f32 %v13225_v23, %v6412_v0  ;;  %v36_v51 = vld [vmem:[%s13404_s4 + $0x58] sm:$0xff]  ;;  %v33_v39 = vld [vmem:[%s13404_s4 + $0x40] sm:$0xff] }
 0x73d   :  { %v8727_v60 = vpop.eup %8726  ;;  %8243 = vmatmul.mubr.msk.f32.vlgmr.msra.gmra.mxu0 %vm78_vm0, %v6430_v20  ;;  %8266 = vmatprep.subr.mxu1 %v36_v51 }
 0x73e   :  { %v6431_v52 = vadd.f32 %v13225_v23, %v6411_v21  ;;  %v6393_v41 = vmul.f32 %v8727_v60, %v13132_v36  ;;  %v6414_v31 = vmul.f32 %v13219_v24, %v6394_v2  ;;  %8267 = vmatpush3.msra.mxu1 %v36_v51 }
 0x740   :  { %v8729_v56 = vpop.eup %8728  ;;  %8245 = vmatprep.mubr.msk.f32.mxu0 %vm78_vm0, %v6431_v52  ;;  %v6413_v58 = vmul.f32 %v13219_v24, %v6393_v41  ;;  %v6434_v36 = vadd.f32 %v13225_v23, %v6414_v31 }
 0x741   :  { %v6396_v12 = vmul.f32 %v8729_v56, %v13145_v40  ;;  %8246 = vmatmul.mubr.msk.f32.gmra.mxu0 %vm78_vm0, %v6432_v54 }
 0x742   :  { %v8731_v34 = vpop.eup %8730  ;;  %v6433_v26 = vadd.f32 %v13225_v23, %v6413_v58 }
 0x743   :  { %v6395_v13 = vmul.f32 %v8731_v34, %v13149_v48  ;;  %v6416_v1 = vmul.f32 %v13219_v24, %v6396_v12 }
 0x744   :  { %8248 = vmatprep.mubr.msk.f32.mxu0 %vm78_vm0, %v6433_v26 }
 0x745   :  { %v6415_v16 = vmul.f32 %v13219_v24, %v6395_v13  ;;  %8249 = vmatmul.mubr.msk.f32.gmra.mxu0 %vm78_vm0, %v6434_v36  ;;  %v6436_v4 = vadd.f32 %v13225_v23, %v6416_v1 }
 0x747   :  { %v6435_v40 = vadd.f32 %v13225_v23, %v6415_v16 }
 0x749   :  { %8251 = vmatprep.mubr.msk.f32.mxu0 %vm78_vm0, %v6435_v40 }
 0x74a   :  { %8252 = vmatmul.mubr.msk.f32.gmra.mxu0 %vm78_vm0, %v6436_v4 }
 0x75a   :  { %v6322_v10 = vpop.xlane.xlu1 %6321 }
 0x75b   :  { %v6350_v48 = vmul.f32 0.03125, %v6322_v10 }
 0x75c   :  { %v6319_v5 = vpop.xlane.xlu0 %6318 }
 0x75d   :  { %v6366_v14 = vadd.f32 1e-06, %v6350_v48  ;;  %v6349_v6 = vmul.f32 0.03125, %v6319_v5 }
 0x75f   :  { %8732 = vrsqrt.f32 %v6366_v14  ;;  %v6365_v15 = vadd.f32 1e-06, %v6349_v6 }
 0x761   :  { %8734 = vrsqrt.f32 %v6365_v15 }
 0x76c   :  { %v8733_v33 = vpop.eup %8732 }
 0x76d   :  { %v6398_v35 = vmul.f32 %v8733_v33, %v13170_v61  ;;  %v35_v61 = vld [vmem:[%s13404_s4 + $0x50] sm:$0xff] }
 0x76e   :  { %v8735_v49 = vpop.eup %8734  ;;  %8268 = vmatprep.subr.mxu1 %v35_v61 }
 0x76f   :  { %v6397_v38 = vmul.f32 %v8735_v49, %v13173_v62  ;;  %v6418_v45 = vmul.f32 %v13219_v24, %v6398_v35  ;;  %8269 = vmatpush3.msra.mxu1 %v35_v61  ;;  %v34_v62 = vld [vmem:[%s13404_s4 + $0x48] sm:$0xff] }
 0x770   :  { %8270 = vmatprep.subr.mxu1 %v34_v62 }
 0x771   :  { %v6417_v30 = vmul.f32 %v13219_v24, %v6397_v38  ;;  %v6438_v42 = vadd.f32 %v13225_v23, %v6418_v45  ;;  %8271 = vmatpush3.msra.mxu1 %v34_v62 }
 0x772   :  { %8272 = vmatprep.subr.mxu1 %v33_v39 }
 0x773   :  { %v6437_v44 = vadd.f32 %v13225_v23, %v6417_v30  ;;  %8273 = vmatpush3.msra.mxu1 %v33_v39 }
 0x775   :  { %8254 = vmatprep.mubr.msk.f32.mxu0 %vm78_vm0, %v6437_v44 }
 0x776   :  { %8255 = vmatmul.mubr.msk.f32.gmra.mxu0 %vm78_vm0, %v6438_v42 }
 0x78f   :  { %v6328_v20 = vpop.xlane.xlu1 %6327 }
 0x790   :  { %v6352_v0 = vmul.f32 0.03125, %v6328_v20 }
 0x791   :  { %v6325_v2 = vpop.xlane.xlu0 %6324 }
 0x792   :  { %v6368_v21 = vadd.f32 1e-06, %v6352_v0  ;;  %v6351_v60 = vmul.f32 0.03125, %v6325_v2 }
 0x794   :  { %8736 = vrsqrt.f32 %v6368_v21  ;;  %v6367_v52 = vadd.f32 1e-06, %v6351_v60 }
 0x796   :  { %8738 = vrsqrt.f32 %v6367_v52 }
 0x7a1   :  { %v8737_v41 = vpop.eup %8736 }
 0x7a2   :  { %v6400_v56 = vmul.f32 %v8737_v41, %v13182_v29 }
 0x7a3   :  { %v8739_v54 = vpop.eup %8738 }
 0x7a4   :  { %v6399_v31 = vmul.f32 %v8739_v54, %v13185_v46  ;;  %v6420_v12 = vmul.f32 %v13219_v24, %v6400_v56 }
 0x7a6   :  { %v6419_v58 = vmul.f32 %v13219_v24, %v6399_v31  ;;  %v6440_v13 = vadd.f32 %v13225_v23, %v6420_v12 }
 0x7a8   :  { %v6439_v34 = vadd.f32 %v13225_v23, %v6419_v58  ;;  %v6334_v26 = vpop.xlane.xlu1 %6333 }
 0x7a9   :  { %v6354_v36 = vmul.f32 0.03125, %v6334_v26 }
 0x7aa   :  { %8257 = vmatprep.mubr.msk.f32.mxu0 %vm78_vm0, %v6439_v34  ;;  %v6331_v1 = vpop.xlane.xlu0 %6330 }
 0x7ab   :  { %8258 = vmatmul.mubr.msk.f32.gmra.mxu0 %vm78_vm0, %v6440_v13  ;;  %v6370_v16 = vadd.f32 1e-06, %v6354_v36  ;;  %v6353_v29 = vmul.f32 0.03125, %v6331_v1 }
 0x7ad   :  { %8740 = vrsqrt.f32 %v6370_v16  ;;  %v6369_v40 = vadd.f32 1e-06, %v6353_v29 }
 0x7ae   :  { %v6340_v46 = vpop.xlane.xlu1 %6339 }
 0x7af   :  { %8742 = vrsqrt.f32 %v6369_v40  ;;  %v6356_v4 = vmul.f32 0.03125, %v6340_v46 }
 0x7b0   :  { %v6337_v10 = vpop.xlane.xlu0 %6336 }
 0x7b1   :  { %v6372_v48 = vadd.f32 1e-06, %v6356_v4  ;;  %v6355_v5 = vmul.f32 0.03125, %v6337_v10 }
 0x7b3   :  { %8744 = vrsqrt.f32 %v6372_v48  ;;  %v6371_v14 = vadd.f32 1e-06, %v6355_v5 }
 0x7b5   :  { %8746 = vrsqrt.f32 %v6371_v14 }
 0x7ba   :  { %v8741_v6 = vpop.eup %8740 }
 0x7bb   :  { %v6402_v15 = vmul.f32 %v8741_v6, %v13194_v19 }
 0x7bc   :  { %v8743_v33 = vpop.eup %8742 }
 0x7bd   :  { %v6401_v35 = vmul.f32 %v8743_v33, %v13197_v59  ;;  %v6422_v49 = vmul.f32 %v13219_v24, %v6402_v15 }
 0x7bf   :  { %v6421_v38 = vmul.f32 %v13219_v24, %v6401_v35  ;;  %v6442_v42 = vadd.f32 %v13225_v23, %v6422_v49 }
 0x7c0   :  { %v8745_v45 = vpop.eup %8744 }
 0x7c1   :  { %v6441_v30 = vadd.f32 %v13225_v23, %v6421_v38  ;;  %v6404_v44 = vmul.f32 %v8745_v45, %v13206_v25  ;;  %v6447_v25 = vsub.s32 6, %v14303_v27 }
 0x7c2   :  { %v8747_v51 = vpop.eup %8746 }
 0x7c3   :  { %8260 = vmatprep.mubr.msk.f32.mxu0 %vm78_vm0, %v6441_v30  ;;  %v6403_v19 = vmul.f32 %v8747_v51, %v13209_v22  ;;  %v6424_v59 = vmul.f32 %v13219_v24, %v6404_v44  ;;  %v6448_v20 = vrot.slane %v12974_v8, %v6447_v25 }
 0x7c4   :  { %8261 = vmatmul.mubr.msk.f32.gmra.mxu0 %vm78_vm0, %v6442_v42 }
 0x7c5   :  { %v6423_v61 = vmul.f32 %v13219_v24, %v6403_v19  ;;  %v6444_v39 = vadd.f32 %v13225_v23, %v6424_v59 }
 0x7c7   :  { %v6443_v62 = vadd.f32 %v13225_v23, %v6423_v61 }
 0x7c9   :  { %8263 = vmatprep.mubr.msk.f32.mxu0 %vm78_vm0, %v6443_v62 }
 0x7ca   :  { %8264 = vmatmul.mubr.msk.f32.gmra.mxu0 %vm78_vm0, %v6444_v39 }
 0x7fd   :  { %v8244_v0 = vpop.f32.mrf.mxu0 }
 0x7fe   :  { %v6569_v2 = vadd.f32 %v8244_v0, %v6448_v20 }
 0x7ff   :  { %v6563_v21 = vpop.f32.mrf.mxu0 }
 0x800   :  { %v6564_v22 = vadd.f32 %v6563_v21, %v6448_v20  ;;  %v6643_v41 = vmax.f32 %v6569_v2, 0.0 }
 0x801   :  { %v8247_v60 = vpop.f32.mrf.mxu0 }
 0x802   :  { %v6642_v52 = vmax.f32 %v6564_v22, 0.0  ;;  %v6579_v24 = vadd.f32 %v8247_v60, %v6448_v20  ;;  %v6660_v22 = vsub.s32 7, %v14303_v27 }
 0x803   :  { %v6573_v56 = vpop.f32.mrf.mxu0 }
 0x804   :  { %v6574_v54 = vadd.f32 %v6573_v56, %v6448_v20  ;;  %8274 = vmatprep.mubr.msk.f32.mxu1 %vm78_vm0, %v6642_v52  ;;  %v6645_v12 = vmax.f32 %v6579_v24, 0.0  ;;  %v6661_v60 = vrot.slane %v12974_v8, %v6660_v22 }
 0x805   :  { %v8250_v23 = vpop.f32.mrf.mxu0  ;;  %8275 = vmatmul.mubr.msk.f32.vlgmr.msra.gmra.mxu1 %vm78_vm0, %v6643_v41 }
 0x806   :  { %v6644_v31 = vmax.f32 %v6574_v54, 0.0  ;;  %v6589_v58 = vadd.f32 %v8250_v23, %v6448_v20 }
 0x807   :  { %v6583_v34 = vpop.f32.mrf.mxu0 }
 0x808   :  { %v6584_v26 = vadd.f32 %v6583_v34, %v6448_v20  ;;  %8277 = vmatprep.mubr.msk.f32.mxu1 %vm78_vm0, %v6644_v31  ;;  %v6647_v1 = vmax.f32 %v6589_v58, 0.0 }
 0x809   :  { %8278 = vmatmul.mubr.msk.f32.gmra.mxu1 %vm78_vm0, %v6645_v12 }
 0x80a   :  { %v8253_v13 = vpop.f32.mrf.mxu0  ;;  %v6646_v36 = vmax.f32 %v6584_v26, 0.0 }
 0x80b   :  { %v6599_v16 = vadd.f32 %v8253_v13, %v6448_v20 }
 0x80c   :  { %v6593_v29 = vpop.f32.mrf.mxu0  ;;  %8280 = vmatprep.mubr.msk.f32.mxu1 %vm78_vm0, %v6646_v36 }
 0x80d   :  { %v6594_v40 = vadd.f32 %v6593_v29, %v6448_v20  ;;  %8281 = vmatmul.mubr.msk.f32.gmra.mxu1 %vm78_vm0, %v6647_v1  ;;  %v6649_v4 = vmax.f32 %v6599_v16, 0.0 }
 0x80f   :  { %v6648_v46 = vmax.f32 %v6594_v40, 0.0 }
 0x811   :  { %8283 = vmatprep.mubr.msk.f32.mxu1 %vm78_vm0, %v6648_v46 }
 0x812   :  { %8284 = vmatmul.mubr.msk.f32.gmra.mxu1 %vm78_vm0, %v6649_v4 }
 0x836   :  { %v8256_v10 = vpop.f32.mrf.mxu0 }
 0x837   :  { %v6609_v48 = vadd.f32 %v8256_v10, %v6448_v20 }
 0x838   :  { %v6603_v5 = vpop.f32.mrf.mxu0 }
 0x839   :  { %v6604_v14 = vadd.f32 %v6603_v5, %v6448_v20  ;;  %v6651_v15 = vmax.f32 %v6609_v48, 0.0 }
 0x83b   :  { %v6650_v6 = vmax.f32 %v6604_v14, 0.0 }
 0x83d   :  { %8286 = vmatprep.mubr.msk.f32.mxu1 %vm78_vm0, %v6650_v6 }
 0x83e   :  { %8287 = vmatmul.mubr.msk.f32.gmra.mxu1 %vm78_vm0, %v6651_v15 }
 0x86b   :  { %v8259_v33 = vpop.f32.mrf.mxu0 }
 0x86c   :  { %v6619_v35 = vadd.f32 %v8259_v33, %v6448_v20 }
 0x86d   :  { %v6613_v49 = vpop.f32.mrf.mxu0 }
 0x86e   :  { %v6614_v38 = vadd.f32 %v6613_v49, %v6448_v20  ;;  %v6653_v30 = vmax.f32 %v6619_v35, 0.0 }
 0x870   :  { %v6652_v45 = vmax.f32 %v6614_v38, 0.0 }
 0x872   :  { %8289 = vmatprep.mubr.msk.f32.mxu1 %vm78_vm0, %v6652_v45 }
 0x873   :  { %8290 = vmatmul.mubr.msk.f32.gmra.mxu1 %vm78_vm0, %v6653_v30 }
 0x884   :  { %v8262_v44 = vpop.f32.mrf.mxu0 }
 0x885   :  { %v6629_v42 = vadd.f32 %v8262_v44, %v6448_v20 }
 0x886   :  { %v6623_v51 = vpop.f32.mrf.mxu0 }
 0x887   :  { %v6624_v19 = vadd.f32 %v6623_v51, %v6448_v20  ;;  %v6655_v61 = vmax.f32 %v6629_v42, 0.0 }
 0x889   :  { %v6654_v59 = vmax.f32 %v6624_v19, 0.0 }
 0x88a   :  { %v8265_v62 = vpop.f32.mrf.mxu0 }
 0x88b   :  { %8292 = vmatprep.mubr.msk.f32.mxu1 %vm78_vm0, %v6654_v59  ;;  %v6639_v39 = vadd.f32 %v8265_v62, %v6448_v20 }
 0x88c   :  { %8293 = vmatmul.mubr.msk.f32.gmra.mxu1 %vm78_vm0, %v6655_v61  ;;  %v6633_v25 = vpop.f32.mrf.mxu0 }
 0x88d   :  { %v6634_v0 = vadd.f32 %v6633_v25, %v6448_v20  ;;  %v6657_v21 = vmax.f32 %v6639_v39, 0.0 }
 0x88f   :  { %v6656_v2 = vmax.f32 %v6634_v0, 0.0 }
 0x891   :  { %8295 = vmatprep.mubr.msk.f32.mxu1 %vm78_vm0, %v6656_v2 }
 0x892   :  { %8296 = vmatmul.mubr.msk.f32.gmra.mxu1 %vm78_vm0, %v6657_v21 }
 0x8c5   :  { %v8276_v52 = vpop.f32.mrf.mxu1 }
 0x8c6   :  { %v6782_v41 = vadd.f32 %v8276_v52, %v6661_v60 }
 0x8c7   :  { %v6776_v24 = vpop.f32.mrf.mxu1 }
 0x8c8   :  { %v6856_v56 = vadd.f32 %v6782_v41, %v12985_v53  ;;  %v6777_v54 = vadd.f32 %v6776_v24, %v6661_v60 }
 0x8c9   :  { %v8279_v23 = vpop.f32.mrf.mxu1 }
 0x8ca   :  { %6872 = vst.msk [vmem:[%s13407_s6 + $0x8] sm:$0xff] %vm78_vm0, %v6856_v56  ;;  %v6855_v20 = vadd.f32 %v6777_v54, %v12991_v63  ;;  %v6792_v31 = vadd.f32 %v8279_v23, %v6661_v60 }
 0x8cb   :  { %v6786_v12 = vpop.f32.mrf.mxu1 }
 0x8cc   :  { %6871 = vst.msk [vmem:[%s13407_s6] sm:$0xff] %vm78_vm0, %v6855_v20  ;;  %v6858_v27 = vadd.f32 %v6792_v31, %v13001_v18  ;;  %v6787_v8 = vadd.f32 %v6786_v12, %v6661_v60 }
 0x8cd   :  { %v8282_v53 = vpop.f32.mrf.mxu1 }
 0x8ce   :  { %6874 = vst.msk [vmem:[%s13407_s6 + $0x18] sm:$0xff] %vm78_vm0, %v6858_v27  ;;  %v6857_v58 = vadd.f32 %v6787_v8, %v13007_v57  ;;  %v6802_v34 = vadd.f32 %v8282_v53, %v6661_v60 }
 0x8cf   :  { %v6796_v63 = vpop.f32.mrf.mxu1 }
 0x8d0   :  { %6873 = vst.msk [vmem:[%s13407_s6 + $0x10] sm:$0xff] %vm78_vm0, %v6857_v58  ;;  %v6860_v26 = vadd.f32 %v6802_v34, %v13017_v32  ;;  %v6797_v13 = vadd.f32 %v6796_v63, %v6661_v60 }
 0x8d2   :  { %v8285_v18 = vpop.f32.mrf.mxu1  ;;  %6876 = vst.msk [vmem:[%s13407_s6 + $0x28] sm:$0xff] %vm78_vm0, %v6860_v26  ;;  %v6859_v36 = vadd.f32 %v6797_v13, %v13023_v7 }
 0x8d3   :  { %v6812_v1 = vadd.f32 %v8285_v18, %v6661_v60 }
 0x8d4   :  { %v6806_v57 = vpop.f32.mrf.mxu1  ;;  %6875 = vst.msk [vmem:[%s13407_s6 + $0x20] sm:$0xff] %vm78_vm0, %v6859_v36 }
 0x8d5   :  { %v6862_v16 = vadd.f32 %v6812_v1, %v13033_v11  ;;  %v6807_v29 = vadd.f32 %v6806_v57, %v6661_v60 }
 0x8d7   :  { %6878 = vst.msk [vmem:[%s13407_s6 + $0x38] sm:$0xff] %vm78_vm0, %v6862_v16  ;;  %v6861_v32 = vadd.f32 %v6807_v29, %v13039_v9 }
 0x8d9   :  { %6877 = vst.msk [vmem:[%s13407_s6 + $0x30] sm:$0xff] %vm78_vm0, %v6861_v32 }
 0x8fe   :  { %v8288_v7 = vpop.f32.mrf.mxu1 }
 0x8ff   :  { %v6822_v40 = vadd.f32 %v8288_v7, %v6661_v60 }
 0x900   :  { %v6816_v46 = vpop.f32.mrf.mxu1 }
 0x901   :  { %v6864_v4 = vadd.f32 %v6822_v40, %v13049_v47  ;;  %v6817_v10 = vadd.f32 %v6816_v46, %v6661_v60 }
 0x903   :  { %6880 = vst.msk [vmem:[%s13407_s6 + $0x48] sm:$0xff] %vm78_vm0, %v6864_v4  ;;  %v6863_v11 = vadd.f32 %v6817_v10, %v13055_v37 }
 0x905   :  { %6879 = vst.msk [vmem:[%s13407_s6 + $0x40] sm:$0xff] %vm78_vm0, %v6863_v11 }
 0x933   :  { %v8291_v9 = vpop.f32.mrf.mxu1 }
 0x934   :  { %v6832_v48 = vadd.f32 %v8291_v9, %v6661_v60 }
 0x935   :  { %v6826_v5 = vpop.f32.mrf.mxu1 }
 0x936   :  { %v6866_v14 = vadd.f32 %v6832_v48, %v13065_v3  ;;  %v6827_v6 = vadd.f32 %v6826_v5, %v6661_v60 }
 0x938   :  { %6882 = vst.msk [vmem:[%s13407_s6 + $0x58] sm:$0xff] %vm78_vm0, %v6866_v14  ;;  %v6865_v47 = vadd.f32 %v6827_v6, %v13071_v28 }
 0x93a   :  { %6881 = vst.msk [vmem:[%s13407_s6 + $0x50] sm:$0xff] %vm78_vm0, %v6865_v47 }
 0x94c   :  { %v8294_v37 = vpop.f32.mrf.mxu1 }
 0x94d   :  { %v6842_v15 = vadd.f32 %v8294_v37, %v6661_v60 }
 0x94e   :  { %v6836_v33 = vpop.f32.mrf.mxu1 }
 0x94f   :  { %v6868_v35 = vadd.f32 %v6842_v15, %v13081_v17  ;;  %v6837_v49 = vadd.f32 %v6836_v33, %v6661_v60 }
 0x951   :  { %6884 = vst.msk [vmem:[%s13407_s6 + $0x68] sm:$0xff] %vm78_vm0, %v6868_v35  ;;  %v6867_v3 = vadd.f32 %v6837_v49, %v13087_v43 }
 0x952   :  { %v8297_v28 = vpop.f32.mrf.mxu1 }
 0x953   :  { %6883 = vst.msk [vmem:[%s13407_s6 + $0x60] sm:$0xff] %vm78_vm0, %v6867_v3  ;;  %v6852_v38 = vadd.f32 %v8297_v28, %v6661_v60 }
 0x954   :  { %v6846_v45 = vpop.f32.mrf.mxu1 }
 0x955   :  { %v6870_v30 = vadd.f32 %v6852_v38, %v13103_v55  ;;  %v6847_v44 = vadd.f32 %v6846_v45, %v6661_v60 }
 0x957   :  { %6886 = vst.msk [vmem:[%s13407_s6 + $0x78] sm:$0xff] %vm78_vm0, %v6870_v30  ;;  %v6869_v17 = vadd.f32 %v6847_v44, %v13114_v50 }
 0x959   :  { %6885 = vst.msk [vmem:[%s13407_s6 + $0x70] sm:$0xff] %vm78_vm0, %v6869_v17 }

</bundles_post_ra>
